<compile_context>
chip_gen: v7x
topology: tpu7x:2x2x1
jax: 0.10.0
libtpu: 0.0.40
codegen_flags: <defaults>
</compile_context>

<pallas_src>
import numpy as np
import jax
import jax.numpy as jnp
from jax.experimental import pallas as pl
from jax.experimental.pallas import tpu as pltpu


def _round_up(x, m):
    return (x + m - 1) // m * m


def _bilinear_matrix(n_in, n_out):
    """Interpolation matrix A (n_out, n_in) for torch Upsample(bilinear, align_corners=True)."""
    A = np.zeros((n_out, n_in), np.float32)
    if n_out == 1 or n_in == 1:
        A[:, 0] = 1.0
        return A
    scale = (n_in - 1) / (n_out - 1)
    for i in range(n_out):
        s = i * scale
        i0 = min(int(np.floor(s)), n_in - 1)
        i1 = min(i0 + 1, n_in - 1)
        w1 = s - i0
        A[i, i0] += 1.0 - w1
        A[i, i1] += w1
    return A


def _bilinear_taps(n_in, n_out):
    """Per output row: (i0, i1, w0, w1) source-row taps (align_corners=True)."""
    if n_out == 1 or n_in == 1:
        return [(0, 0, 1.0, 0.0)] * n_out
    scale = (n_in - 1) / (n_out - 1)
    taps = []
    for a in range(n_out):
        s = a * scale
        i0 = min(int(np.floor(s)), n_in - 1)
        i1 = min(i0 + 1, n_in - 1)
        w1 = float(s - i0)
        taps.append((i0, i1, 1.0 - w1, w1))
    return taps


def _make_kernel(C1, H1, Cin, Cmid, WL, L, offY, h_taps):
    """Fused UpDS forward: upsample + pad + concat + 2x(DSConv -> BN -> ReLU)."""
    Hu = 2 * H1

    def depthwise3x3(x, wd):
        # x : (C, L) row-aligned flat frame (zeros at every padding position).
        # wd: (C, 9) taps, torch order k = dy*3 + dx.
        acc = wd[:, 4:5] * x                                  # center tap, no roll
        for dy in (-1, 0, 1):
            for dx in (-1, 0, 1):
                if dy == 0 and dx == 0:
                    continue
                k = (dy + 1) * 3 + (dx + 1)
                off = dy * WL + dx
                xs = pltpu.roll(x, (-off) % L, 1)             # XLU lane rotation
                acc = acc + wd[:, k:k + 1] * xs
        return acc

    def kernel(x1_ref, x2f_ref, awt_ref, mask_ref,
               wd1_ref, wb1_ref, wd2_ref, wb2_ref,
               o_ref, frame_ref):
        # ---- assemble stage-1 input frame (Cin, L) in VMEM ------------------
        # skip-connection channels: already in frame layout (wrapper pre-pad)
        frame_ref[0:C1, :] = x2f_ref[0]
        # x1 channels: separable bilinear x2 upsample + centering pad
        frame_ref[C1:Cin, :] = jnp.zeros((Cin - C1, L), jnp.float32)
        t = jnp.dot(x1_ref[0], awt_ref[...],
                    preferred_element_type=jnp.float32)        # (C1*H1, WL)
        t3 = t.reshape(C1, H1, WL)
        for a in range(Hu):                                    # 2-tap H blend, static
            i0, i1, w0, w1 = h_taps[a]
            row = w0 * t3[:, i0, :]
            if i1 != i0 and w1 != 0.0:
                row = row + w1 * t3[:, i1, :]
            s = (offY + a) * WL                                # 128-aligned static start
            frame_ref[C1:Cin, s:s + WL] = row

        mask = mask_ref[...]                                   # (1, L), 1 on interior
        x = frame_ref[...]                                     # (Cin, L)

        # ---- stage 1: depthwise 3x3 -> pointwise(+folded bias/BN) -> ReLU ---
        acc1 = depthwise3x3(x, wd1_ref[...])
        h1 = jnp.maximum(
            jnp.dot(wb1_ref[:, 0:Cin], acc1, preferred_element_type=jnp.float32)
            + wb1_ref[:, Cin:Cin + 1], 0.0) * mask             # (Cmid, L), pads zeroed

        # ---- stage 2 ---------------------------------------------------------
        acc2 = depthwise3x3(h1, wd2_ref[...])
        h2 = jnp.maximum(
            jnp.dot(wb2_ref[:, 0:Cmid], acc2, preferred_element_type=jnp.float32)
            + wb2_ref[:, Cmid:Cmid + 1], 0.0) * mask           # (Cout, L)

        o_ref[0] = h2                                          # lane-dense write

    return kernel


def make_dsconv_params(key, cin, cout):
    """Deterministic synthetic params for DSConv + BatchNorm (running stats)."""
    k = jax.random.split(key, 8)
    return dict(
        wd=0.1 * jax.random.normal(k[0], (cin, 9), jnp.float32),
        bd=0.05 * jax.random.normal(k[1], (cin, 1), jnp.float32),
        wp=0.1 * jax.random.normal(k[2], (cout, cin), jnp.float32),
        bp=0.05 * jax.random.normal(k[3], (cout, 1), jnp.float32),
        gamma=1.0 + 0.1 * jax.random.normal(k[4], (cout, 1), jnp.float32),
        beta=0.05 * jax.random.normal(k[5], (cout, 1), jnp.float32),
        mean=0.05 * jax.random.normal(k[6], (cout, 1), jnp.float32),
        var=1.0 + 0.1 * jax.random.uniform(k[7], (cout, 1), jnp.float32),
    )


def _fold_dsconv_bn(p, eps=1e-5):
    """Fold depthwise bias, pointwise bias and inference BN into (wd, [wp'|b'])."""
    scale = p["gamma"] / jnp.sqrt(p["var"] + eps)              # (cout, 1)
    shift = p["beta"] - p["mean"] * scale
    wp_eff = scale * p["wp"]                                   # (cout, cin)
    b_eff = scale * (p["wp"] @ p["bd"] + p["bp"]) + shift      # (cout, 1)
    return p["wd"], jnp.concatenate([wp_eff, b_eff], axis=1)   # (cin,9), (cout,cin+1)


def up_ds_forward(x1, x2, params1, params2, eps=1e-5):
    """UpDS.forward(x1, x2): NCHW float32 in -> NCHW float32 out, one fused Pallas call."""
    N, C1, H1, W1 = x1.shape
    Nb, C2, H2, W2 = x2.shape
    assert Nb == N and C2 == C1
    Cin = 2 * C1
    Cmid = params1["wp"].shape[0]
    Cout = params2["wp"].shape[0]
    assert params1["wd"].shape[0] == Cin and params2["wd"].shape[0] == Cmid

    Hu, Wu = 2 * H1, 2 * W1
    diffY, diffX = H2 - Hu, W2 - Wu
    assert diffY >= 0 and diffX >= 0, "x2 must be spatially >= upsampled x1"
    offY, offX = diffY // 2, diffX // 2

    WL = _round_up(W2 + 1, 128)          # padded row width (lane-aligned)
    HL = H2 + 1                          # image rows + one trailing zero row
    L = HL * WL                          # flat frame length

    # Tiny geometry constants (no O(S^2) scatter/gather matrices).
    awt = np.zeros((W1, WL), np.float32)
    awt[:, offX:offX + Wu] = _bilinear_matrix(W1, Wu).T        # W-upsample + centering pad
    h_taps = _bilinear_taps(H1, Hu)                            # compile-time H taps
    m2 = np.zeros((HL, WL), np.float32)
    m2[:H2, :W2] = 1.0
    mask = m2.reshape(1, L)

    # Frame-friendly input layouts: free reshape for x1, cheap one-time XLA pad for x2.
    x1_2d = x1.reshape(N, C1 * H1, W1).astype(jnp.float32)
    x2f = jnp.pad(x2.astype(jnp.float32),
                  ((0, 0), (0, 0), (0, HL - H2), (0, WL - W2))).reshape(N, C1, L)

    wd1, wb1 = _fold_dsconv_bn(params1, eps)
    wd2, wb2 = _fold_dsconv_bn(params2, eps)

    kernel = _make_kernel(C1, H1, Cin, Cmid, WL, L, offY, h_taps)

    def const_spec(shape):
        nd = len(shape)
        return pl.BlockSpec(shape, lambda n, _nd=nd: (0,) * _nd)

    out_flat = pl.pallas_call(
        kernel,
        out_shape=jax.ShapeDtypeStruct((N, Cout, L), jnp.float32),
        grid=(N,),
        in_specs=[
            pl.BlockSpec((1, C1 * H1, W1), lambda n: (n, 0, 0)),   # x1 (W-major rows)
            pl.BlockSpec((1, C1, L), lambda n: (n, 0, 0)),         # x2 in frame layout
            const_spec((W1, WL)),                                  # Aw^T (padded)
            const_spec((1, L)),                                    # interior mask
            const_spec((Cin, 9)),                                  # stage-1 dw taps
            const_spec((Cmid, Cin + 1)),                           # stage-1 [wp'|b']
            const_spec((Cmid, 9)),                                 # stage-2 dw taps
            const_spec((Cout, Cmid + 1)),                          # stage-2 [wp'|b']
        ],
        out_specs=pl.BlockSpec((1, Cout, L), lambda n: (n, 0, 0)),
        scratch_shapes=[pltpu.VMEM((Cin, L), jnp.float32)],        # frame assembly buffer
        compiler_params=pltpu.CompilerParams(
            dimension_semantics=("parallel",),                     # 2 steps -> both v7x TCs
        ),
    )(x1_2d, x2f, jnp.asarray(awt), jnp.asarray(mask), wd1, wb1, wd2, wb2)

    # Free reshape + cheap XLA crop of the frame interior back to NCHW.
    return out_flat.reshape(N, Cout, HL, WL)[:, :, :H2, :W2]


if __name__ == "__main__":
    # UpDS(in_channels=8, out_channels=4, bilinear=True)
    # => x1 has in_channels//2 = 4 channels (low-res), x2 has 4 channels (skip)
    # => concat = 8 channels, mid_channels = in_channels//2 = 4
    N, C_half, H1, W1 = 2, 4, 16, 16
    in_channels, out_channels = 2 * C_half, 4
    mid_channels = in_channels // 2

    key = jax.random.PRNGKey(0)
    k_x1, k_x2, k_p1, k_p2 = jax.random.split(key, 4)
    x1 = jax.random.normal(k_x1, (N, C_half, H1, W1), jnp.float32)
    x2 = jax.random.normal(k_x2, (N, C_half, 2 * H1, 2 * W1), jnp.float32)

    params1 = make_dsconv_params(k_p1, in_channels, mid_channels)   # DSConv(8 -> 4)
    params2 = make_dsconv_params(k_p2, mid_channels, out_channels)  # DSConv(4 -> 4)

    out = up_ds_forward(x1, x2, params1, params2)
    out = jax.block_until_ready(out)

    assert out.shape == (N, out_channels, 2 * H1, 2 * W1), out.shape
    assert out.dtype == jnp.float32
    assert bool(jnp.all(jnp.isfinite(out)))
    print("KERNEL_OK")
</pallas_src>

<mosaic_0001>
module attributes {stable_mosaic.version = 11 : i64} {
  func.func @kernel(%arg0: i32, %arg1: memref<1x64x16xf32, #tpu.memory_space<vmem>>, %arg2: memref<1x4x4224xf32, #tpu.memory_space<vmem>>, %arg3: memref<16x128xf32, #tpu.memory_space<vmem>>, %arg4: memref<1x4224xf32, #tpu.memory_space<vmem>>, %arg5: memref<8x9xf32, #tpu.memory_space<vmem>>, %arg6: memref<4x9xf32, #tpu.memory_space<vmem>>, %arg7: memref<4x9xf32, #tpu.memory_space<vmem>>, %arg8: memref<4x5xf32, #tpu.memory_space<vmem>>, %arg9: memref<1x4x4224xf32, #tpu.memory_space<vmem>>, %arg10: memref<8x4224xf32, #tpu.memory_space<vmem>>) attributes {dimension_semantics = [#tpu.dimension_semantics<parallel>], iteration_bounds = array<i64: 2>, scalar_prefetch = 0 : i64, scratch_operands = 1 : i64, tpu.core_type = #tpu.core_type<tc>, window_params = [{transform_indices = @transform_0, window_bounds = array<i64: 1, 64, 16>}, {transform_indices = @transform_1, window_bounds = array<i64: 1, 4, 4224>}, {pipeline_mode = #tpu.pipeline_mode<synchronous>, transform_indices = @transform_2, window_bounds = array<i64: 16, 128>}, {pipeline_mode = #tpu.pipeline_mode<synchronous>, transform_indices = @transform_3, window_bounds = array<i64: 1, 4224>}, {pipeline_mode = #tpu.pipeline_mode<synchronous>, transform_indices = @transform_4, window_bounds = array<i64: 8, 9>}, {pipeline_mode = #tpu.pipeline_mode<synchronous>, transform_indices = @transform_5, window_bounds = array<i64: 4, 9>}, {pipeline_mode = #tpu.pipeline_mode<synchronous>, transform_indices = @transform_6, window_bounds = array<i64: 4, 9>}, {pipeline_mode = #tpu.pipeline_mode<synchronous>, transform_indices = @transform_7, window_bounds = array<i64: 4, 5>}, {transform_indices = @transform_8, window_bounds = array<i64: 1, 4, 4224>}]} {
    %c0 = arith.constant 0 : index
    %c0_0 = arith.constant 0 : index
    %c0_1 = arith.constant 0 : index
    %0 = vector.load %arg2[%c0, %c0_0, %c0_1] : memref<1x4x4224xf32, #tpu.memory_space<vmem>>, vector<1x4x4224xf32>
    %1 = vector.shape_cast %0 : vector<1x4x4224xf32> to vector<4x4224xf32>
    %c0_2 = arith.constant 0 : index
    %c0_3 = arith.constant 0 : index
    %2 = vector.load %arg10[%c0_2, %c0_3] : memref<8x4224xf32, #tpu.memory_space<vmem>>, vector<4x4224xf32>
    tpu.vector_store %arg10[%c0_2, %c0_3], %1 {strides = array<i32>} : memref<8x4224xf32, #tpu.memory_space<vmem>>, vector<4x4224xf32>,
    %cst = arith.constant 0.000000e+00 : f32
    %3 = vector.broadcast %cst : f32 to vector<4x4224xf32>
    %c4 = arith.constant 4 : index
    %c0_4 = arith.constant 0 : index
    %4 = vector.load %arg10[%c4, %c0_4] : memref<8x4224xf32, #tpu.memory_space<vmem>>, vector<4x4224xf32>
    tpu.vector_store %arg10[%c4, %c0_4], %3 {strides = array<i32>} : memref<8x4224xf32, #tpu.memory_space<vmem>>, vector<4x4224xf32>,
    %c0_5 = arith.constant 0 : index
    %c0_6 = arith.constant 0 : index
    %c0_7 = arith.constant 0 : index
    %5 = vector.load %arg1[%c0_5, %c0_6, %c0_7] : memref<1x64x16xf32, #tpu.memory_space<vmem>>, vector<1x64x16xf32>
    %6 = vector.shape_cast %5 : vector<1x64x16xf32> to vector<64x16xf32>
    %c0_8 = arith.constant 0 : index
    %c0_9 = arith.constant 0 : index
    %7 = vector.load %arg3[%c0_8, %c0_9] : memref<16x128xf32, #tpu.memory_space<vmem>>, vector<16x128xf32>
    %cst_10 = arith.constant dense<0.000000e+00> : vector<64x128xf32>
    %8 = tpu.matmul %6, %7, %cst_10 {dimension_numbers = #tpu.dot_dimension_numbers<[1], [0], [0], [1], [0, 0, 1, 1], [], []>} : vector<64x16xf32>, vector<16x128xf32>, vector<64x128xf32> -> vector<64x128xf32>
    %9 = vector.shape_cast %8 : vector<64x128xf32> to vector<4x16x128xf32>
    %10 = vector.extract_strided_slice %9 {offsets = [0, 0, 0], sizes = [4, 1, 128], strides = [1, 1, 1]} : vector<4x16x128xf32> to vector<4x1x128xf32>
    %11 = vector.shape_cast %10 : vector<4x1x128xf32> to vector<4x128xf32>
    %cst_11 = arith.constant 1.000000e+00 : f32
    %12 = vector.broadcast %cst_11 : f32 to vector<4x128xf32>
    %13 = arith.mulf %12, %11 : vector<4x128xf32>
    %c4_12 = arith.constant 4 : index
    %c0_13 = arith.constant 0 : index
    %14 = vector.load %arg10[%c4_12, %c0_13] : memref<8x4224xf32, #tpu.memory_space<vmem>>, vector<4x128xf32>
    tpu.vector_store %arg10[%c4_12, %c0_13], %13 {strides = array<i32>} : memref<8x4224xf32, #tpu.memory_space<vmem>>, vector<4x128xf32>,
    %15 = vector.extract_strided_slice %9 {offsets = [0, 0, 0], sizes = [4, 1, 128], strides = [1, 1, 1]} : vector<4x16x128xf32> to vector<4x1x128xf32>
    %16 = vector.shape_cast %15 : vector<4x1x128xf32> to vector<4x128xf32>
    %cst_14 = arith.constant 5.161290e-01 : f32
    %17 = vector.broadcast %cst_14 : f32 to vector<4x128xf32>
    %18 = arith.mulf %17, %16 : vector<4x128xf32>
    %19 = vector.extract_strided_slice %9 {offsets = [0, 1, 0], sizes = [4, 1, 128], strides = [1, 1, 1]} : vector<4x16x128xf32> to vector<4x1x128xf32>
    %20 = vector.shape_cast %19 : vector<4x1x128xf32> to vector<4x128xf32>
    %cst_15 = arith.constant 0.483870953 : f32
    %21 = vector.broadcast %cst_15 : f32 to vector<4x128xf32>
    %22 = arith.mulf %21, %20 : vector<4x128xf32>
    %23 = arith.addf %18, %22 : vector<4x128xf32>
    %c4_16 = arith.constant 4 : index
    %c128 = arith.constant 128 : index
    %24 = vector.load %arg10[%c4_16, %c128] : memref<8x4224xf32, #tpu.memory_space<vmem>>, vector<4x128xf32>
    tpu.vector_store %arg10[%c4_16, %c128], %23 {strides = array<i32>} : memref<8x4224xf32, #tpu.memory_space<vmem>>, vector<4x128xf32>,
    %25 = vector.extract_strided_slice %9 {offsets = [0, 0, 0], sizes = [4, 1, 128], strides = [1, 1, 1]} : vector<4x16x128xf32> to vector<4x1x128xf32>
    %26 = vector.shape_cast %25 : vector<4x1x128xf32> to vector<4x128xf32>
    %cst_17 = arith.constant 0.0322580636 : f32
    %27 = vector.broadcast %cst_17 : f32 to vector<4x128xf32>
    %28 = arith.mulf %27, %26 : vector<4x128xf32>
    %29 = vector.extract_strided_slice %9 {offsets = [0, 1, 0], sizes = [4, 1, 128], strides = [1, 1, 1]} : vector<4x16x128xf32> to vector<4x1x128xf32>
    %30 = vector.shape_cast %29 : vector<4x1x128xf32> to vector<4x128xf32>
    %cst_18 = arith.constant 0.967741906 : f32
    %31 = vector.broadcast %cst_18 : f32 to vector<4x128xf32>
    %32 = arith.mulf %31, %30 : vector<4x128xf32>
    %33 = arith.addf %28, %32 : vector<4x128xf32>
    %c4_19 = arith.constant 4 : index
    %c256 = arith.constant 256 : index
    %34 = vector.load %arg10[%c4_19, %c256] : memref<8x4224xf32, #tpu.memory_space<vmem>>, vector<4x128xf32>
    tpu.vector_store %arg10[%c4_19, %c256], %33 {strides = array<i32>} : memref<8x4224xf32, #tpu.memory_space<vmem>>, vector<4x128xf32>,
    %35 = vector.extract_strided_slice %9 {offsets = [0, 1, 0], sizes = [4, 1, 128], strides = [1, 1, 1]} : vector<4x16x128xf32> to vector<4x1x128xf32>
    %36 = vector.shape_cast %35 : vector<4x1x128xf32> to vector<4x128xf32>
    %cst_20 = arith.constant 0.54838711 : f32
    %37 = vector.broadcast %cst_20 : f32 to vector<4x128xf32>
    %38 = arith.mulf %37, %36 : vector<4x128xf32>
    %39 = vector.extract_strided_slice %9 {offsets = [0, 2, 0], sizes = [4, 1, 128], strides = [1, 1, 1]} : vector<4x16x128xf32> to vector<4x1x128xf32>
    %40 = vector.shape_cast %39 : vector<4x1x128xf32> to vector<4x128xf32>
    %cst_21 = arith.constant 0.45161289 : f32
    %41 = vector.broadcast %cst_21 : f32 to vector<4x128xf32>
    %42 = arith.mulf %41, %40 : vector<4x128xf32>
    %43 = arith.addf %38, %42 : vector<4x128xf32>
    %c4_22 = arith.constant 4 : index
    %c384 = arith.constant 384 : index
    %44 = vector.load %arg10[%c4_22, %c384] : memref<8x4224xf32, #tpu.memory_space<vmem>>, vector<4x128xf32>
    tpu.vector_store %arg10[%c4_22, %c384], %43 {strides = array<i32>} : memref<8x4224xf32, #tpu.memory_space<vmem>>, vector<4x128xf32>,
    %45 = vector.extract_strided_slice %9 {offsets = [0, 1, 0], sizes = [4, 1, 128], strides = [1, 1, 1]} : vector<4x16x128xf32> to vector<4x1x128xf32>
    %46 = vector.shape_cast %45 : vector<4x1x128xf32> to vector<4x128xf32>
    %cst_23 = arith.constant 0.0645161271 : f32
    %47 = vector.broadcast %cst_23 : f32 to vector<4x128xf32>
    %48 = arith.mulf %47, %46 : vector<4x128xf32>
    %49 = vector.extract_strided_slice %9 {offsets = [0, 2, 0], sizes = [4, 1, 128], strides = [1, 1, 1]} : vector<4x16x128xf32> to vector<4x1x128xf32>
    %50 = vector.shape_cast %49 : vector<4x1x128xf32> to vector<4x128xf32>
    %cst_24 = arith.constant 0.935483872 : f32
    %51 = vector.broadcast %cst_24 : f32 to vector<4x128xf32>
    %52 = arith.mulf %51, %50 : vector<4x128xf32>
    %53 = arith.addf %48, %52 : vector<4x128xf32>
    %c4_25 = arith.constant 4 : index
    %c512 = arith.constant 512 : index
    %54 = vector.load %arg10[%c4_25, %c512] : memref<8x4224xf32, #tpu.memory_space<vmem>>, vector<4x128xf32>
    tpu.vector_store %arg10[%c4_25, %c512], %53 {strides = array<i32>} : memref<8x4224xf32, #tpu.memory_space<vmem>>, vector<4x128xf32>,
    %55 = vector.extract_strided_slice %9 {offsets = [0, 2, 0], sizes = [4, 1, 128], strides = [1, 1, 1]} : vector<4x16x128xf32> to vector<4x1x128xf32>
    %56 = vector.shape_cast %55 : vector<4x1x128xf32> to vector<4x128xf32>
    %cst_26 = arith.constant 0.580645144 : f32
    %57 = vector.broadcast %cst_26 : f32 to vector<4x128xf32>
    %58 = arith.mulf %57, %56 : vector<4x128xf32>
    %59 = vector.extract_strided_slice %9 {offsets = [0, 3, 0], sizes = [4, 1, 128], strides = [1, 1, 1]} : vector<4x16x128xf32> to vector<4x1x128xf32>
    %60 = vector.shape_cast %59 : vector<4x1x128xf32> to vector<4x128xf32>
    %cst_27 = arith.constant 0.419354826 : f32
    %61 = vector.broadcast %cst_27 : f32 to vector<4x128xf32>
    %62 = arith.mulf %61, %60 : vector<4x128xf32>
    %63 = arith.addf %58, %62 : vector<4x128xf32>
    %c4_28 = arith.constant 4 : index
    %c640 = arith.constant 640 : index
    %64 = vector.load %arg10[%c4_28, %c640] : memref<8x4224xf32, #tpu.memory_space<vmem>>, vector<4x128xf32>
    tpu.vector_store %arg10[%c4_28, %c640], %63 {strides = array<i32>} : memref<8x4224xf32, #tpu.memory_space<vmem>>, vector<4x128xf32>,
    %65 = vector.extract_strided_slice %9 {offsets = [0, 2, 0], sizes = [4, 1, 128], strides = [1, 1, 1]} : vector<4x16x128xf32> to vector<4x1x128xf32>
    %66 = vector.shape_cast %65 : vector<4x1x128xf32> to vector<4x128xf32>
    %cst_29 = arith.constant 0.0967741906 : f32
    %67 = vector.broadcast %cst_29 : f32 to vector<4x128xf32>
    %68 = arith.mulf %67, %66 : vector<4x128xf32>
    %69 = vector.extract_strided_slice %9 {offsets = [0, 3, 0], sizes = [4, 1, 128], strides = [1, 1, 1]} : vector<4x16x128xf32> to vector<4x1x128xf32>
    %70 = vector.shape_cast %69 : vector<4x1x128xf32> to vector<4x128xf32>
    %cst_30 = arith.constant 0.903225779 : f32
    %71 = vector.broadcast %cst_30 : f32 to vector<4x128xf32>
    %72 = arith.mulf %71, %70 : vector<4x128xf32>
    %73 = arith.addf %68, %72 : vector<4x128xf32>
    %c4_31 = arith.constant 4 : index
    %c768 = arith.constant 768 : index
    %74 = vector.load %arg10[%c4_31, %c768] : memref<8x4224xf32, #tpu.memory_space<vmem>>, vector<4x128xf32>
    tpu.vector_store %arg10[%c4_31, %c768], %73 {strides = array<i32>} : memref<8x4224xf32, #tpu.memory_space<vmem>>, vector<4x128xf32>,
    %75 = vector.extract_strided_slice %9 {offsets = [0, 3, 0], sizes = [4, 1, 128], strides = [1, 1, 1]} : vector<4x16x128xf32> to vector<4x1x128xf32>
    %76 = vector.shape_cast %75 : vector<4x1x128xf32> to vector<4x128xf32>
    %cst_32 = arith.constant 0.612903237 : f32
    %77 = vector.broadcast %cst_32 : f32 to vector<4x128xf32>
    %78 = arith.mulf %77, %76 : vector<4x128xf32>
    %79 = vector.extract_strided_slice %9 {offsets = [0, 4, 0], sizes = [4, 1, 128], strides = [1, 1, 1]} : vector<4x16x128xf32> to vector<4x1x128xf32>
    %80 = vector.shape_cast %79 : vector<4x1x128xf32> to vector<4x128xf32>
    %cst_33 = arith.constant 0.387096763 : f32
    %81 = vector.broadcast %cst_33 : f32 to vector<4x128xf32>
    %82 = arith.mulf %81, %80 : vector<4x128xf32>
    %83 = arith.addf %78, %82 : vector<4x128xf32>
    %c4_34 = arith.constant 4 : index
    %c896 = arith.constant 896 : index
    %84 = vector.load %arg10[%c4_34, %c896] : memref<8x4224xf32, #tpu.memory_space<vmem>>, vector<4x128xf32>
    tpu.vector_store %arg10[%c4_34, %c896], %83 {strides = array<i32>} : memref<8x4224xf32, #tpu.memory_space<vmem>>, vector<4x128xf32>,
    %85 = vector.extract_strided_slice %9 {offsets = [0, 3, 0], sizes = [4, 1, 128], strides = [1, 1, 1]} : vector<4x16x128xf32> to vector<4x1x128xf32>
    %86 = vector.shape_cast %85 : vector<4x1x128xf32> to vector<4x128xf32>
    %cst_35 = arith.constant 0.129032254 : f32
    %87 = vector.broadcast %cst_35 : f32 to vector<4x128xf32>
    %88 = arith.mulf %87, %86 : vector<4x128xf32>
    %89 = vector.extract_strided_slice %9 {offsets = [0, 4, 0], sizes = [4, 1, 128], strides = [1, 1, 1]} : vector<4x16x128xf32> to vector<4x1x128xf32>
    %90 = vector.shape_cast %89 : vector<4x1x128xf32> to vector<4x128xf32>
    %cst_36 = arith.constant 0.870967745 : f32
    %91 = vector.broadcast %cst_36 : f32 to vector<4x128xf32>
    %92 = arith.mulf %91, %90 : vector<4x128xf32>
    %93 = arith.addf %88, %92 : vector<4x128xf32>
    %c4_37 = arith.constant 4 : index
    %c1024 = arith.constant 1024 : index
    %94 = vector.load %arg10[%c4_37, %c1024] : memref<8x4224xf32, #tpu.memory_space<vmem>>, vector<4x128xf32>
    tpu.vector_store %arg10[%c4_37, %c1024], %93 {strides = array<i32>} : memref<8x4224xf32, #tpu.memory_space<vmem>>, vector<4x128xf32>,
    %95 = vector.extract_strided_slice %9 {offsets = [0, 4, 0], sizes = [4, 1, 128], strides = [1, 1, 1]} : vector<4x16x128xf32> to vector<4x1x128xf32>
    %96 = vector.shape_cast %95 : vector<4x1x128xf32> to vector<4x128xf32>
    %cst_38 = arith.constant 0.645161271 : f32
    %97 = vector.broadcast %cst_38 : f32 to vector<4x128xf32>
    %98 = arith.mulf %97, %96 : vector<4x128xf32>
    %99 = vector.extract_strided_slice %9 {offsets = [0, 5, 0], sizes = [4, 1, 128], strides = [1, 1, 1]} : vector<4x16x128xf32> to vector<4x1x128xf32>
    %100 = vector.shape_cast %99 : vector<4x1x128xf32> to vector<4x128xf32>
    %cst_39 = arith.constant 0.354838699 : f32
    %101 = vector.broadcast %cst_39 : f32 to vector<4x128xf32>
    %102 = arith.mulf %101, %100 : vector<4x128xf32>
    %103 = arith.addf %98, %102 : vector<4x128xf32>
    %c4_40 = arith.constant 4 : index
    %c1152 = arith.constant 1152 : index
    %104 = vector.load %arg10[%c4_40, %c1152] : memref<8x4224xf32, #tpu.memory_space<vmem>>, vector<4x128xf32>
    tpu.vector_store %arg10[%c4_40, %c1152], %103 {strides = array<i32>} : memref<8x4224xf32, #tpu.memory_space<vmem>>, vector<4x128xf32>,
    %105 = vector.extract_strided_slice %9 {offsets = [0, 4, 0], sizes = [4, 1, 128], strides = [1, 1, 1]} : vector<4x16x128xf32> to vector<4x1x128xf32>
    %106 = vector.shape_cast %105 : vector<4x1x128xf32> to vector<4x128xf32>
    %cst_41 = arith.constant 0.161290318 : f32
    %107 = vector.broadcast %cst_41 : f32 to vector<4x128xf32>
    %108 = arith.mulf %107, %106 : vector<4x128xf32>
    %109 = vector.extract_strided_slice %9 {offsets = [0, 5, 0], sizes = [4, 1, 128], strides = [1, 1, 1]} : vector<4x16x128xf32> to vector<4x1x128xf32>
    %110 = vector.shape_cast %109 : vector<4x1x128xf32> to vector<4x128xf32>
    %cst_42 = arith.constant 0.838709652 : f32
    %111 = vector.broadcast %cst_42 : f32 to vector<4x128xf32>
    %112 = arith.mulf %111, %110 : vector<4x128xf32>
    %113 = arith.addf %108, %112 : vector<4x128xf32>
    %c4_43 = arith.constant 4 : index
    %c1280 = arith.constant 1280 : index
    %114 = vector.load %arg10[%c4_43, %c1280] : memref<8x4224xf32, #tpu.memory_space<vmem>>, vector<4x128xf32>
    tpu.vector_store %arg10[%c4_43, %c1280], %113 {strides = array<i32>} : memref<8x4224xf32, #tpu.memory_space<vmem>>, vector<4x128xf32>,
    %115 = vector.extract_strided_slice %9 {offsets = [0, 5, 0], sizes = [4, 1, 128], strides = [1, 1, 1]} : vector<4x16x128xf32> to vector<4x1x128xf32>
    %116 = vector.shape_cast %115 : vector<4x1x128xf32> to vector<4x128xf32>
    %cst_44 = arith.constant 0.677419364 : f32
    %117 = vector.broadcast %cst_44 : f32 to vector<4x128xf32>
    %118 = arith.mulf %117, %116 : vector<4x128xf32>
    %119 = vector.extract_strided_slice %9 {offsets = [0, 6, 0], sizes = [4, 1, 128], strides = [1, 1, 1]} : vector<4x16x128xf32> to vector<4x1x128xf32>
    %120 = vector.shape_cast %119 : vector<4x1x128xf32> to vector<4x128xf32>
    %cst_45 = arith.constant 0.322580636 : f32
    %121 = vector.broadcast %cst_45 : f32 to vector<4x128xf32>
    %122 = arith.mulf %121, %120 : vector<4x128xf32>
    %123 = arith.addf %118, %122 : vector<4x128xf32>
    %c4_46 = arith.constant 4 : index
    %c1408 = arith.constant 1408 : index
    %124 = vector.load %arg10[%c4_46, %c1408] : memref<8x4224xf32, #tpu.memory_space<vmem>>, vector<4x128xf32>
    tpu.vector_store %arg10[%c4_46, %c1408], %123 {strides = array<i32>} : memref<8x4224xf32, #tpu.memory_space<vmem>>, vector<4x128xf32>,
    %125 = vector.extract_strided_slice %9 {offsets = [0, 5, 0], sizes = [4, 1, 128], strides = [1, 1, 1]} : vector<4x16x128xf32> to vector<4x1x128xf32>
    %126 = vector.shape_cast %125 : vector<4x1x128xf32> to vector<4x128xf32>
    %cst_47 = arith.constant 0.193548381 : f32
    %127 = vector.broadcast %cst_47 : f32 to vector<4x128xf32>
    %128 = arith.mulf %127, %126 : vector<4x128xf32>
    %129 = vector.extract_strided_slice %9 {offsets = [0, 6, 0], sizes = [4, 1, 128], strides = [1, 1, 1]} : vector<4x16x128xf32> to vector<4x1x128xf32>
    %130 = vector.shape_cast %129 : vector<4x1x128xf32> to vector<4x128xf32>
    %cst_48 = arith.constant 0.806451618 : f32
    %131 = vector.broadcast %cst_48 : f32 to vector<4x128xf32>
    %132 = arith.mulf %131, %130 : vector<4x128xf32>
    %133 = arith.addf %128, %132 : vector<4x128xf32>
    %c4_49 = arith.constant 4 : index
    %c1536 = arith.constant 1536 : index
    %134 = vector.load %arg10[%c4_49, %c1536] : memref<8x4224xf32, #tpu.memory_space<vmem>>, vector<4x128xf32>
    tpu.vector_store %arg10[%c4_49, %c1536], %133 {strides = array<i32>} : memref<8x4224xf32, #tpu.memory_space<vmem>>, vector<4x128xf32>,
    %135 = vector.extract_strided_slice %9 {offsets = [0, 6, 0], sizes = [4, 1, 128], strides = [1, 1, 1]} : vector<4x16x128xf32> to vector<4x1x128xf32>
    %136 = vector.shape_cast %135 : vector<4x1x128xf32> to vector<4x128xf32>
    %cst_50 = arith.constant 0.709677398 : f32
    %137 = vector.broadcast %cst_50 : f32 to vector<4x128xf32>
    %138 = arith.mulf %137, %136 : vector<4x128xf32>
    %139 = vector.extract_strided_slice %9 {offsets = [0, 7, 0], sizes = [4, 1, 128], strides = [1, 1, 1]} : vector<4x16x128xf32> to vector<4x1x128xf32>
    %140 = vector.shape_cast %139 : vector<4x1x128xf32> to vector<4x128xf32>
    %cst_51 = arith.constant 0.290322572 : f32
    %141 = vector.broadcast %cst_51 : f32 to vector<4x128xf32>
    %142 = arith.mulf %141, %140 : vector<4x128xf32>
    %143 = arith.addf %138, %142 : vector<4x128xf32>
    %c4_52 = arith.constant 4 : index
    %c1664 = arith.constant 1664 : index
    %144 = vector.load %arg10[%c4_52, %c1664] : memref<8x4224xf32, #tpu.memory_space<vmem>>, vector<4x128xf32>
    tpu.vector_store %arg10[%c4_52, %c1664], %143 {strides = array<i32>} : memref<8x4224xf32, #tpu.memory_space<vmem>>, vector<4x128xf32>,
    %145 = vector.extract_strided_slice %9 {offsets = [0, 6, 0], sizes = [4, 1, 128], strides = [1, 1, 1]} : vector<4x16x128xf32> to vector<4x1x128xf32>
    %146 = vector.shape_cast %145 : vector<4x1x128xf32> to vector<4x128xf32>
    %cst_53 = arith.constant 0.225806445 : f32
    %147 = vector.broadcast %cst_53 : f32 to vector<4x128xf32>
    %148 = arith.mulf %147, %146 : vector<4x128xf32>
    %149 = vector.extract_strided_slice %9 {offsets = [0, 7, 0], sizes = [4, 1, 128], strides = [1, 1, 1]} : vector<4x16x128xf32> to vector<4x1x128xf32>
    %150 = vector.shape_cast %149 : vector<4x1x128xf32> to vector<4x128xf32>
    %cst_54 = arith.constant 0.774193525 : f32
    %151 = vector.broadcast %cst_54 : f32 to vector<4x128xf32>
    %152 = arith.mulf %151, %150 : vector<4x128xf32>
    %153 = arith.addf %148, %152 : vector<4x128xf32>
    %c4_55 = arith.constant 4 : index
    %c1792 = arith.constant 1792 : index
    %154 = vector.load %arg10[%c4_55, %c1792] : memref<8x4224xf32, #tpu.memory_space<vmem>>, vector<4x128xf32>
    tpu.vector_store %arg10[%c4_55, %c1792], %153 {strides = array<i32>} : memref<8x4224xf32, #tpu.memory_space<vmem>>, vector<4x128xf32>,
    %155 = vector.extract_strided_slice %9 {offsets = [0, 7, 0], sizes = [4, 1, 128], strides = [1, 1, 1]} : vector<4x16x128xf32> to vector<4x1x128xf32>
    %156 = vector.shape_cast %155 : vector<4x1x128xf32> to vector<4x128xf32>
    %cst_56 = arith.constant 0.741935492 : f32
    %157 = vector.broadcast %cst_56 : f32 to vector<4x128xf32>
    %158 = arith.mulf %157, %156 : vector<4x128xf32>
    %159 = vector.extract_strided_slice %9 {offsets = [0, 8, 0], sizes = [4, 1, 128], strides = [1, 1, 1]} : vector<4x16x128xf32> to vector<4x1x128xf32>
    %160 = vector.shape_cast %159 : vector<4x1x128xf32> to vector<4x128xf32>
    %cst_57 = arith.constant 0.258064508 : f32
    %161 = vector.broadcast %cst_57 : f32 to vector<4x128xf32>
    %162 = arith.mulf %161, %160 : vector<4x128xf32>
    %163 = arith.addf %158, %162 : vector<4x128xf32>
    %c4_58 = arith.constant 4 : index
    %c1920 = arith.constant 1920 : index
    %164 = vector.load %arg10[%c4_58, %c1920] : memref<8x4224xf32, #tpu.memory_space<vmem>>, vector<4x128xf32>
    tpu.vector_store %arg10[%c4_58, %c1920], %163 {strides = array<i32>} : memref<8x4224xf32, #tpu.memory_space<vmem>>, vector<4x128xf32>,
    %165 = vector.extract_strided_slice %9 {offsets = [0, 7, 0], sizes = [4, 1, 128], strides = [1, 1, 1]} : vector<4x16x128xf32> to vector<4x1x128xf32>
    %166 = vector.shape_cast %165 : vector<4x1x128xf32> to vector<4x128xf32>
    %cst_59 = arith.constant 0.258064508 : f32
    %167 = vector.broadcast %cst_59 : f32 to vector<4x128xf32>
    %168 = arith.mulf %167, %166 : vector<4x128xf32>
    %169 = vector.extract_strided_slice %9 {offsets = [0, 8, 0], sizes = [4, 1, 128], strides = [1, 1, 1]} : vector<4x16x128xf32> to vector<4x1x128xf32>
    %170 = vector.shape_cast %169 : vector<4x1x128xf32> to vector<4x128xf32>
    %cst_60 = arith.constant 0.741935492 : f32
    %171 = vector.broadcast %cst_60 : f32 to vector<4x128xf32>
    %172 = arith.mulf %171, %170 : vector<4x128xf32>
    %173 = arith.addf %168, %172 : vector<4x128xf32>
    %c4_61 = arith.constant 4 : index
    %c2048 = arith.constant 2048 : index
    %174 = vector.load %arg10[%c4_61, %c2048] : memref<8x4224xf32, #tpu.memory_space<vmem>>, vector<4x128xf32>
    tpu.vector_store %arg10[%c4_61, %c2048], %173 {strides = array<i32>} : memref<8x4224xf32, #tpu.memory_space<vmem>>, vector<4x128xf32>,
    %175 = vector.extract_strided_slice %9 {offsets = [0, 8, 0], sizes = [4, 1, 128], strides = [1, 1, 1]} : vector<4x16x128xf32> to vector<4x1x128xf32>
    %176 = vector.shape_cast %175 : vector<4x1x128xf32> to vector<4x128xf32>
    %cst_62 = arith.constant 0.774193525 : f32
    %177 = vector.broadcast %cst_62 : f32 to vector<4x128xf32>
    %178 = arith.mulf %177, %176 : vector<4x128xf32>
    %179 = vector.extract_strided_slice %9 {offsets = [0, 9, 0], sizes = [4, 1, 128], strides = [1, 1, 1]} : vector<4x16x128xf32> to vector<4x1x128xf32>
    %180 = vector.shape_cast %179 : vector<4x1x128xf32> to vector<4x128xf32>
    %cst_63 = arith.constant 0.225806445 : f32
    %181 = vector.broadcast %cst_63 : f32 to vector<4x128xf32>
    %182 = arith.mulf %181, %180 : vector<4x128xf32>
    %183 = arith.addf %178, %182 : vector<4x128xf32>
    %c4_64 = arith.constant 4 : index
    %c2176 = arith.constant 2176 : index
    %184 = vector.load %arg10[%c4_64, %c2176] : memref<8x4224xf32, #tpu.memory_space<vmem>>, vector<4x128xf32>
    tpu.vector_store %arg10[%c4_64, %c2176], %183 {strides = array<i32>} : memref<8x4224xf32, #tpu.memory_space<vmem>>, vector<4x128xf32>,
    %185 = vector.extract_strided_slice %9 {offsets = [0, 8, 0], sizes = [4, 1, 128], strides = [1, 1, 1]} : vector<4x16x128xf32> to vector<4x1x128xf32>
    %186 = vector.shape_cast %185 : vector<4x1x128xf32> to vector<4x128xf32>
    %cst_65 = arith.constant 0.290322572 : f32
    %187 = vector.broadcast %cst_65 : f32 to vector<4x128xf32>
    %188 = arith.mulf %187, %186 : vector<4x128xf32>
    %189 = vector.extract_strided_slice %9 {offsets = [0, 9, 0], sizes = [4, 1, 128], strides = [1, 1, 1]} : vector<4x16x128xf32> to vector<4x1x128xf32>
    %190 = vector.shape_cast %189 : vector<4x1x128xf32> to vector<4x128xf32>
    %cst_66 = arith.constant 0.709677398 : f32
    %191 = vector.broadcast %cst_66 : f32 to vector<4x128xf32>
    %192 = arith.mulf %191, %190 : vector<4x128xf32>
    %193 = arith.addf %188, %192 : vector<4x128xf32>
    %c4_67 = arith.constant 4 : index
    %c2304 = arith.constant 2304 : index
    %194 = vector.load %arg10[%c4_67, %c2304] : memref<8x4224xf32, #tpu.memory_space<vmem>>, vector<4x128xf32>
    tpu.vector_store %arg10[%c4_67, %c2304], %193 {strides = array<i32>} : memref<8x4224xf32, #tpu.memory_space<vmem>>, vector<4x128xf32>,
    %195 = vector.extract_strided_slice %9 {offsets = [0, 9, 0], sizes = [4, 1, 128], strides = [1, 1, 1]} : vector<4x16x128xf32> to vector<4x1x128xf32>
    %196 = vector.shape_cast %195 : vector<4x1x128xf32> to vector<4x128xf32>
    %cst_68 = arith.constant 0.806451618 : f32
    %197 = vector.broadcast %cst_68 : f32 to vector<4x128xf32>
    %198 = arith.mulf %197, %196 : vector<4x128xf32>
    %199 = vector.extract_strided_slice %9 {offsets = [0, 10, 0], sizes = [4, 1, 128], strides = [1, 1, 1]} : vector<4x16x128xf32> to vector<4x1x128xf32>
    %200 = vector.shape_cast %199 : vector<4x1x128xf32> to vector<4x128xf32>
    %cst_69 = arith.constant 0.193548381 : f32
    %201 = vector.broadcast %cst_69 : f32 to vector<4x128xf32>
    %202 = arith.mulf %201, %200 : vector<4x128xf32>
    %203 = arith.addf %198, %202 : vector<4x128xf32>
    %c4_70 = arith.constant 4 : index
    %c2432 = arith.constant 2432 : index
    %204 = vector.load %arg10[%c4_70, %c2432] : memref<8x4224xf32, #tpu.memory_space<vmem>>, vector<4x128xf32>
    tpu.vector_store %arg10[%c4_70, %c2432], %203 {strides = array<i32>} : memref<8x4224xf32, #tpu.memory_space<vmem>>, vector<4x128xf32>,
    %205 = vector.extract_strided_slice %9 {offsets = [0, 9, 0], sizes = [4, 1, 128], strides = [1, 1, 1]} : vector<4x16x128xf32> to vector<4x1x128xf32>
    %206 = vector.shape_cast %205 : vector<4x1x128xf32> to vector<4x128xf32>
    %cst_71 = arith.constant 0.322580636 : f32
    %207 = vector.broadcast %cst_71 : f32 to vector<4x128xf32>
    %208 = arith.mulf %207, %206 : vector<4x128xf32>
    %209 = vector.extract_strided_slice %9 {offsets = [0, 10, 0], sizes = [4, 1, 128], strides = [1, 1, 1]} : vector<4x16x128xf32> to vector<4x1x128xf32>
    %210 = vector.shape_cast %209 : vector<4x1x128xf32> to vector<4x128xf32>
    %cst_72 = arith.constant 0.677419364 : f32
    %211 = vector.broadcast %cst_72 : f32 to vector<4x128xf32>
    %212 = arith.mulf %211, %210 : vector<4x128xf32>
    %213 = arith.addf %208, %212 : vector<4x128xf32>
    %c4_73 = arith.constant 4 : index
    %c2560 = arith.constant 2560 : index
    %214 = vector.load %arg10[%c4_73, %c2560] : memref<8x4224xf32, #tpu.memory_space<vmem>>, vector<4x128xf32>
    tpu.vector_store %arg10[%c4_73, %c2560], %213 {strides = array<i32>} : memref<8x4224xf32, #tpu.memory_space<vmem>>, vector<4x128xf32>,
    %215 = vector.extract_strided_slice %9 {offsets = [0, 10, 0], sizes = [4, 1, 128], strides = [1, 1, 1]} : vector<4x16x128xf32> to vector<4x1x128xf32>
    %216 = vector.shape_cast %215 : vector<4x1x128xf32> to vector<4x128xf32>
    %cst_74 = arith.constant 0.838709652 : f32
    %217 = vector.broadcast %cst_74 : f32 to vector<4x128xf32>
    %218 = arith.mulf %217, %216 : vector<4x128xf32>
    %219 = vector.extract_strided_slice %9 {offsets = [0, 11, 0], sizes = [4, 1, 128], strides = [1, 1, 1]} : vector<4x16x128xf32> to vector<4x1x128xf32>
    %220 = vector.shape_cast %219 : vector<4x1x128xf32> to vector<4x128xf32>
    %cst_75 = arith.constant 0.161290318 : f32
    %221 = vector.broadcast %cst_75 : f32 to vector<4x128xf32>
    %222 = arith.mulf %221, %220 : vector<4x128xf32>
    %223 = arith.addf %218, %222 : vector<4x128xf32>
    %c4_76 = arith.constant 4 : index
    %c2688 = arith.constant 2688 : index
    %224 = vector.load %arg10[%c4_76, %c2688] : memref<8x4224xf32, #tpu.memory_space<vmem>>, vector<4x128xf32>
    tpu.vector_store %arg10[%c4_76, %c2688], %223 {strides = array<i32>} : memref<8x4224xf32, #tpu.memory_space<vmem>>, vector<4x128xf32>,
    %225 = vector.extract_strided_slice %9 {offsets = [0, 10, 0], sizes = [4, 1, 128], strides = [1, 1, 1]} : vector<4x16x128xf32> to vector<4x1x128xf32>
    %226 = vector.shape_cast %225 : vector<4x1x128xf32> to vector<4x128xf32>
    %cst_77 = arith.constant 0.354838699 : f32
    %227 = vector.broadcast %cst_77 : f32 to vector<4x128xf32>
    %228 = arith.mulf %227, %226 : vector<4x128xf32>
    %229 = vector.extract_strided_slice %9 {offsets = [0, 11, 0], sizes = [4, 1, 128], strides = [1, 1, 1]} : vector<4x16x128xf32> to vector<4x1x128xf32>
    %230 = vector.shape_cast %229 : vector<4x1x128xf32> to vector<4x128xf32>
    %cst_78 = arith.constant 0.645161271 : f32
    %231 = vector.broadcast %cst_78 : f32 to vector<4x128xf32>
    %232 = arith.mulf %231, %230 : vector<4x128xf32>
    %233 = arith.addf %228, %232 : vector<4x128xf32>
    %c4_79 = arith.constant 4 : index
    %c2816 = arith.constant 2816 : index
    %234 = vector.load %arg10[%c4_79, %c2816] : memref<8x4224xf32, #tpu.memory_space<vmem>>, vector<4x128xf32>
    tpu.vector_store %arg10[%c4_79, %c2816], %233 {strides = array<i32>} : memref<8x4224xf32, #tpu.memory_space<vmem>>, vector<4x128xf32>,
    %235 = vector.extract_strided_slice %9 {offsets = [0, 11, 0], sizes = [4, 1, 128], strides = [1, 1, 1]} : vector<4x16x128xf32> to vector<4x1x128xf32>
    %236 = vector.shape_cast %235 : vector<4x1x128xf32> to vector<4x128xf32>
    %cst_80 = arith.constant 0.870967745 : f32
    %237 = vector.broadcast %cst_80 : f32 to vector<4x128xf32>
    %238 = arith.mulf %237, %236 : vector<4x128xf32>
    %239 = vector.extract_strided_slice %9 {offsets = [0, 12, 0], sizes = [4, 1, 128], strides = [1, 1, 1]} : vector<4x16x128xf32> to vector<4x1x128xf32>
    %240 = vector.shape_cast %239 : vector<4x1x128xf32> to vector<4x128xf32>
    %cst_81 = arith.constant 0.129032254 : f32
    %241 = vector.broadcast %cst_81 : f32 to vector<4x128xf32>
    %242 = arith.mulf %241, %240 : vector<4x128xf32>
    %243 = arith.addf %238, %242 : vector<4x128xf32>
    %c4_82 = arith.constant 4 : index
    %c2944 = arith.constant 2944 : index
    %244 = vector.load %arg10[%c4_82, %c2944] : memref<8x4224xf32, #tpu.memory_space<vmem>>, vector<4x128xf32>
    tpu.vector_store %arg10[%c4_82, %c2944], %243 {strides = array<i32>} : memref<8x4224xf32, #tpu.memory_space<vmem>>, vector<4x128xf32>,
    %245 = vector.extract_strided_slice %9 {offsets = [0, 11, 0], sizes = [4, 1, 128], strides = [1, 1, 1]} : vector<4x16x128xf32> to vector<4x1x128xf32>
    %246 = vector.shape_cast %245 : vector<4x1x128xf32> to vector<4x128xf32>
    %cst_83 = arith.constant 0.387096763 : f32
    %247 = vector.broadcast %cst_83 : f32 to vector<4x128xf32>
    %248 = arith.mulf %247, %246 : vector<4x128xf32>
    %249 = vector.extract_strided_slice %9 {offsets = [0, 12, 0], sizes = [4, 1, 128], strides = [1, 1, 1]} : vector<4x16x128xf32> to vector<4x1x128xf32>
    %250 = vector.shape_cast %249 : vector<4x1x128xf32> to vector<4x128xf32>
    %cst_84 = arith.constant 0.612903237 : f32
    %251 = vector.broadcast %cst_84 : f32 to vector<4x128xf32>
    %252 = arith.mulf %251, %250 : vector<4x128xf32>
    %253 = arith.addf %248, %252 : vector<4x128xf32>
    %c4_85 = arith.constant 4 : index
    %c3072 = arith.constant 3072 : index
    %254 = vector.load %arg10[%c4_85, %c3072] : memref<8x4224xf32, #tpu.memory_space<vmem>>, vector<4x128xf32>
    tpu.vector_store %arg10[%c4_85, %c3072], %253 {strides = array<i32>} : memref<8x4224xf32, #tpu.memory_space<vmem>>, vector<4x128xf32>,
    %255 = vector.extract_strided_slice %9 {offsets = [0, 12, 0], sizes = [4, 1, 128], strides = [1, 1, 1]} : vector<4x16x128xf32> to vector<4x1x128xf32>
    %256 = vector.shape_cast %255 : vector<4x1x128xf32> to vector<4x128xf32>
    %cst_86 = arith.constant 0.903225779 : f32
    %257 = vector.broadcast %cst_86 : f32 to vector<4x128xf32>
    %258 = arith.mulf %257, %256 : vector<4x128xf32>
    %259 = vector.extract_strided_slice %9 {offsets = [0, 13, 0], sizes = [4, 1, 128], strides = [1, 1, 1]} : vector<4x16x128xf32> to vector<4x1x128xf32>
    %260 = vector.shape_cast %259 : vector<4x1x128xf32> to vector<4x128xf32>
    %cst_87 = arith.constant 0.0967741906 : f32
    %261 = vector.broadcast %cst_87 : f32 to vector<4x128xf32>
    %262 = arith.mulf %261, %260 : vector<4x128xf32>
    %263 = arith.addf %258, %262 : vector<4x128xf32>
    %c4_88 = arith.constant 4 : index
    %c3200 = arith.constant 3200 : index
    %264 = vector.load %arg10[%c4_88, %c3200] : memref<8x4224xf32, #tpu.memory_space<vmem>>, vector<4x128xf32>
    tpu.vector_store %arg10[%c4_88, %c3200], %263 {strides = array<i32>} : memref<8x4224xf32, #tpu.memory_space<vmem>>, vector<4x128xf32>,
    %265 = vector.extract_strided_slice %9 {offsets = [0, 12, 0], sizes = [4, 1, 128], strides = [1, 1, 1]} : vector<4x16x128xf32> to vector<4x1x128xf32>
    %266 = vector.shape_cast %265 : vector<4x1x128xf32> to vector<4x128xf32>
    %cst_89 = arith.constant 0.419354826 : f32
    %267 = vector.broadcast %cst_89 : f32 to vector<4x128xf32>
    %268 = arith.mulf %267, %266 : vector<4x128xf32>
    %269 = vector.extract_strided_slice %9 {offsets = [0, 13, 0], sizes = [4, 1, 128], strides = [1, 1, 1]} : vector<4x16x128xf32> to vector<4x1x128xf32>
    %270 = vector.shape_cast %269 : vector<4x1x128xf32> to vector<4x128xf32>
    %cst_90 = arith.constant 0.580645144 : f32
    %271 = vector.broadcast %cst_90 : f32 to vector<4x128xf32>
    %272 = arith.mulf %271, %270 : vector<4x128xf32>
    %273 = arith.addf %268, %272 : vector<4x128xf32>
    %c4_91 = arith.constant 4 : index
    %c3328 = arith.constant 3328 : index
    %274 = vector.load %arg10[%c4_91, %c3328] : memref<8x4224xf32, #tpu.memory_space<vmem>>, vector<4x128xf32>
    tpu.vector_store %arg10[%c4_91, %c3328], %273 {strides = array<i32>} : memref<8x4224xf32, #tpu.memory_space<vmem>>, vector<4x128xf32>,
    %275 = vector.extract_strided_slice %9 {offsets = [0, 13, 0], sizes = [4, 1, 128], strides = [1, 1, 1]} : vector<4x16x128xf32> to vector<4x1x128xf32>
    %276 = vector.shape_cast %275 : vector<4x1x128xf32> to vector<4x128xf32>
    %cst_92 = arith.constant 0.935483872 : f32
    %277 = vector.broadcast %cst_92 : f32 to vector<4x128xf32>
    %278 = arith.mulf %277, %276 : vector<4x128xf32>
    %279 = vector.extract_strided_slice %9 {offsets = [0, 14, 0], sizes = [4, 1, 128], strides = [1, 1, 1]} : vector<4x16x128xf32> to vector<4x1x128xf32>
    %280 = vector.shape_cast %279 : vector<4x1x128xf32> to vector<4x128xf32>
    %cst_93 = arith.constant 0.0645161271 : f32
    %281 = vector.broadcast %cst_93 : f32 to vector<4x128xf32>
    %282 = arith.mulf %281, %280 : vector<4x128xf32>
    %283 = arith.addf %278, %282 : vector<4x128xf32>
    %c4_94 = arith.constant 4 : index
    %c3456 = arith.constant 3456 : index
    %284 = vector.load %arg10[%c4_94, %c3456] : memref<8x4224xf32, #tpu.memory_space<vmem>>, vector<4x128xf32>
    tpu.vector_store %arg10[%c4_94, %c3456], %283 {strides = array<i32>} : memref<8x4224xf32, #tpu.memory_space<vmem>>, vector<4x128xf32>,
    %285 = vector.extract_strided_slice %9 {offsets = [0, 13, 0], sizes = [4, 1, 128], strides = [1, 1, 1]} : vector<4x16x128xf32> to vector<4x1x128xf32>
    %286 = vector.shape_cast %285 : vector<4x1x128xf32> to vector<4x128xf32>
    %cst_95 = arith.constant 0.45161289 : f32
    %287 = vector.broadcast %cst_95 : f32 to vector<4x128xf32>
    %288 = arith.mulf %287, %286 : vector<4x128xf32>
    %289 = vector.extract_strided_slice %9 {offsets = [0, 14, 0], sizes = [4, 1, 128], strides = [1, 1, 1]} : vector<4x16x128xf32> to vector<4x1x128xf32>
    %290 = vector.shape_cast %289 : vector<4x1x128xf32> to vector<4x128xf32>
    %cst_96 = arith.constant 0.54838711 : f32
    %291 = vector.broadcast %cst_96 : f32 to vector<4x128xf32>
    %292 = arith.mulf %291, %290 : vector<4x128xf32>
    %293 = arith.addf %288, %292 : vector<4x128xf32>
    %c4_97 = arith.constant 4 : index
    %c3584 = arith.constant 3584 : index
    %294 = vector.load %arg10[%c4_97, %c3584] : memref<8x4224xf32, #tpu.memory_space<vmem>>, vector<4x128xf32>
    tpu.vector_store %arg10[%c4_97, %c3584], %293 {strides = array<i32>} : memref<8x4224xf32, #tpu.memory_space<vmem>>, vector<4x128xf32>,
    %295 = vector.extract_strided_slice %9 {offsets = [0, 14, 0], sizes = [4, 1, 128], strides = [1, 1, 1]} : vector<4x16x128xf32> to vector<4x1x128xf32>
    %296 = vector.shape_cast %295 : vector<4x1x128xf32> to vector<4x128xf32>
    %cst_98 = arith.constant 0.967741906 : f32
    %297 = vector.broadcast %cst_98 : f32 to vector<4x128xf32>
    %298 = arith.mulf %297, %296 : vector<4x128xf32>
    %299 = vector.extract_strided_slice %9 {offsets = [0, 15, 0], sizes = [4, 1, 128], strides = [1, 1, 1]} : vector<4x16x128xf32> to vector<4x1x128xf32>
    %300 = vector.shape_cast %299 : vector<4x1x128xf32> to vector<4x128xf32>
    %cst_99 = arith.constant 0.0322580636 : f32
    %301 = vector.broadcast %cst_99 : f32 to vector<4x128xf32>
    %302 = arith.mulf %301, %300 : vector<4x128xf32>
    %303 = arith.addf %298, %302 : vector<4x128xf32>
    %c4_100 = arith.constant 4 : index
    %c3712 = arith.constant 3712 : index
    %304 = vector.load %arg10[%c4_100, %c3712] : memref<8x4224xf32, #tpu.memory_space<vmem>>, vector<4x128xf32>
    tpu.vector_store %arg10[%c4_100, %c3712], %303 {strides = array<i32>} : memref<8x4224xf32, #tpu.memory_space<vmem>>, vector<4x128xf32>,
    %305 = vector.extract_strided_slice %9 {offsets = [0, 14, 0], sizes = [4, 1, 128], strides = [1, 1, 1]} : vector<4x16x128xf32> to vector<4x1x128xf32>
    %306 = vector.shape_cast %305 : vector<4x1x128xf32> to vector<4x128xf32>
    %cst_101 = arith.constant 0.483870953 : f32
    %307 = vector.broadcast %cst_101 : f32 to vector<4x128xf32>
    %308 = arith.mulf %307, %306 : vector<4x128xf32>
    %309 = vector.extract_strided_slice %9 {offsets = [0, 15, 0], sizes = [4, 1, 128], strides = [1, 1, 1]} : vector<4x16x128xf32> to vector<4x1x128xf32>
    %310 = vector.shape_cast %309 : vector<4x1x128xf32> to vector<4x128xf32>
    %cst_102 = arith.constant 5.161290e-01 : f32
    %311 = vector.broadcast %cst_102 : f32 to vector<4x128xf32>
    %312 = arith.mulf %311, %310 : vector<4x128xf32>
    %313 = arith.addf %308, %312 : vector<4x128xf32>
    %c4_103 = arith.constant 4 : index
    %c3840 = arith.constant 3840 : index
    %314 = vector.load %arg10[%c4_103, %c3840] : memref<8x4224xf32, #tpu.memory_space<vmem>>, vector<4x128xf32>
    tpu.vector_store %arg10[%c4_103, %c3840], %313 {strides = array<i32>} : memref<8x4224xf32, #tpu.memory_space<vmem>>, vector<4x128xf32>,
    %315 = vector.extract_strided_slice %9 {offsets = [0, 15, 0], sizes = [4, 1, 128], strides = [1, 1, 1]} : vector<4x16x128xf32> to vector<4x1x128xf32>
    %316 = vector.shape_cast %315 : vector<4x1x128xf32> to vector<4x128xf32>
    %cst_104 = arith.constant 1.000000e+00 : f32
    %317 = vector.broadcast %cst_104 : f32 to vector<4x128xf32>
    %318 = arith.mulf %317, %316 : vector<4x128xf32>
    %c4_105 = arith.constant 4 : index
    %c3968 = arith.constant 3968 : index
    %319 = vector.load %arg10[%c4_105, %c3968] : memref<8x4224xf32, #tpu.memory_space<vmem>>, vector<4x128xf32>
    tpu.vector_store %arg10[%c4_105, %c3968], %318 {strides = array<i32>} : memref<8x4224xf32, #tpu.memory_space<vmem>>, vector<4x128xf32>,
    %c0_106 = arith.constant 0 : index
    %c0_107 = arith.constant 0 : index
    %320 = vector.load %arg4[%c0_106, %c0_107] : memref<1x4224xf32, #tpu.memory_space<vmem>>, vector<1x4224xf32>
    %c0_108 = arith.constant 0 : index
    %c0_109 = arith.constant 0 : index
    %321 = vector.load %arg10[%c0_108, %c0_109] : memref<8x4224xf32, #tpu.memory_space<vmem>>, vector<8x4224xf32>
    %c0_110 = arith.constant 0 : index
    %c0_111 = arith.constant 0 : index
    %322 = vector.load %arg5[%c0_110, %c0_111] : memref<8x9xf32, #tpu.memory_space<vmem>>, vector<8x9xf32>
    %323 = vector.extract_strided_slice %322 {offsets = [0, 4], sizes = [8, 1], strides = [1, 1]} : vector<8x9xf32> to vector<8x1xf32>
    %324 = vector.broadcast %323 : vector<8x1xf32> to vector<8x4224xf32>
    %325 = arith.mulf %324, %321 : vector<8x4224xf32>
    %c129_i32 = arith.constant 129 : i32
    %326 = tpu.dynamic_rotate %321 by %c129_i32 dim 1 : vector<8x4224xf32>, i32 -> vector<8x4224xf32>
    %327 = vector.extract_strided_slice %322 {offsets = [0, 0], sizes = [8, 1], strides = [1, 1]} : vector<8x9xf32> to vector<8x1xf32>
    %328 = vector.broadcast %327 : vector<8x1xf32> to vector<8x4224xf32>
    %329 = arith.mulf %328, %326 : vector<8x4224xf32>
    %330 = arith.addf %325, %329 : vector<8x4224xf32>
    %c128_i32 = arith.constant 128 : i32
    %331 = tpu.dynamic_rotate %321 by %c128_i32 dim 1 : vector<8x4224xf32>, i32 -> vector<8x4224xf32>
    %332 = vector.extract_strided_slice %322 {offsets = [0, 1], sizes = [8, 1], strides = [1, 1]} : vector<8x9xf32> to vector<8x1xf32>
    %333 = vector.broadcast %332 : vector<8x1xf32> to vector<8x4224xf32>
    %334 = arith.mulf %333, %331 : vector<8x4224xf32>
    %335 = arith.addf %330, %334 : vector<8x4224xf32>
    %c127_i32 = arith.constant 127 : i32
    %336 = tpu.dynamic_rotate %321 by %c127_i32 dim 1 : vector<8x4224xf32>, i32 -> vector<8x4224xf32>
    %337 = vector.extract_strided_slice %322 {offsets = [0, 2], sizes = [8, 1], strides = [1, 1]} : vector<8x9xf32> to vector<8x1xf32>
    %338 = vector.broadcast %337 : vector<8x1xf32> to vector<8x4224xf32>
    %339 = arith.mulf %338, %336 : vector<8x4224xf32>
    %340 = arith.addf %335, %339 : vector<8x4224xf32>
    %c1_i32 = arith.constant 1 : i32
    %341 = tpu.dynamic_rotate %321 by %c1_i32 dim 1 : vector<8x4224xf32>, i32 -> vector<8x4224xf32>
    %342 = vector.extract_strided_slice %322 {offsets = [0, 3], sizes = [8, 1], strides = [1, 1]} : vector<8x9xf32> to vector<8x1xf32>
    %343 = vector.broadcast %342 : vector<8x1xf32> to vector<8x4224xf32>
    %344 = arith.mulf %343, %341 : vector<8x4224xf32>
    %345 = arith.addf %340, %344 : vector<8x4224xf32>
    %c4223_i32 = arith.constant 4223 : i32
    %346 = tpu.dynamic_rotate %321 by %c4223_i32 dim 1 : vector<8x4224xf32>, i32 -> vector<8x4224xf32>
    %347 = vector.extract_strided_slice %322 {offsets = [0, 5], sizes = [8, 1], strides = [1, 1]} : vector<8x9xf32> to vector<8x1xf32>
    %348 = vector.broadcast %347 : vector<8x1xf32> to vector<8x4224xf32>
    %349 = arith.mulf %348, %346 : vector<8x4224xf32>
    %350 = arith.addf %345, %349 : vector<8x4224xf32>
    %c4097_i32 = arith.constant 4097 : i32
    %351 = tpu.dynamic_rotate %321 by %c4097_i32 dim 1 : vector<8x4224xf32>, i32 -> vector<8x4224xf32>
    %352 = vector.extract_strided_slice %322 {offsets = [0, 6], sizes = [8, 1], strides = [1, 1]} : vector<8x9xf32> to vector<8x1xf32>
    %353 = vector.broadcast %352 : vector<8x1xf32> to vector<8x4224xf32>
    %354 = arith.mulf %353, %351 : vector<8x4224xf32>
    %355 = arith.addf %350, %354 : vector<8x4224xf32>
    %c4096_i32 = arith.constant 4096 : i32
    %356 = tpu.dynamic_rotate %321 by %c4096_i32 dim 1 : vector<8x4224xf32>, i32 -> vector<8x4224xf32>
    %357 = vector.extract_strided_slice %322 {offsets = [0, 7], sizes = [8, 1], strides = [1, 1]} : vector<8x9xf32> to vector<8x1xf32>
    %358 = vector.broadcast %357 : vector<8x1xf32> to vector<8x4224xf32>
    %359 = arith.mulf %358, %356 : vector<8x4224xf32>
    %360 = arith.addf %355, %359 : vector<8x4224xf32>
    %c4095_i32 = arith.constant 4095 : i32
    %361 = tpu.dynamic_rotate %321 by %c4095_i32 dim 1 : vector<8x4224xf32>, i32 -> vector<8x4224xf32>
    %362 = vector.extract_strided_slice %322 {offsets = [0, 8], sizes = [8, 1], strides = [1, 1]} : vector<8x9xf32> to vector<8x1xf32>
    %363 = vector.broadcast %362 : vector<8x1xf32> to vector<8x4224xf32>
    %364 = arith.mulf %363, %361 : vector<8x4224xf32>
    %365 = arith.addf %360, %364 : vector<8x4224xf32>
    %c0_112 = arith.constant 0 : index
    %c0_113 = arith.constant 0 : index
    %366 = vector.load %arg6[%c0_112, %c0_113] : memref<4x9xf32, #tpu.memory_space<vmem>>, vector<4x8xf32>
    %cst_114 = arith.constant dense<0.000000e+00> : vector<4x4224xf32>
    %367 = tpu.matmul %366, %365, %cst_114 {dimension_numbers = #tpu.dot_dimension_numbers<[1], [0], [0], [1], [0, 0, 1, 1], [], []>} : vector<4x8xf32>, vector<8x4224xf32>, vector<4x4224xf32> -> vector<4x4224xf32>
    %c0_115 = arith.constant 0 : index
    %c8 = arith.constant 8 : index
    %368 = vector.load %arg6[%c0_115, %c8] : memref<4x9xf32, #tpu.memory_space<vmem>>, vector<4x1xf32>
    %369 = vector.broadcast %368 : vector<4x1xf32> to vector<4x4224xf32>
    %370 = arith.addf %367, %369 : vector<4x4224xf32>
    %cst_116 = arith.constant 0.000000e+00 : f32
    %371 = vector.broadcast %cst_116 : f32 to vector<4x4224xf32>
    %372 = arith.maximumf %370, %371 : vector<4x4224xf32>
    %373 = vector.broadcast %320 : vector<1x4224xf32> to vector<4x4224xf32>
    %374 = arith.mulf %372, %373 : vector<4x4224xf32>
    %c0_117 = arith.constant 0 : index
    %c0_118 = arith.constant 0 : index
    %375 = vector.load %arg7[%c0_117, %c0_118] : memref<4x9xf32, #tpu.memory_space<vmem>>, vector<4x9xf32>
    %376 = vector.extract_strided_slice %375 {offsets = [0, 4], sizes = [4, 1], strides = [1, 1]} : vector<4x9xf32> to vector<4x1xf32>
    %377 = vector.broadcast %376 : vector<4x1xf32> to vector<4x4224xf32>
    %378 = arith.mulf %377, %374 : vector<4x4224xf32>
    %c129_i32_119 = arith.constant 129 : i32
    %379 = tpu.dynamic_rotate %374 by %c129_i32_119 dim 1 : vector<4x4224xf32>, i32 -> vector<4x4224xf32>
    %380 = vector.extract_strided_slice %375 {offsets = [0, 0], sizes = [4, 1], strides = [1, 1]} : vector<4x9xf32> to vector<4x1xf32>
    %381 = vector.broadcast %380 : vector<4x1xf32> to vector<4x4224xf32>
    %382 = arith.mulf %381, %379 : vector<4x4224xf32>
    %383 = arith.addf %378, %382 : vector<4x4224xf32>
    %c128_i32_120 = arith.constant 128 : i32
    %384 = tpu.dynamic_rotate %374 by %c128_i32_120 dim 1 : vector<4x4224xf32>, i32 -> vector<4x4224xf32>
    %385 = vector.extract_strided_slice %375 {offsets = [0, 1], sizes = [4, 1], strides = [1, 1]} : vector<4x9xf32> to vector<4x1xf32>
    %386 = vector.broadcast %385 : vector<4x1xf32> to vector<4x4224xf32>
    %387 = arith.mulf %386, %384 : vector<4x4224xf32>
    %388 = arith.addf %383, %387 : vector<4x4224xf32>
    %c127_i32_121 = arith.constant 127 : i32
    %389 = tpu.dynamic_rotate %374 by %c127_i32_121 dim 1 : vector<4x4224xf32>, i32 -> vector<4x4224xf32>
    %390 = vector.extract_strided_slice %375 {offsets = [0, 2], sizes = [4, 1], strides = [1, 1]} : vector<4x9xf32> to vector<4x1xf32>
    %391 = vector.broadcast %390 : vector<4x1xf32> to vector<4x4224xf32>
    %392 = arith.mulf %391, %389 : vector<4x4224xf32>
    %393 = arith.addf %388, %392 : vector<4x4224xf32>
    %c1_i32_122 = arith.constant 1 : i32
    %394 = tpu.dynamic_rotate %374 by %c1_i32_122 dim 1 : vector<4x4224xf32>, i32 -> vector<4x4224xf32>
    %395 = vector.extract_strided_slice %375 {offsets = [0, 3], sizes = [4, 1], strides = [1, 1]} : vector<4x9xf32> to vector<4x1xf32>
    %396 = vector.broadcast %395 : vector<4x1xf32> to vector<4x4224xf32>
    %397 = arith.mulf %396, %394 : vector<4x4224xf32>
    %398 = arith.addf %393, %397 : vector<4x4224xf32>
    %c4223_i32_123 = arith.constant 4223 : i32
    %399 = tpu.dynamic_rotate %374 by %c4223_i32_123 dim 1 : vector<4x4224xf32>, i32 -> vector<4x4224xf32>
    %400 = vector.extract_strided_slice %375 {offsets = [0, 5], sizes = [4, 1], strides = [1, 1]} : vector<4x9xf32> to vector<4x1xf32>
    %401 = vector.broadcast %400 : vector<4x1xf32> to vector<4x4224xf32>
    %402 = arith.mulf %401, %399 : vector<4x4224xf32>
    %403 = arith.addf %398, %402 : vector<4x4224xf32>
    %c4097_i32_124 = arith.constant 4097 : i32
    %404 = tpu.dynamic_rotate %374 by %c4097_i32_124 dim 1 : vector<4x4224xf32>, i32 -> vector<4x4224xf32>
    %405 = vector.extract_strided_slice %375 {offsets = [0, 6], sizes = [4, 1], strides = [1, 1]} : vector<4x9xf32> to vector<4x1xf32>
    %406 = vector.broadcast %405 : vector<4x1xf32> to vector<4x4224xf32>
    %407 = arith.mulf %406, %404 : vector<4x4224xf32>
    %408 = arith.addf %403, %407 : vector<4x4224xf32>
    %c4096_i32_125 = arith.constant 4096 : i32
    %409 = tpu.dynamic_rotate %374 by %c4096_i32_125 dim 1 : vector<4x4224xf32>, i32 -> vector<4x4224xf32>
    %410 = vector.extract_strided_slice %375 {offsets = [0, 7], sizes = [4, 1], strides = [1, 1]} : vector<4x9xf32> to vector<4x1xf32>
    %411 = vector.broadcast %410 : vector<4x1xf32> to vector<4x4224xf32>
    %412 = arith.mulf %411, %409 : vector<4x4224xf32>
    %413 = arith.addf %408, %412 : vector<4x4224xf32>
    %c4095_i32_126 = arith.constant 4095 : i32
    %414 = tpu.dynamic_rotate %374 by %c4095_i32_126 dim 1 : vector<4x4224xf32>, i32 -> vector<4x4224xf32>
    %415 = vector.extract_strided_slice %375 {offsets = [0, 8], sizes = [4, 1], strides = [1, 1]} : vector<4x9xf32> to vector<4x1xf32>
    %416 = vector.broadcast %415 : vector<4x1xf32> to vector<4x4224xf32>
    %417 = arith.mulf %416, %414 : vector<4x4224xf32>
    %418 = arith.addf %413, %417 : vector<4x4224xf32>
    %c0_127 = arith.constant 0 : index
    %c0_128 = arith.constant 0 : index
    %419 = vector.load %arg8[%c0_127, %c0_128] : memref<4x5xf32, #tpu.memory_space<vmem>>, vector<4x4xf32>
    %cst_129 = arith.constant dense<0.000000e+00> : vector<4x4224xf32>
    %420 = tpu.matmul %419, %418, %cst_129 {dimension_numbers = #tpu.dot_dimension_numbers<[1], [0], [0], [1], [0, 0, 1, 1], [], []>} : vector<4x4xf32>, vector<4x4224xf32>, vector<4x4224xf32> -> vector<4x4224xf32>
    %c0_130 = arith.constant 0 : index
    %c4_131 = arith.constant 4 : index
    %421 = vector.load %arg8[%c0_130, %c4_131] : memref<4x5xf32, #tpu.memory_space<vmem>>, vector<4x1xf32>
    %422 = vector.broadcast %421 : vector<4x1xf32> to vector<4x4224xf32>
    %423 = arith.addf %420, %422 : vector<4x4224xf32>
    %cst_132 = arith.constant 0.000000e+00 : f32
    %424 = vector.broadcast %cst_132 : f32 to vector<4x4224xf32>
    %425 = arith.maximumf %423, %424 : vector<4x4224xf32>
    %426 = vector.broadcast %320 : vector<1x4224xf32> to vector<4x4224xf32>
    %427 = arith.mulf %425, %426 : vector<4x4224xf32>
    %c0_133 = arith.constant 0 : index
    %c0_134 = arith.constant 0 : index
    %c0_135 = arith.constant 0 : index
    %428 = vector.load %arg9[%c0_133, %c0_134, %c0_135] : memref<1x4x4224xf32, #tpu.memory_space<vmem>>, vector<1x4x4224xf32>
    %429 = vector.shape_cast %428 : vector<1x4x4224xf32> to vector<4x4224xf32>
    %430 = vector.shape_cast %427 : vector<4x4224xf32> to vector<1x4x4224xf32>
    tpu.vector_store %arg9[%c0_133, %c0_134, %c0_135], %430 {strides = array<i32>} : memref<1x4x4224xf32, #tpu.memory_space<vmem>>, vector<1x4x4224xf32>,
    return
  }
  func.func @transform_0(%arg0: i32) -> (i32, i32, i32) {
    %c0_i32 = arith.constant 0 : i32
    %c0_i32_0 = arith.constant 0 : i32
    %c0_i32_1 = arith.constant 0 : i32
    return %arg0, %c0_i32, %c0_i32_0 : i32, i32, i32
  }
  func.func @transform_1(%arg0: i32) -> (i32, i32, i32) {
    %c0_i32 = arith.constant 0 : i32
    %c0_i32_0 = arith.constant 0 : i32
    %c0_i32_1 = arith.constant 0 : i32
    return %arg0, %c0_i32, %c0_i32_0 : i32, i32, i32
  }
  func.func @transform_2(%arg0: i32) -> (i32, i32) {
    %c0_i32 = arith.constant 0 : i32
    %c0_i32_0 = arith.constant 0 : i32
    %c0_i32_1 = arith.constant 0 : i32
    return %c0_i32, %c0_i32_0 : i32, i32
  }
  func.func @transform_3(%arg0: i32) -> (i32, i32) {
    %c0_i32 = arith.constant 0 : i32
    %c0_i32_0 = arith.constant 0 : i32
    %c0_i32_1 = arith.constant 0 : i32
    return %c0_i32, %c0_i32_0 : i32, i32
  }
  func.func @transform_4(%arg0: i32) -> (i32, i32) {
    %c0_i32 = arith.constant 0 : i32
    %c0_i32_0 = arith.constant 0 : i32
    %c0_i32_1 = arith.constant 0 : i32
    return %c0_i32, %c0_i32_0 : i32, i32
  }
  func.func @transform_5(%arg0: i32) -> (i32, i32) {
    %c0_i32 = arith.constant 0 : i32
    %c0_i32_0 = arith.constant 0 : i32
    %c0_i32_1 = arith.constant 0 : i32
    return %c0_i32, %c0_i32_0 : i32, i32
  }
  func.func @transform_6(%arg0: i32) -> (i32, i32) {
    %c0_i32 = arith.constant 0 : i32
    %c0_i32_0 = arith.constant 0 : i32
    %c0_i32_1 = arith.constant 0 : i32
    return %c0_i32, %c0_i32_0 : i32, i32
  }
  func.func @transform_7(%arg0: i32) -> (i32, i32) {
    %c0_i32 = arith.constant 0 : i32
    %c0_i32_0 = arith.constant 0 : i32
    %c0_i32_1 = arith.constant 0 : i32
    return %c0_i32, %c0_i32_0 : i32, i32
  }
  func.func @transform_8(%arg0: i32) -> (i32, i32, i32) {
    %c0_i32 = arith.constant 0 : i32
    %c0_i32_0 = arith.constant 0 : i32
    %c0_i32_1 = arith.constant 0 : i32
    return %arg0, %c0_i32, %c0_i32_0 : i32, i32, i32
  }
}

</mosaic_0001>

<bundles_post_ra>
// kernel: tpu_custom_call.1
= control target key start
LH: loop header
LB: loop body
LE: loop exit
PB: predicated region body
PF: predicated region fallthrough
CT: control target
= control target key end

     0   :  { %13 = vsyncpa [#allocation4], 0  ;;  %s10878_s0 = inlined_call_operand.vmem [shape: f32[2,64,16], index: 0, kind: input, shape index: {}]   ;;  %s10879_s1 = inlined_call_operand.hbm [shape: f32[2,4,4224], index: 1, kind: input, shape index: {}]   ;;  %s10880_s2 = inlined_call_operand.vmem [shape: f32[16,128], index: 2, kind: input, shape index: {}]   ;;  %s10881_s3 = inlined_call_operand.vmem [shape: f32[1,4224], index: 3, kind: input, shape index: {}]   ;;  %s10882_s4 = inlined_call_operand.vmem [shape: f32[8,9], index: 4, kind: input, shape index: {}]   ;;  %s10883_s5 = inlined_call_operand.vmem [shape: f32[4,9], index: 5, kind: input, shape index: {}]   ;;  %s10884_s6 = inlined_call_operand.vmem [shape: f32[4,9], index: 6, kind: input, shape index: {}]   ;;  %s10885_s7 = inlined_call_operand.vmem [shape: f32[4,5], index: 7, kind: input, shape index: {}]   ;;  %s10886_s8 = inlined_call_operand.hbm [shape: f32[2,4,4224], index: 8, kind: output, shape index: {}]  }
   0x1   :  { %15 = vsyncpa [#allocation4 + $0x1], 0 }
   0x2   :  { %16 = vsyncpa [#allocation5], 0 }
   0x3   :  { %18 = vsyncpa [#allocation5 + $0x1], 0  ;;  %s6796_s27 = smov 0   ;;  %s6798_s28 = smov 0  }
   0x4   :  { %s6800_s29 = smov 0   ;;  %s6802_s30 = smov 0  }
   0x5 LB: > { %s6817_s9 = sadd.s32 4294967295, %s6734_s30   ;;  %s6383_s10 = sadd.s32 4294967294, %s6734_s30   ;;  %s6734_s30 = sphi %s6802_s30, %s11572_s30   ;;  %s6730_s29 = sphi %s6800_s29, %s11571_s29   ;;  %s6726_s28 = sphi %s6798_s28, %s11570_s28   ;;  %s6722_s27 = sphi %s6796_s27, %s11569_s27  }
   0x6   : > { %s6821_s11 = sadd.s32 1, %s6734_s30   ;;  %s57_s12 = sadd.s32 1, %s6730_s29 }
   0x7   : > { %s54_s13 = ssub.s32 %s6734_s30, %s6821_s11  ;;  %p64_p0 = scmp.ne.s32.totalorder %s6730_s29, %s6726_s28 }
   0x8   : > { %p55_p1 = scmp.eq.s32.totalorder %s54_s13, 0  ;;  %p65_p2 = scmp.eq.s32.totalorder %s6734_s30, 0 }
   0x9   : > { %p70_p3 = scmp.ne.s32.totalorder %s6726_s28, %s6722_s27  ;;  %p71_p4 = scmp.eq.s32.totalorder %s6817_s9, 0 }
   0xa   : > { %s6833_s14 = scalar_select %p55_p1, %s6730_s29, %s57_s12  }
   0xb   : > { %p66_p5 = por %p65_p2, %p64_p0  ;;  %p6835_p6 = por %p71_p4, %p70_p3 }
   0xc   : > { %11002 = sst [smem:[#allocation9_spill]] %s6833_s14  ;;  %p220_p7 = scmp.eq.s32.totalorder %s6817_s9, 1 }
   0xd   : > { %p226_p8 = scmp.eq.s32.totalorder %s6383_s10, 1  ;;  %p6530_p10 = scmp.lt.s32.totalorder %s6734_s30, 2 }
   0xe   : > { %p6842_p11 = por %p220_p7, %p64_p0  ;;  %s272_s18 = sand.u32 1, %s6730_s29  }
   0xf   : > { %p6846_p12 = por %p226_p8, %p70_p3  ;;  %s6515_s19 = smul.u32 2112, %s6734_s30 }
  0x10   : > { %s11004_s16 = scalar_select %p6842_p11, 1, 0 }
  0x11   : > { %s11005_s17 = scalar_select %p6846_p12, 1, 0 }
  0x12   : > { %s6514_s20 = smul.u32 132, %s272_s18  ;;  %s6855_s23 = scalar_lea.hbm %s10879_s1, %s6515_s19 }
  0x13   : > { %p6857_p13 = pnand %p6530_p10, %p66_p5  ;;  %s273_s10 = scalar_lea.sflag [#allocation4], %s272_s18 }
  0x14   : > { %s276_s25 = scalar_lea.vmem [#allocation3], %s6514_s20  ;;  %s6638_s12 = scalar_lea.hbm %s6855_s23, 2112 }
  0x15   : > { %s284_s26 = sshll.u32 %s276_s25, 4  ;;  %p6639_p2 = scmp.ne.s32.totalorder %s6855_s23, %s6638_s12  ;;  %s6862_s26 = int_to_ptr.vmem [resolvable:$true] %s284_s26 }
  0x16   : > { %p6640_p3 = pneg %p6857_p13  ;;  %s6643_s21 = scalar_lea.hbm %s10879_s1, 4224 }
  0x17   : > { %p6644_p7 = scmp.lt.u32.totalorder %s6855_s23, %s10879_s1  ;;  %p6645_p8 = scmp.lt.u32.totalorder %s6643_s21, %s6638_s12 }
  0x18   : > { %p6641_p4 = pnand %p6640_p3, %p6639_p2  ;;  %p6647_p9 = scmp.lt.u32.totalorder %s6638_s12, %s6855_s23 }
  0x19   : > { %p6646_p10 = por %p6645_p8, %p6644_p7 }
  0x1a   : > { %p6642_p5 = pneg %p6641_p4 }
  0x1b   : > { %p6648_p0 = por %p6647_p9, %p6646_p10 }
  0x1d   : > { %p6649_p1 = pnand %p6648_p0, %p6642_p5 }
  0x1f   : > { %6652 = shalt.err (!%p6649_p1)
}
  0x20   : > { %s6653_s18 = scalar_lea.vmem %s6862_s26, 2112  ;;  %s6736_s20 = smov [#allocation3]  }
  0x21   : > { %p6654_p2 = scmp.ne.s32.totalorder %s6862_s26, %s6653_s18  ;;  %s6658_s25 = sshll.u32 %s6736_s20, 4  ;;  %s6659_s25 = int_to_ptr.vmem [resolvable:$false] %s6658_s25 }
  0x22   : > { %s6660_s14 = scalar_lea.vmem %s6659_s25, 4224  ;;  %p6661_p11 = scmp.lt.s32.totalorder %s6862_s26, %s6659_s25 }
  0x23   : > { %p6656_p4 = pnand %p6654_p2, %p6640_p3  ;;  %p6662_p7 = scmp.lt.s32.totalorder %s6660_s14, %s6653_s18 }
  0x25   : > { %p6657_p12 = pneg %p6656_p4  ;;  %p6663_p8 = por %p6662_p7, %p6661_p11 }
  0x27   : > { %p6664_p9 = pnand %p6663_p8, %p6657_p12 }
  0x29   : > { %6667 = shalt.err (!%p6664_p9)
}
  0x2a   : > { %6525 = dma.hbm_to_vmem [thread:$0]  (!%p6857_p13), %s6855_s23, 2112, %s6862_s26, %s273_s10  }
  0x2b   : > { %p11007_p0 = scmp.lt.s32.totalorder %s6734_s30, 3  ;;  %p11008_p1 = scmp.ge.s32.totalorder %s6734_s30, 1 }
  0x2d   : > { %p290_p3 = pnand %p11008_p1, %p11007_p0 }
  0x2f   : > { %293 = sbr.rel (%p290_p3) target bundleno = 1349 (0x545), region = 52 }
  0x36   : > { %s6895_s12 = sand.u32 1, %s6726_s28  }
  0x37   : > { %s6516_s13 = smul.u32 132, %s6895_s12  ;;  %s296_s19 = scalar_lea.sflag [#allocation4], %s6895_s12 }
  0x39   : > { %s6901_s24 = scalar_lea.vmem [#allocation3], %s6516_s13 }
  0x3a   : > { %6713 = dma.done.wait (%p6835_p6), %s296_s19, 2112  }
  0x3b   : > { %6715 = vsyncadd (%p6835_p6), %s296_s19, 4294965184  ;;  %p337_p11 = scmp.lt.s32.totalorder %s6817_s9, 1  ;;  %v10895_v0 = vmov 1   ;;  %v10888_v1 = vmov 0.0   ;;  %v10892_v2 = vmov 4   ;;  %vm483_vm0 = vcmask 130048  }
  0x3c   : > { %6578 = vset.pattern.permute.xlu1 %v10895_v0  ;;  %472 = vst [vmem:[#allocation2 + $0x100] sm:$0xf0] %v10888_v1  ;;  %440 = vst [vmem:[#allocation2] sm:$0xf0] %v10888_v1  ;;  %6577 = vset.pattern.permute.xlu0 %v10892_v2  ;;  %v481_v3 = vld [vmem:[%s10880_s2] sm:$0xff]  ;;  %v482_v4 = vld [vmem:[%s10880_s2 + $0x8] sm:$0xff] }
  0x3d   : > { %s6910_s23 = scalar_select %p337_p11, %s6817_s9, 1  ;;  %441 = vst [vmem:[#allocation2 + $0x8] sm:$0xf0] %v10888_v1  ;;  %442 = vst [vmem:[#allocation2 + $0x10] sm:$0xf0] %v10888_v1  ;;  %2649 = vmatprep.mubr.f32.mxu1 %v10888_v1  ;;  %v6510_v6 = vpack.c.bf16 %v482_v4, %v481_v3  ;;  %v1775_v7 = vld [vmem:[%s10882_s4] sm:$0xff] }
  0x3e   : > { %443 = vst [vmem:[#allocation2 + $0x18] sm:$0xf0] %v10888_v1  ;;  %444 = vst [vmem:[#allocation2 + $0x20] sm:$0xf0] %v10888_v1  ;;  %v358_v8 = vld [vmem:[%s6901_s24 + $0x80] sm:$0xf]  ;;  %1987 = vperm.xlu1 %6578, %v1775_v7   ;;  %1778 = vperm.xlu0 %6577, %v1775_v7  }
  0x3f   : > { %445 = vst [vmem:[#allocation2 + $0x28] sm:$0xf0] %v10888_v1  ;;  %446 = vst [vmem:[#allocation2 + $0x30] sm:$0xf0] %v10888_v1  ;;  %s6469_s15 = sshll.u32 %s6910_s23, 6  ;;  %6511 = vmatprep.subr.bf16.mxu0 %v6510_v6  ;;  %v10893_v12 = vmov 2  }
  0x40   : > { %447 = vst [vmem:[#allocation2 + $0x38] sm:$0xf0] %v10888_v1  ;;  %448 = vst [vmem:[#allocation2 + $0x40] sm:$0xf0] %v10888_v1  ;;  %s6951_s21 = scalar_lea.vmem %s10878_s0, %s6469_s15  ;;  %6513 = vmatpush3.bf16.msra.mxu0 %v6510_v6  ;;  %v10897_v14 = vmov 6   ;;  %v10898_v17 = vmov 3  }
  0x41   : > { %449 = vst [vmem:[#allocation2 + $0x48] sm:$0xf0] %v10888_v1  ;;  %450 = vst [vmem:[#allocation2 + $0x50] sm:$0xf0] %v10888_v1  ;;  %v473_v5 = vld [vmem:[%s6951_s21] sm:$0xff]  ;;  %v474_v9 = vld [vmem:[%s6951_s21 + $0x8] sm:$0xff] }
  0x42   : > { %451 = vst [vmem:[#allocation2 + $0x58] sm:$0xf0] %v10888_v1  ;;  %452 = vst [vmem:[#allocation2 + $0x60] sm:$0xf0] %v10888_v1  ;;  %6488 = vmatprep.mubr.msk.f32.mxu0 %vm483_vm0, %v473_v5  ;;  %v475_v10 = vld [vmem:[%s6951_s21 + $0x10] sm:$0xff]  ;;  %v476_v11 = vld [vmem:[%s6951_s21 + $0x18] sm:$0xff]  ;;  %6579 = vset.pattern.permute.xlu1 %v10893_v12 }
  0x43   : > { %453 = vst [vmem:[#allocation2 + $0x68] sm:$0xf0] %v10888_v1  ;;  %454 = vst [vmem:[#allocation2 + $0x70] sm:$0xf0] %v10888_v1  ;;  %6489 = vmatmul.mubr.msk.f32.vlgmr.msra.gmra.mrb[0].mxu0 %vm483_vm0, %v474_v9  ;;  %v477_v13 = vld [vmem:[%s6951_s21 + $0x20] sm:$0xff]  ;;  %2157 = vperm.xlu1 %6579, %v1775_v7   ;;  %v478_v15 = vld [vmem:[%s6951_s21 + $0x28] sm:$0xff] }
  0x44   : > { %455 = vst [vmem:[#allocation2 + $0x78] sm:$0xf0] %v10888_v1  ;;  %456 = vst [vmem:[#allocation2 + $0x80] sm:$0xf0] %v10888_v1  ;;  %6491 = vmatprep.mubr.msk.f32.mxu0 %vm483_vm0, %v475_v10  ;;  %6582 = vset.pattern.permute.xlu0 %v10897_v14  ;;  %v479_v16 = vld [vmem:[%s6951_s21 + $0x30] sm:$0xff]  ;;  %s6743_s23 = smov 1  }
  0x45   : > { %457 = vst [vmem:[#allocation2 + $0x88] sm:$0xf0] %v10888_v1  ;;  %458 = vst [vmem:[#allocation2 + $0x90] sm:$0xf0] %v10888_v1  ;;  %2367 = vperm.xlu0 %6582, %v1775_v7   ;;  %v10896_v19 = vmov 8   ;;  %v480_v20 = vld [vmem:[%s6951_s21 + $0x38] sm:$0xff] }
  0x46   : > { %459 = vst [vmem:[#allocation2 + $0x98] sm:$0xf0] %v10888_v1  ;;  %460 = vst [vmem:[#allocation2 + $0xa0] sm:$0xf0] %v10888_v1  ;;  %v10891_v21 = vmov 5   ;;  %s6746_s15 = smov 127  }
  0x47   : > { %461 = vst [vmem:[#allocation2 + $0xa8] sm:$0xf0] %v10888_v1  ;;  %462 = vst [vmem:[#allocation2 + $0xb0] sm:$0xf0] %v10888_v1  ;;  %6492 = vmatmul.mubr.msk.f32.gmra.mrb[2].mxu0 %vm483_vm0, %v476_v11  ;;  %6580 = vset.pattern.permute.xlu1 %v10898_v17  ;;  %v10890_v22 = vmov 7   ;;  %v6748_v23 = vmov 0  }
  0x48   : > { %463 = vst [vmem:[#allocation2 + $0xb8] sm:$0xf0] %v10888_v1  ;;  %464 = vst [vmem:[#allocation2 + $0xc0] sm:$0xf0] %v10888_v1  ;;  %6494 = vmatprep.mubr.msk.f32.mxu0 %vm483_vm0, %v477_v13  ;;  %2227 = vperm.xlu1 %6580, %v1775_v7   ;;  %v357_v24 = vld [vmem:[%s6901_s24 + $0x78] sm:$0xff]  ;;  %v342_v26 = vld [vmem:[%s6901_s24] sm:$0xff] }
  0x49   : > { %465 = vst [vmem:[#allocation2 + $0xc8] sm:$0xf0] %v10888_v1  ;;  %466 = vst [vmem:[#allocation2 + $0xd0] sm:$0xf0] %v10888_v1  ;;  %6584 = vset.pattern.permute.xlu0 %v10896_v19  ;;  %v390_v25 = vcombine.high %v357_v24, %v357_v24  ;;  %v349_v27 = vld [vmem:[%s6901_s24 + $0x38] sm:$0xff]  ;;  %v350_v29 = vld [vmem:[%s6901_s24 + $0x40] sm:$0xff]  ;;  %v375_v43 = vcombine.high %v342_v26, %v342_v26 }
  0x4a   : > { %467 = vst [vmem:[#allocation2 + $0xd8] sm:$0xf0] %v10888_v1  ;;  %468 = vst [vmem:[#allocation2 + $0xe0] sm:$0xf0] %v10888_v1  ;;  %v382_v28 = vcombine.high %v349_v27, %v349_v27  ;;  %v351_v30 = vld [vmem:[%s6901_s24 + $0x48] sm:$0xff]  ;;  %v383_v31 = vcombine.high %v350_v29, %v350_v29  ;;  %v352_v32 = vld [vmem:[%s6901_s24 + $0x50] sm:$0xff] }
  0x4b   : > { %469 = vst [vmem:[#allocation2 + $0xe8] sm:$0xf0] %v10888_v1  ;;  %470 = vst [vmem:[#allocation2 + $0xf0] sm:$0xf0] %v10888_v1  ;;  %6495 = vmatmul.mubr.msk.f32.gmra.mrb[4].mxu0 %vm483_vm0, %v478_v15  ;;  %v384_v33 = vcombine.high %v351_v30, %v351_v30  ;;  %v385_v34 = vcombine.high %v352_v32, %v352_v32  ;;  %v353_v35 = vld [vmem:[%s6901_s24 + $0x58] sm:$0xff]  ;;  %v354_v37 = vld [vmem:[%s6901_s24 + $0x60] sm:$0xff] }
  0x4c   : > { %471 = vst [vmem:[#allocation2 + $0xf8] sm:$0xf0] %v10888_v1  ;;  %439 = vst [vmem:[#allocation2 + $0x100] sm:$0xf] %v358_v8  ;;  %6497 = vmatprep.mubr.msk.f32.mxu0 %vm483_vm0, %v479_v16  ;;  %6581 = vset.pattern.permute.xlu1 %v10891_v21  ;;  %v386_v36 = vcombine.high %v353_v35, %v353_v35  ;;  %v387_v38 = vcombine.high %v354_v37, %v354_v37  ;;  %v355_v39 = vld [vmem:[%s6901_s24 + $0x68] sm:$0xff]  ;;  %v6999_v41 = vld [vmem:[%s6901_s24 + $0x70] sm:$0xff] }
  0x4d   : > { %2297 = vperm.xlu1 %6581, %v1775_v7   ;;  %437 = vst [vmem:[#allocation2 + $0xf0] sm:$0xf] %v357_v24  ;;  %438 = vst [vmem:[#allocation2 + $0xf8] sm:$0xf] %v390_v25  ;;  %v388_v40 = vcombine.high %v355_v39, %v355_v39  ;;  %v343_v42 = vld [vmem:[%s6901_s24 + $0x8] sm:$0xff]  ;;  %v344_v45 = vld [vmem:[%s6901_s24 + $0x10] sm:$0xff] }
  0x4e   : > { %407 = vst [vmem:[#allocation2] sm:$0xf] %v342_v26  ;;  %421 = vst [vmem:[#allocation2 + $0x70] sm:$0xf] %v349_v27  ;;  %v376_v44 = vcombine.high %v343_v42, %v343_v42  ;;  %v377_v46 = vcombine.high %v344_v45, %v344_v45  ;;  %vm619_vm1 = vcmask 1045509   ;;  %v345_v48 = vld [vmem:[%s6901_s24 + $0x18] sm:$0xff] }
  0x4f   : > { %6498 = vmatmul.mubr.msk.f32.gmra.mrb[6].mxu0 %vm483_vm0, %v480_v20  ;;  %423 = vst [vmem:[#allocation2 + $0x80] sm:$0xf] %v350_v29  ;;  %422 = vst [vmem:[#allocation2 + $0x78] sm:$0xf] %v382_v28  ;;  %vm622_vm2 = vcmask 1046534   ;;  %v378_v52 = vcombine.high %v345_v48, %v345_v48  ;;  %vm625_vm3 = vcmask 1047559  }
  0x50   : > { %3004 = vmatprep.mubr.f32.mxu0 %v10888_v1  ;;  %425 = vst [vmem:[#allocation2 + $0x90] sm:$0xf] %v351_v30  ;;  %424 = vst [vmem:[#allocation2 + $0x88] sm:$0xf] %v383_v31  ;;  %vm2582_vm6 = vcmask 64512   ;;  %vm6749_vm7 = vmmov 0  }
  0x51   : > { %6583 = vset.pattern.permute.xlu1 %v10890_v22  ;;  %427 = vst [vmem:[#allocation2 + $0xa0] sm:$0xf] %v352_v32  ;;  %426 = vst [vmem:[#allocation2 + $0x98] sm:$0xf] %v384_v33  ;;  %vm4833_vm8 = vcmask 1043456   ;;  %vm4830_vm9 = vcmask 31744  }
  0x52   : > { %428 = vst [vmem:[#allocation2 + $0xa8] sm:$0xf] %v385_v34  ;;  %429 = vst [vmem:[#allocation2 + $0xb0] sm:$0xf] %v353_v35  ;;  %s10746_s14 = scalar_lea.vmem [#allocation6], %s6516_s13  ;;  %s6517_s13 = smul.u32 2112, %s6817_s9 }
  0x53   : > { %v1774_v18 = vld [vmem:[#allocation2 + $0x100] sm:$0xff]  ;;  %430 = vst [vmem:[#allocation2 + $0xb8] sm:$0xf] %v386_v36  ;;  %431 = vst [vmem:[#allocation2 + $0xc0] sm:$0xf] %v354_v37  ;;  %s6301_s19 = sshll.u32 %s10746_s14, 4  ;;  %s10834_s19 = int_to_ptr.vmem [resolvable:$true] %s6301_s19 }
  0x54   : > { %1878 = vrot.lane.b32.xlu0 %v1774_v18, %s6743_s23  ;;  %2120 = vrot.lane.b32.xlu1 %v1774_v18, %s6746_s15  ;;  %432 = vst [vmem:[#allocation2 + $0xc8] sm:$0xf] %v387_v38  ;;  %433 = vst [vmem:[#allocation2 + $0xd0] sm:$0xf] %v355_v39  ;;  %s10832_s22 = scalar_lea.hbm %s10886_s8, %s6517_s13  ;;  %s6287_s9 = scalar_lea.sflag [#allocation5], %s6895_s12 }
  0x55   : > { %434 = vst [vmem:[#allocation2 + $0xd8] sm:$0xf] %v388_v40  ;;  %435 = vst [vmem:[#allocation2 + $0xe0] sm:$0xf] %v6999_v41  ;;  %s6668_s18 = scalar_lea.vmem %s10834_s19, 2112  ;;  %p11565_p12 = scmp.ne.s32.totalorder %s11004_s16, 0 }
  0x56   : > { %409 = vst [vmem:[#allocation2 + $0x10] sm:$0xf] %v343_v42  ;;  %408 = vst [vmem:[#allocation2 + $0x8] sm:$0xf] %v375_v43  ;;  %p6669_p6 = scmp.ne.s32.totalorder %s10834_s19, %s6668_s18  ;;  %s6750_s20 = smov [#allocation6]  }
  0x57   : > { %410 = vst [vmem:[#allocation2 + $0x18] sm:$0xf] %v376_v44  ;;  %411 = vst [vmem:[#allocation2 + $0x20] sm:$0xf] %v344_v45  ;;  %s6672_s25 = sshll.u32 %s6750_s20, 4  ;;  %s6673_s25 = int_to_ptr.vmem [resolvable:$false] %s6672_s25 }
  0x58   : > { %2507 = vperm.xlu0 %6584, %v1775_v7   ;;  %2437 = vperm.xlu1 %6583, %v1775_v7   ;;  %412 = vst [vmem:[#allocation2 + $0x28] sm:$0xf] %v377_v46  ;;  %413 = vst [vmem:[#allocation2 + $0x30] sm:$0xf] %v345_v48  ;;  %p6670_p13 = pnand %p6669_p6, %p11565_p12  ;;  %p6675_p10 = scmp.lt.s32.totalorder %s10834_s19, %s6673_s25 }
  0x59   : > { %414 = vst [vmem:[#allocation2 + $0x38] sm:$0xf] %v378_v52 }
  0x5a   : > { %p6671_p5 = pneg %p6670_p13 }
  0x5c   : > { %6586 = vset.pattern.permute.xlu1 %v10892_v2  ;;  %6585 = vset.pattern.permute.xlu0 %v6748_v23 }
  0x5d   : > { %1917 = vperm.xlu0 %6585, %v1775_v7  }
 0x116   : > { %v7004_v47 = vpop.f32.mrb[0].mxu0 }
 0x117   : > { %v7007_v49 = vpop.f32.mrb[1].mxu0  ;;  %v1181_v50 = vmul.f32 0.7419355, %v7004_v47  ;;  %v1145_v51 = vmul.f32 0.2580645, %v7004_v47  ;;  %v1729_v53 = vrot.slane %v7004_v47, 3 }
 0x118   : > { %v1177_v54 = vmul.f32 0.2580645, %v7007_v49  ;;  %v1141_v55 = vmul.f32 0.7419355, %v7007_v49  ;;  %v7015_v58 = vmul.f32 0.29032257, %v7004_v47 }
 0x119   : > { %v1189_v56 = vrot.slane %v1181_v50, 1  ;;  %v1153_v57 = vrot.slane %v1145_v51, 1  ;;  %v7018_v59 = vmul.f32 0.7096774, %v7004_v47  ;;  %v617_v61 = vrot.slane %v7007_v49, 4 }
 0x11a   : > { %v7020_v60 = vpop.f32.mrb[2].mxu0  ;;  %v7024_v62 = vmul.f32 0.7741935, %v7004_v47  ;;  %v7027_v63 = vmul.f32 0.22580644, %v7004_v47 }
 0x11b   : > { %v7029_v3 = vpop.f32.mrb[3].mxu0  ;;  %v1730_v4 = vrot.slane %v7020_v60, 2  ;;  %v1182_v5 = vmul.f32 0.7419355, %v7020_v60  ;;  %v1197_v6 = vadd.f32 %v1189_v56, %v1177_v54  ;;  %v1146_v7 = vmul.f32 0.2580645, %v7020_v60 }
 0x11c   : > { %v618_v8 = vrot.slane %v7029_v3, 3  ;;  %v1178_v9 = vmul.f32 0.2580645, %v7029_v3  ;;  %v1142_v10 = vmul.f32 0.7419355, %v7029_v3  ;;  %v1161_v11 = vadd.f32 %v1153_v57, %v1141_v55 }
 0x11d   : > { %v1731_v13 = vsel %vm619_vm1, %v1730_v4, %v1729_v53  ;;  %v1190_v15 = vrot.slane %v1182_v5, 1  ;;  %v1205_v16 = vrot.slane %v1197_v6, 3  ;;  %v1154_v18 = vrot.slane %v1146_v7, 1  ;;  %v7064_v53 = vld [vmem:[%s6901_s24 + $0x20] sm:$0xff] }
 0x11e   : > { %v7038_v20 = vpop.f32.mrb[4].mxu0  ;;  %v620_v23 = vsel %vm619_vm1, %v618_v8, %v617_v61  ;;  %v1169_v24 = vrot.slane %v1161_v11, 3  ;;  %v1251_v25 = vmul.f32 0.29032257, %v7020_v60  ;;  %v1255_v26 = vmul.f32 0.7096774, %v7020_v60 }
 0x11f   : > { %v7043_v27 = vpop.f32.mrb[5].mxu0  ;;  %v1732_v28 = vrot.slane %v7038_v20, 1  ;;  %v1183_v29 = vmul.f32 0.7419355, %v7038_v20  ;;  %v1198_v30 = vadd.f32 %v1190_v15, %v1178_v9  ;;  %v1147_v31 = vmul.f32 0.2580645, %v7038_v20 }
 0x120   : > { %v621_v32 = vrot.slane %v7043_v27, 2  ;;  %v1179_v33 = vmul.f32 0.2580645, %v7043_v27  ;;  %v1143_v34 = vmul.f32 0.7419355, %v7043_v27  ;;  %v1162_v35 = vadd.f32 %v1154_v18, %v1142_v10 }
 0x121   : > { %v1733_v36 = vsel %vm622_vm2, %v1732_v28, %v1731_v13  ;;  %v1191_v37 = vrot.slane %v1183_v29, 1  ;;  %v1206_v38 = vrot.slane %v1198_v30, 2  ;;  %v1155_v39 = vrot.slane %v1147_v31, 1  ;;  %415 = vst [vmem:[#allocation2 + $0x40] sm:$0xf] %v7064_v53 }
 0x122   : > { %v7052_v40 = vpop.f32.mrb[6].mxu0  ;;  %v623_v42 = vsel %vm622_vm2, %v621_v32, %v620_v23  ;;  %v1170_v43 = vrot.slane %v1162_v35, 2  ;;  %v1252_v44 = vmul.f32 0.29032257, %v7038_v20  ;;  %v1256_v45 = vmul.f32 0.7096774, %v7038_v20 }
 0x123   : > { %v7057_v46 = vpop.f32.mrb[7].mxu0  ;;  %v1734_v48 = vsel %vm625_vm3, %v7052_v40, %v1733_v36  ;;  %v1184_v50 = vmul.f32 0.7419355, %v7052_v40  ;;  %v1199_v51 = vadd.f32 %v1191_v37, %v1179_v33  ;;  %v1207_v52 = vsel %vm619_vm1, %v1206_v38, %v1205_v16 }
 0x124   : > { %1736 = vst [vmem:[#allocation2 + $0xf8] sm:$0xf0] %v1734_v48  ;;  %v624_v54 = vrot.slane %v7057_v46, 1  ;;  %v1180_v55 = vmul.f32 0.2580645, %v7057_v46  ;;  %v1163_v57 = vadd.f32 %v1155_v39, %v1143_v34  ;;  %v1171_v6 = vsel %vm619_vm1, %v1170_v43, %v1169_v24 }
 0x125   : > { %v1144_v56 = vmul.f32 0.7419355, %v7057_v46  ;;  %v1192_v61 = vrot.slane %v1184_v50, 1  ;;  %v1208_v4 = vrot.slane %v1199_v51, 1  ;;  %v1148_v5 = vmul.f32 0.2580645, %v7052_v40 }
 0x126   : > { %v626_v7 = vsel %vm625_vm3, %v624_v54, %v623_v42  ;;  %v1172_v8 = vrot.slane %v1163_v57, 1  ;;  %v1253_v9 = vmul.f32 0.29032257, %v7052_v40  ;;  %v1257_v10 = vmul.f32 0.7096774, %v7052_v40 }
 0x127   : > { %628 = vst [vmem:[#allocation2] sm:$0xf0] %v626_v7  ;;  %v1200_v11 = vadd.f32 %v1192_v61, %v1180_v55  ;;  %v1209_v13 = vsel %vm622_vm2, %v1208_v4, %v1207_v52  ;;  %v1156_v15 = vrot.slane %v1148_v5, 1  ;;  %v1262_v16 = vrot.slane %v7018_v59, 1 }
 0x128   : > { %v1173_v18 = vsel %vm622_vm2, %v1172_v8, %v1171_v6  ;;  %v1263_v23 = vrot.slane %v1255_v26, 1  ;;  %v1264_v28 = vrot.slane %v1256_v45, 1  ;;  %v1265_v29 = vrot.slane %v1257_v10, 1 }
 0x129   : > { %v1210_v24 = vsel %vm625_vm3, %v1200_v11, %v1209_v13  ;;  %v1164_v30 = vadd.f32 %v1156_v15, %v1144_v56  ;;  %v1270_v31 = vadd.f32 %v1262_v16, %v7015_v58  ;;  %v1214_v32 = vmul.f32 0.7741935, %v7020_v60 }
 0x12a   : > { %1212 = vst [vmem:[#allocation2 + $0x80] sm:$0xf0] %v1210_v24  ;;  %v1271_v33 = vadd.f32 %v1263_v23, %v1251_v25  ;;  %v1272_v34 = vadd.f32 %v1264_v28, %v1252_v44  ;;  %v1273_v35 = vadd.f32 %v1265_v29, %v1253_v9  ;;  %v1215_v36 = vmul.f32 0.7741935, %v7038_v20 }
 0x12b   : > { %v1773_v37 = vld [vmem:[#allocation2 + $0xf8] sm:$0xff]  ;;  %v1174_v59 = vsel %vm625_vm3, %v1164_v30, %v1173_v18  ;;  %v1278_v38 = vrot.slane %v1270_v31, 4  ;;  %v1216_v26 = vmul.f32 0.7741935, %v7052_v40  ;;  %v1218_v39 = vmul.f32 0.22580644, %v7020_v60 }
 0x12c   : > { %1876 = vrot.lane.b32.xlu0 %v1773_v37, %s6743_s23  ;;  %1176 = vst [vmem:[#allocation2 + $0x78] sm:$0xf0] %v1174_v59  ;;  %v1279_v58 = vrot.slane %v1271_v33, 3  ;;  %v1281_v42 = vrot.slane %v1272_v34, 2  ;;  %v1283_v43 = vrot.slane %v1273_v35, 1  ;;  %v1225_v45 = vrot.slane %v7027_v63, 1 }
 0x12d   : > { %v1219_v25 = vmul.f32 0.22580644, %v7038_v20  ;;  %v1220_v44 = vmul.f32 0.22580644, %v7052_v40  ;;  %v1226_v48 = vrot.slane %v1218_v39, 1  ;;  %v347_v63 = vld [vmem:[%s6901_s24 + $0x28] sm:$0xff] }
 0x12e   : > { %v1324_v50 = vmul.f32 0.32258064, %v7004_v47  ;;  %v1742_v51 = vld [vmem:[#allocation2] sm:$0xff]  ;;  %v1280_v52 = vsel %vm619_vm1, %v1279_v58, %v1278_v38  ;;  %v1325_v55 = vmul.f32 0.32258064, %v7020_v60  ;;  %v1233_v4 = vadd.f32 %v1225_v45, %v7024_v62 }
 0x12f   : > { %v1227_v54 = vrot.slane %v1219_v25, 1  ;;  %v1326_v56 = vmul.f32 0.32258064, %v7038_v20  ;;  %1814 = vrot.lane.b32.xlu1 %v1742_v51, %s6743_s23  ;;  %v1282_v57 = vsel %vm622_vm2, %v1281_v42, %v1280_v52  ;;  %v1228_v61 = vrot.slane %v1220_v44, 1  ;;  %417 = vst [vmem:[#allocation2 + $0x50] sm:$0xf] %v347_v63 }
 0x130   : > { %v1234_v5 = vadd.f32 %v1226_v48, %v1214_v32  ;;  %2056 = vrot.lane.b32.xlu0 %v1742_v51, %s6746_s15  ;;  %v1284_v6 = vsel %vm625_vm3, %v1283_v43, %v1282_v57  ;;  %v1327_v8 = vmul.f32 0.32258064, %v7052_v40  ;;  %v1328_v9 = vmul.f32 0.67741936, %v7004_v47 }
 0x131   : > { %v1235_v7 = vadd.f32 %v1227_v54, %v1215_v36  ;;  %v1758_v10 = vld [vmem:[#allocation2 + $0x80] sm:$0xff]  ;;  %1286 = vst [vmem:[#allocation2 + $0x90] sm:$0xf0] %v1284_v6  ;;  %v1236_v11 = vadd.f32 %v1228_v61, %v1216_v26  ;;  %v1241_v13 = vrot.slane %v1233_v4, 4  ;;  %v1329_v16 = vmul.f32 0.67741936, %v7020_v60 }
 0x132   : > { %v1242_v15 = vrot.slane %v1234_v5, 3  ;;  %v1330_v18 = vmul.f32 0.67741936, %v7038_v20  ;;  %v1331_v23 = vmul.f32 0.67741936, %v7052_v40  ;;  %v1336_v28 = vrot.slane %v1328_v9, 1 }
 0x133   : > { %v1244_v62 = vrot.slane %v1235_v7, 2  ;;  %1846 = vrot.lane.b32.xlu1 %v1758_v10, %s6743_s23  ;;  %v1757_v29 = vld [vmem:[#allocation2 + $0x78] sm:$0xff]  ;;  %v1246_v30 = vrot.slane %v1236_v11, 1  ;;  %v1337_v31 = vrot.slane %v1329_v16, 1  ;;  %v1287_v32 = vmul.f32 0.8064516, %v7004_v47 }
 0x134   : > { %v1243_v24 = vsel %vm619_vm1, %v1242_v15, %v1241_v13  ;;  %1844 = vrot.lane.b32.xlu0 %v1757_v29, %s6743_s23  ;;  %v1338_v34 = vrot.slane %v1330_v18, 1  ;;  %v1339_v35 = vrot.slane %v1331_v23, 1  ;;  %v1344_v36 = vadd.f32 %v1336_v28, %v1324_v50  ;;  %v348_v7 = vld [vmem:[%s6901_s24 + $0x30] sm:$0xff] }
 0x135   : > { %v1245_v33 = vsel %vm622_vm2, %v1244_v62, %v1243_v24  ;;  %v1345_v59 = vadd.f32 %v1337_v31, %v1325_v55  ;;  %v1288_v38 = vmul.f32 0.8064516, %v7020_v60  ;;  %v1289_v26 = vmul.f32 0.8064516, %v7038_v20  ;;  %419 = vst [vmem:[#allocation2 + $0x60] sm:$0xf] %v348_v7 }
 0x136   : > { %v1247_v37 = vsel %vm625_vm3, %v1246_v30, %v1245_v33  ;;  %v1346_v39 = vadd.f32 %v1338_v34, %v1326_v56  ;;  %v1347_v58 = vadd.f32 %v1339_v35, %v1327_v8  ;;  %v1352_v42 = vrot.slane %v1344_v36, 5 }
 0x137   : > { %1249 = vst [vmem:[#allocation2 + $0x88] sm:$0xf0] %v1247_v37  ;;  %v1290_v43 = vmul.f32 0.8064516, %v7052_v40  ;;  %2086 = vrot.lane.b32.xlu1 %v1757_v29, %s6746_s15  ;;  %v1353_v25 = vrot.slane %v1345_v59, 4  ;;  %v379_v48 = vcombine.high %v7064_v53, %v7064_v53  ;;  %v380_v54 = vcombine.high %v347_v63, %v347_v63 }
 0x138   : > { %v1291_v44 = vmul.f32 0.19354838, %v7004_v47  ;;  %v1292_v45 = vmul.f32 0.19354838, %v7020_v60  ;;  %2088 = vrot.lane.b32.xlu0 %v1758_v10, %s6746_s15  ;;  %v1355_v50 = vrot.slane %v1346_v39, 3  ;;  %v1357_v51 = vrot.slane %v1347_v58, 2 }
 0x139   : > { %v1293_v52 = vmul.f32 0.19354838, %v7038_v20  ;;  %v1354_v55 = vsel %vm619_vm1, %v1353_v25, %v1352_v42  ;;  %v1294_v56 = vmul.f32 0.19354838, %v7052_v40  ;;  %416 = vst [vmem:[#allocation2 + $0x48] sm:$0xf] %v379_v48 }
 0x13a   : > { %v1299_v57 = vrot.slane %v1291_v44, 1  ;;  %v1300_v61 = vrot.slane %v1292_v45, 1  ;;  %v7122_v4 = vld [vmem:[#allocation2 + $0x90] sm:$0xff]  ;;  %v1356_v5 = vsel %vm622_vm2, %v1355_v50, %v1354_v55  ;;  %v1361_v6 = vmul.f32 0.83870965, %v7004_v47 }
 0x13b   : > { %v1301_v53 = vrot.slane %v1293_v52, 1  ;;  %418 = vst [vmem:[#allocation2 + $0x58] sm:$0xf] %v380_v54  ;;  %1850 = vrot.lane.b32.xlu1 %v7122_v4, %s6743_s23  ;;  %v1358_v63 = vsel %vm625_vm3, %v1357_v51, %v1356_v5  ;;  %v1302_v8 = vrot.slane %v1294_v56, 1  ;;  %v1362_v13 = vmul.f32 0.83870965, %v7020_v60 }
 0x13c   : > { %v1307_v9 = vadd.f32 %v1299_v57, %v1287_v32  ;;  %v1308_v10 = vadd.f32 %v1300_v61, %v1288_v38  ;;  %1360 = vst [vmem:[#allocation2 + $0xa0] sm:$0xf0] %v1358_v63  ;;  %v1363_v15 = vmul.f32 0.83870965, %v7038_v20  ;;  %v1365_v16 = vmul.f32 0.16129032, %v7004_v47 }
 0x13d   : > { %v1309_v11 = vadd.f32 %v1301_v53, %v1289_v26  ;;  %v1310_v18 = vadd.f32 %v1302_v8, %v1290_v43  ;;  %v1366_v29 = vmul.f32 0.16129032, %v7020_v60  ;;  %v1367_v30 = vmul.f32 0.16129032, %v7038_v20 }
 0x13e   : > { %v1759_v62 = vld [vmem:[#allocation2 + $0x88] sm:$0xff]  ;;  %v1315_v23 = vrot.slane %v1307_v9, 5  ;;  %v1316_v28 = vrot.slane %v1308_v10, 4  ;;  %v1368_v31 = vmul.f32 0.16129032, %v7052_v40  ;;  %v1373_v32 = vrot.slane %v1365_v16, 1 }
 0x13f   : > { %1848 = vrot.lane.b32.xlu0 %v1759_v62, %s6743_s23  ;;  %v1318_v24 = vrot.slane %v1309_v11, 3  ;;  %v1320_v34 = vrot.slane %v1310_v18, 2  ;;  %v1364_v35 = vmul.f32 0.83870965, %v7052_v40  ;;  %v1374_v36 = vrot.slane %v1366_v29, 1 }
 0x140   : > { %v1317_v33 = vsel %vm619_vm1, %v1316_v28, %v1315_v23  ;;  %v1375_v59 = vrot.slane %v1367_v30, 1  ;;  %v1376_v38 = vrot.slane %v1368_v31, 1  ;;  %v1381_v26 = vadd.f32 %v1373_v32, %v1361_v6 }
 0x141   : > { %v1319_v37 = vsel %vm622_vm2, %v1318_v24, %v1317_v33  ;;  %v1382_v58 = vadd.f32 %v1374_v36, %v1362_v13  ;;  %v1398_v42 = vmul.f32 0.3548387, %v7004_v47  ;;  %v1399_v45 = vmul.f32 0.3548387, %v7020_v60 }
 0x142   : > { %v1321_v39 = vsel %vm625_vm3, %v1320_v34, %v1319_v37  ;;  %v1383_v43 = vadd.f32 %v1375_v59, %v1363_v15  ;;  %v1384_v25 = vadd.f32 %v1376_v38, %v1364_v35  ;;  %v1389_v44 = vrot.slane %v1381_v26, 6 }
 0x143   : > { %1323 = vst [vmem:[#allocation2 + $0x98] sm:$0xf0] %v1321_v39  ;;  %v7143_v48 = vld [vmem:[#allocation2 + $0xa0] sm:$0xff]  ;;  %v1390_v50 = vrot.slane %v1382_v58, 5  ;;  %v1402_v51 = vmul.f32 0.6451613, %v7004_v47  ;;  %v381_v54 = vcombine.high %v348_v7, %v348_v7 }
 0x144   : > { %v1403_v52 = vmul.f32 0.6451613, %v7020_v60  ;;  %1854 = vrot.lane.b32.xlu1 %v7143_v48, %s6743_s23  ;;  %v1392_v55 = vrot.slane %v1383_v43, 4  ;;  %v1394_v56 = vrot.slane %v1384_v25, 3  ;;  %v1404_v57 = vmul.f32 0.6451613, %v7038_v20 }
 0x145   : > { %v1405_v61 = vmul.f32 0.6451613, %v7052_v40  ;;  %v1391_v5 = vsel %vm619_vm1, %v1390_v50, %v1389_v44  ;;  %v1400_v53 = vmul.f32 0.3548387, %v7038_v20  ;;  %v1410_v6 = vrot.slane %v1402_v51, 1 }
 0x146   : > { %v1411_v63 = vrot.slane %v1403_v52, 1  ;;  %420 = vst [vmem:[#allocation2 + $0x68] sm:$0xf] %v381_v54  ;;  %v1393_v8 = vsel %vm622_vm2, %v1392_v55, %v1391_v5  ;;  %v1401_v7 = vmul.f32 0.3548387, %v7052_v40  ;;  %v1412_v9 = vrot.slane %v1404_v57, 1 }
 0x147   : > { %v1413_v10 = vrot.slane %v1405_v61, 1  ;;  %v1395_v11 = vsel %vm625_vm3, %v1394_v56, %v1393_v8  ;;  %v1418_v13 = vadd.f32 %v1410_v6, %v1398_v42  ;;  %v1435_v16 = vmul.f32 0.87096775, %v7004_v47 }
 0x148   : > { %v1419_v15 = vadd.f32 %v1411_v63, %v1399_v45  ;;  %2090 = vrot.lane.b32.xlu1 %v1759_v62, %s6746_s15  ;;  %1397 = vst [vmem:[#allocation2 + $0xa8] sm:$0xf0] %v1395_v11  ;;  %v1420_v18 = vadd.f32 %v1412_v9, %v1400_v53  ;;  %v1436_v28 = vmul.f32 0.87096775, %v7020_v60  ;;  %v1439_v29 = vmul.f32 0.12903225, %v7004_v47 }
 0x149   : > { %v1421_v23 = vadd.f32 %v1413_v10, %v1401_v7  ;;  %v1426_v30 = vrot.slane %v1418_v13, 6  ;;  %v1440_v32 = vmul.f32 0.12903225, %v7020_v60  ;;  %v1441_v62 = vmul.f32 0.12903225, %v7038_v20 }
 0x14a   : > { %v7160_v24 = vld [vmem:[#allocation2 + $0x98] sm:$0xff]  ;;  %v1427_v31 = vrot.slane %v1419_v15, 5  ;;  %v1429_v33 = vrot.slane %v1420_v18, 4  ;;  %v1442_v35 = vmul.f32 0.12903225, %v7052_v40  ;;  %v1447_v59 = vrot.slane %v1439_v29, 1 }
 0x14b   : > { %1852 = vrot.lane.b32.xlu0 %v7160_v24, %s6743_s23  ;;  %v1431_v34 = vrot.slane %v1421_v23, 3  ;;  %v1437_v37 = vmul.f32 0.87096775, %v7038_v20  ;;  %v1448_v38 = vrot.slane %v1440_v32, 1  ;;  %v1438_v39 = vmul.f32 0.87096775, %v7052_v40 }
 0x14c   : > { %v1428_v36 = vsel %vm619_vm1, %v1427_v31, %v1426_v30  ;;  %v1449_v58 = vrot.slane %v1441_v62, 1  ;;  %v1450_v42 = vrot.slane %v1442_v35, 1  ;;  %v1455_v25 = vadd.f32 %v1447_v59, %v1435_v16 }
 0x14d   : > { %v1430_v26 = vsel %vm622_vm2, %v1429_v33, %v1428_v36  ;;  %v1456_v44 = vadd.f32 %v1448_v38, %v1436_v28  ;;  %v1472_v45 = vmul.f32 0.38709676, %v7004_v47  ;;  %v1473_v52 = vmul.f32 0.38709676, %v7020_v60 }
 0x14e   : > { %v1432_v43 = vsel %vm625_vm3, %v1431_v34, %v1430_v26  ;;  %v1457_v50 = vadd.f32 %v1449_v58, %v1437_v37  ;;  %v1458_v51 = vadd.f32 %v1450_v42, %v1438_v39  ;;  %v1476_v54 = vmul.f32 0.61290324, %v7004_v47 }
 0x14f   : > { %1434 = vst [vmem:[#allocation2 + $0xb0] sm:$0xf0] %v1432_v43  ;;  %v7175_v55 = vld [vmem:[#allocation2 + $0xa8] sm:$0xff]  ;;  %v1463_v56 = vrot.slane %v1455_v25, 7  ;;  %v1464_v57 = vrot.slane %v1456_v44, 6  ;;  %v389_v5 = vcombine.high %v6999_v41, %v6999_v41 }
 0x150   : > { %v1477_v61 = vmul.f32 0.61290324, %v7020_v60  ;;  %1856 = vrot.lane.b32.xlu0 %v7175_v55, %s6743_s23  ;;  %v1466_v53 = vrot.slane %v1457_v50, 5  ;;  %v1468_v6 = vrot.slane %v1458_v51, 4  ;;  %v1478_v63 = vmul.f32 0.61290324, %v7038_v20 }
 0x151   : > { %v1479_v8 = vmul.f32 0.61290324, %v7052_v40  ;;  %v1465_v7 = vsel %vm619_vm1, %v1464_v57, %v1463_v56  ;;  %v1474_v9 = vmul.f32 0.38709676, %v7038_v20  ;;  %v1484_v10 = vrot.slane %v1476_v54, 1  ;;  %v7638_v19 = vld [vmem:[#allocation2 + $0xa8] sm:$0xff] }
 0x152   : > { %v1485_v11 = vrot.slane %v1477_v61, 1  ;;  %436 = vst [vmem:[#allocation2 + $0xe8] sm:$0xf] %v389_v5  ;;  %v1467_v13 = vsel %vm622_vm2, %v1466_v53, %v1465_v7  ;;  %v1475_v41 = vmul.f32 0.38709676, %v7052_v40  ;;  %v1486_v15 = vrot.slane %v1478_v63, 1 }
 0x153   : > { %v1487_v16 = vrot.slane %v1479_v8, 1  ;;  %v1469_v18 = vsel %vm625_vm3, %v1468_v6, %v1467_v13  ;;  %v1492_v23 = vadd.f32 %v1484_v10, %v1472_v45  ;;  %v1510_v31 = vmul.f32 0.9032258, %v7020_v60  ;;  %11030 = vst [vmem:[#allocation31_spill] sm:$0xff] %v7638_v19 }
 0x154   : > { %v1493_v28 = vadd.f32 %v1485_v11, %v1473_v52  ;;  %1471 = vst [vmem:[#allocation2 + $0xb8] sm:$0xf0] %v1469_v18  ;;  %v1494_v29 = vadd.f32 %v1486_v15, %v1474_v9  ;;  %v1513_v32 = vmul.f32 0.09677419, %v7004_v47  ;;  %v1514_v35 = vmul.f32 0.09677419, %v7020_v60 }
 0x155   : > { %v1495_v30 = vadd.f32 %v1487_v16, %v1475_v41  ;;  %v1500_v34 = vrot.slane %v1492_v23, 7  ;;  %v1515_v59 = vmul.f32 0.09677419, %v7038_v20  ;;  %v1516_v38 = vmul.f32 0.09677419, %v7052_v40 }
 0x156   : > { %v7191_v33 = vld [vmem:[#allocation2 + $0xb0] sm:$0xff]  ;;  %v1501_v62 = vrot.slane %v1493_v28, 6  ;;  %v1503_v36 = vrot.slane %v1494_v29, 5  ;;  %v1511_v39 = vmul.f32 0.9032258, %v7038_v20  ;;  %v1521_v58 = vrot.slane %v1513_v32, 1 }
 0x157   : > { %1858 = vrot.lane.b32.xlu1 %v7191_v33, %s6743_s23  ;;  %v1505_v37 = vrot.slane %v1495_v30, 4  ;;  %v1522_v42 = vrot.slane %v1514_v35, 1  ;;  %v1512_v25 = vmul.f32 0.9032258, %v7052_v40  ;;  %v1523_v44 = vrot.slane %v1515_v59, 1 }
 0x158   : > { %v1502_v26 = vsel %vm619_vm1, %v1501_v62, %v1500_v34  ;;  %v1524_v45 = vrot.slane %v1516_v38, 1  ;;  %v1509_v51 = vmul.f32 0.9032258, %v7004_v47  ;;  %v1545_v54 = vmul.f32 0.41935483, %v7004_v47 }
 0x159   : > { %v1504_v43 = vsel %vm622_vm2, %v1503_v36, %v1502_v26  ;;  %v1530_v52 = vadd.f32 %v1522_v42, %v1510_v31  ;;  %v1531_v56 = vadd.f32 %v1523_v44, %v1511_v39  ;;  %v1546_v61 = vmul.f32 0.41935483, %v7020_v60 }
 0x15a   : > { %v1506_v50 = vsel %vm625_vm3, %v1505_v37, %v1504_v43  ;;  %v1532_v57 = vadd.f32 %v1524_v45, %v1512_v25  ;;  %v1549_v5 = vmul.f32 0.58064514, %v7004_v47  ;;  %v1529_v6 = vadd.f32 %v1521_v58, %v1509_v51 }
 0x15b   : > { %1508 = vst [vmem:[#allocation2 + $0xc0] sm:$0xf0] %v1506_v50  ;;  %v7207_v53 = vld [vmem:[#allocation2 + $0xb8] sm:$0xff]  ;;  %v1537_v63 = vrot.slane %v1530_v52, 7  ;;  %v1550_v8 = vmul.f32 0.58064514, %v7020_v60 }
 0x15c   : > { %v1551_v7 = vmul.f32 0.58064514, %v7038_v20  ;;  %1860 = vrot.lane.b32.xlu0 %v7207_v53, %s6743_s23  ;;  %v1539_v9 = vrot.slane %v1531_v56, 6  ;;  %v1541_v10 = vrot.slane %v1532_v57, 5  ;;  %v1547_v11 = vmul.f32 0.41935483, %v7038_v20 }
 0x15d   : > { %v1552_v13 = vmul.f32 0.58064514, %v7052_v40  ;;  %v1538_v41 = vsel %vm619_vm1, %v1537_v63, %v1529_v6  ;;  %v1557_v15 = vrot.slane %v1549_v5, 1  ;;  %v1558_v16 = vrot.slane %v1550_v8, 1 }
 0x15e   : > { %v1559_v18 = vrot.slane %v1551_v7, 1  ;;  %v1540_v23 = vsel %vm622_vm2, %v1539_v9, %v1538_v41  ;;  %v1548_v28 = vmul.f32 0.41935483, %v7052_v40  ;;  %v1581_v30 = vmul.f32 0.9354839, %v7004_v47 }
 0x15f   : > { %v1560_v29 = vrot.slane %v1552_v13, 1  ;;  %v1542_v31 = vsel %vm625_vm3, %v1541_v10, %v1540_v23  ;;  %v1566_v32 = vadd.f32 %v1558_v16, %v1546_v61  ;;  %v1582_v62 = vmul.f32 0.9354839, %v7020_v60 }
 0x160   : > { %v1567_v34 = vadd.f32 %v1559_v18, %v1547_v11  ;;  %2092 = vrot.lane.b32.xlu0 %v7122_v4, %s6746_s15  ;;  %1544 = vst [vmem:[#allocation2 + $0xc8] sm:$0xf0] %v1542_v31  ;;  %v1583_v36 = vmul.f32 0.9354839, %v7038_v20  ;;  %v1585_v37 = vmul.f32 0.06451613, %v7004_v47  ;;  %v1565_v26 = vadd.f32 %v1557_v15, %v1545_v54 }
 0x161   : > { %v1568_v35 = vadd.f32 %v1560_v29, %v1548_v28  ;;  %v1586_v59 = vmul.f32 0.06451613, %v7020_v60  ;;  %v1573_v39 = vrot.slane %v1566_v32, 7  ;;  %v1587_v42 = vmul.f32 0.06451613, %v7038_v20 }
 0x162   : > { %v7226_v38 = vld [vmem:[#allocation2 + $0xc0] sm:$0xff]  ;;  %v1575_v58 = vrot.slane %v1567_v34, 6  ;;  %v1588_v4 = vmul.f32 0.06451613, %v7052_v40  ;;  %v1593_v25 = vrot.slane %v1585_v37, 1 }
 0x163   : > { %1862 = vrot.lane.b32.xlu1 %v7226_v38, %s6743_s23  ;;  %v1577_v43 = vrot.slane %v1568_v35, 5  ;;  %v1594_v44 = vrot.slane %v1586_v59, 1  ;;  %v1574_v45 = vsel %vm619_vm1, %v1573_v39, %v1565_v26  ;;  %v1584_v50 = vmul.f32 0.9354839, %v7052_v40 }
 0x164   : > { %v1595_v51 = vrot.slane %v1587_v42, 1  ;;  %v1617_v52 = vmul.f32 0.4516129, %v7004_v47  ;;  %2096 = vrot.lane.b32.xlu0 %v7143_v48, %s6746_s15  ;;  %v1576_v54 = vsel %vm622_vm2, %v1575_v58, %v1574_v45  ;;  %v1596_v56 = vrot.slane %v1588_v4, 1 }
 0x165   : > { %v1601_v57 = vadd.f32 %v1593_v25, %v1581_v30  ;;  %v1602_v61 = vadd.f32 %v1594_v44, %v1582_v62  ;;  %v1578_v5 = vsel %vm625_vm3, %v1577_v43, %v1576_v54  ;;  %v1618_v63 = vmul.f32 0.4516129, %v7020_v60 }
 0x166   : > { %v1603_v6 = vadd.f32 %v1595_v51, %v1583_v36  ;;  %v1619_v8 = vmul.f32 0.4516129, %v7038_v20  ;;  %1580 = vst [vmem:[#allocation2 + $0xd0] sm:$0xf0] %v1578_v5  ;;  %v1604_v7 = vadd.f32 %v1596_v56, %v1584_v50  ;;  %v1621_v48 = vmul.f32 0.5483871, %v7004_v47 }
 0x167   : > { %2094 = vrot.lane.b32.xlu1 %v7160_v24, %s6746_s15  ;;  %v1609_v9 = vrot.slane %v1601_v57, 1  ;;  %v1622_v10 = vmul.f32 0.5483871, %v7020_v60  ;;  %v1767_v11 = vld [vmem:[#allocation2 + $0xc8] sm:$0xff]  ;;  %v1623_v41 = vmul.f32 0.5483871, %v7038_v20 }
 0x168   : > { %v1611_v13 = vrot.slane %v1603_v6, 7  ;;  %v1624_v15 = vmul.f32 0.5483871, %v7052_v40  ;;  %1864 = vrot.lane.b32.xlu0 %v1767_v11, %s6743_s23  ;;  %v1613_v18 = vrot.slane %v1604_v7, 6  ;;  %v1629_v23 = vrot.slane %v1621_v48, 1 }
 0x169   : > { %v1610_v16 = vsel %vm619_vm1, %v1602_v61, %v1609_v9  ;;  %v1630_v24 = vrot.slane %v1622_v10, 1  ;;  %v1620_v29 = vmul.f32 0.4516129, %v7052_v40  ;;  %v1631_v30 = vrot.slane %v1623_v41, 1 }
 0x16a   : > { %v1612_v28 = vsel %vm622_vm2, %v1611_v13, %v1610_v16  ;;  %v1632_v31 = vrot.slane %v1624_v15, 1  ;;  %v1637_v34 = vadd.f32 %v1629_v23, %v1617_v52  ;;  %v666_v35 = vmul.f32 0.032258064, %v7007_v49 }
 0x16b   : > { %2098 = vrot.lane.b32.xlu1 %v7175_v55, %s6746_s15  ;;  %v1614_v32 = vsel %vm625_vm3, %v1613_v18, %v1612_v28  ;;  %v1638_v62 = vadd.f32 %v1630_v24, %v1618_v63  ;;  %v1639_v36 = vadd.f32 %v1631_v30, %v1619_v8  ;;  %v667_v59 = vmul.f32 0.032258064, %v7029_v3 }
 0x16c   : > { %1616 = vst [vmem:[#allocation2 + $0xd8] sm:$0xf0] %v1614_v32  ;;  %v1640_v37 = vadd.f32 %v1632_v31, %v1620_v29  ;;  %v668_v26 = vmul.f32 0.032258064, %v7043_v27  ;;  %v1645_v39 = vrot.slane %v1637_v34, 1 }
 0x16d   : > { %v670_v58 = vmul.f32 0.9677419, %v7007_v49  ;;  %v671_v42 = vmul.f32 0.9677419, %v7029_v3  ;;  %v7259_v43 = vld [vmem:[#allocation2 + $0xd0] sm:$0xff]  ;;  %v1647_v55 = vrot.slane %v1639_v36, 7 }
 0x16e   : > { %v1649_v4 = vrot.slane %v1640_v37, 6  ;;  %v672_v25 = vmul.f32 0.9677419, %v7043_v27  ;;  %v1646_v44 = vsel %vm619_vm1, %v1638_v62, %v1645_v39  ;;  %v673_v45 = vmul.f32 0.9677419, %v7057_v46 }
 0x16f   : > { %1866 = vrot.lane.b32.xlu1 %v7259_v43, %s6743_s23  ;;  %v678_v50 = vrot.slane %v670_v58, 1  ;;  %v679_v51 = vrot.slane %v671_v42, 1  ;;  %v1648_v52 = vsel %vm622_vm2, %v1647_v55, %v1646_v44  ;;  %v669_v54 = vmul.f32 0.032258064, %v7057_v46 }
 0x170   : > { %v680_v56 = vrot.slane %v672_v25, 1  ;;  %v629_v57 = vmul.f32 0.516129, %v7007_v49  ;;  %v1650_v61 = vsel %vm625_vm3, %v1649_v4, %v1648_v52  ;;  %v681_v5 = vrot.slane %v673_v45, 1 }
 0x171   : > { %v686_v6 = vadd.f32 %v678_v50, %v666_v35  ;;  %v687_v63 = vadd.f32 %v679_v51, %v667_v59  ;;  %1652 = vst [vmem:[#allocation2 + $0xe0] sm:$0xf0] %v1650_v61  ;;  %v630_v7 = vmul.f32 0.516129, %v7029_v3  ;;  %v631_v9 = vmul.f32 0.516129, %v7043_v27 }
 0x172   : > { %v688_v8 = vadd.f32 %v680_v56, %v668_v26  ;;  %v633_v48 = vmul.f32 0.48387095, %v7007_v49  ;;  %v689_v11 = vadd.f32 %v681_v5, %v669_v54  ;;  %v634_v15 = vmul.f32 0.48387095, %v7029_v3 }
 0x173   : > { %v7273_v10 = vld [vmem:[#allocation2 + $0xd8] sm:$0xff]  ;;  %v694_v13 = vrot.slane %v686_v6, 4  ;;  %v695_v41 = vrot.slane %v687_v63, 3  ;;  %v635_v18 = vmul.f32 0.48387095, %v7043_v27 }
 0x174   : > { %1868 = vrot.lane.b32.xlu0 %v7273_v10, %s6743_s23  ;;  %v697_v16 = vrot.slane %v688_v8, 2  ;;  %v636_v23 = vmul.f32 0.48387095, %v7057_v46  ;;  %v641_v24 = vrot.slane %v633_v48, 1  ;;  %v699_v29 = vrot.slane %v689_v11, 1 }
 0x175   : > { %v696_v28 = vsel %vm619_vm1, %v695_v41, %v694_v13  ;;  %v632_v30 = vmul.f32 0.516129, %v7057_v46  ;;  %v642_v31 = vrot.slane %v634_v15, 1  ;;  %v643_v34 = vrot.slane %v635_v18, 1 }
 0x176   : > { %v698_v32 = vsel %vm622_vm2, %v697_v16, %v696_v28  ;;  %v644_v62 = vrot.slane %v636_v23, 1  ;;  %v649_v35 = vadd.f32 %v641_v24, %v629_v57  ;;  %v703_v59 = vmul.f32 0.5483871, %v7007_v49 }
 0x177   : > { %v700_v36 = vsel %vm625_vm3, %v699_v29, %v698_v32  ;;  %v650_v37 = vadd.f32 %v642_v31, %v630_v7  ;;  %v651_v26 = vadd.f32 %v643_v34, %v631_v9  ;;  %v704_v42 = vmul.f32 0.5483871, %v7029_v3 }
 0x178   : > { %2100 = vrot.lane.b32.xlu0 %v7191_v33, %s6746_s15  ;;  %702 = vst [vmem:[#allocation2 + $0x10] sm:$0xf0] %v700_v36  ;;  %v652_v39 = vadd.f32 %v644_v62, %v632_v30  ;;  %v657_v58 = vrot.slane %v649_v35, 4  ;;  %v7288_v55 = vld [vmem:[#allocation2 + $0xe0] sm:$0xff]  ;;  %v707_v25 = vmul.f32 0.4516129, %v7007_v49 }
 0x179   : > { %v658_v4 = vrot.slane %v650_v37, 3  ;;  %v708_v44 = vmul.f32 0.4516129, %v7029_v3  ;;  %1870 = vrot.lane.b32.xlu1 %v7288_v55, %s6743_s23  ;;  %v660_v45 = vrot.slane %v651_v26, 2  ;;  %v709_v33 = vmul.f32 0.4516129, %v7043_v27 }
 0x17a   : > { %v662_v50 = vrot.slane %v652_v39, 1  ;;  %v710_v51 = vmul.f32 0.4516129, %v7057_v46  ;;  %v705_v54 = vmul.f32 0.5483871, %v7043_v27  ;;  %v715_v56 = vrot.slane %v707_v25, 1 }
 0x17b   : > { %v659_v52 = vsel %vm619_vm1, %v658_v4, %v657_v58  ;;  %v716_v57 = vrot.slane %v708_v44, 1  ;;  %v706_v5 = vmul.f32 0.5483871, %v7057_v46  ;;  %v717_v6 = vrot.slane %v709_v33, 1 }
 0x17c   : > { %2104 = vrot.lane.b32.xlu0 %v7226_v38, %s6746_s15  ;;  %v661_v61 = vsel %vm622_vm2, %v660_v45, %v659_v52  ;;  %v718_v63 = vrot.slane %v710_v51, 1  ;;  %v723_v7 = vadd.f32 %v715_v56, %v703_v59  ;;  %v740_v13 = vmul.f32 0.06451613, %v7007_v49 }
 0x17d   : > { %v663_v8 = vsel %vm625_vm3, %v662_v50, %v661_v61  ;;  %v724_v9 = vadd.f32 %v716_v57, %v704_v42  ;;  %2102 = vrot.lane.b32.xlu1 %v7207_v53, %s6746_s15  ;;  %v725_v48 = vadd.f32 %v717_v6, %v705_v54  ;;  %v744_v38 = vmul.f32 0.9354839, %v7007_v49 }
 0x17e   : > { %665 = vst [vmem:[#allocation2 + $0x8] sm:$0xf0] %v663_v8  ;;  %v726_v11 = vadd.f32 %v718_v63, %v706_v5  ;;  %v731_v41 = vrot.slane %v723_v7, 5  ;;  %v741_v16 = vmul.f32 0.06451613, %v7029_v3 }
 0x17f   : > { %v732_v15 = vrot.slane %v724_v9, 4  ;;  %v745_v18 = vmul.f32 0.9354839, %v7029_v3  ;;  %v734_v23 = vrot.slane %v725_v48, 3  ;;  %v746_v28 = vmul.f32 0.9354839, %v7043_v27 }
 0x180   : > { %v736_v24 = vrot.slane %v726_v11, 2  ;;  %v747_v29 = vmul.f32 0.9354839, %v7057_v46  ;;  %v7311_v53 = vld [vmem:[#allocation2 + $0x10] sm:$0xff]  ;;  %v742_v31 = vmul.f32 0.06451613, %v7043_v27  ;;  %v7336_v11 = vpop.permute.xlu1 %1987 }
 0x181   : > { %v733_v30 = vsel %vm619_vm1, %v732_v15, %v731_v41  ;;  %v752_v32 = vrot.slane %v744_v38, 1  ;;  %v753_v34 = vrot.slane %v745_v18, 1  ;;  %1818 = vrot.lane.b32.xlu1 %v7311_v53, %s6743_s23  ;;  %v743_v35 = vmul.f32 0.06451613, %v7057_v46 }
 0x182   : > { %v735_v62 = vsel %vm622_vm2, %v734_v23, %v733_v30  ;;  %v754_v36 = vrot.slane %v746_v28, 1  ;;  %v755_v37 = vrot.slane %v747_v29, 1  ;;  %v777_v58 = vmul.f32 0.58064514, %v7007_v49  ;;  %v7342_v28 = vpop.permute.xlu0 %1778 }
 0x183   : > { %v737_v59 = vsel %vm625_vm3, %v736_v24, %v735_v62  ;;  %v760_v26 = vadd.f32 %v752_v32, %v740_v13  ;;  %v761_v39 = vadd.f32 %v753_v34, %v741_v16  ;;  %v778_v25 = vmul.f32 0.58064514, %v7029_v3 }
 0x184   : > { %739 = vst [vmem:[#allocation2 + $0x18] sm:$0xf0] %v737_v59  ;;  %v762_v42 = vadd.f32 %v754_v36, %v742_v31  ;;  %v763_v4 = vadd.f32 %v755_v37, %v743_v35  ;;  %v781_v44 = vmul.f32 0.41935483, %v7007_v49  ;;  %v782_v51 = vmul.f32 0.41935483, %v7029_v3 }
 0x185   : > { %v7323_v45 = vld [vmem:[#allocation2 + $0x8] sm:$0xff]  ;;  %v768_v50 = vrot.slane %v760_v26, 5  ;;  %v769_v33 = vrot.slane %v761_v39, 4  ;;  %v783_v56 = vmul.f32 0.41935483, %v7043_v27  ;;  %v1802_v14 = vmul.f32 %v7638_v19, %v7342_v28 }
 0x186   : > { %1816 = vrot.lane.b32.xlu0 %v7323_v45, %s6743_s23  ;;  %2058 = vrot.lane.b32.xlu1 %v7323_v45, %s6746_s15  ;;  %v771_v52 = vrot.slane %v762_v42, 3  ;;  %v773_v54 = vrot.slane %v763_v4, 2  ;;  %v784_v57 = vmul.f32 0.41935483, %v7057_v46  ;;  %v779_v5 = vmul.f32 0.58064514, %v7043_v27 }
 0x187   : > { %v770_v61 = vsel %vm619_vm1, %v769_v33, %v768_v50  ;;  %v789_v6 = vrot.slane %v781_v44, 1  ;;  %v790_v63 = vrot.slane %v782_v51, 1  ;;  %v780_v7 = vmul.f32 0.58064514, %v7057_v46  ;;  %v7352_v44 = vpop.permute.xlu1 %2157 }
 0x188   : > { %v772_v8 = vsel %vm622_vm2, %v771_v52, %v770_v61  ;;  %v791_v9 = vrot.slane %v783_v56, 1  ;;  %v792_v48 = vrot.slane %v784_v57, 1  ;;  %v851_v15 = vmul.f32 0.61290324, %v7007_v49 }
 0x189   : > { %v774_v13 = vsel %vm625_vm3, %v773_v54, %v772_v8  ;;  %v797_v38 = vadd.f32 %v789_v6, %v777_v58  ;;  %v798_v41 = vadd.f32 %v790_v63, %v778_v25  ;;  %v852_v23 = vmul.f32 0.61290324, %v7029_v3  ;;  %v7356_v54 = vpop.permute.xlu0 %2367 }
 0x18a   : > { %776 = vst [vmem:[#allocation2 + $0x20] sm:$0xf0] %v774_v13  ;;  %v799_v16 = vadd.f32 %v791_v9, %v779_v5  ;;  %v800_v18 = vadd.f32 %v792_v48, %v780_v7  ;;  %v855_v24 = vmul.f32 0.38709676, %v7007_v49  ;;  %v856_v32 = vmul.f32 0.38709676, %v7029_v3 }
 0x18b   : > { %v1745_v29 = vld [vmem:[#allocation2 + $0x18] sm:$0xff]  ;;  %v805_v30 = vrot.slane %v797_v38, 6  ;;  %v806_v31 = vrot.slane %v798_v41, 5  ;;  %v857_v35 = vmul.f32 0.38709676, %v7043_v27 }
 0x18c   : > { %1820 = vrot.lane.b32.xlu0 %v1745_v29, %s6743_s23  ;;  %v808_v34 = vrot.slane %v799_v16, 4  ;;  %v810_v62 = vrot.slane %v800_v18, 3  ;;  %v858_v36 = vmul.f32 0.38709676, %v7057_v46  ;;  %v853_v59 = vmul.f32 0.61290324, %v7043_v27 }
 0x18d   : > { %v807_v37 = vsel %vm619_vm1, %v806_v31, %v805_v30  ;;  %v863_v26 = vrot.slane %v855_v24, 1  ;;  %v864_v39 = vrot.slane %v856_v32, 1  ;;  %v854_v42 = vmul.f32 0.61290324, %v7057_v46  ;;  %v7371_v31 = vpop.permute.xlu1 %2227 }
 0x18e   : > { %v809_v58 = vsel %vm622_vm2, %v808_v34, %v807_v37  ;;  %v865_v4 = vrot.slane %v857_v35, 1  ;;  %v866_v25 = vrot.slane %v858_v36, 1  ;;  %v814_v52 = vmul.f32 0.09677419, %v7007_v49  ;;  %v7374_v35 = vpop.permute.xlu0 %1878 }
 0x18f   : > { %v811_v50 = vsel %vm625_vm3, %v810_v62, %v809_v58  ;;  %v871_v33 = vadd.f32 %v863_v26, %v851_v15  ;;  %v872_v51 = vadd.f32 %v864_v39, %v852_v23  ;;  %v815_v61 = vmul.f32 0.09677419, %v7029_v3 }
 0x190   : > { %2060 = vrot.lane.b32.xlu0 %v7311_v53, %s6746_s15  ;;  %813 = vst [vmem:[#allocation2 + $0x28] sm:$0xf0] %v811_v50  ;;  %v873_v56 = vadd.f32 %v865_v4, %v853_v59  ;;  %v874_v57 = vadd.f32 %v866_v25, %v854_v42  ;;  %v818_v5 = vmul.f32 0.9032258, %v7007_v49  ;;  %v819_v7 = vmul.f32 0.9032258, %v7029_v3 }
 0x191   : > { %v1746_v6 = vld [vmem:[#allocation2 + $0x20] sm:$0xff]  ;;  %v879_v63 = vrot.slane %v871_v33, 7  ;;  %v880_v8 = vrot.slane %v872_v51, 6  ;;  %v820_v13 = vmul.f32 0.9032258, %v7043_v27 }
 0x192   : > { %1822 = vrot.lane.b32.xlu1 %v1746_v6, %s6743_s23  ;;  %v882_v9 = vrot.slane %v873_v56, 5  ;;  %v884_v48 = vrot.slane %v874_v57, 4  ;;  %v821_v53 = vmul.f32 0.9032258, %v7057_v46  ;;  %v816_v41 = vmul.f32 0.09677419, %v7043_v27 }
 0x193   : > { %v881_v38 = vsel %vm619_vm1, %v880_v8, %v879_v63  ;;  %v826_v15 = vrot.slane %v818_v5, 1  ;;  %v827_v16 = vrot.slane %v819_v7, 1  ;;  %v817_v23 = vmul.f32 0.09677419, %v7057_v46  ;;  %v7392_v7 = vpop.permute.xlu1 %2297 }
 0x194   : > { %2064 = vrot.lane.b32.xlu0 %v1746_v6, %s6746_s15  ;;  %v883_v18 = vsel %vm622_vm2, %v882_v9, %v881_v38  ;;  %v828_v24 = vrot.slane %v820_v13, 1  ;;  %v829_v30 = vrot.slane %v821_v53, 1  ;;  %v929_v59 = vmul.f32 0.3548387, %v7007_v49 }
 0x195   : > { %v885_v32 = vsel %vm625_vm3, %v884_v48, %v883_v18  ;;  %v834_v34 = vadd.f32 %v826_v15, %v814_v52  ;;  %v835_v62 = vadd.f32 %v827_v16, %v815_v61  ;;  %v926_v58 = vmul.f32 0.6451613, %v7029_v3  ;;  %v7386_v61 = vpop.permute.xlu0 %2507 }
 0x196   : > { %2062 = vrot.lane.b32.xlu1 %v1745_v29, %s6746_s15  ;;  %887 = vst [vmem:[#allocation2 + $0x38] sm:$0xf0] %v885_v32  ;;  %v836_v36 = vadd.f32 %v828_v24, %v816_v41  ;;  %v837_v37 = vadd.f32 %v829_v30, %v817_v23  ;;  %v930_v42 = vmul.f32 0.3548387, %v7029_v3  ;;  %v931_v50 = vmul.f32 0.3548387, %v7043_v27 }
 0x197   : > { %v842_v26 = vrot.slane %v834_v34, 6  ;;  %v843_v39 = vrot.slane %v835_v62, 5  ;;  %v932_v33 = vmul.f32 0.3548387, %v7057_v46  ;;  %v7382_v51 = vld [vmem:[#allocation2 + $0x28] sm:$0xff]  ;;  %v937_v56 = vrot.slane %v929_v59, 1 }
 0x198   : > { %v845_v4 = vrot.slane %v836_v36, 4  ;;  %v847_v25 = vrot.slane %v837_v37, 3  ;;  %11009 = vst [vmem:[#allocation10_spill] sm:$0xff] %v7382_v51  ;;  %v927_v52 = vmul.f32 0.6451613, %v7043_v27  ;;  %v938_v57 = vrot.slane %v930_v42, 1 }
 0x199   : > { %v844_v29 = vsel %vm619_vm1, %v843_v39, %v842_v26  ;;  %v928_v6 = vmul.f32 0.6451613, %v7057_v46  ;;  %v939_v63 = vrot.slane %v931_v50, 1  ;;  %v940_v8 = vrot.slane %v932_v33, 1  ;;  %v7408_v42 = vpop.permute.xlu0 %1917 }
 0x19a   : > { %1824 = vrot.lane.b32.xlu1 %v7382_v51, %s6743_s23  ;;  %v846_v5 = vsel %vm622_vm2, %v845_v4, %v844_v29  ;;  %v925_v48 = vmul.f32 0.6451613, %v7007_v49  ;;  %v946_v13 = vadd.f32 %v938_v57, %v926_v58  ;;  %v888_v53 = vmul.f32 0.12903225, %v7007_v49  ;;  %v7412_v29 = vpop.permute.xlu1 %2120 }
 0x19b   : > { %v848_v9 = vsel %vm625_vm3, %v847_v25, %v846_v5  ;;  %v947_v38 = vadd.f32 %v939_v63, %v927_v52  ;;  %v948_v41 = vadd.f32 %v940_v8, %v928_v6  ;;  %v889_v15 = vmul.f32 0.12903225, %v7029_v3  ;;  %11011 = vst [vmem:[#allocation12_spill] sm:$0xff] %v7412_v29 }
 0x19c   : > { %850 = vst [vmem:[#allocation2 + $0x30] sm:$0xf0] %v848_v9  ;;  %v892_v16 = vmul.f32 0.87096775, %v7007_v49  ;;  %v945_v23 = vadd.f32 %v937_v56, %v925_v48  ;;  %v953_v24 = vrot.slane %v946_v13, 7 }
 0x19d   : > { %v7399_v18 = vld [vmem:[#allocation2 + $0x38] sm:$0xff]  ;;  %v893_v30 = vmul.f32 0.87096775, %v7029_v3  ;;  %v894_v32 = vmul.f32 0.87096775, %v7043_v27  ;;  %v955_v34 = vrot.slane %v947_v38, 6 }
 0x19e   : > { %11010 = vst [vmem:[#allocation11_spill] sm:$0xff] %v7399_v18  ;;  %1828 = vrot.lane.b32.xlu0 %v7399_v18, %s6743_s23  ;;  %v957_v62 = vrot.slane %v948_v41, 5  ;;  %v895_v36 = vmul.f32 0.87096775, %v7057_v46  ;;  %v900_v37 = vrot.slane %v892_v16, 1  ;;  %v954_v59 = vsel %vm619_vm1, %v953_v24, %v945_v23 }
 0x19f   : > { %v890_v26 = vmul.f32 0.12903225, %v7043_v27  ;;  %v901_v39 = vrot.slane %v893_v30, 1  ;;  %v902_v58 = vrot.slane %v894_v32, 1  ;;  %v956_v4 = vsel %vm622_vm2, %v955_v34, %v954_v59 }
 0x1a0   : > { %v891_v25 = vmul.f32 0.12903225, %v7057_v46  ;;  %v903_v50 = vrot.slane %v895_v36, 1  ;;  %v908_v33 = vadd.f32 %v900_v37, %v888_v53  ;;  %v958_v52 = vsel %vm625_vm3, %v957_v62, %v956_v4  ;;  %v7430_v62 = vpop.permute.xlu0 %1876 }
 0x1a1   : > { %v909_v56 = vadd.f32 %v901_v39, %v889_v15  ;;  %v910_v57 = vadd.f32 %v902_v58, %v890_v26  ;;  %960 = vst [vmem:[#allocation2 + $0x48] sm:$0xf0] %v958_v52  ;;  %v997_v6 = vmul.f32 0.67741936, %v7007_v49  ;;  %v998_v63 = vmul.f32 0.67741936, %v7029_v3  ;;  %v7433_v39 = vpop.permute.xlu1 %2437 }
 0x1a2   : > { %v911_v5 = vadd.f32 %v903_v50, %v891_v25  ;;  %v1001_v8 = vmul.f32 0.32258064, %v7007_v49  ;;  %v916_v48 = vrot.slane %v908_v33, 7  ;;  %v1002_v53 = vmul.f32 0.32258064, %v7029_v3  ;;  %11013 = vst [vmem:[#allocation14_spill] sm:$0xff] %v7430_v62 }
 0x1a3   : > { %v7418_v9 = vld [vmem:[#allocation2 + $0x30] sm:$0xff]  ;;  %v917_v13 = vrot.slane %v909_v56, 6  ;;  %v919_v38 = vrot.slane %v910_v57, 5  ;;  %v1003_v15 = vmul.f32 0.32258064, %v7043_v27  ;;  %11014 = vst [vmem:[#allocation15_spill] sm:$0xff] %v7433_v39 }
 0x1a4   : > { %11012 = vst [vmem:[#allocation13_spill] sm:$0xff] %v7418_v9  ;;  %1826 = vrot.lane.b32.xlu1 %v7418_v9, %s6743_s23  ;;  %2068 = vrot.lane.b32.xlu0 %v7418_v9, %s6746_s15  ;;  %v921_v41 = vrot.slane %v911_v5, 4  ;;  %v1004_v16 = vmul.f32 0.32258064, %v7057_v46  ;;  %v1009_v23 = vrot.slane %v1001_v8, 1  ;;  %v1010_v34 = vrot.slane %v1002_v53, 1 }
 0x1a5   : > { %v918_v24 = vsel %vm619_vm1, %v917_v13, %v916_v48  ;;  %v999_v30 = vmul.f32 0.67741936, %v7043_v27  ;;  %v1000_v32 = vmul.f32 0.67741936, %v7057_v46  ;;  %v1011_v37 = vrot.slane %v1003_v15, 1 }
 0x1a6   : > { %v920_v36 = vsel %vm622_vm2, %v919_v38, %v918_v24  ;;  %v1012_v59 = vrot.slane %v1004_v16, 1  ;;  %v1017_v26 = vadd.f32 %v1009_v23, %v997_v6  ;;  %v1018_v4 = vadd.f32 %v1010_v34, %v998_v63  ;;  %v7450_v23 = vpop.permute.xlu1 %1814  ;;  %v7452_v24 = vpop.permute.xlu0 %2056 }
 0x1a7   : > { %v922_v58 = vsel %vm625_vm3, %v921_v41, %v920_v36  ;;  %v961_v25 = vmul.f32 0.16129032, %v7007_v49  ;;  %v962_v50 = vmul.f32 0.16129032, %v7029_v3  ;;  %v1019_v33 = vadd.f32 %v1011_v37, %v999_v30 }
 0x1a8   : > { %2066 = vrot.lane.b32.xlu1 %v7382_v51, %s6746_s15  ;;  %924 = vst [vmem:[#allocation2 + $0x40] sm:$0xf0] %v922_v58  ;;  %v1020_v52 = vadd.f32 %v1012_v59, %v1000_v32  ;;  %v1025_v56 = vrot.slane %v1017_v26, 1  ;;  %v965_v57 = vmul.f32 0.83870965, %v7007_v49  ;;  %v7441_v5 = vld [vmem:[#allocation2 + $0x48] sm:$0xff] }
 0x1a9   : > { %11015 = vst [vmem:[#allocation16_spill] sm:$0xff] %v7441_v5  ;;  %v966_v6 = vmul.f32 0.83870965, %v7029_v3  ;;  %v967_v8 = vmul.f32 0.83870965, %v7043_v27  ;;  %1832 = vrot.lane.b32.xlu0 %v7441_v5, %s6743_s23  ;;  %v1027_v48 = vrot.slane %v1019_v33, 7 }
 0x1aa   : > { %v1026_v63 = vsel %vm619_vm1, %v1018_v4, %v1025_v56  ;;  %v1029_v13 = vrot.slane %v1020_v52, 6  ;;  %v968_v38 = vmul.f32 0.83870965, %v7057_v46  ;;  %v963_v53 = vmul.f32 0.16129032, %v7043_v27 }
 0x1ab   : > { %v973_v41 = vrot.slane %v965_v57, 1  ;;  %v974_v15 = vrot.slane %v966_v6, 1  ;;  %v975_v16 = vrot.slane %v967_v8, 1  ;;  %v1028_v30 = vsel %vm622_vm2, %v1027_v48, %v1026_v63 }
 0x1ac   : > { %v964_v32 = vmul.f32 0.16129032, %v7057_v46  ;;  %v976_v34 = vrot.slane %v968_v38, 1  ;;  %v1069_v36 = vmul.f32 0.7096774, %v7007_v49  ;;  %v1030_v37 = vsel %vm625_vm3, %v1029_v13, %v1028_v30 }
 0x1ad   : > { %v982_v59 = vadd.f32 %v974_v15, %v962_v50  ;;  %v983_v26 = vadd.f32 %v975_v16, %v963_v53  ;;  %v1070_v58 = vmul.f32 0.7096774, %v7029_v3  ;;  %1032 = vst [vmem:[#allocation2 + $0x58] sm:$0xf0] %v1030_v37  ;;  %v1071_v33 = vmul.f32 0.7096774, %v7043_v27 }
 0x1ae   : > { %v984_v4 = vadd.f32 %v976_v34, %v964_v32  ;;  %v1073_v52 = vmul.f32 0.29032257, %v7007_v49  ;;  %v1074_v56 = vmul.f32 0.29032257, %v7029_v3  ;;  %v981_v6 = vadd.f32 %v973_v41, %v961_v25  ;;  %v7471_v25 = vpop.permute.xlu1 %1846  ;;  %v7473_v41 = vpop.permute.xlu0 %1844 }
 0x1af   : > { %v7462_v57 = vld [vmem:[#allocation2 + $0x40] sm:$0xff]  ;;  %v989_v8 = vrot.slane %v982_v59, 7  ;;  %v991_v63 = vrot.slane %v983_v26, 6  ;;  %v1075_v48 = vmul.f32 0.29032257, %v7043_v27  ;;  %11017 = vst [vmem:[#allocation18_spill] sm:$0xff] %v7473_v41 }
 0x1b0   : > { %11016 = vst [vmem:[#allocation17_spill] sm:$0xff] %v7462_v57  ;;  %1830 = vrot.lane.b32.xlu1 %v7462_v57, %s6743_s23  ;;  %v993_v50 = vrot.slane %v984_v4, 5  ;;  %v1076_v13 = vmul.f32 0.29032257, %v7057_v46  ;;  %v1081_v38 = vrot.slane %v1073_v52, 1  ;;  %v1082_v53 = vrot.slane %v1074_v56, 1 }
 0x1b1   : > { %v990_v15 = vsel %vm619_vm1, %v989_v8, %v981_v6  ;;  %v1072_v16 = vmul.f32 0.7096774, %v7057_v46  ;;  %v1083_v30 = vrot.slane %v1075_v48, 1  ;;  %v1033_v32 = vmul.f32 0.19354838, %v7007_v49 }
 0x1b2   : > { %v992_v34 = vsel %vm622_vm2, %v991_v63, %v990_v15  ;;  %v1084_v37 = vrot.slane %v1076_v13, 1  ;;  %v1089_v59 = vadd.f32 %v1081_v38, %v1069_v36  ;;  %v1090_v26 = vadd.f32 %v1082_v53, %v1070_v58 }
 0x1b3   : > { %v994_v4 = vsel %vm625_vm3, %v993_v50, %v992_v34  ;;  %v1091_v52 = vadd.f32 %v1083_v30, %v1071_v33  ;;  %v1034_v56 = vmul.f32 0.19354838, %v7029_v3  ;;  %v1035_v6 = vmul.f32 0.19354838, %v7043_v27  ;;  %v7492_v34 = vpop.permute.xlu1 %2086 }
 0x1b4   : > { %2070 = vrot.lane.b32.xlu1 %v7399_v18, %s6746_s15  ;;  %996 = vst [vmem:[#allocation2 + $0x50] sm:$0xf0] %v994_v4  ;;  %v1092_v8 = vadd.f32 %v1084_v37, %v1072_v16  ;;  %v1097_v48 = vrot.slane %v1089_v59, 2  ;;  %v1098_v1 = vrot.slane %v1090_v26, 1  ;;  %v1037_v22 = vmul.f32 0.8064516, %v7007_v49  ;;  %v7494_v37 = vpop.permute.xlu0 %2088 }
 0x1b5   : > { %v7482_v63 = vld [vmem:[#allocation2 + $0x58] sm:$0xff]  ;;  %v1038_v36 = vmul.f32 0.8064516, %v7029_v3  ;;  %v1039_v58 = vmul.f32 0.8064516, %v7043_v27  ;;  %11019 = vst [vmem:[#allocation20_spill] sm:$0xff] %v7492_v34 }
 0x1b6   : > { %11018 = vst [vmem:[#allocation19_spill] sm:$0xff] %v7482_v63  ;;  %1836 = vrot.lane.b32.xlu0 %v7482_v63, %s6743_s23  ;;  %v1099_v33 = vsel %vm619_vm1, %v1098_v1, %v1097_v48  ;;  %v1101_v50 = vrot.slane %v1092_v8, 7  ;;  %v1040_v13 = vmul.f32 0.8064516, %v7057_v46  ;;  %v1045_v38 = vrot.slane %v1037_v22, 1 }
 0x1b7   : > { %v1100_v53 = vsel %vm622_vm2, %v1091_v52, %v1099_v33  ;;  %v1036_v15 = vmul.f32 0.19354838, %v7057_v46  ;;  %v1046_v16 = vrot.slane %v1038_v36, 1  ;;  %v1047_v30 = vrot.slane %v1039_v58, 1 }
 0x1b8   : > { %v1102_v59 = vsel %vm625_vm3, %v1101_v50, %v1100_v53  ;;  %v1048_v26 = vrot.slane %v1040_v13, 1  ;;  %v1053_v4 = vadd.f32 %v1045_v38, %v1033_v32  ;;  %v1105_v1 = vmul.f32 0.22580644, %v7007_v49 }
 0x1b9   : > { %1104 = vst [vmem:[#allocation2 + $0x68] sm:$0xf0] %v1102_v59  ;;  %v1054_v8 = vadd.f32 %v1046_v16, %v1034_v56  ;;  %v1055_v48 = vadd.f32 %v1047_v30, %v1035_v6  ;;  %v1106_v22 = vmul.f32 0.22580644, %v7029_v3  ;;  %v1107_v52 = vmul.f32 0.22580644, %v7043_v27 }
 0x1ba   : > { %2072 = vrot.lane.b32.xlu0 %v7462_v57, %s6746_s15  ;;  %v1056_v36 = vadd.f32 %v1048_v26, %v1036_v15  ;;  %v1061_v58 = vrot.slane %v1053_v4, 1  ;;  %v1109_v33 = vmul.f32 0.7741935, %v7007_v49  ;;  %v1110_v50 = vmul.f32 0.7741935, %v7029_v3  ;;  %v7513_v4 = vpop.permute.xlu1 %1850 }
 0x1bb   : > { %v7504_v13 = vld [vmem:[#allocation2 + $0x50] sm:$0xff]  ;;  %v1063_v32 = vrot.slane %v1055_v48, 7  ;;  %v1111_v38 = vmul.f32 0.7741935, %v7043_v27  ;;  %v1112_v56 = vmul.f32 0.7741935, %v7057_v46  ;;  %v10894_v6 = vlaneseq  ;;  %v7515_v27 = vpop.permute.xlu0 %1848 }
 0x1bc   : > { %11020 = vst [vmem:[#allocation21_spill] sm:$0xff] %v7504_v13  ;;  %1834 = vrot.lane.b32.xlu1 %v7504_v13, %s6743_s23  ;;  %v1062_v53 = vsel %vm619_vm1, %v1054_v8, %v1061_v58  ;;  %v1065_v16 = vrot.slane %v1056_v36, 6  ;;  %v1117_v15 = vrot.slane %v1109_v33, 1  ;;  %v1118_v30 = vrot.slane %v1110_v50, 1 }
 0x1bd   : > { %v1064_v49 = vsel %vm622_vm2, %v1063_v32, %v1062_v53  ;;  %v1108_v3 = vmul.f32 0.22580644, %v7057_v46  ;;  %v1119_v59 = vrot.slane %v1111_v38, 1  ;;  %v1120_v26 = vrot.slane %v1112_v56, 1 }
 0x1be   : > { %v1066_v48 = vsel %vm625_vm3, %v1065_v16, %v1064_v49  ;;  %v1125_v21 = vadd.f32 %v1117_v15, %v1105_v1  ;;  %v1126_v2 = vadd.f32 %v1118_v30, %v1106_v22  ;;  %v1653_v36 = vmul.f32 0.9677419, %v7004_v47  ;;  %v7534_v49 = vpop.permute.xlu1 %1854 }
 0x1bf   : > { %1068 = vst [vmem:[#allocation2 + $0x60] sm:$0xf0] %v1066_v48  ;;  %v1127_v12 = vadd.f32 %v1119_v59, %v1107_v52  ;;  %v1128_v8 = vadd.f32 %v1120_v26, %v1108_v3  ;;  %v1657_v46 = vmul.f32 0.032258064, %v7004_v47  ;;  %v1658_v38 = vmul.f32 0.032258064, %v7020_v60  ;;  %v7536_v3 = vpop.permute.xlu0 %1852 }
 0x1c0   : > { %v7519_v58 = vld [vmem:[#allocation2 + $0x68] sm:$0xff]  ;;  %v1133_v33 = vrot.slane %v1125_v21, 2  ;;  %v1134_v50 = vrot.slane %v1126_v2, 1  ;;  %v1659_v1 = vmul.f32 0.032258064, %v7038_v20  ;;  %v7527_v22 = vand.u32 127, %v10894_v6 }
 0x1c1   : > { %11021 = vst [vmem:[#allocation22_spill] sm:$0xff] %v7519_v58  ;;  %1840 = vrot.lane.b32.xlu0 %v7519_v58, %s6743_s23  ;;  %v1137_v32 = vrot.slane %v1128_v8, 7  ;;  %v1654_v56 = vmul.f32 0.9677419, %v7020_v60  ;;  %v1660_v21 = vmul.f32 0.032258064, %v7052_v40 }
 0x1c2   : > { %v1135_v52 = vsel %vm619_vm1, %v1134_v50, %v1133_v33  ;;  %v1665_v2 = vrot.slane %v1657_v46, 1  ;;  %v1655_v16 = vmul.f32 0.9677419, %v7038_v20  ;;  %v1666_v15 = vrot.slane %v1658_v38, 1 }
 0x1c3   : > { %v1136_v53 = vsel %vm622_vm2, %v1127_v12, %v1135_v52  ;;  %v1667_v30 = vrot.slane %v1659_v1, 1  ;;  %v1656_v26 = vmul.f32 0.9677419, %v7052_v40  ;;  %v1668_v48 = vrot.slane %v1660_v21, 1 }
 0x1c4   : > { %v1138_v59 = vsel %vm625_vm3, %v1137_v32, %v1136_v53  ;;  %v1673_v8 = vadd.f32 %v1665_v2, %v1653_v36  ;;  %v1674_v33 = vadd.f32 %v1666_v15, %v1654_v56  ;;  %vm1882_vm4 = vcmp.lt.s32.totalorder %v7527_v22, 1  ;;  %v7557_v15 = vpop.permute.xlu0 %1856 }
 0x1c5   : > { %2076 = vrot.lane.b32.xlu0 %v7504_v13, %s6746_s15  ;;  %1140 = vst [vmem:[#allocation2 + $0x70] sm:$0xf0] %v1138_v59  ;;  %v1675_v50 = vadd.f32 %v1667_v30, %v1655_v16  ;;  %v1676_v46 = vadd.f32 %v1668_v48, %v1656_v26  ;;  %v1689_v32 = vmul.f32 0.48387095, %v7004_v47  ;;  %v1693_v36 = vmul.f32 0.516129, %v7004_v47  ;;  %v7555_v16 = vpop.permute.xlu1 %2090 }
 0x1c6   : > { %v7542_v12 = vld [vmem:[#allocation2 + $0x60] sm:$0xff]  ;;  %v1681_v38 = vrot.slane %v1673_v8, 2  ;;  %v1682_v1 = vrot.slane %v1674_v33, 1  ;;  %v1694_v21 = vmul.f32 0.516129, %v7020_v60  ;;  %vm2122_vm5 = vcmp.lt.s32.totalorder %v7527_v22, 127 }
 0x1c7   : > { %11022 = vst [vmem:[#allocation23_spill] sm:$0xff] %v7542_v12  ;;  %1838 = vrot.lane.b32.xlu1 %v7542_v12, %s6743_s23  ;;  %v1685_v52 = vrot.slane %v1676_v46, 7  ;;  %v1695_v2 = vmul.f32 0.516129, %v7038_v20  ;;  %v1696_v53 = vmul.f32 0.516129, %v7052_v40 }
 0x1c8   : > { %v1683_v56 = vsel %vm619_vm1, %v1682_v1, %v1681_v38  ;;  %v1690_v59 = vmul.f32 0.48387095, %v7020_v60  ;;  %v1692_v47 = vmul.f32 0.48387095, %v7052_v40  ;;  %v1701_v26 = vrot.slane %v1693_v36, 1  ;;  %v7821_v13 = vld [vmem:[#allocation2 + $0xb8] sm:$0xff] }
 0x1c9   : > { %2080 = vrot.lane.b32.xlu0 %v7542_v12, %s6746_s15  ;;  %v1684_v30 = vsel %vm622_vm2, %v1675_v50, %v1683_v56  ;;  %v1702_v8 = vrot.slane %v1694_v21, 1  ;;  %v1703_v33 = vrot.slane %v1695_v2, 1  ;;  %v1704_v46 = vrot.slane %v1696_v53, 1  ;;  %v7576_v2 = vpop.permute.xlu1 %1858  ;;  %11051 = vst [vmem:[#allocation52_spill] sm:$0xff] %v7821_v13 }
 0x1ca   : > { %v1686_v48 = vsel %vm625_vm3, %v1685_v52, %v1684_v30  ;;  %v1691_v1 = vmul.f32 0.48387095, %v7038_v20  ;;  %v1709_v6 = vadd.f32 %v1701_v26, %v1689_v32  ;;  %v1883_v50 = vsel %vm1882_vm4, %v7430_v62, %v7374_v35 }
 0x1cb   : > { %2074 = vrot.lane.b32.xlu1 %v7441_v5, %s6746_s15  ;;  %1688 = vst [vmem:[#allocation2 + $0xe8] sm:$0xf0] %v1686_v48  ;;  %v1710_v60 = vadd.f32 %v1702_v8, %v1690_v59  ;;  %v1712_v40 = vadd.f32 %v1704_v46, %v1692_v47  ;;  %v1920_v32 = vmul.f32 %v7408_v42, %v1883_v50  ;;  %v7587_v47 = vld [vmem:[#allocation2] sm:$0xff]  ;;  %v11053_v39 = vmov 3  }
 0x1cc   : > { %v7565_v38 = vld [vmem:[#allocation2 + $0x70] sm:$0xff]  ;;  %v1711_v52 = vadd.f32 %v1703_v33, %v1691_v1  ;;  %v1717_v36 = vrot.slane %v1709_v6, 2  ;;  %11024 = vst [vmem:[#allocation25_spill] sm:$0xff] %v7587_v47  ;;  %v1781_v6 = vmul.f32 %v7587_v47, %v7342_v28  ;;  %v1915_v26 = vsel %vm1882_vm4, %v7374_v35, %v7450_v23 }
 0x1cd   : > { %11023 = vst [vmem:[#allocation24_spill] sm:$0xff] %v7565_v38  ;;  %2084 = vrot.lane.b32.xlu0 %v7565_v38, %s6746_s15  ;;  %v1718_v56 = vrot.slane %v1710_v60, 1  ;;  %v1721_v21 = vrot.slane %v1712_v40, 7  ;;  %v1921_v1 = vmul.f32 %v7408_v42, %v1915_v26  ;;  %v2155_v35 = vsel %vm2122_vm5, %v7412_v29, %v7452_v24  ;;  %v7614_v40 = vld [vmem:[#allocation2 + $0x100] sm:$0xff] }
 0x1ce   : > { %v7578_v20 = vpop.permute.xlu0 %1860  ;;  %v1953_v33 = vadd.f32 %v1920_v32, %v1781_v6  ;;  %v1899_v60 = vsel %vm1882_vm4, %v7473_v41, %v7471_v25  ;;  %11025 = vst [vmem:[#allocation26_spill] sm:$0xff] %v7614_v40  ;;  %v1897_v29 = vsel %vm1882_vm4, %v7515_v27, %v7513_v4  ;;  %v7649_v62 = vmul.f32 %v7371_v31, %v1883_v50 }
 0x1cf   : > { %1842 = vrot.lane.b32.xlu1 %v7565_v38, %s6743_s23  ;;  %v1719_v53 = vsel %vm619_vm1, %v1718_v56, %v1717_v36  ;;  %v7618_v36 = vld [vmem:[#allocation2 + $0x88] sm:$0xff]  ;;  %v7652_v41 = vmul.f32 %v7356_v54, %v1883_v50  ;;  %v7672_v50 = vmul.f32 %v7356_v54, %v1915_v26  ;;  %v7698_v12 = vmul.f32 %v7371_v31, %v1899_v60 }
 0x1d0   : > { %v1720_v30 = vsel %vm622_vm2, %v1711_v52, %v1719_v53  ;;  %v1990_v52 = vmul.f32 %v7614_v40, %v7336_v11  ;;  %11026 = vst [vmem:[#allocation27_spill] sm:$0xff] %v7618_v36  ;;  %v1798_v56 = vmul.f32 %v7618_v36, %v7342_v28  ;;  %v1782_v53 = vmul.f32 %v7342_v28, %v7323_v45 }
 0x1d1   : > { %v1722_v48 = vsel %vm625_vm3, %v1721_v21, %v1720_v30  ;;  %v7622_v21 = vld [vmem:[#allocation2 + $0x90] sm:$0xff]  ;;  %v7630_v30 = vld [vmem:[#allocation2 + $0x98] sm:$0xff]  ;;  %v1937_v45 = vmul.f32 %v7408_v42, %v1899_v60  ;;  %11031 = vst [vmem:[#allocation32_spill] sm:$0xff] %v7649_v62  ;;  %11032 = vst [vmem:[#allocation33_spill] sm:$0xff] %v7652_v41  ;;  %v7669_v62 = vmul.f32 %v7371_v31, %v1915_v26 }
 0x1d2   : > { %v7585_v59 = vld [vmem:[#allocation2 + $0xe8] sm:$0xff]  ;;  %1724 = vst [vmem:[#allocation2 + $0xf0] sm:$0xf0] %v1722_v48  ;;  %v7599_v8 = vpop.permute.xlu0 %2092  ;;  %11027 = vst [vmem:[#allocation28_spill] sm:$0xff] %v7622_v21  ;;  %v1799_v32 = vmul.f32 %v7622_v21, %v7342_v28  ;;  %v1800_v6 = vmul.f32 %v7630_v30, %v7342_v28  ;;  %v7634_v48 = vld [vmem:[#allocation2 + $0xa0] sm:$0xff]  ;;  %v2023_v17 = vadd.f32 %v1990_v52, %v1953_v33 }
 0x1d3   : > { %2078 = vrot.lane.b32.xlu1 %v7482_v63, %s6746_s15  ;;  %1872 = vrot.lane.b32.xlu0 %v7585_v59, %s6743_s23  ;;  %11028 = vst [vmem:[#allocation29_spill] sm:$0xff] %v7630_v30  ;;  %11029 = vst [vmem:[#allocation30_spill] sm:$0xff] %v7634_v48  ;;  %v1801_v0 = vmul.f32 %v7634_v48, %v7342_v28  ;;  %v7654_v40 = vadd.f32 %v1921_v1, %v1782_v53 }
 0x1d4   : > { %v1898_v33 = vsel %vm1882_vm4, %v7471_v25, %v7515_v27  ;;  %11033 = vst [vmem:[#allocation34_spill] sm:$0xff] %v7669_v62  ;;  %11034 = vst [vmem:[#allocation35_spill] sm:$0xff] %v7672_v50  ;;  %v2139_v25 = vsel %vm2122_vm5, %v7492_v34, %v7494_v37  ;;  %v1895_v27 = vsel %vm1882_vm4, %v7536_v3, %v7534_v49 }
 0x1d5   : > { %v7601_v46 = vpop.permute.xlu1 %1862  ;;  %v7685_v1 = vmul.f32 %v7392_v7, %v2155_v35  ;;  %v7688_v53 = vmul.f32 %v7386_v61, %v2155_v35  ;;  %v1939_v26 = vmul.f32 %v7408_v42, %v1897_v29  ;;  %v1896_v50 = vsel %vm1882_vm4, %v7513_v4, %v7536_v3  ;;  %11038 = vst [vmem:[#allocation39_spill] sm:$0xff] %v7698_v12 }
 0x1d6   : > { %v7662_v38 = vpop.permute.xlu0 %2096  ;;  %v1970_v34 = vadd.f32 %v1937_v45, %v1798_v56  ;;  %v7716_v4 = vmul.f32 %v7386_v61, %v2139_v25  ;;  %v7719_v3 = vmul.f32 %v7371_v31, %v1898_v33  ;;  %v1940_v56 = vmul.f32 %v7408_v42, %v1896_v50 }
 0x1d7   : > { %2082 = vrot.lane.b32.xlu1 %v7519_v58, %s6746_s15  ;;  %2108 = vrot.lane.b32.xlu0 %v7259_v43, %s6746_s15  ;;  %v2160_v43 = vmul.f32 %v7352_v44, %v2155_v35  ;;  %v7664_v58 = vld [vmem:[#allocation2 + $0xc8] sm:$0xff]  ;;  %11035 = vst [vmem:[#allocation36_spill] sm:$0xff] %v7685_v1  ;;  %11036 = vst [vmem:[#allocation37_spill] sm:$0xff] %v7688_v53  ;;  %v7704_v35 = vmul.f32 %v7356_v54, %v1899_v60 }
 0x1d8   : > { %v7707_v53 = vmul.f32 %v7352_v44, %v2139_v25  ;;  %v7710_v1 = vmul.f32 %v7392_v7, %v2139_v25  ;;  %11043 = vst [vmem:[#allocation44_spill] sm:$0xff] %v7716_v4  ;;  %v7722_v60 = vmul.f32 %v7371_v31, %v1897_v29  ;;  %v7730_v45 = vmul.f32 %v7356_v54, %v1898_v33 }
 0x1d9   : > { %v7660_v52 = vpop.permute.xlu1 %2094  ;;  %v7695_v41 = vadd.f32 %v2160_v43, %v2023_v17  ;;  %v7701_v63 = vld [vmem:[#allocation2 + $0xf0] sm:$0xff]  ;;  %11040 = vst [vmem:[#allocation41_spill] sm:$0xff] %v7704_v35  ;;  %v1941_v17 = vmul.f32 %v7408_v42, %v1895_v27  ;;  %v7727_v43 = vadd.f32 %v1939_v26, %v1800_v6  ;;  %v7733_v35 = vmul.f32 %v7356_v54, %v1897_v29  ;;  %v7746_v6 = vld [vmem:[%s10884_s6] sm:$0xf] }
 0x1da   : > { %11039 = vst [vmem:[#allocation40_spill] sm:$0xff] %v7701_v63  ;;  %11041 = vst [vmem:[#allocation42_spill] sm:$0xff] %v7707_v53  ;;  %v2138_v25 = vsel %vm2122_vm5, %v7494_v37, %v7555_v16  ;;  %v7752_v29 = vmul.f32 %v7371_v31, %v1895_v27  ;;  %v7758_v37 = vsel %vm2122_vm5, %v7555_v16, %v7599_v8  ;;  %v7765_v53 = vld [vmem:[#allocation2 + $0x80] sm:$0xff] }
 0x1db   : > { %2106 = vrot.lane.b32.xlu1 %v7664_v58, %s6746_s15  ;;  %2112 = vrot.lane.b32.xlu0 %v7288_v55, %s6746_s15  ;;  %11037 = vst [vmem:[#allocation38_spill] sm:$0xff] %v7695_v41  ;;  %v1938_v55 = vmul.f32 %v7408_v42, %v1898_v33  ;;  %11042 = vst [vmem:[#allocation43_spill] sm:$0xff] %v7710_v1  ;;  %v7741_v1 = vpop.permute.xlu0 %1864  ;;  %v7749_v33 = vmul.f32 %v7371_v31, %v1896_v50 }
 0x1dc   : > { %11044 = vst [vmem:[#allocation45_spill] sm:$0xff] %v7730_v45  ;;  %11045 = vst [vmem:[#allocation46_spill] sm:$0xff] %v7733_v35  ;;  %v7760_v45 = vadd.f32 %v1941_v17, %v1802_v14  ;;  %v7763_v12 = vmul.f32 %v7356_v54, %v1896_v50  ;;  %v1973_v16 = vadd.f32 %v1940_v56, %v1801_v0  ;;  %v7779_v17 = vld [vmem:[#allocation2 + $0xb0] sm:$0xff] }
 0x1dd   : > { %v7739_v4 = vpop.permute.xlu1 %2098  ;;  %v1971_v26 = vadd.f32 %v1938_v55, %v1799_v32  ;;  %11046 = vst [vmem:[#allocation47_spill] sm:$0xff] %v7765_v53  ;;  %v2007_v32 = vmul.f32 %v7765_v53, %v7336_v11  ;;  %v1894_v55 = vsel %vm1882_vm4, %v7534_v49, %v7557_v15  ;;  %v7776_v14 = vmul.f32 %v7356_v54, %v1895_v27 }
 0x1de   : > { %v2177_v50 = vmul.f32 %v7352_v44, %v2138_v25  ;;  %11048 = vst [vmem:[#allocation49_spill] sm:$0xff] %v7779_v17  ;;  %v1803_v35 = vmul.f32 %v7779_v17, %v7342_v28  ;;  %v7785_v53 = vmul.f32 %v7392_v7, %v2138_v25  ;;  %v2178_v0 = vmul.f32 %v7352_v44, %v7758_v37 }
 0x1df   : > { %1874 = vrot.lane.b32.xlu1 %v7701_v63, %s6743_s23  ;;  %2116 = vrot.lane.b32.xlu0 %v7701_v63, %s6746_s15  ;;  %11047 = vst [vmem:[#allocation48_spill] sm:$0xff] %v7776_v14  ;;  %v2040_v63 = vadd.f32 %v2007_v32, %v1970_v34  ;;  %v7792_v49 = vmul.f32 %v7386_v61, %v2138_v25 }
 0x1e0   : > { %11049 = vst [vmem:[#allocation50_spill] sm:$0xff] %v7785_v53  ;;  %v1942_v27 = vmul.f32 %v7408_v42, %v1894_v55  ;;  %v7796_v56 = vmul.f32 %v7371_v31, %v1894_v55  ;;  %v7802_v34 = vsel %vm2122_vm5, %v7660_v52, %v7662_v38  ;;  %v7805_v32 = vmul.f32 %v7356_v54, %v1894_v55 }
 0x1e1   : > { %11050 = vst [vmem:[#allocation51_spill] sm:$0xff] %v7792_v49  ;;  %v1893_v25 = vsel %vm1882_vm4, %v7557_v15, %v7576_v2  ;;  %v2136_v49 = vsel %vm2122_vm5, %v7599_v8, %v7660_v52  ;;  %v2210_v55 = vadd.f32 %v2177_v50, %v2040_v63  ;;  %v1804_v5 = vmul.f32 %v7821_v13, %v7342_v28  ;;  %v7825_v15 = vld [vmem:[#allocation2 + $0xc0] sm:$0xff] }
 0x1e2   : > { %11052 = vst [vmem:[#allocation53_spill] sm:$0xff] %v7825_v15  ;;  %v1892_v8 = vsel %vm1882_vm4, %v7576_v2, %v7578_v20  ;;  %v1891_v63 = vsel %vm1882_vm4, %v7578_v20, %v7601_v46  ;;  %v2010_v50 = vmul.f32 %v7630_v30, %v7336_v11  ;;  %v1943_v57 = vmul.f32 %v7408_v42, %v1893_v25 }
 0x1e3   : > { %2110 = vrot.lane.b32.xlu1 %v7273_v10, %s6746_s15  ;;  %4166 = vperm.xlu0 %6585, %v7746_v6   ;;  %v2008_v10 = vmul.f32 %v7618_v36, %v7336_v11  ;;  %v7815_v36 = vpop.permute.xlu1 %1866  ;;  %v2009_v2 = vmul.f32 %v7622_v21, %v7336_v11  ;;  %v2179_v18 = vmul.f32 %v7352_v44, %v2136_v49 }
 0x1e4   : > { %v7850_v20 = vmul.f32 %v7371_v31, %v1893_v25  ;;  %v1945_v30 = vmul.f32 %v7408_v42, %v1891_v63  ;;  %v2317_v21 = vmul.f32 %v7392_v7, %v7758_v37  ;;  %v2280_v62 = vadd.f32 %v7719_v3, %v2210_v55 }
 0x1e5   : > { %v2041_v53 = vadd.f32 %v2008_v10, %v1971_v26  ;;  %v1805_v26 = vmul.f32 %v7825_v15, %v7342_v28  ;;  %v2180_v10 = vmul.f32 %v7352_v44, %v7802_v34  ;;  %v7842_v15 = vadd.f32 %v1942_v27, %v1803_v35  ;;  %v7856_v35 = vld [vmem:[#allocation2 + $0xf8] sm:$0xff] }
 0x1e6   : > { %v7817_v14 = vpop.permute.xlu0 %1868  ;;  %11055 = vst [vmem:[#allocation55_spill] sm:$0xff] %v7856_v35  ;;  %v7861_v27 = vmul.f32 %v7371_v31, %v1892_v8  ;;  %v2042_v9 = vadd.f32 %v2009_v2, %v7727_v43  ;;  %v2134_v43 = vsel %vm2122_vm5, %v7662_v38, %v7739_v4  ;;  %v7892_v2 = vmul.f32 %v7356_v54, %v1891_v63 }
 0x1e7   : > { %2114 = vrot.lane.b32.xlu1 %v7585_v59, %s6746_s15  ;;  %v2211_v52 = vadd.f32 %v2178_v0, %v2041_v53  ;;  %6589 = vset.pattern.permute.xlu0 %v11053_v39  ;;  %v7853_v53 = vmul.f32 %v7356_v54, %v1893_v25  ;;  %v1944_v0 = vmul.f32 %v7408_v42, %v1892_v8 }
 0x1e8   : > { %4475 = vperm.xlu0 %6589, %v7746_v6   ;;  %v2043_v39 = vadd.f32 %v2010_v50, %v1973_v16  ;;  %11056 = vst [vmem:[#allocation56_spill] sm:$0xff] %v7861_v27  ;;  %v7868_v25 = vmul.f32 %v7356_v54, %v1892_v8  ;;  %v2318_v50 = vmul.f32 %v7392_v7, %v2136_v49  ;;  %v11058_v8 = vmov 6   ;;  %11059 = vst [vmem:[#allocation58_spill] sm:$0xff] %v7892_v2 }
 0x1e9   : > { %11054 = vst [vmem:[#allocation54_spill] sm:$0xff] %v7853_v53  ;;  %v2281_v16 = vadd.f32 %v7722_v60, %v2211_v52  ;;  %v1806_v27 = vmul.f32 %v7664_v58, %v7342_v28  ;;  %v2212_v41 = vadd.f32 %v2179_v18, %v2042_v9  ;;  %v7884_v60 = vadd.f32 %v1943_v57, %v1804_v5 }
 0x1ea   : > { %v2213_v53 = vadd.f32 %v2180_v10, %v2043_v39  ;;  %v7886_v52 = vadd.f32 %v1944_v0, %v1805_v26  ;;  %v7889_v10 = vmul.f32 %v7371_v31, %v1891_v63  ;;  %v7897_v9 = vadd.f32 %v2317_v21, %v2280_v62  ;;  %v7942_v39 = vld [vmem:[#allocation2 + $0xd0] sm:$0xff] }
 0x1eb   : > { %2118 = vrot.lane.b32.xlu1 %v7856_v35, %s6746_s15  ;;  %v7872_v51 = vpop.permute.xlu1 %1870  ;;  %v7874_v35 = vpop.permute.xlu0 %2100  ;;  %v7895_v18 = vadd.f32 %v1945_v30, %v1806_v27  ;;  %v7901_v38 = vmul.f32 %v7386_v61, %v7758_v37  ;;  %v1890_v5 = vsel %vm1882_vm4, %v7601_v46, %v7741_v1  ;;  %v2351_v57 = vadd.f32 %v2318_v50, %v2281_v16 }
 0x1ec   : > { %11057 = vst [vmem:[#allocation57_spill] sm:$0xff] %v7872_v51  ;;  %6591 = vset.pattern.permute.xlu0 %v11058_v8  ;;  %11060 = vst [vmem:[#allocation59_spill] sm:$0xff] %v7897_v9  ;;  %v2283_v3 = vadd.f32 %v7752_v29, %v2213_v53  ;;  %v2320_v55 = vmul.f32 %v7392_v7, %v2134_v43  ;;  %v1889_v62 = vsel %vm1882_vm4, %v7741_v1, %v7815_v36  ;;  %v7955_v8 = vld [vmem:[#allocation2 + $0xd8] sm:$0xff] }
 0x1ed   : > { %4615 = vperm.xlu0 %6591, %v7746_v6   ;;  %11061 = vst [vmem:[#allocation60_spill] sm:$0xff] %v7901_v38  ;;  %v7917_v30 = vmul.f32 %v7386_v61, %v2136_v49  ;;  %v2282_v37 = vadd.f32 %v7749_v33, %v2212_v41  ;;  %v2011_v46 = vmul.f32 %v7634_v48, %v7336_v11  ;;  %v7938_v41 = vld [vmem:[%s10883_s5] sm:$0xf]  ;;  %v11066_v33 = vmov 8  }
 0x1ee   : > { %v2181_v26 = vmul.f32 %v7352_v44, %v2134_v43  ;;  %v2319_v29 = vmul.f32 %v7392_v7, %v7802_v34  ;;  %v7927_v63 = vmul.f32 %v7386_v61, %v7802_v34  ;;  %v7930_v1 = vmul.f32 %v7386_v61, %v2134_v43 }
 0x1ef   : > { %4030 = vperm.xlu1 %6586, %v7746_v6   ;;  %v7914_v21 = vpop.permute.xlu1 %2102  ;;  %11062 = vst [vmem:[#allocation61_spill] sm:$0xff] %v7917_v30  ;;  %v1946_v49 = vmul.f32 %v7408_v42, %v1890_v5  ;;  %v7933_v53 = vpop.permute.xlu0 %2104  ;;  %v2044_v0 = vadd.f32 %v2011_v46, %v7760_v45  ;;  %v1807_v34 = vmul.f32 %v7942_v39, %v7342_v28  ;;  %v11068_v38 = vmov 1  }
 0x1f0   : > { %11063 = vst [vmem:[#allocation62_spill] sm:$0xff] %v7927_v63  ;;  %11064 = vst [vmem:[#allocation63_spill] sm:$0xff] %v7930_v1  ;;  %v1947_v27 = vmul.f32 %v7408_v42, %v1889_v62  ;;  %v1888_v16 = vsel %vm1882_vm4, %v7815_v36, %v7817_v14  ;;  %v7953_v50 = vadd.f32 %v7763_v12, %v2351_v57  ;;  %v11088_v1 = vmov 7  }
 0x1f1   : > { %11065 = vst [vmem:[#allocation64_spill] sm:$0xff] %v7933_v53  ;;  %6592 = vset.pattern.permute.xlu0 %v11066_v33  ;;  %v2353_v43 = vadd.f32 %v2320_v55, %v2283_v3  ;;  %v1808_v45 = vmul.f32 %v7955_v8, %v7342_v28  ;;  %v2133_v46 = vsel %vm2122_vm5, %v7739_v4, %v7874_v35 }
 0x1f2   : > { %2579 = vperm.xlu0 %6592, %v7938_v41   ;;  %11067 = vst [vmem:[#allocation65_spill] sm:$0xff] %v7953_v50  ;;  %v7966_v36 = vadd.f32 %v2319_v29, %v2282_v37  ;;  %v2214_v63 = vadd.f32 %v2181_v26, %v2044_v0  ;;  %v7969_v12 = vmul.f32 %v7371_v31, %v1890_v5  ;;  %v7986_v26 = vld [vmem:[#allocation2 + $0xe0] sm:$0xff] }
 0x1f3   : > { %v7963_v33 = vpop.permute.xlu1 %1818  ;;  %6587 = vset.pattern.permute.xlu1 %v11068_v38  ;;  %v7972_v57 = vmul.f32 %v7356_v54, %v1890_v5  ;;  %v7975_v3 = vadd.f32 %v1946_v49, %v1807_v34  ;;  %v7978_v55 = vmul.f32 %v7371_v31, %v1889_v62  ;;  %v7981_v4 = vmul.f32 %v7356_v54, %v1889_v62 }
 0x1f4   : > { %11069 = vst [vmem:[#allocation66_spill] sm:$0xff] %v7969_v12  ;;  %4236 = vperm.xlu1 %6587, %v7746_v6   ;;  %v1948_v38 = vmul.f32 %v7408_v42, %v1888_v16  ;;  %v7984_v37 = vadd.f32 %v1947_v27, %v1808_v45  ;;  %v1809_v5 = vmul.f32 %v7986_v26, %v7342_v28 }
 0x1f5   : > { %11070 = vst [vmem:[#allocation67_spill] sm:$0xff] %v7972_v57  ;;  %11071 = vst [vmem:[#allocation68_spill] sm:$0xff] %v7978_v55  ;;  %v2012_v29 = vmul.f32 %v7638_v19, %v7336_v11  ;;  %v2182_v49 = vmul.f32 %v7352_v44, %v2133_v46  ;;  %v7995_v0 = vadd.f32 %v7805_v32, %v2353_v43  ;;  %v6630_v19 = vld [vmem:[#allocation2 + $0x8] sm:$0xff] }
 0x1f6   : > { %11072 = vst [vmem:[#allocation69_spill] sm:$0xff] %v7981_v4  ;;  %4755 = vperm.xlu0 %6592, %v7746_v6   ;;  %v7998_v62 = vmul.f32 %v7371_v31, %v1888_v16  ;;  %v1810_v34 = vmul.f32 %v7342_v28, %v7585_v59  ;;  %v1887_v27 = vsel %vm1882_vm4, %v7817_v14, %v7872_v51 }
 0x1f7   : > { %11073 = vst [vmem:[#allocation70_spill] sm:$0xff] %v7995_v0  ;;  %v8007_v55 = vmul.f32 %v7356_v54, %v1888_v16  ;;  %v2045_v57 = vadd.f32 %v2012_v29, %v7842_v15  ;;  %v2321_v32 = vmul.f32 %v7392_v7, %v2133_v46  ;;  %v8017_v12 = vadd.f32 %v1948_v38, %v1809_v5 }
 0x1f8   : > { %11074 = vst [vmem:[#allocation71_spill] sm:$0xff] %v7998_v62  ;;  %v1817_v45 = vpop.permute.xlu0 %1816  ;;  %v2059_v4 = vpop.permute.xlu1 %2058  ;;  %v11076_v62 = vmov 2   ;;  %v2284_v14 = vadd.f32 %v7796_v56, %v2214_v63  ;;  %v8021_v51 = vmul.f32 %v7386_v61, %v2133_v46  ;;  %v2013_v16 = vmul.f32 %v7779_v17, %v7336_v11 }
 0x1f9   : > { %11075 = vst [vmem:[#allocation72_spill] sm:$0xff] %v8007_v55  ;;  %v8014_v43 = vsel %vm2122_vm5, %v7452_v24, %v2059_v4  ;;  %6588 = vset.pattern.permute.xlu1 %v11076_v62  ;;  %v1949_v15 = vmul.f32 %v7408_v42, %v1887_v27  ;;  %v2215_v29 = vadd.f32 %v2182_v49, %v2045_v57  ;;  %v11078_v5 = vmov 4   ;;  %v6627_v62 = vld [vmem:[#allocation2 + $0x10] sm:$0xff] }
 0x1fa   : > { %11077 = vst [vmem:[#allocation73_spill] sm:$0xff] %v8021_v51  ;;  %4405 = vperm.xlu1 %6588, %v7746_v6   ;;  %v1991_v24 = vmul.f32 %v7587_v47, %v7336_v11  ;;  %v2161_v38 = vmul.f32 %v7352_v44, %v8014_v43  ;;  %6594 = vset.pattern.permute.xlu0 %v11078_v5  ;;  %v11086_v47 = vld [vmem:[#allocation10_spill] sm:$0xff] }
 0x1fb   : > { %v8033_v56 = vmul.f32 %v7371_v31, %v1887_v27  ;;  %v2046_v63 = vadd.f32 %v2013_v16, %v7884_v60  ;;  %v2014_v46 = vmul.f32 %v7821_v13, %v7336_v11  ;;  %v1783_v55 = vmul.f32 %v6627_v62, %v7342_v28 }
 0x1fc   : > { %v8040_v57 = vmul.f32 %v7356_v54, %v1887_v27  ;;  %v8042_v49 = vadd.f32 %v2321_v32, %v2284_v14  ;;  %v2132_v5 = vsel %vm2122_vm5, %v7874_v35, %v7914_v21  ;;  %v2131_v16 = vsel %vm2122_vm5, %v7914_v21, %v7933_v53 }
 0x1fd   : > { %11079 = vst [vmem:[#allocation74_spill] sm:$0xff] %v8033_v56  ;;  %v2024_v56 = vadd.f32 %v1991_v24, %v7654_v40  ;;  %v2047_v60 = vadd.f32 %v2014_v46, %v7886_v52  ;;  %v1914_v27 = vsel %vm1882_vm4, %v7450_v23, %v1817_v45  ;;  %v2300_v32 = vmul.f32 %v7392_v7, %v8014_v43  ;;  %v8065_v52 = vld [vmem:[#allocation2 + $0x18] sm:$0xff] }
 0x1fe   : > { %11080 = vst [vmem:[#allocation75_spill] sm:$0xff] %v8040_v57  ;;  %11081 = vst [vmem:[#allocation76_spill] sm:$0xff] %v8042_v49  ;;  %v8059_v14 = vpop.permute.xlu0 %1820  ;;  %v11082_v57 = vmov 5   ;;  %v8062_v35 = vadd.f32 %v1949_v15, %v1810_v34  ;;  %v2285_v40 = vadd.f32 %v7850_v20, %v2215_v29  ;;  %v1784_v21 = vmul.f32 %v8065_v52, %v7342_v28  ;;  %v11084_v34 = vld [vmem:[#allocation38_spill] sm:$0xff] }
 0x1ff   : > { %6590 = vset.pattern.permute.xlu1 %v11082_v57  ;;  %v2194_v24 = vadd.f32 %v2161_v38, %v2024_v56  ;;  %v2322_v23 = vmul.f32 %v7392_v7, %v2132_v5  ;;  %v8074_v46 = vsel %vm1882_vm4, %v1817_v45, %v7963_v33  ;;  %v8076_v57 = vld [vmem:[#allocation2 + $0x20] sm:$0xff]  ;;  %v11085_v15 = vld [vmem:[#allocation34_spill] sm:$0xff]  ;;  %v2183_v38 = vmul.f32 %v7352_v44, %v2132_v5 }
 0x200   : > { %11083 = vst [vmem:[#allocation77_spill] sm:$0xff] %v8062_v35  ;;  %4545 = vperm.xlu1 %6590, %v7746_v6   ;;  %v8080_v20 = vmul.f32 %v8076_v57, %v7342_v28  ;;  %v2263_v29 = vadd.f32 %v11085_v15, %v11084_v34  ;;  %v2184_v56 = vmul.f32 %v7352_v44, %v2131_v16  ;;  %v11096_v35 = vld [vmem:[#allocation15_spill] sm:$0xff] }
 0x201   : > { %v2231_v53 = vmul.f32 %v7371_v31, %v1914_v27  ;;  %v8089_v51 = vmul.f32 %v7342_v28, %v11086_v47  ;;  %v8092_v45 = vmul.f32 %v7386_v61, %v2132_v5  ;;  %v1922_v0 = vmul.f32 %v7408_v42, %v1914_v27 }
 0x202   : > { %v2061_v13 = vpop.permute.xlu0 %2060  ;;  %v1992_v17 = vmul.f32 %v6630_v19, %v7336_v11  ;;  %v2333_v34 = vadd.f32 %v2300_v32, %v2263_v29  ;;  %v2323_v15 = vmul.f32 %v7392_v7, %v2131_v16  ;;  %v1923_v49 = vmul.f32 %v7408_v42, %v8074_v46 }
 0x203   : > { %11087 = vst [vmem:[#allocation38_spill] sm:$0xff] %v8092_v45  ;;  %v2153_v30 = vsel %vm2122_vm5, %v2059_v4, %v2061_v13  ;;  %v2264_v47 = vadd.f32 %v2231_v53, %v2194_v24  ;;  %v2355_v5 = vadd.f32 %v2322_v23, %v2285_v40  ;;  %v8103_v45 = vmul.f32 %v7386_v61, %v2131_v16  ;;  %v11090_v16 = vld [vmem:[#allocation13_spill] sm:$0xff] }
 0x204   : > { %6593 = vset.pattern.permute.xlu1 %v11088_v1  ;;  %v2370_v2 = vmul.f32 %v7356_v54, %v1914_v27  ;;  %v8106_v50 = vpop.permute.xlu1 %1822  ;;  %v2301_v32 = vmul.f32 %v7392_v7, %v2153_v30  ;;  %v2216_v29 = vadd.f32 %v2183_v38, %v2046_v63  ;;  %v8110_v48 = vadd.f32 %v2184_v56, %v2047_v60  ;;  %v11091_v27 = vld [vmem:[#allocation11_spill] sm:$0xff]  ;;  %v11093_v60 = vld [vmem:[#allocation17_spill] sm:$0xff] }
 0x205   : > { %11089 = vst [vmem:[#allocation34_spill] sm:$0xff] %v8103_v45  ;;  %4685 = vperm.xlu1 %6593, %v7746_v6   ;;  %v1993_v4 = vmul.f32 %v6627_v62, %v7336_v11  ;;  %v8115_v1 = vmul.f32 %v8065_v52, %v7336_v11  ;;  %v1955_v53 = vadd.f32 %v1922_v0, %v1783_v55 }
 0x206   : > { %v8119_v40 = vmul.f32 %v7342_v28, %v11090_v16  ;;  %v8123_v24 = vmul.f32 %v7342_v28, %v11091_v27  ;;  %v2403_v23 = vadd.f32 %v2370_v2, %v2333_v34  ;;  %v1956_v6 = vadd.f32 %v1923_v49, %v1784_v21  ;;  %v11097_v2 = vld [vmem:[#allocation56_spill] sm:$0xff] }
 0x207   : > { %v2371_v63 = vmul.f32 %v7356_v54, %v8074_v46  ;;  %v8129_v38 = vmul.f32 %v7342_v28, %v11093_v60  ;;  %v2334_v56 = vadd.f32 %v2301_v32, %v2264_v47  ;;  %v8132_v55 = vadd.f32 %v7868_v25, %v2355_v5 }
 0x208   : > { %11092 = vst [vmem:[#allocation10_spill] sm:$0xff] %v8123_v24  ;;  %v2162_v0 = vmul.f32 %v7352_v44, %v2153_v30  ;;  %v2063_v45 = vpop.permute.xlu1 %2062  ;;  %v2441_v9 = vmul.f32 %v6627_v62, %v11096_v35  ;;  %v2440_v27 = vmul.f32 %v6630_v19, %v11096_v35  ;;  %v2286_v49 = vadd.f32 %v11097_v2, %v2216_v29  ;;  %v6632_v2 = vld [vmem:[#allocation2 + $0x38] sm:$0xff] }
 0x209   : > { %11094 = vst [vmem:[#allocation13_spill] sm:$0xff] %v8129_v38  ;;  %11095 = vst [vmem:[#allocation11_spill] sm:$0xff] %v8132_v55  ;;  %v2152_v21 = vsel %vm2122_vm5, %v2061_v13, %v2063_v45  ;;  %v2404_v34 = vadd.f32 %v2371_v63, %v2334_v56  ;;  %v2025_v24 = vadd.f32 %v1992_v17, %v1955_v53  ;;  %v6631_v17 = vld [vmem:[#allocation2 + $0x28] sm:$0xff]  ;;  %v11101_v63 = vld [vmem:[#allocation21_spill] sm:$0xff] }
 0x20a   : > { %v2163_v47 = vmul.f32 %v7352_v44, %v2152_v21  ;;  %v2473_v32 = vadd.f32 %v2440_v27, %v2403_v23  ;;  %v2510_v25 = vmul.f32 %v7386_v61, %v2153_v30  ;;  %v2026_v5 = vadd.f32 %v1993_v4, %v1956_v6  ;;  %v11098_v53 = vld [vmem:[#allocation16_spill] sm:$0xff]  ;;  %v8160_v23 = vpop.permute.xlu0 %2064 }
 0x20b   : > { %v2474_v55 = vadd.f32 %v2441_v9, %v2404_v34  ;;  %v2511_v38 = vmul.f32 %v7386_v61, %v2152_v21  ;;  %v8145_v19 = vmul.f32 %v8076_v57, %v7336_v11  ;;  %v1912_v13 = vsel %vm1882_vm4, %v7963_v33, %v8059_v14 }
 0x20c   : > { %v2195_v62 = vadd.f32 %v2162_v0, %v2025_v24  ;;  %v8152_v29 = vmul.f32 %v6631_v17, %v7336_v11  ;;  %v8156_v30 = vmul.f32 %v7342_v28, %v11098_v53  ;;  %v8158_v9 = vadd.f32 %v2323_v15, %v2286_v49 }
 0x20d   : > { %v2196_v4 = vadd.f32 %v2163_v47, %v2026_v5  ;;  %v2544_v6 = vadd.f32 %v2511_v38, %v2474_v55  ;;  %v8164_v56 = vmul.f32 %v7342_v28, %v11101_v63  ;;  %v2232_v33 = vmul.f32 %v7371_v31, %v8074_v46  ;;  %v8193_v47 = vpop.permute.xlu1 %1824  ;;  %v11109_v5 = vld [vmem:[#allocation23_spill] sm:$0xff] }
 0x20e   : > { %11099 = vst [vmem:[#allocation17_spill] sm:$0xff] %v8156_v30  ;;  %11100 = vst [vmem:[#allocation15_spill] sm:$0xff] %v8158_v9  ;;  %v2543_v24 = vadd.f32 %v2510_v25, %v2473_v32  ;;  %v8170_v0 = vmul.f32 %v8076_v57, %v11096_v35  ;;  %v8174_v15 = vmul.f32 %v8065_v52, %v11096_v35 }
 0x20f   : > { %11102 = vst [vmem:[#allocation56_spill] sm:$0xff] %v8164_v56  ;;  %v1924_v27 = vmul.f32 %v7408_v42, %v1912_v13  ;;  %v2233_v38 = vmul.f32 %v7371_v31, %v1912_v13  ;;  %2585 = vmatprep.subr.mxu1 %v2544_v6  ;;  %v8180_v55 = vmul.f32 %v7336_v11, %v11090_v16  ;;  %v11111_v6 = vld [vmem:[#allocation22_spill] sm:$0xff] }
 0x210   : > { %v8183_v46 = vmul.f32 %v6632_v2, %v7336_v11  ;;  %v8187_v57 = vmul.f32 %v7386_v61, %v8014_v43  ;;  %v2265_v49 = vadd.f32 %v2232_v33, %v2195_v62  ;;  %v2302_v52 = vmul.f32 %v7392_v7, %v2152_v21  ;;  %2586 = vmatpush1.msra.mxu1 %v2543_v24  ;;  %v11106_v21 = vld [vmem:[#allocation19_spill] sm:$0xff]  ;;  %v6633_v24 = vld [vmem:[#allocation2 + $0x30] sm:$0xff] }
 0x211   : > { %v2151_v34 = vsel %vm2122_vm5, %v2063_v45, %v8160_v23  ;;  %v1911_v16 = vsel %vm1882_vm4, %v8059_v14, %v8106_v50  ;;  %v2266_v32 = vadd.f32 %v2233_v38, %v2196_v4  ;;  %6398 = vmatmul.mubr.msk.f32.vlgmr.msra.gmra.mrb[0].mxu1 %vm2582_vm6, %v7938_v41  ;;  %v8202_v43 = vmul.f32 %v6632_v2, %v11096_v35  ;;  %v11113_v4 = vld [vmem:[#allocation24_spill] sm:$0xff] }
 0x212   : > { %11103 = vst [vmem:[#allocation16_spill] sm:$0xff] %v8183_v46  ;;  %11104 = vst [vmem:[#allocation21_spill] sm:$0xff] %v8187_v57  ;;  %v8206_v25 = vmul.f32 %v7342_v28, %v11106_v21  ;;  %v11108_v45 = vmov 0.0   ;;  %v8211_v62 = vmul.f32 %v7342_v28, %v11109_v5  ;;  %v8215_v14 = vmul.f32 %v7342_v28, %v11111_v6 }
 0x213   : > { %11105 = vst [vmem:[#allocation78_spill] sm:$0xff] %v8202_v43  ;;  %2720 = vmatprep.mubr.f32.mxu1 %v11108_v45  ;;  %v8219_v33 = vmul.f32 %v7342_v28, %v11113_v4  ;;  %v8222_v38 = vmul.f32 %v6633_v24, %v11096_v35  ;;  %v1957_v2 = vadd.f32 %v1924_v27, %v8080_v20 }
 0x214   : > { %11107 = vst [vmem:[#allocation19_spill] sm:$0xff] %v8206_v25  ;;  %11110 = vst [vmem:[#allocation23_spill] sm:$0xff] %v8211_v62  ;;  %v2372_v57 = vmul.f32 %v7356_v54, %v1912_v13  ;;  %v2303_v25 = vmul.f32 %v7392_v7, %v2151_v34  ;;  %v8228_v62 = vmul.f32 %v6631_v17, %v11096_v35  ;;  %v8244_v17 = vld [vmem:[#allocation2 + $0x78] sm:$0xff] }
 0x215   : > { %11112 = vst [vmem:[#allocation22_spill] sm:$0xff] %v8215_v14  ;;  %11114 = vst [vmem:[#allocation24_spill] sm:$0xff] %v8219_v33  ;;  %v1925_v43 = vmul.f32 %v7408_v42, %v1911_v16  ;;  %v2335_v14 = vadd.f32 %v2302_v52, %v2265_v49  ;;  %v8233_v56 = vmul.f32 %v7336_v11, %v11093_v60  ;;  %v8250_v52 = vpop.permute.xlu0 %1828 }
 0x216   : > { %v8237_v24 = vmul.f32 %v7336_v11, %v11098_v53  ;;  %v2164_v20 = vmul.f32 %v7352_v44, %v2151_v34  ;;  %v2336_v27 = vadd.f32 %v2303_v25, %v2266_v32  ;;  %v8242_v13 = vmul.f32 %v11096_v35, %v11098_v53  ;;  %v8252_v33 = vpop.permute.xlu1 %1826 }
 0x217   : > { %11115 = vst [vmem:[#allocation79_spill] sm:$0xff] %v8233_v56  ;;  %v8248_v49 = vmul.f32 %v8244_v17, %v7342_v28  ;;  %v11119_v56 = vld [vmem:[#allocation47_spill] sm:$0xff]  ;;  %v8260_v32 = vmul.f32 %v8244_v17, %v7336_v11  ;;  %v8264_v53 = vmul.f32 %v7336_v11, %v11113_v4  ;;  %v8268_v25 = vmul.f32 %v11096_v35, %v11093_v60 }
 0x218   : > { %11116 = vst [vmem:[#allocation80_spill] sm:$0xff] %v8237_v24  ;;  %11117 = vst [vmem:[#allocation81_spill] sm:$0xff] %v8242_v13  ;;  %v8256_v24 = vmul.f32 %v11119_v56, %v7342_v28  ;;  %v2373_v13 = vmul.f32 %v7356_v54, %v1911_v16  ;;  %v8274_v30 = vmul.f32 %v7336_v11, %v11101_v63 }
 0x219   : > { %11118 = vst [vmem:[#allocation82_spill] sm:$0xff] %v8248_v49  ;;  %11121 = vst [vmem:[#allocation83_spill] sm:$0xff] %v8260_v32  ;;  %v2027_v49 = vadd.f32 %v8115_v1, %v1957_v2  ;;  %v1958_v32 = vadd.f32 %v1925_v43, %v8089_v51  ;;  %v2405_v46 = vadd.f32 %v2372_v57, %v2335_v14 }
 0x21a   : > { %11120 = vst [vmem:[#allocation47_spill] sm:$0xff] %v8256_v24  ;;  %11122 = vst [vmem:[#allocation84_spill] sm:$0xff] %v8264_v53  ;;  %v8278_v24 = vmul.f32 %v7336_v11, %v11106_v21  ;;  %v1910_v60 = vsel %vm1882_vm4, %v8106_v50, %v8193_v47  ;;  %v8287_v53 = vmul.f32 %v11096_v35, %v11106_v21 }
 0x21b   : > { %11123 = vst [vmem:[#allocation85_spill] sm:$0xff] %v8268_v25  ;;  %11124 = vst [vmem:[#allocation86_spill] sm:$0xff] %v8274_v30  ;;  %v2234_v1 = vmul.f32 %v7371_v31, %v1911_v16  ;;  %v2197_v2 = vadd.f32 %v2164_v20, %v2027_v49  ;;  %v2406_v30 = vadd.f32 %v2373_v13, %v2336_v27  ;;  %v11127_v25 = vld [vmem:[#allocation40_spill] sm:$0xff]  ;;  %v11132_v16 = vld [vmem:[#allocation53_spill] sm:$0xff]  ;;  %v2069_v13 = vpop.permute.xlu0 %2068 }
 0x21c   : > { %11125 = vst [vmem:[#allocation87_spill] sm:$0xff] %v8278_v24  ;;  %11126 = vst [vmem:[#allocation88_spill] sm:$0xff] %v8287_v53  ;;  %v8292_v9 = vmul.f32 %v7342_v28, %v11127_v25  ;;  %v2067_v24 = vpop.permute.xlu1 %2066  ;;  %v8296_v51 = vmul.f32 %v7336_v11, %v11109_v5  ;;  %v8300_v50 = vmul.f32 %v7336_v11, %v11111_v6 }
 0x21d   : > { %v8304_v57 = vmul.f32 %v11096_v35, %v11111_v6  ;;  %v2015_v43 = vmul.f32 %v11132_v16, %v7336_v11  ;;  %v2512_v21 = vmul.f32 %v7386_v61, %v2151_v34  ;;  %v1926_v14 = vmul.f32 %v7408_v42, %v1910_v60 }
 0x21e   : > { %11128 = vst [vmem:[#allocation89_spill] sm:$0xff] %v8292_v9  ;;  %11129 = vst [vmem:[#allocation90_spill] sm:$0xff] %v8296_v51  ;;  %v2150_v20 = vsel %vm2122_vm5, %v8160_v23, %v2067_v24  ;;  %v2016_v27 = vmul.f32 %v7664_v58, %v7336_v11  ;;  %v2028_v49 = vadd.f32 %v8145_v19, %v1958_v32 }
 0x21f   : > { %11130 = vst [vmem:[#allocation91_spill] sm:$0xff] %v8300_v50  ;;  %11131 = vst [vmem:[#allocation92_spill] sm:$0xff] %v8304_v57  ;;  %v2165_v6 = vmul.f32 %v7352_v44, %v2150_v20  ;;  %v2304_v57 = vmul.f32 %v7392_v7, %v2150_v20  ;;  %v2475_v9 = vadd.f32 %v8174_v15, %v2405_v46 }
 0x220   : > { %v2149_v34 = vsel %vm2122_vm5, %v2067_v24, %v2069_v13  ;;  %v2267_v53 = vadd.f32 %v2234_v1, %v2197_v2  ;;  %v2513_v50 = vmul.f32 %v7386_v61, %v2150_v20  ;;  %v2476_v23 = vadd.f32 %v8170_v0, %v2406_v30 }
 0x221   : > { %v2235_v51 = vmul.f32 %v7371_v31, %v1910_v60  ;;  %v2198_v25 = vadd.f32 %v2165_v6, %v2028_v49  ;;  %v8325_v16 = vadd.f32 %v2015_v43, %v7895_v18  ;;  %v8328_v19 = vadd.f32 %v2016_v27, %v7975_v3 }
 0x222   : > { %v1959_v32 = vadd.f32 %v1926_v14, %v8119_v40  ;;  %v2337_v15 = vadd.f32 %v2304_v57, %v2267_v53  ;;  %v2546_v46 = vadd.f32 %v2513_v50, %v2476_v23  ;;  %v8333_v24 = vadd.f32 %v7889_v10, %v8110_v48  ;;  %v11133_v10 = vld [vmem:[#allocation55_spill] sm:$0xff]  ;;  %v8355_v2 = vpop.permute.xlu1 %1830 }
 0x223   : > { %v1909_v30 = vsel %vm1882_vm4, %v8193_v47, %v8252_v33  ;;  %v2268_v0 = vadd.f32 %v2235_v51, %v2198_v25  ;;  %v2305_v18 = vmul.f32 %v7392_v7, %v2149_v34  ;;  %v2545_v1 = vadd.f32 %v2512_v21, %v2475_v9  ;;  %v8353_v25 = vpop.permute.xlu0 %1832  ;;  %v11134_v9 = vld [vmem:[#allocation26_spill] sm:$0xff] }
 0x224   : > { %v2374_v3 = vmul.f32 %v7356_v54, %v1910_v60  ;;  %2656 = vmatprep.subr.mxu1 %v2546_v46  ;;  %v8343_v40 = vmul.f32 %v7664_v58, %v11096_v35  ;;  %v8347_v48 = vmul.f32 %v11096_v35, %v11101_v63  ;;  %v8351_v53 = vmul.f32 %v11133_v10, %v7342_v28  ;;  %v11139_v46 = vld [vmem:[#allocation59_spill] sm:$0xff] }
 0x225   : > { %v2338_v47 = vadd.f32 %v2305_v18, %v2268_v0  ;;  %2657 = vmatpush1.msra.mxu1 %v2545_v1  ;;  %v8359_v60 = vmul.f32 %v11134_v9, %v7342_v28  ;;  %v2017_v58 = vmul.f32 %v7942_v39, %v7336_v11  ;;  %v2018_v63 = vmul.f32 %v7955_v8, %v7336_v11  ;;  %v11140_v0 = vld [vmem:[#allocation46_spill] sm:$0xff] }
 0x226   : > { %v2375_v51 = vmul.f32 %v7356_v54, %v1909_v30  ;;  %v2029_v50 = vadd.f32 %v8152_v29, %v1959_v32  ;;  %v2407_v57 = vadd.f32 %v2374_v3, %v2337_v15  ;;  %6399 = vmatmul.mubr.msk.f32.vlgmr.msra.gmra.mrb[2].mxu1 %vm2582_vm6, %v7938_v41  ;;  %v8371_v43 = vmul.f32 %v7955_v8, %v11096_v35  ;;  %v2071_v49 = vpop.permute.xlu1 %2070  ;;  %v11141_v3 = vld [vmem:[#allocation10_spill] sm:$0xff] }
 0x227   : > { %11135 = vst [vmem:[#allocation55_spill] sm:$0xff] %v8359_v60  ;;  %v1927_v28 = vmul.f32 %v7408_v42, %v1909_v30  ;;  %2791 = vmatprep.mubr.f32.mxu1 %v11108_v45  ;;  %v8376_v21 = vadd.f32 %v2017_v58, %v7984_v37  ;;  %v8379_v14 = vadd.f32 %v2018_v63, %v8017_v12 }
 0x228   : > { %11136 = vst [vmem:[#allocation26_spill] sm:$0xff] %v8371_v43  ;;  %v8383_v29 = vmul.f32 %v11096_v35, %v11109_v5  ;;  %v1908_v8 = vsel %vm1882_vm4, %v8252_v33, %v8250_v52  ;;  %v2408_v20 = vadd.f32 %v2375_v51, %v2338_v47  ;;  %v8391_v27 = vmul.f32 %v11119_v56, %v11096_v35  ;;  %v11138_v33 = vld [vmem:[#allocation48_spill] sm:$0xff]  ;;  %v8414_v58 = vpop.permute.xlu0 %1836 }
 0x229   : > { %v2019_v37 = vmul.f32 %v7986_v26, %v7336_v11  ;;  %v2166_v12 = vmul.f32 %v7352_v44, %v2149_v34  ;;  %v8398_v5 = vmul.f32 %v7336_v11, %v7585_v59  ;;  %v8402_v6 = vmul.f32 %v11096_v35, %v7585_v59 }
 0x22a   : > { %v2422_v23 = vadd.f32 %v11138_v33, %v7966_v36  ;;  %v2148_v56 = vsel %vm2122_vm5, %v2069_v13, %v2071_v49  ;;  %v2478_v32 = vadd.f32 %v8222_v38, %v2408_v20  ;;  %v2477_v15 = vadd.f32 %v8228_v62, %v2407_v57  ;;  %v11143_v38 = vld [vmem:[#allocation77_spill] sm:$0xff]  ;;  %v11145_v62 = vld [vmem:[#allocation30_spill] sm:$0xff]  ;;  %v11146_v57 = vld [vmem:[#allocation28_spill] sm:$0xff] }
 0x22b   : > { %11137 = vst [vmem:[#allocation93_spill] sm:$0xff] %v8402_v6  ;;  %v2420_v18 = vadd.f32 %v11140_v0, %v11139_v46  ;;  %v1928_v1 = vmul.f32 %v7408_v42, %v1908_v8  ;;  %v1960_v47 = vadd.f32 %v1927_v28, %v11141_v3  ;;  %v2515_v59 = vmul.f32 %v7386_v61, %v2148_v56  ;;  %v11147_v0 = vld [vmem:[#allocation29_spill] sm:$0xff] }
 0x22c   : > { %v8419_v36 = vmul.f32 %v11096_v35, %v11113_v4  ;;  %v2514_v13 = vmul.f32 %v7386_v61, %v2149_v34  ;;  %v8423_v63 = vadd.f32 %v2019_v37, %v11143_v38  ;;  %v2459_v51 = vmul.f32 %v11145_v62, %v11096_v35  ;;  %v11148_v37 = vld [vmem:[#allocation13_spill] sm:$0xff] }
 0x22d   : > { %v2457_v20 = vmul.f32 %v11146_v57, %v11096_v35  ;;  %v2199_v28 = vadd.f32 %v2166_v12, %v2029_v50  ;;  %v2167_v33 = vmul.f32 %v7352_v44, %v2148_v56  ;;  %v2548_v46 = vadd.f32 %v2515_v59, %v2478_v32  ;;  %v11149_v57 = vld [vmem:[#allocation65_spill] sm:$0xff]  ;;  %v8438_v32 = vpop.permute.xlu0 %2072 }
 0x22e   : > { %11142 = vst [vmem:[#allocation48_spill] sm:$0xff] %v8419_v36  ;;  %11144 = vst [vmem:[#allocation59_spill] sm:$0xff] %v8423_v63  ;;  %v2458_v3 = vmul.f32 %v11147_v0, %v11096_v35  ;;  %v2236_v4 = vmul.f32 %v7371_v31, %v1909_v30  ;;  %v2547_v6 = vadd.f32 %v2514_v13, %v2477_v15  ;;  %v11160_v0 = vld [vmem:[#allocation40_spill] sm:$0xff]  ;;  %v11203_v63 = vld [vmem:[#allocation90_spill] sm:$0xff] }
 0x22f   : > { %v2492_v34 = vadd.f32 %v2459_v51, %v2422_v23  ;;  %v2490_v36 = vadd.f32 %v2457_v20, %v2420_v18  ;;  %v1961_v38 = vadd.f32 %v1928_v1, %v11148_v37  ;;  %v2030_v43 = vadd.f32 %v8180_v55, %v1960_v47  ;;  %2727 = vmatprep.subr.mxu1 %v2548_v46  ;;  %v11151_v23 = vld [vmem:[#allocation27_spill] sm:$0xff]  ;;  %v11154_v55 = vld [vmem:[#allocation58_spill] sm:$0xff]  ;;  %v11157_v51 = vld [vmem:[#allocation61_spill] sm:$0xff] }
 0x230   : > { %v2306_v62 = vmul.f32 %v7392_v7, %v2148_v56  ;;  %v2491_v50 = vadd.f32 %v2458_v3, %v11149_v57  ;;  %v2237_v12 = vmul.f32 %v7371_v31, %v1908_v8  ;;  %2728 = vmatpush1.msra.mxu1 %v2547_v6  ;;  %v8442_v30 = vmul.f32 %v8244_v17, %v11096_v35  ;;  %v11153_v18 = vld [vmem:[#allocation15_spill] sm:$0xff]  ;;  %v1835_v57 = vpop.permute.xlu1 %1834 }
 0x231   : > { %v8446_v15 = vmul.f32 %v11151_v23, %v11096_v35  ;;  %v2426_v1 = vadd.f32 %v11154_v55, %v11153_v18  ;;  %v2376_v56 = vmul.f32 %v7356_v54, %v1908_v8  ;;  %v1907_v47 = vsel %vm1882_vm4, %v8250_v52, %v8355_v2  ;;  %6400 = vmatmul.mubr.msk.f32.vlgmr.msra.gmra.mrb[4].mxu1 %vm2582_vm6, %v7938_v41  ;;  %v11155_v17 = vld [vmem:[#allocation63_spill] sm:$0xff]  ;;  %v11159_v8 = vld [vmem:[#allocation53_spill] sm:$0xff]  ;;  %v11166_v18 = vld [vmem:[#allocation76_spill] sm:$0xff] }
 0x232   : > { %11150 = vst [vmem:[#allocation46_spill] sm:$0xff] %v8442_v30  ;;  %v2200_v59 = vadd.f32 %v2167_v33, %v2030_v43  ;;  %v2269_v6 = vadd.f32 %v2236_v4, %v2199_v28  ;;  %2862 = vmatprep.mubr.f32.mxu1 %v11108_v45  ;;  %v8459_v13 = vadd.f32 %v11155_v17, %v2492_v34  ;;  %v11162_v28 = vld [vmem:[#allocation16_spill] sm:$0xff]  ;;  %v11163_v4 = vld [vmem:[#allocation62_spill] sm:$0xff] }
 0x233   : > { %11152 = vst [vmem:[#allocation10_spill] sm:$0xff] %v8446_v15  ;;  %v8462_v20 = vadd.f32 %v11157_v51, %v2490_v36  ;;  %v2463_v46 = vmul.f32 %v11159_v8, %v11096_v35  ;;  %v8468_v3 = vmul.f32 %v7336_v11, %v11160_v0  ;;  %v1906_v52 = vsel %vm1882_vm4, %v8355_v2, %v8353_v25  ;;  %v11167_v55 = vld [vmem:[#allocation54_spill] sm:$0xff]  ;;  %v11199_v15 = vld [vmem:[#allocation20_spill] sm:$0xff] }
 0x234   : > { %11156 = vst [vmem:[#allocation77_spill] sm:$0xff] %v8459_v13  ;;  %v2339_v43 = vadd.f32 %v2306_v62, %v2269_v6  ;;  %v2031_v33 = vadd.f32 %v11162_v28, %v1961_v38  ;;  %v8476_v34 = vadd.f32 %v11163_v4, %v2491_v50  ;;  %v1929_v36 = vmul.f32 %v7408_v42, %v1907_v47  ;;  %v11170_v62 = vld [vmem:[#allocation49_spill] sm:$0xff]  ;;  %v8497_v6 = vpop.permute.xlu0 %1840 }
 0x235   : > { %11158 = vst [vmem:[#allocation30_spill] sm:$0xff] %v8462_v20  ;;  %11161 = vst [vmem:[#allocation28_spill] sm:$0xff] %v8468_v3  ;;  %v2147_v37 = vsel %vm2122_vm5, %v2071_v49, %v8438_v32  ;;  %v8482_v23 = vadd.f32 %v2463_v46, %v2426_v1  ;;  %v2424_v17 = vadd.f32 %v11167_v55, %v11166_v18  ;;  %v11171_v1 = vld [vmem:[#allocation31_spill] sm:$0xff]  ;;  %v11174_v18 = vld [vmem:[#allocation17_spill] sm:$0xff] }
 0x236   : > { %11164 = vst [vmem:[#allocation29_spill] sm:$0xff] %v8476_v34  ;;  %v2270_v51 = vadd.f32 %v2237_v12, %v2200_v59  ;;  %v8488_v2 = vmul.f32 %v11133_v10, %v7336_v11  ;;  %v8492_v38 = vmul.f32 %v11133_v10, %v11096_v35  ;;  %v2461_v50 = vmul.f32 %v11170_v62, %v11096_v35  ;;  %v11172_v12 = vld [vmem:[#allocation52_spill] sm:$0xff]  ;;  %v11184_v20 = vld [vmem:[#allocation73_spill] sm:$0xff] }
 0x237   : > { %11165 = vst [vmem:[#allocation13_spill] sm:$0xff] %v8482_v23  ;;  %v1930_v49 = vmul.f32 %v7408_v42, %v1906_v52  ;;  %v2460_v8 = vmul.f32 %v11171_v1, %v11096_v35  ;;  %v2462_v59 = vmul.f32 %v11172_v12, %v11096_v35  ;;  %v8505_v11 = vmul.f32 %v7942_v39, %v11096_v35  ;;  %v11178_v34 = vld [vmem:[#allocation56_spill] sm:$0xff] }
 0x238   : > { %11168 = vst [vmem:[#allocation65_spill] sm:$0xff] %v8488_v2  ;;  %11169 = vst [vmem:[#allocation27_spill] sm:$0xff] %v8492_v38  ;;  %v2409_v46 = vadd.f32 %v2376_v56, %v2339_v43  ;;  %v2307_v10 = vmul.f32 %v7392_v7, %v2147_v37  ;;  %v1904_v28 = vsel %vm1882_vm4, %v1835_v57, %v8414_v58  ;;  %v11177_v38 = vld [vmem:[#allocation70_spill] sm:$0xff]  ;;  %v11202_v2 = vld [vmem:[#allocation47_spill] sm:$0xff] }
 0x239   : > { %11173 = vst [vmem:[#allocation15_spill] sm:$0xff] %v8505_v11  ;;  %v1905_v4 = vsel %vm1882_vm4, %v8353_v25, %v1835_v57  ;;  %v1962_v55 = vadd.f32 %v1929_v36, %v11174_v18  ;;  %v2494_v62 = vadd.f32 %v2461_v50, %v2424_v17  ;;  %v8517_v1 = vmul.f32 %v7986_v26, %v11096_v35  ;;  %v8529_v17 = vpop.permute.xlu0 %2076  ;;  %v11179_v26 = vld [vmem:[#allocation11_spill] sm:$0xff] }
 0x23a   : > { %v8521_v39 = vmul.f32 %v11096_v35, %v11160_v0  ;;  %v2238_v56 = vmul.f32 %v7371_v31, %v1907_v47  ;;  %v2168_v43 = vmul.f32 %v7352_v44, %v2147_v37  ;;  %v2340_v12 = vadd.f32 %v2307_v10, %v2270_v51  ;;  %v1839_v10 = vpop.permute.xlu1 %1838 }
 0x23b   : > { %11175 = vst [vmem:[#allocation58_spill] sm:$0xff] %v8517_v1  ;;  %v2493_v11 = vadd.f32 %v2460_v8, %v11177_v38  ;;  %v1963_v25 = vadd.f32 %v1930_v49, %v11178_v34  ;;  %v1931_v36 = vmul.f32 %v7408_v42, %v1905_v4  ;;  %v1932_v57 = vmul.f32 %v7408_v42, %v1904_v28  ;;  %v11180_v1 = vld [vmem:[#allocation78_spill] sm:$0xff]  ;;  %v11181_v38 = vld [vmem:[#allocation79_spill] sm:$0xff] }
 0x23c   : > { %11176 = vst [vmem:[#allocation63_spill] sm:$0xff] %v8521_v39  ;;  %v2495_v50 = vadd.f32 %v2462_v59, %v11179_v26  ;;  %v2239_v0 = vmul.f32 %v7371_v31, %v1906_v52  ;;  %v2377_v18 = vmul.f32 %v7356_v54, %v1907_v47  ;;  %v2378_v39 = vmul.f32 %v7356_v54, %v1906_v52  ;;  %v11182_v34 = vld [vmem:[#allocation38_spill] sm:$0xff] }
 0x23d   : > { %v2479_v51 = vadd.f32 %v11180_v1, %v2409_v46  ;;  %v2032_v8 = vadd.f32 %v11181_v38, %v1962_v55  ;;  %v8538_v49 = vadd.f32 %v11182_v34, %v2494_v62  ;;  %v8541_v23 = vadd.f32 %v11184_v20, %v2493_v11  ;;  %v11187_v1 = vld [vmem:[#allocation19_spill] sm:$0xff]  ;;  %v11189_v34 = vld [vmem:[#allocation80_spill] sm:$0xff]  ;;  %v8554_v20 = vpop.permute.xlu0 %2080  ;;  %v11190_v11 = vld [vmem:[#allocation34_spill] sm:$0xff] }
 0x23e   : > { %v8545_v59 = vmul.f32 %v11134_v9, %v11096_v35  ;;  %v2201_v26 = vadd.f32 %v2168_v43, %v2031_v33  ;;  %v2516_v47 = vmul.f32 %v7386_v61, %v2147_v37  ;;  %v1903_v52 = vsel %vm1882_vm4, %v8414_v58, %v1839_v10  ;;  %v11188_v38 = vld [vmem:[#allocation23_spill] sm:$0xff]  ;;  %v11192_v58 = vld [vmem:[#allocation25_spill] sm:$0xff] }
 0x23f   : > { %11183 = vst [vmem:[#allocation61_spill] sm:$0xff] %v8538_v49  ;;  %11185 = vst [vmem:[#allocation53_spill] sm:$0xff] %v8541_v23  ;;  %v2410_v46 = vadd.f32 %v2377_v18, %v2340_v12  ;;  %v1964_v55 = vadd.f32 %v1931_v36, %v11187_v1  ;;  %v1965_v62 = vadd.f32 %v1932_v57, %v11188_v38 }
 0x240   : > { %11186 = vst [vmem:[#allocation40_spill] sm:$0xff] %v8545_v59  ;;  %v2033_v49 = vadd.f32 %v11189_v34, %v1963_v25  ;;  %v8557_v23 = vadd.f32 %v11190_v11, %v2495_v50  ;;  %v2549_v9 = vadd.f32 %v2516_v47, %v2479_v51  ;;  %v2240_v33 = vmul.f32 %v7371_v31, %v1905_v4  ;;  %v2075_v50 = vpop.permute.xlu1 %2074  ;;  %v11194_v51 = vld [vmem:[#allocation85_spill] sm:$0xff]  ;;  %v11196_v11 = vld [vmem:[#allocation87_spill] sm:$0xff] }
 0x241   : > { %v8561_v37 = vmul.f32 %v7371_v31, %v1904_v28  ;;  %v8565_v43 = vmul.f32 %v11192_v58, %v11096_v35  ;;  %v8568_v12 = vmul.f32 %v7356_v54, %v1905_v4  ;;  %v8571_v25 = vmul.f32 %v7356_v54, %v1904_v28  ;;  %v8586_v38 = vpop.permute.xlu0 %2084 }
 0x242   : > { %11191 = vst [vmem:[#allocation16_spill] sm:$0xff] %v8557_v23  ;;  %v1902_v36 = vsel %vm1882_vm4, %v1839_v10, %v8497_v6  ;;  %v1933_v57 = vmul.f32 %v7408_v42, %v1903_v52  ;;  %v2145_v18 = vsel %vm2122_vm5, %v2075_v50, %v8529_v17  ;;  %v2146_v35 = vsel %vm2122_vm5, %v8438_v32, %v2075_v50  ;;  %v11195_v10 = vld [vmem:[#allocation86_spill] sm:$0xff] }
 0x243   : > { %11193 = vst [vmem:[#allocation62_spill] sm:$0xff] %v8565_v43  ;;  %v2271_v4 = vadd.f32 %v2238_v56, %v2201_v26  ;;  %v2480_v47 = vadd.f32 %v11194_v51, %v2410_v46  ;;  %v2169_v28 = vmul.f32 %v7352_v44, %v2146_v35  ;;  %v2308_v1 = vmul.f32 %v7392_v7, %v2146_v35  ;;  %v11197_v26 = vld [vmem:[#allocation22_spill] sm:$0xff] }
 0x244   : > { %v2034_v34 = vadd.f32 %v11195_v10, %v1964_v55  ;;  %v2035_v58 = vadd.f32 %v11196_v11, %v1965_v62  ;;  %v1934_v43 = vmul.f32 %v7408_v42, %v1902_v36  ;;  %v8592_v59 = vmul.f32 %v7371_v31, %v1903_v52  ;;  %v1843_v10 = vpop.permute.xlu1 %1842  ;;  %v11198_v11 = vld [vmem:[#allocation18_spill] sm:$0xff] }
 0x245   : > { %v8595_v32 = vmul.f32 %v7371_v31, %v1902_v36  ;;  %v2170_v56 = vmul.f32 %v7352_v44, %v2145_v18  ;;  %v1966_v46 = vadd.f32 %v1933_v57, %v11197_v26  ;;  %v8600_v50 = vmul.f32 %v7356_v54, %v1903_v52 }
 0x246   : > { %v2341_v51 = vadd.f32 %v2308_v1, %v2271_v4  ;;  %v2517_v55 = vmul.f32 %v7386_v61, %v2146_v35  ;;  %v2202_v62 = vadd.f32 %v2169_v28, %v2032_v8  ;;  %v1900_v23 = vsel %vm1882_vm4, %v1843_v10, %v11198_v11  ;;  %v11200_v28 = vld [vmem:[#allocation24_spill] sm:$0xff] }
 0x247   : > { %v1901_v13 = vsel %vm1882_vm4, %v8497_v6, %v1843_v10  ;;  %v2140_v57 = vsel %vm2122_vm5, %v8586_v38, %v11199_v15  ;;  %v8614_v52 = vmul.f32 %v7356_v54, %v1902_v36  ;;  %v1936_v8 = vmul.f32 %v7408_v42, %v1900_v23  ;;  %v11201_v10 = vld [vmem:[#allocation82_spill] sm:$0xff] }
 0x248   : > { %v2411_v4 = vadd.f32 %v2378_v39, %v2341_v51  ;;  %v1935_v35 = vmul.f32 %v7408_v42, %v1901_v13  ;;  %v1967_v1 = vadd.f32 %v1934_v43, %v11200_v28  ;;  %v2203_v26 = vadd.f32 %v2170_v56, %v2033_v49  ;;  %v2079_v36 = vpop.permute.xlu1 %2078 }
 0x249   : > { %v2309_v11 = vmul.f32 %v7392_v7, %v2145_v18  ;;  %v2518_v6 = vmul.f32 %v7386_v61, %v2145_v18  ;;  %v1969_v30 = vadd.f32 %v1936_v8, %v11202_v2  ;;  %v2175_v15 = vmul.f32 %v7352_v44, %v2140_v57  ;;  %v11204_v18 = vld [vmem:[#allocation81_spill] sm:$0xff] }
 0x24a   : > { %v1968_v3 = vadd.f32 %v1935_v35, %v11201_v10  ;;  %v2036_v39 = vadd.f32 %v11203_v63, %v1966_v46  ;;  %v2272_v51 = vadd.f32 %v2239_v0, %v2202_v62  ;;  %v2550_v60 = vadd.f32 %v2517_v55, %v2480_v47  ;;  %v11205_v35 = vld [vmem:[#allocation83_spill] sm:$0xff]  ;;  %v11206_v63 = vld [vmem:[#allocation84_spill] sm:$0xff]  ;;  %v1873_v10 = vpop.permute.xlu0 %1872 }
 0x24b   : > { %v2143_v43 = vsel %vm2122_vm5, %v2079_v36, %v8554_v20  ;;  %v2144_v49 = vsel %vm2122_vm5, %v8529_v17, %v2079_v36  ;;  %v2481_v56 = vadd.f32 %v11204_v18, %v2411_v4  ;;  %v2039_v28 = vadd.f32 %v11205_v35, %v1969_v30  ;;  %v11208_v35 = vld [vmem:[#allocation42_spill] sm:$0xff] }
 0x24c   : > { %v8634_v2 = vmul.f32 %v7392_v7, %v2140_v57  ;;  %v2171_v8 = vmul.f32 %v7352_v44, %v2144_v49  ;;  %v2038_v0 = vadd.f32 %v11206_v63, %v1968_v3  ;;  %2798 = vmatprep.subr.mxu1 %v2550_v60  ;;  %v2172_v47 = vmul.f32 %v7352_v44, %v2143_v43  ;;  %v2083_v36 = vpop.permute.xlu1 %2082 }
 0x24d   : > { %v2273_v46 = vadd.f32 %v2240_v33, %v2203_v26  ;;  %v2310_v55 = vmul.f32 %v7392_v7, %v2144_v49  ;;  %v2244_v62 = vmul.f32 %v7371_v31, %v1901_v13  ;;  %v2245_v17 = vmul.f32 %v7371_v31, %v1900_v23  ;;  %2799 = vmatpush1.msra.mxu1 %v2549_v9 }
 0x24e   : > { %v8643_v4 = vmul.f32 %v7356_v54, %v1901_v13  ;;  %v8646_v30 = vmul.f32 %v7386_v61, %v2140_v57  ;;  %v2342_v3 = vadd.f32 %v2309_v11, %v2272_v51  ;;  %v8649_v60 = vmul.f32 %v7356_v54, %v1900_v23  ;;  %6401 = vmatmul.mubr.msk.f32.vlgmr.msra.gmra.mrb[6].mxu1 %vm2582_vm6, %v7938_v41  ;;  %v11209_v51 = vld [vmem:[#allocation57_spill] sm:$0xff] }
 0x24f   : > { %v2205_v33 = vadd.f32 %v2172_v47, %v2035_v58  ;;  %v2343_v26 = vadd.f32 %v2310_v55, %v2273_v46  ;;  %v8653_v18 = vadd.f32 %v2518_v6, %v2481_v56  ;;  %v2209_v13 = vadd.f32 %v11208_v35, %v2039_v28  ;;  %2933 = vmatprep.mubr.f32.mxu1 %v11108_v45  ;;  %v11210_v56 = vld [vmem:[#allocation91_spill] sm:$0xff] }
 0x250   : > { %11207 = vst [vmem:[#allocation76_spill] sm:$0xff] %v8646_v30  ;;  %v2204_v63 = vadd.f32 %v2171_v8, %v2034_v34  ;;  %v2311_v57 = vmul.f32 %v7392_v7, %v2143_v43  ;;  %v2208_v9 = vadd.f32 %v2175_v15, %v2038_v0  ;;  %v2519_v11 = vmul.f32 %v7386_v61, %v2144_v49  ;;  %v2107_v8 = vpop.permute.xlu1 %2106 }
 0x251   : > { %v1886_v23 = vsel %vm1882_vm4, %v11209_v51, %v1873_v10  ;;  %v2141_v58 = vsel %vm2122_vm5, %v2083_v36, %v8586_v38  ;;  %v2413_v6 = vadd.f32 %v8571_v25, %v2343_v26  ;;  %v2037_v28 = vadd.f32 %v11210_v56, %v1967_v1  ;;  %v11211_v38 = vld [vmem:[#allocation39_spill] sm:$0xff]  ;;  %v11212_v56 = vld [vmem:[#allocation88_spill] sm:$0xff] }
 0x252   : > { %v2142_v34 = vsel %vm2122_vm5, %v8554_v20, %v2083_v36  ;;  %v2174_v15 = vmul.f32 %v7352_v44, %v2141_v58  ;;  %v2520_v49 = vmul.f32 %v7386_v61, %v2143_v43  ;;  %v2275_v47 = vadd.f32 %v8592_v59, %v2205_v33  ;;  %v2109_v20 = vpop.permute.xlu0 %2108  ;;  %v11213_v33 = vld [vmem:[#allocation64_spill] sm:$0xff] }
 0x253   : > { %v2173_v0 = vmul.f32 %v7352_v44, %v2142_v34  ;;  %v2312_v46 = vmul.f32 %v7392_v7, %v2142_v34  ;;  %v8676_v55 = vadd.f32 %v11211_v38, %v2209_v13  ;;  %v2274_v25 = vadd.f32 %v8561_v37, %v2204_v63 }
 0x254   : > { %v1950_v1 = vmul.f32 %v7408_v42, %v1886_v23  ;;  %v2207_v26 = vadd.f32 %v2174_v15, %v2037_v28  ;;  %v2278_v36 = vadd.f32 %v2245_v17, %v2208_v9  ;;  %v2129_v43 = vsel %vm2122_vm5, %v2107_v8, %v2109_v20  ;;  %v1875_v63 = vpop.permute.xlu1 %1874 }
 0x255   : > { %v2206_v35 = vadd.f32 %v2173_v0, %v2036_v39  ;;  %v2345_v51 = vadd.f32 %v2312_v46, %v2275_v47  ;;  %v2483_v30 = vadd.f32 %v11212_v56, %v2413_v6  ;;  %v8684_v59 = vmul.f32 %v7371_v31, %v1886_v23  ;;  %v11214_v0 = vld [vmem:[#allocation89_spill] sm:$0xff] }
 0x256   : > { %v2130_v13 = vsel %vm2122_vm5, %v11213_v33, %v2107_v8  ;;  %v2186_v37 = vmul.f32 %v7352_v44, %v2129_v43  ;;  %v2277_v28 = vadd.f32 %v2244_v62, %v2207_v26  ;;  %v2344_v15 = vadd.f32 %v2311_v57, %v2274_v25  ;;  %v11215_v26 = vld [vmem:[#allocation92_spill] sm:$0xff] }
 0x257   : > { %v2415_v17 = vadd.f32 %v8614_v52, %v2345_v51  ;;  %v2185_v39 = vmul.f32 %v7352_v44, %v2130_v13  ;;  %v2324_v9 = vmul.f32 %v7392_v7, %v2130_v13  ;;  %v1983_v6 = vadd.f32 %v1950_v1, %v11214_v0 }
 0x258   : > { %v8695_v47 = vmul.f32 %v7356_v54, %v1886_v23  ;;  %v2313_v46 = vmul.f32 %v7392_v7, %v2141_v58  ;;  %v2276_v8 = vadd.f32 %v8595_v32, %v2206_v35  ;;  %v2219_v62 = vadd.f32 %v2186_v37, %v8328_v19  ;;  %v2111_v23 = vpop.permute.xlu1 %2110 }
 0x259   : > { %v2218_v38 = vadd.f32 %v2185_v39, %v8325_v16  ;;  %v2357_v52 = vadd.f32 %v2324_v9, %v8333_v24  ;;  %v2485_v51 = vadd.f32 %v11215_v26, %v2415_v17  ;;  %v2521_v56 = vmul.f32 %v7386_v61, %v2142_v34  ;;  %v2113_v16 = vpop.permute.xlu0 %2112  ;;  %v11216_v24 = vld [vmem:[#allocation66_spill] sm:$0xff] }
 0x25a   : > { %v2522_v57 = vmul.f32 %v7386_v61, %v2141_v58  ;;  %v2412_v25 = vadd.f32 %v8568_v12, %v2342_v3  ;;  %v2553_v1 = vadd.f32 %v2520_v49, %v2483_v30  ;;  %v8707_v33 = vadd.f32 %v8634_v2, %v2277_v28  ;;  %v11217_v34 = vld [vmem:[#allocation14_spill] sm:$0xff]  ;;  %v11218_v2 = vld [vmem:[#allocation67_spill] sm:$0xff]  ;;  %v11219_v28 = vld [vmem:[#allocation68_spill] sm:$0xff] }
 0x25b   : > { %v2325_v32 = vmul.f32 %v7392_v7, %v2129_v43  ;;  %v1885_v19 = vsel %vm1882_vm4, %v1873_v10, %v1875_v63  ;;  %v2288_v35 = vadd.f32 %v11216_v24, %v2218_v38  ;;  %v8714_v37 = vmul.f32 %v7386_v61, %v2130_v13  ;;  %v11223_v24 = vld [vmem:[#allocation72_spill] sm:$0xff] }
 0x25c   : > { %v2482_v58 = vadd.f32 %v8347_v48, %v2412_v25  ;;  %v1884_v12 = vsel %vm1882_vm4, %v1875_v63, %v11217_v34  ;;  %v2346_v30 = vadd.f32 %v2313_v46, %v2276_v8  ;;  %v2427_v3 = vadd.f32 %v11218_v2, %v2357_v52  ;;  %v2115_v46 = vpop.permute.xlu1 %2114  ;;  %v11224_v34 = vld [vmem:[#allocation74_spill] sm:$0xff] }
 0x25d   : > { %v8722_v49 = vmul.f32 %v7386_v61, %v2129_v43  ;;  %v2289_v17 = vadd.f32 %v11219_v28, %v2219_v62  ;;  %v8725_v10 = vadd.f32 %v2522_v57, %v2485_v51  ;;  %v1951_v13 = vmul.f32 %v7408_v42, %v1885_v19  ;;  %v11220_v51 = vld [vmem:[#allocation43_spill] sm:$0xff] }
 0x25e   : > { %v2552_v39 = vadd.f32 %v2519_v11, %v2482_v58  ;;  %v8730_v48 = vsel %vm2122_vm5, %v2111_v23, %v2113_v16  ;;  %v1952_v9 = vmul.f32 %v7408_v42, %v1884_v12  ;;  %v8734_v63 = vmul.f32 %v7371_v31, %v1885_v19  ;;  %v11225_v28 = vld [vmem:[#allocation55_spill] sm:$0xff] }
 0x25f   : > { %v2128_v43 = vsel %vm2122_vm5, %v2109_v20, %v2111_v23  ;;  %v2188_v0 = vmul.f32 %v7352_v44, %v8730_v48  ;;  %v8740_v8 = vadd.f32 %v2325_v32, %v2288_v35  ;;  %v8743_v11 = vmul.f32 %v7371_v31, %v1884_v12  ;;  %v2117_v20 = vpop.permute.xlu0 %2116 }
 0x260   : > { %2869 = vmatprep.subr.mxu1 %v2552_v39  ;;  %v2187_v38 = vmul.f32 %v7352_v44, %v2128_v43  ;;  %v2326_v42 = vmul.f32 %v7392_v7, %v2128_v43  ;;  %v8748_v62 = vadd.f32 %v8343_v40, %v2427_v3  ;;  %v2414_v26 = vadd.f32 %v8600_v50, %v2344_v15 }
 0x261   : > { %2870 = vmatpush1.msra.mxu1 %v8653_v18  ;;  %v2221_v52 = vadd.f32 %v2188_v0, %v8379_v14  ;;  %v2348_v57 = vadd.f32 %v11220_v51, %v2278_v36  ;;  %v8759_v23 = vsel %vm2122_vm5, %v2115_v46, %v2117_v20  ;;  %v2126_v40 = vsel %vm2122_vm5, %v2113_v16, %v2115_v46  ;;  %v11221_v14 = vld [vmem:[#allocation41_spill] sm:$0xff]  ;;  %v11222_v36 = vld [vmem:[#allocation71_spill] sm:$0xff] }
 0x262   : > { %v2220_v25 = vadd.f32 %v2187_v38, %v8376_v21  ;;  %v2359_v31 = vadd.f32 %v2326_v42, %v2289_v17  ;;  %6402 = vmatmul.mubr.msk.f32.vlgmr.msra.gmra.mrb[8].mxu1 %vm2582_vm6, %v7938_v41  ;;  %v2484_v18 = vadd.f32 %v8383_v29, %v2414_v26  ;;  %v2189_v50 = vmul.f32 %v7352_v44, %v2126_v40  ;;  %v11228_v42 = vld [vmem:[#allocation26_spill] sm:$0xff]  ;;  %v2119_v26 = vpop.permute.xlu1 %2118 }
 0x263   : > { %v2418_v32 = vadd.f32 %v11221_v14, %v2348_v57  ;;  %v2190_v21 = vmul.f32 %v7352_v44, %v8759_v23  ;;  %3075 = vmatprep.mubr.f32.mxu1 %v11108_v45  ;;  %v1984_v41 = vadd.f32 %v1951_v13, %v8351_v53  ;;  %v2053_v58 = vadd.f32 %v8398_v5, %v1983_v6  ;;  %v11226_v13 = vld [vmem:[#allocation59_spill] sm:$0xff]  ;;  %v11231_v57 = vld [vmem:[#allocation46_spill] sm:$0xff]  ;;  %v11233_v14 = vld [vmem:[#allocation65_spill] sm:$0xff] }
 0x264   : > { %v2290_v15 = vadd.f32 %v11222_v36, %v2220_v25  ;;  %v2429_v35 = vadd.f32 %v11223_v24, %v2359_v31  ;;  %v2554_v16 = vadd.f32 %v2521_v56, %v2484_v18  ;;  %v2291_v2 = vadd.f32 %v11224_v34, %v2221_v52  ;;  %v11232_v31 = vld [vmem:[#allocation45_spill] sm:$0xff]  ;;  %v11236_v36 = vld [vmem:[#allocation44_spill] sm:$0xff] }
 0x265   : > { %v2488_v29 = vadd.f32 %v8391_v27, %v2418_v32  ;;  %v2328_v3 = vmul.f32 %v7392_v7, %v2126_v40  ;;  %v1985_v17 = vadd.f32 %v1952_v9, %v11225_v28  ;;  %v2399_v39 = vmul.f32 %v7356_v54, %v1885_v19  ;;  %v11227_v27 = vld [vmem:[#allocation51_spill] sm:$0xff]  ;;  %v11237_v24 = vld [vmem:[#allocation28_spill] sm:$0xff] }
 0x266   : > { %v2327_v53 = vmul.f32 %v7392_v7, %v8730_v48  ;;  %v2222_v0 = vadd.f32 %v2189_v50, %v11226_v13  ;;  %v8782_v46 = vmul.f32 %v7356_v54, %v1884_v12  ;;  %v8785_v5 = vmul.f32 %v7386_v61, %v2128_v43  ;;  %2940 = vmatprep.subr.mxu0 %v2554_v16  ;;  %v8797_v54 = vld [vmem:[%s10883_s5] sm:$0xf]  ;;  %v11234_v50 = vld [vmem:[#allocation12_spill] sm:$0xff]  ;;  %v11238_v16 = vld [vmem:[#allocation10_spill] sm:$0xff] }
 0x267   : > { %v2558_v6 = vadd.f32 %v11227_v27, %v2488_v29  ;;  %v2223_v56 = vadd.f32 %v2190_v21, %v2053_v58  ;;  %v8789_v9 = vadd.f32 %v11228_v42, %v2429_v35  ;;  %2941 = vmatpush1.msra.mxu0 %v2553_v1  ;;  %v2416_v19 = vadd.f32 %v8643_v4, %v2346_v30  ;;  %v11229_v1 = vld [vmem:[#allocation50_spill] sm:$0xff]  ;;  %v11245_v42 = vld [vmem:[#allocation32_spill] sm:$0xff] }
 0x268   : > { %v2360_v38 = vadd.f32 %v2327_v53, %v2290_v15  ;;  %v2417_v52 = vadd.f32 %v8649_v60, %v8707_v33  ;;  %6403 = vmatmul.mubr.msk.f32.vlgmr.msra.gmra.mrb[8].mxu0 %vm2582_vm6, %v8797_v54  ;;  %v2329_v12 = vmul.f32 %v7392_v7, %v8759_v23  ;;  %v2361_v43 = vadd.f32 %v2328_v3, %v2291_v2  ;;  %v11230_v33 = vld [vmem:[#allocation48_spill] sm:$0xff]  ;;  %v11240_v53 = vld [vmem:[#allocation13_spill] sm:$0xff] }
 0x269   : > { %3082 = vmatprep.subr.mxu0 %v2558_v6  ;;  %v2349_v4 = vadd.f32 %v11229_v1, %v8676_v55  ;;  %v2292_v30 = vadd.f32 %v8684_v59, %v2222_v0  ;;  %v2537_v60 = vmul.f32 %v7386_v61, %v2126_v40  ;;  %v2486_v51 = vadd.f32 %v11230_v33, %v2416_v19  ;;  %v11235_v59 = vld [vmem:[#allocation76_spill] sm:$0xff] }
 0x26a   : > { %v2487_v25 = vadd.f32 %v11231_v57, %v2417_v52  ;;  %3146 = vmatprep.mubr.f32.mxu0 %v11108_v45  ;;  %v2055_v32 = vadd.f32 %v11233_v14, %v1985_v17  ;;  %v8815_v21 = vsel %vm2122_vm5, %v2119_v26, %v11234_v50  ;;  %v2124_v55 = vsel %vm2122_vm5, %v2117_v20, %v2119_v26  ;;  %v11246_v52 = vld [vmem:[#allocation75_spill] sm:$0xff] }
 0x26b   : > { %v2419_v18 = vadd.f32 %v11232_v31, %v2349_v4  ;;  %v2556_v40 = vadd.f32 %v11235_v59, %v2486_v51  ;;  %v2054_v35 = vadd.f32 %v11237_v24, %v1984_v41  ;;  %v2191_v58 = vmul.f32 %v7352_v44, %v2124_v55  ;;  %v11239_v41 = vld [vmem:[#allocation77_spill] sm:$0xff]  ;;  %v11250_v51 = vld [vmem:[#allocation58_spill] sm:$0xff] }
 0x26c   : > { %v2557_v15 = vadd.f32 %v11236_v36, %v2487_v25  ;;  %v2192_v34 = vmul.f32 %v7352_v44, %v8815_v21  ;;  %v2293_v2 = vadd.f32 %v8734_v63, %v2223_v56  ;;  %v2330_v3 = vmul.f32 %v7392_v7, %v2124_v55  ;;  %v11243_v56 = vld [vmem:[#allocation30_spill] sm:$0xff]  ;;  %v11251_v25 = vld [vmem:[#allocation63_spill] sm:$0xff]  ;;  %v11255_v36 = vld [vmem:[#allocation16_spill] sm:$0xff] }
 0x26d   : > { %v2489_v29 = vadd.f32 %v11238_v16, %v2419_v18  ;;  %v2362_v28 = vadd.f32 %v2329_v12, %v2292_v30  ;;  %v2431_v20 = vadd.f32 %v8695_v47, %v2361_v43  ;;  %3011 = vmatprep.subr.mxu1 %v2556_v40  ;;  %v2224_v17 = vadd.f32 %v2191_v58, %v2054_v35  ;;  %v11241_v47 = vld [vmem:[#allocation60_spill] sm:$0xff]  ;;  %v11247_v43 = vld [vmem:[#allocation15_spill] sm:$0xff]  ;;  %v11258_v58 = vld [vmem:[#allocation62_spill] sm:$0xff] }
 0x26e   : > { %3083 = vmatpush1.msra.mxu0 %v2557_v15  ;;  %3012 = vmatpush1.msra.mxu1 %v8725_v10  ;;  %v2566_v13 = vadd.f32 %v8714_v37, %v11240_v53  ;;  %v2225_v0 = vadd.f32 %v2192_v34, %v2055_v32  ;;  %v2331_v44 = vmul.f32 %v7392_v7, %v8815_v21  ;;  %v11242_v10 = vld [vmem:[#allocation69_spill] sm:$0xff]  ;;  %v11248_v30 = vld [vmem:[#allocation36_spill] sm:$0xff]  ;;  %v11260_v34 = vld [vmem:[#allocation27_spill] sm:$0xff] }
 0x26f   : > { %3224 = vmatprep.subr.mxu0 %v11239_v41  ;;  %6404 = vmatmul.mubr.msk.f32.vlgmr.msra.gmra.mrb[10].mxu1 %vm2582_vm6, %v8797_v54  ;;  %v2559_v63 = vadd.f32 %v11241_v47, %v2489_v29  ;;  %v2294_v27 = vadd.f32 %v8743_v11, %v2224_v17  ;;  %v2428_v6 = vadd.f32 %v11242_v10, %v8740_v8  ;;  %v11244_v37 = vld [vmem:[#allocation29_spill] sm:$0xff]  ;;  %v11256_v15 = vld [vmem:[#allocation40_spill] sm:$0xff]  ;;  %v8914_v41 = vld [vmem:[%s10881_s3] sm:$0xff] }
 0x270   : > { %6405 = vmatmul.mubr.msk.f32.vlgmr.msra.gmra.mrb[10].mxu0 %vm2582_vm6, %v8797_v54  ;;  %3153 = vmatprep.subr.mxu1 %v11243_v56  ;;  %v2295_v19 = vadd.f32 %v11245_v42, %v2225_v0  ;;  %v2363_v7 = vadd.f32 %v2330_v3, %v2293_v2  ;;  %v2430_v26 = vadd.f32 %v11246_v52, %v2360_v38  ;;  %v11249_v8 = vld [vmem:[#allocation61_spill] sm:$0xff]  ;;  %v8927_v0 = vpop.permute.xlu0 %4166 }
 0x271   : > { %3225 = vmatpush1.msra.mxu0 %v11244_v37  ;;  %3154 = vmatpush1.msra.mxu1 %v2559_v63  ;;  %v2364_v12 = vadd.f32 %v2331_v44, %v2294_v27  ;;  %v2498_v1 = vadd.f32 %v11247_v43, %v2428_v6  ;;  %v2432_v4 = vadd.f32 %v2399_v39, %v2362_v28  ;;  %v11252_v39 = vld [vmem:[#allocation33_spill] sm:$0xff] }
 0x272   : > { %3366 = vmatprep.subr.mxu0 %v2566_v13  ;;  %v2365_v11 = vadd.f32 %v11248_v30, %v2295_v19  ;;  %v2539_v33 = vmul.f32 %v7386_v61, %v2124_v55  ;;  %3295 = vmatprep.subr.mxu1 %v11249_v8  ;;  %v2500_v57 = vadd.f32 %v11250_v51, %v2430_v26  ;;  %v11253_v32 = vld [vmem:[#allocation53_spill] sm:$0xff]  ;;  %v11254_v55 = vld [vmem:[#allocation35_spill] sm:$0xff] }
 0x273   : > { %3217 = vmatprep.mubr.f32.mxu1 %v11108_v45  ;;  %3288 = vmatprep.mubr.f32.mxu0 %v11108_v45  ;;  %v2568_v38 = vadd.f32 %v8785_v5, %v2498_v1  ;;  %v2502_v31 = vadd.f32 %v11251_v25, %v2432_v4  ;;  %v2434_v18 = vadd.f32 %v11252_v39, %v2364_v12  ;;  %v11261_v3 = vld [vmem:[#allocation21_spill] sm:$0xff] }
 0x274   : > { %6406 = vmatmul.mubr.msk.f32.vlgmr.msra.gmra.mrb[12].mxu1 %vm2582_vm6, %v8797_v54  ;;  %v2433_v14 = vadd.f32 %v8782_v46, %v2363_v7  ;;  %6407 = vmatmul.mubr.msk.f32.vlgmr.msra.gmra.mrb[12].mxu0 %vm2582_vm6, %v8797_v54  ;;  %v2570_v50 = vadd.f32 %v2537_v60, %v2500_v57  ;;  %v2435_v59 = vadd.f32 %v11254_v55, %v2365_v11  ;;  %v11257_v46 = vld [vmem:[#allocation93_spill] sm:$0xff]  ;;  %v8929_v44 = vpop.permute.xlu0 %4475 }
 0x275   : > { %3296 = vmatpush1.msra.mxu1 %v11253_v32  ;;  %v2567_v40 = vadd.f32 %v8722_v49, %v8748_v62  ;;  %v2536_v5 = vmul.f32 %v7386_v61, %v8730_v48  ;;  %3367 = vmatpush1.msra.mxu0 %v11255_v36  ;;  %v2504_v24 = vadd.f32 %v11256_v15, %v2434_v18  ;;  %v11259_v49 = vld [vmem:[#allocation37_spill] sm:$0xff] }
 0x276   : > { %3437 = vmatprep.subr.mxu1 %v2568_v38  ;;  %v2501_v35 = vadd.f32 %v11257_v46, %v2431_v20  ;;  %3359 = vmatprep.mubr.f32.mxu1 %v11108_v45  ;;  %v2572_v60 = vadd.f32 %v2539_v33, %v2502_v31  ;;  %v2505_v16 = vadd.f32 %v11258_v58, %v2435_v59 }
 0x277   : > { %3430 = vmatprep.mubr.f32.mxu0 %v11108_v45  ;;  %v2569_v29 = vadd.f32 %v2536_v5, %v8789_v9  ;;  %3508 = vmatprep.subr.mxu0 %v2570_v50  ;;  %v2574_v48 = vadd.f32 %v11259_v49, %v2504_v24  ;;  %v2538_v62 = vmul.f32 %v7386_v61, %v8759_v23 }
 0x278   : > { %6408 = vmatmul.mubr.msk.f32.vlgmr.msra.gmra.mrb[14].mxu1 %vm2582_vm6, %v8797_v54  ;;  %v2503_v2 = vadd.f32 %v11260_v34, %v2433_v14  ;;  %6409 = vmatmul.mubr.msk.f32.vlgmr.msra.gmra.mrb[14].mxu0 %vm2582_vm6, %v8797_v54  ;;  %v2575_v28 = vadd.f32 %v11261_v3, %v2505_v16  ;;  %v2540_v20 = vmul.f32 %v7386_v61, %v8815_v21  ;;  %v11262_v61 = vlaneseq  ;;  %v8931_v47 = vpop.permute.xlu0 %4615  ;;  %v8989_v14 = vld [vmem:[%s10881_s3 + $0x8] sm:$0xff] }
 0x279   : > { %3438 = vmatpush1.msra.mxu1 %v2567_v40  ;;  %3501 = vmatprep.mubr.f32.mxu1 %v11108_v45  ;;  %v2571_v9 = vadd.f32 %v2538_v62, %v2501_v35 }
 0x27a   : > { %3509 = vmatpush1.msra.mxu0 %v2569_v29  ;;  %3572 = vmatprep.mubr.f32.mxu0 %v11108_v45  ;;  %v2573_v23 = vadd.f32 %v2540_v20, %v2503_v2  ;;  %v8906_v21 = vshrl.u32 %v11262_v61, 7 }
 0x27b   : > { %3579 = vmatprep.subr.mxu1 %v2572_v60  ;;  %3650 = vmatprep.subr.mxu0 %v2574_v48 }
 0x27c   : > { %6410 = vmatmul.mubr.msk.f32.vlgmr.msra.gmra.mrb[16].mxu1 %vm2582_vm6, %v8797_v54  ;;  %6411 = vmatmul.mubr.msk.f32.vlgmr.msra.gmra.mrb[16].mxu0 %vm2582_vm6, %v8797_v54  ;;  %v8909_v17 = vsub.s32 6, %v8906_v21  ;;  %v8921_v13 = vsub.s32 7, %v8906_v21  ;;  %v8934_v63 = vsub.s32 0, %v8906_v21  ;;  %v8936_v27 = vpop.permute.xlu0 %2579  ;;  %v8939_v10 = vsub.s32 1, %v8906_v21 }
 0x27d   : > { %3580 = vmatpush1.msra.mxu1 %v2571_v9  ;;  %3643 = vmatprep.mubr.f32.mxu1 %v11108_v45  ;;  %v8966_v1 = vsub.s32 2, %v8906_v21  ;;  %v8993_v55 = vsub.s32 3, %v8906_v21  ;;  %v9015_v16 = vsub.s32 4, %v8906_v21 }
 0x27e   : > { %6500 = vmatprep.subr.mxu1 %v11108_v45  ;;  %3651 = vmatpush1.msra.mxu0 %v2573_v23  ;;  %v8918_v53 = vrot.slane %v8914_v41, %v8909_v17  ;;  %v8944_v42 = vrot.slane %v8914_v41, %v8934_v63  ;;  %v8949_v7 = vrot.slane %v8914_v41, %v8939_v10 }
 0x27f   : > { %3714 = vmatprep.mubr.f32.mxu0 %v11108_v45  ;;  %v8971_v11 = vrot.slane %v8914_v41, %v8966_v1  ;;  %v8998_v40 = vrot.slane %v8989_v14, %v8966_v1  ;;  %v9002_v24 = vrot.slane %v8914_v41, %v8993_v55  ;;  %v9025_v2 = vrot.slane %v8989_v14, %v8993_v55 }
 0x280   : > { %6412 = vmatmul.mubr.msk.f32.vlgmr.msra.gmra.mrb[18].mxu1 %vm2582_vm6, %v8797_v54  ;;  %6413 = vmatmul.mubr.msk.f32.vlgmr.msra.gmra.mrb[18].mxu0 %vm2582_vm6, %v8797_v54  ;;  %11263 = vst [vmem:[#allocation54_spill] sm:$0xff] %v8918_v53  ;;  %11265 = vst [vmem:[#allocation31_spill] sm:$0xff] %v8944_v42  ;;  %v9037_v23 = vrot.slane %v8914_v41, %v9015_v16 }
 0x281   : > { %6501 = vmatpush3.msra.mxu1 %v2575_v28  ;;  %6502 = vmatprep.mubr.msk.f32.mxu1 %vm6749_vm7, %v11108_v45  ;;  %11266 = vst [vmem:[#allocation52_spill] sm:$0xff] %v8949_v7  ;;  %11267 = vst [vmem:[#allocation17_spill] sm:$0xff] %v8971_v11 }
 0x282   : > { %4997 = vmatprep.mubr.f32.mxu0 %v11108_v45  ;;  %11268 = vst [vmem:[#allocation70_spill] sm:$0xff] %v8998_v40  ;;  %11269 = vst [vmem:[#allocation56_spill] sm:$0xff] %v9002_v24 }
 0x283   : > { %11270 = vst [vmem:[#allocation11_spill] sm:$0xff] %v9025_v2  ;;  %11271 = vst [vmem:[#allocation78_spill] sm:$0xff] %v9037_v23 }
 0x284   : > { %6503 = vmatmul.mubr.msk.f32.vlgmr.msra.gmra.mrb[20].mxu1 %vm2582_vm6, %v8797_v54  ;;  %v8925_v54 = vrot.slane %v8914_v41, %v8921_v13 }
 0x285   : > { %5068 = vmatprep.mubr.f32.mxu1 %v11108_v45 }
 0x286   : > { %11264 = vst [vmem:[#allocation49_spill] sm:$0xff] %v8925_v54 }
 0x2e4   : > { %v2651_v6 = vpop.f32.mrb[0].mxu1 }
 0x2e5   : > { %v2653_v56 = vpop.f32.mrb[1].mxu1  ;;  %v2652_v37 = vadd.f32 %v2651_v6, %v8936_v27 }
 0x2e6   : > { %v2654_v19 = vadd.f32 %v2653_v56, %v8936_v27 }
 0x2e7   : > { %v3791_v52 = vmax.f32 %v2652_v37, 0.0 }
 0x2e8   : > { %v3792_v26 = vmax.f32 %v2654_v19, 0.0  ;;  %v9050_v19 = vsub.s32 5, %v8906_v21 }
 0x2e9   : > { %v8952_v12 = vmul.f32 %v8944_v42, %v3791_v52  ;;  %v9054_v52 = vrot.slane %v8989_v14, %v8909_v17 }
 0x2ea   : > { %v8955_v43 = vmul.f32 %v8949_v7, %v3792_v26  ;;  %v9073_v21 = vrot.slane %v8914_v41, %v9050_v19 }
 0x2eb   : > { %4066 = vrot.lane.b32.xlu0 %v8952_v12, %s6743_s23  ;;  %11272 = vst [vmem:[#allocation79_spill] sm:$0xff] %v9054_v52 }
 0x2ec   : > { %4068 = vrot.lane.b32.xlu1 %v8955_v43, %s6743_s23  ;;  %11273 = vst [vmem:[#allocation38_spill] sm:$0xff] %v9073_v21 }
 0x2ef   : > { %4305 = vrot.lane.b32.xlu0 %v8952_v12, %s6746_s15 }
 0x2f0   : > { %4307 = vrot.lane.b32.xlu1 %v8955_v43, %s6746_s15 }
 0x2f9   : > { %v2722_v4 = vpop.f32.mrb[2].mxu1 }
 0x2fa   : > { %v2723_v30 = vadd.f32 %v2722_v4, %v8936_v27  ;;  %v2724_v33 = vpop.f32.mrb[3].mxu1 }
 0x2fb   : > { %v2725_v50 = vadd.f32 %v2724_v33, %v8936_v27 }
 0x2fc   : > { %v3793_v8 = vmax.f32 %v2723_v30, 0.0 }
 0x2fd   : > { %v3794_v15 = vmax.f32 %v2725_v50, 0.0 }
 0x2fe   : > { %v8974_v51 = vmul.f32 %v8971_v11, %v3793_v8 }
 0x2ff   : > { %v9020_v48 = vmul.f32 %v9002_v24, %v3794_v15 }
 0x300   : > { %4070 = vrot.lane.b32.xlu1 %v8974_v51, %s6743_s23  ;;  %4309 = vrot.lane.b32.xlu0 %v8974_v51, %s6746_s15 }
 0x304   : > { %v2793_v57 = vpop.f32.mrb[4].mxu1 }
 0x305   : > { %v2795_v38 = vpop.f32.mrb[5].mxu1  ;;  %v2794_v62 = vadd.f32 %v2793_v57, %v8936_v27 }
 0x306   : > { %v2796_v33 = vadd.f32 %v2795_v38, %v8936_v27 }
 0x307   : > { %v3795_v20 = vmax.f32 %v2794_v62, 0.0 }
 0x309   : > { %v9061_v30 = vmul.f32 %v9037_v23, %v3795_v20 }
 0x321   : > { %v2864_v25 = vpop.f32.mrb[6].mxu1 }
 0x322   : > { %v8980_v31 = vpop.f32.mrb[7].mxu1  ;;  %v2865_v15 = vadd.f32 %v2864_v25, %v8936_v27 }
 0x324   : > { %v3797_v25 = vmax.f32 %v2865_v15, 0.0 }
 0x326   : > { %v9118_v15 = vmul.f32 %v8918_v53, %v3797_v25 }
 0x335   : > { %v8982_v39 = vpop.f32.mrb[8].mxu1 }
 0x336   : > { %v8984_v18 = vpop.f32.mrb[9].mxu1 }
 0x33b   : > { %v3006_v32 = vpop.f32.mrb[8].mxu0 }
 0x33c   : > { %v3007_v59 = vadd.f32 %v3006_v32, %v8936_v27  ;;  %v3008_v5 = vpop.f32.mrb[9].mxu0 }
 0x33d   : > { %v3009_v35 = vadd.f32 %v3008_v5, %v8936_v27 }
 0x33e   : > { %v3801_v36 = vmax.f32 %v3007_v59, 0.0  ;;  %v9077_v59 = vrot.slane %v8989_v14, %v8921_v13 }
 0x33f   : > { %v3802_v34 = vmax.f32 %v3009_v35, 0.0 }
 0x340   : > { %v9005_v46 = vmul.f32 %v8998_v40, %v3801_v36  ;;  %11274 = vst [vmem:[#allocation73_spill] sm:$0xff] %v9077_v59  ;;  %v3796_v36 = vmax.f32 %v2796_v33, 0.0 }
 0x341   : > { %v9040_v61 = vmul.f32 %v9025_v2, %v3802_v34 }
 0x342   : > { %v9008_v60 = vpop.f32.mrb[10].mxu1  ;;  %4086 = vrot.lane.b32.xlu1 %v9005_v46, %s6743_s23  ;;  %4325 = vrot.lane.b32.xlu0 %v9005_v46, %s6746_s15  ;;  %v9098_v34 = vmul.f32 %v9073_v21, %v3796_v36 }
 0x343   : > { %v3148_v58 = vpop.f32.mrb[10].mxu0  ;;  %v9017_v29 = vpop.f32.mrb[11].mxu1 }
 0x344   : > { %v3150_v49 = vpop.f32.mrb[11].mxu0  ;;  %v3149_v6 = vadd.f32 %v3148_v58, %v8936_v27 }
 0x345   : > { %v3151_v57 = vadd.f32 %v3150_v49, %v8936_v27 }
 0x346   : > { %4311 = vrot.lane.b32.xlu1 %v9020_v48, %s6746_s15  ;;  %4072 = vrot.lane.b32.xlu0 %v9020_v48, %s6743_s23  ;;  %v3805_v8 = vmax.f32 %v3149_v6, 0.0 }
 0x347   : > { %v9027_v3 = vpop.f32.mrb[12].mxu1  ;;  %v3290_v28 = vpop.f32.mrb[12].mxu0  ;;  %v3806_v58 = vmax.f32 %v3151_v57, 0.0 }
 0x348   : > { %v9033_v9 = vpop.f32.mrb[13].mxu1  ;;  %v3292_v56 = vpop.f32.mrb[13].mxu0  ;;  %v9085_v35 = vmul.f32 %v9054_v52, %v3805_v8  ;;  %v3291_v6 = vadd.f32 %v3290_v28, %v8936_v27  ;;  %v9109_v8 = vld [vmem:[%s10881_s3 + $0x10] sm:$0xff]  ;;  %v2867_v28 = vadd.f32 %v8980_v31, %v8936_v27  ;;  %v9212_v52 = vrot.slane %v8989_v14, %v8939_v10 }
 0x349   : > { %v9101_v20 = vmul.f32 %v9077_v59, %v3806_v58  ;;  %v9124_v21 = vrot.slane %v9109_v8, %v8966_v1  ;;  %v3293_v25 = vadd.f32 %v3292_v56, %v8936_v27  ;;  %v9170_v59 = vrot.slane %v9109_v8, %v8921_v13 }
 0x34a   : > { %4327 = vrot.lane.b32.xlu1 %v9040_v61, %s6746_s15  ;;  %4088 = vrot.lane.b32.xlu0 %v9040_v61, %s6743_s23  ;;  %v3809_v58 = vmax.f32 %v3291_v6, 0.0  ;;  %v3798_v7 = vmax.f32 %v2867_v28, 0.0  ;;  %v2936_v6 = vadd.f32 %v8982_v39, %v8936_v27  ;;  %v9145_v28 = vrot.slane %v9109_v8, %v8993_v55  ;;  %11282 = vst [vmem:[#allocation87_spill] sm:$0xff] %v9212_v52 }
 0x34b   : > { %v9043_v37 = vpop.f32.mrb[14].mxu1  ;;  %v9056_v26 = vpop.f32.mrb[14].mxu0  ;;  %11275 = vst [vmem:[#allocation19_spill] sm:$0xff] %v9124_v21  ;;  %v3810_v42 = vmax.f32 %v3293_v25, 0.0  ;;  %11278 = vst [vmem:[#allocation34_spill] sm:$0xff] %v9170_v59 }
 0x34c   : > { %v9058_v4 = vpop.f32.mrb[15].mxu1  ;;  %v3434_v32 = vpop.f32.mrb[15].mxu0  ;;  %v9139_v31 = vmul.f32 %v8925_v54, %v3798_v7  ;;  %11276 = vst [vmem:[#allocation23_spill] sm:$0xff] %v9145_v28  ;;  %v3799_v56 = vmax.f32 %v2936_v6, 0.0  ;;  %v3078_v6 = vadd.f32 %v9008_v60, %v8936_v27  ;;  %v3433_v60 = vadd.f32 %v9056_v26, %v8936_v27 }
 0x34d   : > { %v9156_v7 = vmul.f32 %v9145_v28, %v3810_v42  ;;  %v3435_v39 = vadd.f32 %v3434_v32, %v8936_v27  ;;  %v9178_v42 = vrot.slane %v8989_v14, %v9015_v16 }
 0x34e   : > { %4074 = vrot.lane.b32.xlu1 %v9061_v30, %s6743_s23  ;;  %4313 = vrot.lane.b32.xlu0 %v9061_v30, %s6746_s15  ;;  %v3803_v32 = vmax.f32 %v3078_v6, 0.0  ;;  %v9195_v6 = vrot.slane %v8989_v14, %v9050_v19  ;;  %v3813_v28 = vmax.f32 %v3433_v60, 0.0 }
 0x34f   : > { %v9065_v50 = vpop.f32.mrb[16].mxu1  ;;  %v9079_v38 = vpop.f32.mrb[16].mxu0  ;;  %11279 = vst [vmem:[#allocation25_spill] sm:$0xff] %v9178_v42 }
 0x350   : > { %v9081_v5 = vpop.f32.mrb[17].mxu1  ;;  %v9087_v49 = vpop.f32.mrb[17].mxu0  ;;  %11280 = vst [vmem:[#allocation85_spill] sm:$0xff] %v9195_v6  ;;  %v9202_v26 = vmul.f32 %v9178_v42, %v3803_v32  ;;  %v9216_v32 = vrot.slane %v9109_v8, %v8934_v63 }
 0x352   : > { %4094 = vrot.lane.b32.xlu1 %v9085_v35, %s6743_s23  ;;  %4333 = vrot.lane.b32.xlu0 %v9085_v35, %s6746_s15  ;;  %11283 = vst [vmem:[#allocation22_spill] sm:$0xff] %v9216_v32 }
 0x353   : > { %v9089_v62 = vpop.f32.mrb[18].mxu1  ;;  %v9104_v33 = vpop.f32.mrb[18].mxu0 }
 0x354   : > { %v9095_v41 = vpop.f32.mrb[19].mxu1  ;;  %v3718_v57 = vpop.f32.mrb[19].mxu0 }
 0x355   : > { %v3719_v42 = vadd.f32 %v3718_v57, %v8936_v27 }
 0x356   : > { %4076 = vrot.lane.b32.xlu1 %v9098_v34, %s6743_s23  ;;  %4096 = vrot.lane.b32.xlu0 %v9101_v20, %s6743_s23 }
 0x357   : > { %v9111_v23 = vpop.f32.mrb[20].mxu1 }
 0x358   : > { %v6504_v36 = vpop.f32.mrb[21].mxu1 }
 0x359   : > { %v9131_v36 = vmul.f32 %v9124_v21, %v3809_v58  ;;  %v9153_v58 = vrot.slane %v8989_v14, %v8934_v63  ;;  %v3814_v21 = vmax.f32 %v3435_v39, 0.0 }
 0x35a   : > { %4315 = vrot.lane.b32.xlu1 %v9098_v34, %s6746_s15  ;;  %4317 = vrot.lane.b32.xlu0 %v9118_v15, %s6746_s15 }
 0x35b   : > { %11277 = vst [vmem:[#allocation80_spill] sm:$0xff] %v9153_v58  ;;  %v9164_v25 = vmul.f32 %v9153_v58, %v3799_v56  ;;  %v3080_v56 = vadd.f32 %v9017_v29, %v8936_v27  ;;  %v9185_v39 = vmul.f32 %v9170_v59, %v3814_v21  ;;  %v2938_v58 = vadd.f32 %v8984_v18, %v8936_v27 }
 0x35c   : > { %v9199_v29 = vrot.slane %v9109_v8, %v8909_v17  ;;  %v3220_v59 = vadd.f32 %v9027_v3, %v8936_v27 }
 0x35d   : > { %v3804_v21 = vmax.f32 %v3080_v56, 0.0  ;;  %v3800_v18 = vmax.f32 %v2938_v58, 0.0  ;;  %v9228_v58 = vld [vmem:[%s10881_s3 + $0x18] sm:$0xff] }
 0x35e   : > { %4335 = vrot.lane.b32.xlu1 %v9101_v20, %s6746_s15  ;;  %4341 = vrot.lane.b32.xlu0 %v9131_v36, %s6746_s15  ;;  %11281 = vst [vmem:[#allocation86_spill] sm:$0xff] %v9199_v29  ;;  %v3807_v3 = vmax.f32 %v3220_v59, 0.0  ;;  %v9222_v60 = vmul.f32 %v9199_v29, %v3813_v28  ;;  %v9236_v14 = vrot.slane %v9228_v58, %v8921_v13 }
 0x35f   : > { %v9219_v56 = vmul.f32 %v9195_v6, %v3804_v21  ;;  %v9239_v59 = vmul.f32 %v9212_v52, %v3800_v18  ;;  %v3222_v28 = vadd.f32 %v9033_v9, %v8936_v27  ;;  %v3822_v21 = vmax.f32 %v3719_v42, 0.0 }
 0x360   : > { %11284 = vst [vmem:[#allocation18_spill] sm:$0xff] %v9236_v14  ;;  %v9242_v57 = vmul.f32 %v9216_v32, %v3807_v3  ;;  %v9252_v13 = vrot.slane %v9109_v8, %v8939_v10  ;;  %v3362_v18 = vadd.f32 %v9043_v37, %v8936_v27  ;;  %v3364_v37 = vadd.f32 %v9058_v4, %v8936_v27  ;;  %v9289_v4 = vpop.permute.xlu1 %4030 }
 0x361   : > { %v3808_v6 = vmax.f32 %v3222_v28, 0.0  ;;  %v9257_v3 = vmul.f32 %v9236_v14, %v3822_v21  ;;  %v9268_v28 = vrot.slane %v9109_v8, %v9015_v16  ;;  %v9386_v32 = vrot.slane %v9228_v58, %v9015_v16 }
 0x362   : > { %4078 = vrot.lane.b32.xlu1 %v9118_v15, %s6743_s23  ;;  %4080 = vrot.lane.b32.xlu0 %v9139_v31, %s6743_s23  ;;  %11285 = vst [vmem:[#allocation20_spill] sm:$0xff] %v9252_v13  ;;  %v3811_v42 = vmax.f32 %v3362_v18, 0.0  ;;  %v3812_v14 = vmax.f32 %v3364_v37, 0.0  ;;  %v3506_v18 = vadd.f32 %v9081_v5, %v8936_v27  ;;  %v9296_v37 = vrot.slane %v9228_v58, %v8939_v10  ;;  %v6415_v10 = vld [vmem:[%s10881_s3 + $0x20] ss:$0 sm:$0xff] }
 0x363   : > { %v9264_v9 = vmul.f32 %v9252_v13, %v3808_v6  ;;  %11286 = vst [vmem:[#allocation24_spill] sm:$0xff] %v9268_v28  ;;  %v9281_v6 = vrot.slane %v9109_v8, %v9050_v19  ;;  %v3788_v8 = vadd.f32 %v9111_v23, %v8936_v27  ;;  %v3504_v5 = vadd.f32 %v9065_v50, %v8936_v27 }
 0x364   : > { %v9277_v21 = vmul.f32 %v9268_v28, %v3811_v42  ;;  %v3816_v42 = vmax.f32 %v3506_v18, 0.0  ;;  %11288 = vst [vmem:[#allocation47_spill] sm:$0xff] %v9296_v37  ;;  %v9320_v50 = vrot.slane %v9228_v58, %v8934_v63  ;;  %v9337_v63 = vrot.slane %v9228_v58, %v8993_v55  ;;  %11297 = vst [vmem:[#allocation88_spill] sm:$0xff] %v9386_v32 }
 0x365   : > { %11287 = vst [vmem:[#allocation82_spill] sm:$0xff] %v9281_v6  ;;  %v9292_v13 = vmul.f32 %v9281_v6, %v3812_v14  ;;  %v3823_v18 = vmax.f32 %v3788_v8, 0.0  ;;  %v9309_v6 = vpop.permute.xlu1 %4236  ;;  %v3815_v23 = vmax.f32 %v3504_v5, 0.0  ;;  %v9446_v54 = vmul.f32 %v9289_v4, %v9118_v15 }
 0x366   : > { %4102 = vrot.lane.b32.xlu1 %v9131_v36, %s6743_s23  ;;  %4104 = vrot.lane.b32.xlu0 %v9156_v7, %s6743_s23  ;;  %v9307_v14 = vmul.f32 %v9296_v37, %v3816_v42  ;;  %11290 = vst [vmem:[#allocation81_spill] sm:$0xff] %v9320_v50  ;;  %v3577_v42 = vadd.f32 %v9087_v49, %v8936_v27  ;;  %11292 = vst [vmem:[#allocation84_spill] sm:$0xff] %v9337_v63 }
 0x367   : > { %v9324_v8 = vmul.f32 %v6415_v10, %v3823_v18  ;;  %v9333_v28 = vmul.f32 %v9320_v50, %v3815_v23  ;;  %v3575_v49 = vadd.f32 %v9079_v38, %v8936_v27  ;;  %v3648_v10 = vadd.f32 %v9095_v41, %v8936_v27  ;;  %v9370_v50 = vpop.permute.xlu0 %4755 }
 0x368   : > { %11289 = vst [vmem:[#allocation90_spill] sm:$0xff] %v9307_v14  ;;  %v3818_v5 = vmax.f32 %v3577_v42, 0.0  ;;  %v9358_v42 = vrot.slane %v9228_v58, %v8966_v1  ;;  %v3646_v1 = vadd.f32 %v9089_v62, %v8936_v27  ;;  %v9438_v2 = vmul.f32 %v9309_v6, %v9020_v48 }
 0x369   : > { %11291 = vst [vmem:[#allocation83_spill] sm:$0xff] %v9324_v8  ;;  %v9330_v37 = vpop.permute.xlu1 %4405  ;;  %v3817_v55 = vmax.f32 %v3575_v49, 0.0  ;;  %v3820_v38 = vmax.f32 %v3648_v10, 0.0  ;;  %v9454_v24 = vmul.f32 %v9289_v4, %v9202_v26  ;;  %v9458_v11 = vmul.f32 %v9289_v4, %v9242_v57 }
 0x36a   : > { %4319 = vrot.lane.b32.xlu1 %v9139_v31, %s6746_s15  ;;  %4321 = vrot.lane.b32.xlu0 %v9164_v25, %s6746_s15  ;;  %v9346_v18 = vmul.f32 %v9337_v63, %v3818_v5  ;;  %11293 = vst [vmem:[#allocation42_spill] sm:$0xff] %v9358_v42  ;;  %v9362_v5 = vrot.slane %v9228_v58, %v9050_v19  ;;  %v3819_v63 = vmax.f32 %v3646_v1, 0.0 }
 0x36b   : > { %v9373_v49 = vmul.f32 %v9358_v42, %v3817_v55  ;;  %v3717_v55 = vadd.f32 %v9104_v33, %v8936_v27  ;;  %v9390_v42 = vpop.permute.xlu0 %4066  ;;  %v9401_v1 = vrot.slane %v9228_v58, %v8909_v17  ;;  %v4035_v17 = vmul.f32 %v9289_v4, %v8974_v51 }
 0x36c   : > { %11294 = vst [vmem:[#allocation57_spill] sm:$0xff] %v9362_v5  ;;  %v9378_v10 = vmul.f32 %v9362_v5, %v3820_v38  ;;  %11298 = vst [vmem:[#allocation64_spill] sm:$0xff] %v9390_v42  ;;  %v9397_v62 = vmul.f32 %v9386_v32, %v3819_v63  ;;  %v4036_v58 = vmul.f32 %v9289_v4, %v9020_v48 }
 0x36d   : > { %v9350_v23 = vpop.permute.xlu1 %4545  ;;  %11296 = vst [vmem:[#allocation39_spill] sm:$0xff] %v9373_v49  ;;  %v3821_v38 = vmax.f32 %v3717_v55, 0.0  ;;  %11300 = vst [vmem:[#allocation92_spill] sm:$0xff] %v9401_v1  ;;  %v4241_v55 = vmul.f32 %v9309_v6, %v8955_v43  ;;  %v4037_v32 = vmul.f32 %v9289_v4, %v9061_v30 }
 0x36e   : > { %4343 = vrot.lane.b32.xlu1 %v9156_v7, %s6746_s15  ;;  %4112 = vrot.lane.b32.xlu0 %v9185_v39, %s6743_s23  ;;  %11299 = vst [vmem:[#allocation89_spill] sm:$0xff] %v9397_v62 }
 0x36f   : > { %v9403_v5 = vpop.permute.xlu0 %4305  ;;  %v9410_v27 = vmul.f32 %v9401_v1, %v3821_v38  ;;  %v9427_v38 = vmul.f32 %v9309_v6, %v8974_v51  ;;  %v9433_v1 = vmul.f32 %v9289_v4, %v9098_v34 }
 0x370   : > { %11301 = vst [vmem:[#allocation66_spill] sm:$0xff] %v9403_v5 }
 0x371   : > { %v9368_v41 = vpop.permute.xlu1 %4685  ;;  %11302 = vst [vmem:[#allocation14_spill] sm:$0xff] %v9410_v27 }
 0x372   : > { %4082 = vrot.lane.b32.xlu1 %v9164_v25, %s6743_s23  ;;  %4329 = vrot.lane.b32.xlu0 %v9202_v26, %s6746_s15  ;;  %11295 = vst [vmem:[#allocation91_spill] sm:$0xff] %v9368_v41  ;;  %v9442_v40 = vmul.f32 %v9368_v41, %v9020_v48  ;;  %v9450_v53 = vmul.f32 %v9368_v41, %v9101_v20 }
 0x373   : > { %v4310_v29 = vpop.permute.xlu0 %4309  ;;  %v9462_v48 = vmul.f32 %v9309_v6, %v9061_v30  ;;  %v9488_v45 = vmul.f32 %v9368_v41, %v9098_v34 }
 0x374   : > { %11303 = vst [vmem:[#allocation67_spill] sm:$0xff] %v9450_v53  ;;  %v9471_v53 = vmul.f32 %v9368_v41, %v9156_v7 }
 0x375   : > { %v4069_v19 = vpop.permute.xlu1 %4068  ;;  %11306 = vst [vmem:[#allocation41_spill] sm:$0xff] %v9488_v45 }
 0x376   : > { %4110 = vrot.lane.b32.xlu1 %v9222_v60, %s6743_s23  ;;  %4092 = vrot.lane.b32.xlu0 %v9219_v56, %s6743_s23  ;;  %v4163_v33 = vsel %vm1882_vm4, %v9390_v42, %v4069_v19  ;;  %v9467_v42 = vld [vmem:[%s10885_s7] sm:$0xf]  ;;  %11305 = vst [vmem:[#allocation43_spill] sm:$0xff] %v9471_v53  ;;  %v9496_v53 = vmul.f32 %v9289_v4, %v9164_v25 }
 0x377   : > { %v4171_v52 = vmul.f32 %v8927_v0, %v4163_v33  ;;  %11304 = vst [vmem:[#allocation68_spill] sm:$0xff] %v9467_v42  ;;  %v9515_v45 = vmul.f32 %v8929_v44, %v4163_v33 }
 0x379   : > { %v4308_v16 = vpop.permute.xlu1 %4307  ;;  %11313 = vst [vmem:[#allocation26_spill] sm:$0xff] %v9515_v45  ;;  %v9538_v45 = vmul.f32 %v9289_v4, %v9239_v59 }
 0x37a   : > { %4084 = vrot.lane.b32.xlu1 %v9239_v59, %s6743_s23  ;;  %4337 = vrot.lane.b32.xlu0 %v9242_v57, %s6746_s15 }
 0x37b   : > { %11318 = vst [vmem:[#allocation65_spill] sm:$0xff] %v9538_v45 }
 0x37d   : > { %v4071_v63 = vpop.permute.xlu1 %4070 }
 0x37e   : > { %4323 = vrot.lane.b32.xlu1 %v9239_v59, %s6746_s15  ;;  %4128 = vrot.lane.b32.xlu0 %v9257_v3, %s6743_s23 }
 0x382   : > { %4090 = vrot.lane.b32.xlu1 %v9202_v26, %s6743_s23  ;;  %4100 = vrot.lane.b32.xlu0 %v9264_v9, %s6743_s23 }
 0x386   : > { %4331 = vrot.lane.b32.xlu1 %v9219_v56, %s6746_s15  ;;  %4345 = vrot.lane.b32.xlu0 %v9277_v21, %s6746_s15 }
 0x38a   : > { %4098 = vrot.lane.b32.xlu1 %v9242_v57, %s6743_s23  ;;  %4108 = vrot.lane.b32.xlu0 %v9292_v13, %s6743_s23 }
 0x38e   : > { %4339 = vrot.lane.b32.xlu1 %v9264_v9, %s6746_s15  ;;  %4116 = vrot.lane.b32.xlu0 %v9307_v14, %s6743_s23 }
 0x392   : > { %4106 = vrot.lane.b32.xlu1 %v9277_v21, %s6743_s23  ;;  %4369 = vrot.lane.b32.xlu0 %v9324_v8, %s6746_s15 }
 0x396   : > { %4114 = vrot.lane.b32.xlu1 %v9333_v28, %s6743_s23  ;;  %4349 = vrot.lane.b32.xlu0 %v9222_v60, %s6746_s15 }
 0x39a   : > { %4130 = vrot.lane.b32.xlu1 %v9324_v8, %s6743_s23  ;;  %4120 = vrot.lane.b32.xlu0 %v9346_v18, %s6743_s23  ;;  %v4162_v8 = vsel %vm1882_vm4, %v4069_v19, %v4071_v63  ;;  %v9492_v19 = vmul.f32 %v9289_v4, %v9139_v31 }
 0x39c   : > { %11307 = vst [vmem:[#allocation71_spill] sm:$0xff] %v9492_v19  ;;  %v9512_v19 = vmul.f32 %v9368_v41, %v9118_v15 }
 0x39e   : > { %4347 = vrot.lane.b32.xlu1 %v9292_v13, %s6746_s15  ;;  %4353 = vrot.lane.b32.xlu0 %v9333_v28, %s6746_s15  ;;  %11312 = vst [vmem:[#allocation51_spill] sm:$0xff] %v9512_v19 }
 0x3a2   : > { %4118 = vrot.lane.b32.xlu1 %v9373_v49, %s6743_s23  ;;  %4124 = vrot.lane.b32.xlu0 %v9378_v10, %s6743_s23 }
 0x3a6   : > { %4351 = vrot.lane.b32.xlu1 %v9185_v39, %s6746_s15  ;;  %4357 = vrot.lane.b32.xlu0 %v9373_v49, %s6746_s15 }
 0x3aa   : > { %4122 = vrot.lane.b32.xlu1 %v9397_v62, %s6743_s23  ;;  %4361 = vrot.lane.b32.xlu0 %v9397_v62, %s6746_s15  ;;  %v9479_v62 = vmul.f32 %v9368_v41, %v9061_v30  ;;  %v4204_v30 = vadd.f32 %v4171_v52, %v4035_v17  ;;  %v4172_v52 = vmul.f32 %v8927_v0, %v4162_v8 }
 0x3ab   : > { %v9520_v17 = vmul.f32 %v9309_v6, %v9139_v31 }
 0x3ad   : > { %11314 = vst [vmem:[#allocation50_spill] sm:$0xff] %v9520_v17  ;;  %v9542_v17 = vmul.f32 %v9289_v4, %v8952_v12 }
 0x3ae   : > { %4355 = vrot.lane.b32.xlu1 %v9307_v14, %s6746_s15  ;;  %4365 = vrot.lane.b32.xlu0 %v9410_v27, %s6746_s15  ;;  %v9484_v14 = vmul.f32 %v9309_v6, %v9098_v34  ;;  %v9508_v34 = vmul.f32 %v9309_v6, %v9118_v15  ;;  %v9532_v15 = vsel %vm2122_vm5, %v9403_v5, %v4308_v16 }
 0x3af   : > { %11317 = vst [vmem:[#allocation45_spill] sm:$0xff] %v9532_v15  ;;  %11319 = vst [vmem:[#allocation12_spill] sm:$0xff] %v9542_v17  ;;  %v9558_v5 = vmul.f32 %v9368_v41, %v8955_v43  ;;  %v9562_v45 = vmul.f32 %v9350_v23, %v9532_v15  ;;  %v4274_v17 = vadd.f32 %v4241_v55, %v4204_v30 }
 0x3b0   : > { %11311 = vst [vmem:[#allocation59_spill] sm:$0xff] %v9508_v34  ;;  %v4205_v34 = vadd.f32 %v4172_v52, %v4036_v58  ;;  %v9586_v58 = vmul.f32 %v9309_v6, %v9164_v25  ;;  %v9600_v52 = vmul.f32 %v9289_v4, %v9101_v20 }
 0x3b1   : > { %11323 = vst [vmem:[#allocation10_spill] sm:$0xff] %v9558_v5  ;;  %11324 = vst [vmem:[#allocation77_spill] sm:$0xff] %v9562_v45  ;;  %v9608_v5 = vmul.f32 %v9368_v41, %v9164_v25  ;;  %v9617_v45 = vmul.f32 %v9309_v6, %v9239_v59 }
 0x3b2   : > { %4126 = vrot.lane.b32.xlu1 %v9410_v27, %s6743_s23  ;;  %4827 = vperm.xlu0 %6594, %v9467_v42   ;;  %v9504_v42 = vmul.f32 %v9289_v4, %v9277_v21  ;;  %11328 = vst [vmem:[#allocation30_spill] sm:$0xff] %v9600_v52  ;;  %s6674_s23 = scalar_lea.vmem %s6673_s25, 4224 }
 0x3b3   : > { %11331 = vst [vmem:[#allocation75_spill] sm:$0xff] %v9617_v45  ;;  %v9658_v45 = vmul.f32 %v8931_v47, %v4162_v8  ;;  %p6676_p2 = scmp.lt.s32.totalorder %s6674_s23, %s6668_s18 }
 0x3b4   : > { %v9498_v27 = vpop.permute.xlu1 %4086  ;;  %v9500_v49 = vpop.permute.xlu0 %4325  ;;  %11310 = vst [vmem:[#allocation55_spill] sm:$0xff] %v9504_v42  ;;  %v9527_v42 = vmul.f32 %v8931_v47, %v4163_v33  ;;  %v9550_v33 = vmul.f32 %v9289_v4, %v8955_v43 }
 0x3b5   : > { %11308 = vst [vmem:[#allocation72_spill] sm:$0xff] %v9498_v27  ;;  %11309 = vst [vmem:[#allocation74_spill] sm:$0xff] %v9500_v49  ;;  %v9524_v49 = vmul.f32 %v9368_v41, %v9139_v31  ;;  %v9546_v31 = vmul.f32 %v9330_v37, %v9532_v15  ;;  %v9604_v15 = vmul.f32 %v9309_v6, %v9085_v35  ;;  %p6677_p4 = por %p6676_p2, %p6675_p10 }
 0x3b6   : > { %11316 = vst [vmem:[#allocation46_spill] sm:$0xff] %v9527_v42  ;;  %4359 = vrot.lane.b32.xlu1 %v9346_v18, %s6746_s15  ;;  %11321 = vst [vmem:[#allocation44_spill] sm:$0xff] %v9550_v33  ;;  %v9554_v42 = vmul.f32 %v9309_v6, %v8952_v12  ;;  %v9568_v33 = vmul.f32 %v9289_v4, %v9333_v28 }
 0x3b7   : > { %11315 = vst [vmem:[#allocation48_spill] sm:$0xff] %v9524_v49  ;;  %11320 = vst [vmem:[#allocation76_spill] sm:$0xff] %v9546_v31  ;;  %v4251_v31 = vmul.f32 %v9309_v6, %v9040_v61  ;;  %p6678_p7 = pnand %p6677_p4, %p6671_p5 }
 0x3b8   : > { %11322 = vst [vmem:[#allocation28_spill] sm:$0xff] %v9554_v42  ;;  %v4312_v49 = vpop.permute.xlu1 %4311  ;;  %v4073_v19 = vpop.permute.xlu0 %4072  ;;  %11325 = vst [vmem:[#allocation13_spill] sm:$0xff] %v9568_v33  ;;  %v4401_v42 = vsel %vm2122_vm5, %v4308_v16, %v4310_v29  ;;  %v9590_v16 = vmul.f32 %v9368_v41, %v8974_v51  ;;  %v9621_v33 = vmul.f32 %v9368_v41, %v9239_v59 }
 0x3b9   : > { %v9574_v43 = vsel %vm2122_vm5, %v4310_v29, %v4312_v49  ;;  %v9578_v55 = vsel %vm1882_vm4, %v4071_v63, %v4073_v19  ;;  %v9594_v29 = vmul.f32 %v9368_v41, %v8952_v12  ;;  %11329 = vst [vmem:[#allocation29_spill] sm:$0xff] %v9604_v15  ;;  %v4410_v51 = vmul.f32 %v9330_v37, %v4401_v42 }
 0x3ba   : > { %v4173_v30 = vmul.f32 %v8927_v0, %v9578_v55  ;;  %4363 = vrot.lane.b32.xlu1 %v9378_v10, %s6746_s15  ;;  %11326 = vst [vmem:[#allocation60_spill] sm:$0xff] %v9590_v16  ;;  %v4411_v63 = vmul.f32 %v9330_v37, %v9574_v43  ;;  %11332 = vst [vmem:[#allocation15_spill] sm:$0xff] %v9621_v33  ;;  %v4275_v15 = vadd.f32 %v9427_v38, %v4205_v34 }
 0x3bb   : > { %11327 = vst [vmem:[#allocation69_spill] sm:$0xff] %v9594_v29  ;;  %v9642_v59 = vmul.f32 %v9309_v6, %v9005_v46  ;;  %v9646_v38 = vmul.f32 %v9309_v6, %v9101_v20  ;;  %v9650_v34 = vmul.f32 %v9368_v41, %v9040_v61  ;;  %v9654_v33 = vmul.f32 %v9368_v41, %v9005_v46 }
 0x3bc   : > { %v4206_v16 = vadd.f32 %v4173_v30, %v4037_v32  ;;  %v9611_v12 = vpop.permute.xlu1 %4327  ;;  %v9613_v29 = vpop.permute.xlu0 %4088  ;;  %v9632_v32 = vmul.f32 %v9289_v4, %v9005_v46  ;;  %v9636_v30 = vmul.f32 %v9289_v4, %v9040_v61  ;;  %11338 = vst [vmem:[#allocation53_spill] sm:$0xff] %v9658_v45  ;;  %v9663_v20 = vmul.f32 %v9350_v23, %v4401_v42 }
 0x3bd   : > { %11330 = vst [vmem:[#allocation32_spill] sm:$0xff] %v9613_v29  ;;  %v9628_v25 = vsel %vm1882_vm4, %v9498_v27, %v9613_v29  ;;  %11335 = vst [vmem:[#allocation58_spill] sm:$0xff] %v9642_v59  ;;  %v4480_v29 = vmul.f32 %v8929_v44, %v4162_v8  ;;  %v9666_v61 = vmul.f32 %v9370_v50, %v4401_v42 }
 0x3be   : > { %11333 = vst [vmem:[#allocation36_spill] sm:$0xff] %v9632_v32  ;;  %11334 = vst [vmem:[#allocation61_spill] sm:$0xff] %v9636_v30  ;;  %4367 = vrot.lane.b32.xlu1 %v9257_v3, %s6746_s15  ;;  %v4444_v30 = vadd.f32 %v4411_v63, %v4275_v15  ;;  %v4181_v59 = vmul.f32 %v8927_v0, %v9628_v25  ;;  %v4443_v32 = vadd.f32 %v4410_v51, %v4274_v17 }
 0x3bf   : > { %11336 = vst [vmem:[#allocation63_spill] sm:$0xff] %v9650_v34  ;;  %11337 = vst [vmem:[#allocation33_spill] sm:$0xff] %v9654_v33  ;;  %v4276_v46 = vadd.f32 %v9438_v2, %v4206_v16  ;;  %v4481_v27 = vmul.f32 %v8929_v44, %v9578_v55  ;;  %v9680_v51 = vmul.f32 %v9289_v4, %v9085_v35 }
 0x3c0   : > { %11339 = vst [vmem:[#allocation35_spill] sm:$0xff] %v9663_v20  ;;  %11340 = vst [vmem:[#allocation16_spill] sm:$0xff] %v9666_v61  ;;  %v4075_v34 = vpop.permute.xlu1 %4074  ;;  %v4314_v33 = vpop.permute.xlu0 %4313  ;;  %v4214_v8 = vadd.f32 %v4181_v59, %v9454_v24  ;;  %v9684_v2 = vmul.f32 %v9309_v6, %v9202_v26  ;;  %v4550_v24 = vmul.f32 %v9350_v23, %v9574_v43 }
 0x3c1   : > { %v4160_v15 = vsel %vm1882_vm4, %v4073_v19, %v4075_v34  ;;  %v4399_v17 = vsel %vm2122_vm5, %v4312_v49, %v4314_v33  ;;  %11341 = vst [vmem:[#allocation40_spill] sm:$0xff] %v9680_v51  ;;  %v4514_v16 = vadd.f32 %v4481_v27, %v4444_v30  ;;  %v4513_v52 = vadd.f32 %v4480_v29, %v4443_v32 }
 0x3c2   : > { %v4174_v63 = vmul.f32 %v8927_v0, %v4160_v15  ;;  %v4412_v42 = vmul.f32 %v9330_v37, %v4399_v17  ;;  %11342 = vst [vmem:[#allocation93_spill] sm:$0xff] %v9684_v2  ;;  %v4551_v19 = vmul.f32 %v9350_v23, %v4399_v17  ;;  %v9689_v59 = vadd.f32 %v4251_v31, %v4214_v8 }
 0x3c3   : > { %v4482_v45 = vmul.f32 %v8929_v44, %v4160_v15  ;;  %v9699_v2 = vmul.f32 %v9289_v4, %v9219_v56  ;;  %v4621_v27 = vmul.f32 %v8931_v47, %v4160_v15  ;;  %v9704_v31 = vmul.f32 %v9309_v6, %v9219_v56 }
 0x3c4   : > { %v4207_v49 = vadd.f32 %v4174_v63, %v9433_v1  ;;  %v4445_v61 = vadd.f32 %v4412_v42, %v4276_v46  ;;  %v9693_v20 = vpop.permute.xlu1 %4094  ;;  %v9695_v51 = vpop.permute.xlu0 %4333  ;;  %v4584_v30 = vadd.f32 %v4551_v19, %v4514_v16  ;;  %v9709_v46 = vmul.f32 %v9368_v41, %v9202_v26 }
 0x3c5   : > { %v9713_v63 = vmul.f32 %v9368_v41, %v9219_v56  ;;  %v4583_v42 = vadd.f32 %v4550_v24, %v4513_v52  ;;  %v9717_v32 = vmul.f32 %v9309_v6, %v9131_v36  ;;  %v9721_v15 = vmul.f32 %v9368_v41, %v9085_v35 }
 0x3c6   : > { %v4277_v1 = vadd.f32 %v9462_v48, %v4207_v49  ;;  %v4515_v8 = vadd.f32 %v4482_v45, %v4445_v61  ;;  %v4654_v29 = vadd.f32 %v4621_v27, %v4584_v30  ;;  %v9729_v26 = vmul.f32 %v9289_v4, %v9156_v7 }
 0x3c7   : > { %11343 = vst [vmem:[#allocation62_spill] sm:$0xff] %v9721_v15  ;;  %v9733_v56 = vmul.f32 %v9289_v4, %v9131_v36  ;;  %v9737_v52 = vmul.f32 %v9309_v6, %v9242_v57  ;;  %v9741_v35 = vmul.f32 %v9368_v41, %v9242_v57  ;;  %v4620_v61 = vmul.f32 %v8931_v47, %v9578_v55 }
 0x3c8   : > { %v9723_v45 = vpop.permute.xlu1 %4076  ;;  %v9725_v48 = vpop.permute.xlu0 %4096  ;;  %v4724_v19 = vadd.f32 %v9479_v62, %v4654_v29  ;;  %v9760_v55 = vmul.f32 %v9309_v6, %v9156_v7  ;;  %v9768_v30 = vmul.f32 %v9309_v6, %v9264_v9  ;;  %v9772_v62 = vmul.f32 %v9368_v41, %v9264_v9 }
 0x3c9   : > { %11344 = vst [vmem:[#allocation37_spill] sm:$0xff] %v9733_v56  ;;  %11345 = vst [vmem:[#allocation27_spill] sm:$0xff] %v9737_v52  ;;  %v4159_v24 = vsel %vm1882_vm4, %v4075_v34, %v9723_v45  ;;  %v9752_v16 = vsel %vm1882_vm4, %v9693_v20, %v9725_v48  ;;  %v9764_v34 = vmul.f32 %v9289_v4, %v9264_v9 }
 0x3ca   : > { %11346 = vst [vmem:[#allocation21_spill] sm:$0xff] %v9741_v35  ;;  %v4175_v49 = vmul.f32 %v8927_v0, %v4159_v24  ;;  %v4185_v57 = vmul.f32 %v8927_v0, %v9752_v16  ;;  %v4653_v27 = vadd.f32 %v4620_v61, %v4583_v42  ;;  %11347 = vst [vmem:[#allocation94_spill] sm:$0xff] %v9768_v30 }
 0x3cb   : > { %11348 = vst [vmem:[#allocation95_spill] sm:$0xff] %v9772_v62  ;;  %v9776_v29 = vmul.f32 %v9368_v41, %v9131_v36  ;;  %v9784_v42 = vmul.f32 %v9289_v4, %v9222_v60  ;;  %v4760_v61 = vmul.f32 %v9370_v50, %v4399_v17  ;;  %v9791_v36 = vmul.f32 %v9309_v6, %v9277_v21 }
 0x3cc   : > { %v4208_v7 = vadd.f32 %v4175_v49, %v9446_v54  ;;  %v4218_v15 = vadd.f32 %v4185_v57, %v9458_v11  ;;  %v4316_v35 = vpop.permute.xlu1 %4315  ;;  %v9780_v52 = vpop.permute.xlu0 %4317  ;;  %v9795_v54 = vmul.f32 %v9368_v41, %v9277_v21  ;;  %v4723_v17 = vadd.f32 %v9442_v40, %v4653_v27 }
 0x3cd   : > { %11349 = vst [vmem:[#allocation96_spill] sm:$0xff] %v9776_v29  ;;  %11350 = vst [vmem:[#allocation97_spill] sm:$0xff] %v9784_v42  ;;  %v4398_v9 = vsel %vm2122_vm5, %v4314_v33, %v4316_v35  ;;  %v4483_v33 = vmul.f32 %v8929_v44, %v4159_v24  ;;  %v4622_v21 = vmul.f32 %v8931_v47, %v4159_v24 }
 0x3ce   : > { %11351 = vst [vmem:[#allocation98_spill] sm:$0xff] %v9791_v36  ;;  %11352 = vst [vmem:[#allocation99_spill] sm:$0xff] %v9795_v54  ;;  %v4413_v11 = vmul.f32 %v9330_v37, %v4398_v9  ;;  %v4552_v49 = vmul.f32 %v9350_v23, %v4398_v9  ;;  %v4761_v57 = vmul.f32 %v9370_v50, %v4398_v9 }
 0x3cf   : > { %v4278_v29 = vadd.f32 %v9484_v14, %v4208_v7  ;;  %v4397_v36 = vsel %vm2122_vm5, %v4316_v35, %v9780_v52  ;;  %v9807_v42 = vadd.f32 %v9646_v38, %v4218_v15  ;;  %v4793_v14 = vadd.f32 %v4760_v61, %v4723_v17  ;;  %v11364_v17 = vld [vmem:[#allocation39_spill] sm:$0xff] }
 0x3d0   : > { %v4446_v54 = vadd.f32 %v4413_v11, %v4277_v1  ;;  %v4585_v62 = vadd.f32 %v4552_v49, %v4515_v8  ;;  %v4794_v30 = vadd.f32 %v4761_v57, %v4724_v19  ;;  %v9810_v56 = vpop.permute.xlu1 %4335  ;;  %v9812_v9 = vpop.permute.xlu0 %4341  ;;  %v9816_v40 = vmul.f32 %v9289_v4, %v9185_v39  ;;  %v11363_v57 = vld [vmem:[#allocation68_spill] sm:$0xff] }
 0x3d1   : > { %11353 = vst [vmem:[#allocation100_spill] sm:$0xff] %v9812_v9  ;;  %v9820_v35 = vmul.f32 %v9289_v4, %v9292_v13  ;;  %v9824_v38 = vmul.f32 %v9309_v6, %v9292_v13  ;;  %v4553_v15 = vmul.f32 %v9350_v23, %v4397_v36  ;;  %v9830_v24 = vmul.f32 %v9368_v41, %v9292_v13  ;;  %v11362_v13 = vld [vmem:[#allocation41_spill] sm:$0xff] }
 0x3d2   : > { %11354 = vst [vmem:[#allocation101_spill] sm:$0xff] %v9816_v40  ;;  %v4655_v1 = vadd.f32 %v4622_v21, %v4585_v62  ;;  %v4516_v8 = vadd.f32 %v4483_v33, %v4446_v54  ;;  %6419 = vmatprep.subr.msk.mxu1 %vm4833_vm8, %v4794_v30  ;;  %v9835_v19 = vmul.f32 %v9309_v6, %v9222_v60  ;;  %v11366_v21 = vmov 0.0  }
 0x3d3   : > { %11355 = vst [vmem:[#allocation102_spill] sm:$0xff] %v9820_v35  ;;  %11356 = vst [vmem:[#allocation103_spill] sm:$0xff] %v9824_v38  ;;  %6420 = vmatpush1.msk.msra.mxu1 %vm4833_vm8, %v4793_v14  ;;  %v9839_v27 = vmul.f32 %v9309_v6, %v9185_v39  ;;  %v9843_v62 = vmul.f32 %v9368_v41, %v9222_v60  ;;  %v9847_v30 = vmul.f32 %v9368_v41, %v9185_v39  ;;  %v11386_v38 = vld [vmem:[#allocation55_spill] sm:$0xff] }
 0x3d4   : > { %11357 = vst [vmem:[#allocation104_spill] sm:$0xff] %v9830_v24  ;;  %11358 = vst [vmem:[#allocation105_spill] sm:$0xff] %v9835_v19  ;;  %v4725_v7 = vadd.f32 %v11362_v13, %v4655_v1  ;;  %v4586_v61 = vadd.f32 %v4553_v15, %v4516_v8  ;;  %v4762_v54 = vmul.f32 %v9370_v50, %v4397_v36  ;;  %v4079_v11 = vpop.permute.xlu1 %4078  ;;  %v9851_v49 = vpop.permute.xlu0 %4080  ;;  %6421 = vmatmul.mubr.msk.f32.vlgmr.msra.gmra.mrb[22].mxu1 %vm4830_vm9, %v11363_v57 }
 0x3d5   : > { %11359 = vst [vmem:[#allocation106_spill] sm:$0xff] %v9839_v27  ;;  %11360 = vst [vmem:[#allocation107_spill] sm:$0xff] %v9843_v62  ;;  %v9857_v33 = vmul.f32 %v9289_v4, %v11364_v17  ;;  %v4158_v39 = vsel %vm1882_vm4, %v9723_v45, %v4079_v11  ;;  %v4157_v60 = vsel %vm1882_vm4, %v4079_v11, %v9851_v49  ;;  %5210 = vmatprep.mubr.f32.mxu1 %v11366_v21  ;;  %v11371_v62 = vld [vmem:[#allocation90_spill] sm:$0xff] }
 0x3d6   : > { %11361 = vst [vmem:[#allocation108_spill] sm:$0xff] %v9847_v30  ;;  %v9868_v14 = vmul.f32 %v9309_v6, %v9333_v28  ;;  %v9872_v1 = vmul.f32 %v9368_v41, %v9333_v28  ;;  %v9874_v8 = vadd.f32 %v4762_v54, %v4725_v7  ;;  %v4176_v15 = vmul.f32 %v8927_v0, %v4158_v39  ;;  %v11374_v7 = vld [vmem:[#allocation71_spill] sm:$0xff] }
 0x3d7   : > { %11365 = vst [vmem:[#allocation41_spill] sm:$0xff] %v9857_v33  ;;  %v4623_v45 = vmul.f32 %v8931_v47, %v4158_v39  ;;  %v9880_v13 = vmul.f32 %v9309_v6, %v11364_v17  ;;  %v4414_v11 = vmul.f32 %v9330_v37, %v4397_v36  ;;  %v4177_v30 = vmul.f32 %v8927_v0, %v4157_v60  ;;  %v11384_v33 = vld [vmem:[#allocation89_spill] sm:$0xff] }
 0x3d8   : > { %11367 = vst [vmem:[#allocation68_spill] sm:$0xff] %v9868_v14  ;;  %11368 = vst [vmem:[#allocation39_spill] sm:$0xff] %v9872_v1  ;;  %v9886_v14 = vmul.f32 %v9289_v4, %v11371_v62  ;;  %v9890_v28 = vmul.f32 %v9289_v4, %v9346_v18  ;;  %v4209_v54 = vadd.f32 %v4176_v15, %v11374_v7  ;;  %v9893_v1 = vpop.permute.xlu1 %4102  ;;  %v9895_v27 = vpop.permute.xlu0 %4104  ;;  %v11379_v7 = vld [vmem:[#allocation59_spill] sm:$0xff] }
 0x3d9   : > { %11369 = vst [vmem:[#allocation109_spill] sm:$0xff] %v9874_v8  ;;  %11370 = vst [vmem:[#allocation110_spill] sm:$0xff] %v9880_v13  ;;  %v4656_v8 = vadd.f32 %v4623_v45, %v4586_v61  ;;  %v9899_v36 = vmul.f32 %v9309_v6, %v11371_v62  ;;  %v9903_v13 = vmul.f32 %v9368_v41, %v11371_v62 }
 0x3da   : > { %11372 = vst [vmem:[#allocation90_spill] sm:$0xff] %v9886_v14  ;;  %11373 = vst [vmem:[#allocation111_spill] sm:$0xff] %v9890_v28  ;;  %v4484_v19 = vmul.f32 %v8929_v44, %v4158_v39  ;;  %v4210_v24 = vadd.f32 %v4177_v30, %v9496_v53  ;;  %v9911_v61 = vsel %vm1882_vm4, %v9893_v1, %v9895_v27  ;;  %v11383_v28 = vld [vmem:[#allocation50_spill] sm:$0xff] }
 0x3db   : > { %11375 = vst [vmem:[#allocation71_spill] sm:$0xff] %v9895_v27  ;;  %11376 = vst [vmem:[#allocation112_spill] sm:$0xff] %v9899_v36  ;;  %v9915_v15 = vmul.f32 %v9309_v6, %v9346_v18  ;;  %v4189_v45 = vmul.f32 %v8927_v0, %v9911_v61  ;;  %v4279_v62 = vadd.f32 %v11379_v7, %v4209_v54  ;;  %v11426_v27 = vld [vmem:[#allocation61_spill] sm:$0xff] }
 0x3dc   : > { %11377 = vst [vmem:[#allocation113_spill] sm:$0xff] %v9903_v13  ;;  %v9922_v39 = vmul.f32 %v9368_v41, %v11364_v17  ;;  %v9926_v53 = vmul.f32 %v9368_v41, %v9346_v18  ;;  %v4447_v30 = vadd.f32 %v4414_v11, %v4278_v29  ;;  %v11382_v13 = vld [vmem:[#allocation51_spill] sm:$0xff]  ;;  %v4280_v14 = vadd.f32 %v11383_v28, %v4210_v24  ;;  %v4320_v54 = vpop.permute.xlu1 %4319  ;;  %v9935_v7 = vpop.permute.xlu0 %4321 }
 0x3dd   : > { %11378 = vst [vmem:[#allocation114_spill] sm:$0xff] %v9915_v15  ;;  %v4726_v36 = vadd.f32 %v11382_v13, %v4656_v8  ;;  %v9932_v15 = vmul.f32 %v9289_v4, %v11384_v33  ;;  %v4222_v35 = vadd.f32 %v4189_v45, %v11386_v38  ;;  %v9939_v17 = vmul.f32 %v9289_v4, %v9378_v10 }
 0x3de   : > { %11380 = vst [vmem:[#allocation59_spill] sm:$0xff] %v9922_v39  ;;  %11381 = vst [vmem:[#allocation115_spill] sm:$0xff] %v9926_v53  ;;  %v9943_v18 = vmul.f32 %v9309_v6, %v11384_v33  ;;  %v9947_v29 = vmul.f32 %v9368_v41, %v11384_v33  ;;  %v4517_v24 = vadd.f32 %v4484_v19, %v4447_v30 }
 0x3df   : > { %11385 = vst [vmem:[#allocation51_spill] sm:$0xff] %v9932_v15  ;;  %11387 = vst [vmem:[#allocation50_spill] sm:$0xff] %v9939_v17  ;;  %v4396_v38 = vsel %vm2122_vm5, %v9780_v52, %v4320_v54  ;;  %v4395_v8 = vsel %vm2122_vm5, %v4320_v54, %v9935_v7  ;;  %v9957_v13 = vmul.f32 %v9309_v6, %v9378_v10  ;;  %v11394_v17 = vld [vmem:[#allocation74_spill] sm:$0xff] }
 0x3e0   : > { %11388 = vst [vmem:[#allocation89_spill] sm:$0xff] %v9943_v18  ;;  %11389 = vst [vmem:[#allocation55_spill] sm:$0xff] %v9947_v29  ;;  %v4415_v11 = vmul.f32 %v9330_v37, %v4396_v38  ;;  %v4554_v28 = vmul.f32 %v9350_v23, %v4396_v38  ;;  %v4763_v33 = vmul.f32 %v9370_v50, %v4396_v38  ;;  %v9974_v39 = vpop.permute.xlu1 %4343  ;;  %v9976_v38 = vpop.permute.xlu0 %4112 }
 0x3e1   : > { %11390 = vst [vmem:[#allocation116_spill] sm:$0xff] %v9957_v13  ;;  %v4416_v19 = vmul.f32 %v9330_v37, %v4395_v8  ;;  %v4485_v45 = vmul.f32 %v8929_v44, %v4157_v60  ;;  %v4624_v52 = vmul.f32 %v8931_v47, %v4157_v60  ;;  %v9966_v30 = vadd.f32 %v9760_v55, %v4222_v35  ;;  %v11395_v55 = vld [vmem:[#allocation83_spill] sm:$0xff] }
 0x3e2   : > { %v9970_v54 = vmul.f32 %v9368_v41, %v9378_v10  ;;  %v4448_v29 = vadd.f32 %v4415_v11, %v4279_v62  ;;  %v4587_v53 = vadd.f32 %v4554_v28, %v4517_v24  ;;  %v9972_v13 = vadd.f32 %v4763_v33, %v4726_v36  ;;  %11393 = vst [vmem:[#allocation119_spill] sm:$0xff] %v9976_v38  ;;  %v11397_v10 = vld [vmem:[#allocation14_spill] sm:$0xff] }
 0x3e3   : > { %v4449_v18 = vadd.f32 %v4416_v19, %v4280_v14  ;;  %v4392_v60 = vsel %vm2122_vm5, %v11394_v17, %v9611_v12  ;;  %v9984_v35 = vmul.f32 %v9309_v6, %v11395_v55  ;;  %v9988_v62 = vmul.f32 %v9289_v4, %v11397_v10 }
 0x3e4   : > { %11391 = vst [vmem:[#allocation117_spill] sm:$0xff] %v9970_v54  ;;  %11392 = vst [vmem:[#allocation118_spill] sm:$0xff] %v9972_v13  ;;  %v9992_v14 = vmul.f32 %v9289_v4, %v11395_v55  ;;  %v4657_v36 = vadd.f32 %v4624_v52, %v4587_v53  ;;  %v4518_v24 = vadd.f32 %v4485_v45, %v4448_v29  ;;  %v11406_v45 = vld [vmem:[#allocation48_spill] sm:$0xff]  ;;  %v4083_v55 = vpop.permute.xlu1 %4082  ;;  %v10027_v54 = vpop.permute.xlu0 %4329 }
 0x3e5   : > { %11396 = vst [vmem:[#allocation74_spill] sm:$0xff] %v9984_v35  ;;  %11398 = vst [vmem:[#allocation14_spill] sm:$0xff] %v9988_v62  ;;  %v9996_v11 = vmul.f32 %v9289_v4, %v9257_v3  ;;  %v10000_v28 = vmul.f32 %v9309_v6, %v11397_v10  ;;  %v10004_v33 = vmul.f32 %v9370_v50, %v9574_v43  ;;  %v11417_v35 = vld [vmem:[#allocation30_spill] sm:$0xff] }
 0x3e6   : > { %11399 = vst [vmem:[#allocation120_spill] sm:$0xff] %v9992_v14  ;;  %v10008_v19 = vmul.f32 %v9309_v6, %v9257_v3  ;;  %v10012_v53 = vmul.f32 %v9368_v41, %v11397_v10  ;;  %v10016_v4 = vmul.f32 %v9368_v41, %v9257_v3  ;;  %v10019_v29 = vmul.f32 %v9330_v37, %v4392_v60 }
 0x3e7   : > { %11400 = vst [vmem:[#allocation121_spill] sm:$0xff] %v9996_v11  ;;  %11401 = vst [vmem:[#allocation122_spill] sm:$0xff] %v10000_v28  ;;  %v4388_v43 = vsel %vm2122_vm5, %v9695_v51, %v9810_v56  ;;  %v4727_v52 = vadd.f32 %v11406_v45, %v4657_v36  ;;  %v4555_v6 = vmul.f32 %v9350_v23, %v4395_v8 }
 0x3e8   : > { %11402 = vst [vmem:[#allocation123_spill] sm:$0xff] %v10004_v33  ;;  %11403 = vst [vmem:[#allocation124_spill] sm:$0xff] %v10008_v19  ;;  %v10030_v10 = vmul.f32 %v9350_v23, %v4392_v60  ;;  %v10033_v3 = vmul.f32 %v9370_v50, %v4392_v60  ;;  %v10037_v41 = vmul.f32 %v8929_v44, %v9628_v25 }
 0x3e9   : > { %11404 = vst [vmem:[#allocation125_spill] sm:$0xff] %v10012_v53  ;;  %11405 = vst [vmem:[#allocation126_spill] sm:$0xff] %v10016_v4  ;;  %v4156_v4 = vsel %vm1882_vm4, %v9851_v49, %v4083_v55  ;;  %v4588_v36 = vadd.f32 %v4555_v6, %v4518_v24  ;;  %v10047_v28 = vmul.f32 %v8931_v47, %v9628_v25  ;;  %v11409_v24 = vld [vmem:[#allocation65_spill] sm:$0xff] }
 0x3ea   : > { %11407 = vst [vmem:[#allocation48_spill] sm:$0xff] %v10033_v3  ;;  %v4178_v45 = vmul.f32 %v8927_v0, %v4156_v4  ;;  %v4486_v53 = vmul.f32 %v8929_v44, %v4156_v4  ;;  %v4625_v19 = vmul.f32 %v8931_v47, %v4156_v4  ;;  %v10051_v60 = vmul.f32 %v8929_v44, %v9752_v16  ;;  %v10065_v4 = vpop.permute.xlu1 %4110  ;;  %v4093_v3 = vpop.permute.xlu0 %4092 }
 0x3eb   : > { %v10055_v14 = vmul.f32 %v8931_v47, %v9752_v16  ;;  %v10058_v49 = vmul.f32 %v9330_v37, %v4388_v43  ;;  %v4391_v25 = vsel %vm2122_vm5, %v9611_v12, %v10027_v54  ;;  %11410 = vst [vmem:[#allocation65_spill] sm:$0xff] %v10065_v4  ;;  %v10068_v33 = vmul.f32 %v9350_v23, %v4388_v43 }
 0x3ec   : > { %v4211_v6 = vadd.f32 %v4178_v45, %v11409_v24  ;;  %v4519_v11 = vadd.f32 %v4486_v53, %v4449_v18  ;;  %v4658_v13 = vadd.f32 %v4625_v19, %v4588_v36  ;;  %v10071_v16 = vmul.f32 %v9370_v50, %v4388_v43 }
 0x3ed   : > { %11408 = vst [vmem:[#allocation127_spill] sm:$0xff] %v10055_v14  ;;  %11411 = vst [vmem:[#allocation128_spill] sm:$0xff] %v10068_v33  ;;  %v4384_v18 = vsel %vm2122_vm5, %v9812_v9, %v9974_v39  ;;  %v4150_v19 = vsel %vm1882_vm4, %v4093_v3, %v9693_v20  ;;  %v10082_v12 = vmul.f32 %v8929_v44, %v9911_v61 }
 0x3ee   : > { %11412 = vst [vmem:[#allocation129_spill] sm:$0xff] %v10071_v16  ;;  %v10086_v53 = vmul.f32 %v8931_v47, %v9911_v61  ;;  %v4141_v43 = vsel %vm1882_vm4, %v10065_v4, %v9976_v38  ;;  %v4184_v36 = vmul.f32 %v8927_v0, %v4150_v19  ;;  %v4764_v45 = vmul.f32 %v9370_v50, %v4395_v8  ;;  %v10107_v40 = vpop.permute.xlu0 %4337 }
 0x3ef   : > { %11413 = vst [vmem:[#allocation130_spill] sm:$0xff] %v10082_v12  ;;  %v4420_v24 = vmul.f32 %v9330_v37, %v4391_v25  ;;  %v4281_v20 = vadd.f32 %v9586_v58, %v4211_v6  ;;  %v4728_v16 = vadd.f32 %v9608_v5, %v4658_v13  ;;  %v10098_v62 = vmul.f32 %v9330_v37, %v4384_v18  ;;  %v11419_v58 = vld [vmem:[#allocation72_spill] sm:$0xff] }
 0x3f0   : > { %11414 = vst [vmem:[#allocation131_spill] sm:$0xff] %v10086_v53  ;;  %v10101_v61 = vmul.f32 %v9350_v23, %v4384_v18  ;;  %v10104_v15 = vmul.f32 %v9370_v50, %v4384_v18  ;;  %v4217_v38 = vadd.f32 %v4184_v36, %v11417_v35  ;;  %v4085_v53 = vpop.permute.xlu1 %4084  ;;  %11418 = vst [vmem:[#allocation30_spill] sm:$0xff] %v10107_v40 }
 0x3f1   : > { %v4797_v8 = vadd.f32 %v4764_v45, %v4727_v52  ;;  %v4193_v14 = vmul.f32 %v8927_v0, %v4141_v43  ;;  %v4154_v5 = vsel %vm1882_vm4, %v4085_v53, %v11419_v58  ;;  %v4155_v13 = vsel %vm1882_vm4, %v4083_v55, %v4085_v53  ;;  %v11425_v53 = vld [vmem:[#allocation36_spill] sm:$0xff] }
 0x3f2   : > { %11415 = vst [vmem:[#allocation132_spill] sm:$0xff] %v10101_v61  ;;  %11416 = vst [vmem:[#allocation133_spill] sm:$0xff] %v10104_v15  ;;  %v4559_v6 = vmul.f32 %v9350_v23, %v4391_v25  ;;  %v11420_v61 = vld [vmem:[#allocation29_spill] sm:$0xff]  ;;  %v4179_v15 = vmul.f32 %v8927_v0, %v4155_v13  ;;  %v4180_v35 = vmul.f32 %v8927_v0, %v4154_v5  ;;  %v10139_v9 = vpop.permute.xlu0 %4128 }
 0x3f3   : > { %v4287_v18 = vadd.f32 %v11420_v61, %v4217_v38  ;;  %v10120_v36 = vadd.f32 %v4420_v24, %v9689_v59  ;;  %v10123_v52 = vmul.f32 %v9370_v50, %v4391_v25  ;;  %v10126_v45 = vmul.f32 %v8929_v44, %v4141_v43  ;;  %11427 = vst [vmem:[#allocation36_spill] sm:$0xff] %v10139_v9  ;;  %v11428_v25 = vld [vmem:[#allocation13_spill] sm:$0xff] }
 0x3f4   : > { %v10129_v58 = vmul.f32 %v8931_v47, %v4141_v43  ;;  %v10132_v55 = vmul.f32 %v8929_v44, %v4150_v19  ;;  %v10135_v38 = vmul.f32 %v8931_v47, %v4150_v19  ;;  %v4212_v61 = vadd.f32 %v4179_v15, %v11425_v53  ;;  %v4324_v24 = vpop.permute.xlu1 %4323  ;;  %v11430_v15 = vld [vmem:[#allocation58_spill] sm:$0xff] }
 0x3f5   : > { %11421 = vst [vmem:[#allocation72_spill] sm:$0xff] %v10123_v52  ;;  %11422 = vst [vmem:[#allocation29_spill] sm:$0xff] %v10126_v45  ;;  %v4213_v59 = vadd.f32 %v4180_v35, %v11426_v27  ;;  %v10142_v52 = vadd.f32 %v4193_v14, %v11428_v25  ;;  %v10148_v43 = vsel %vm2122_vm5, %v9810_v56, %v10107_v40  ;;  %v11431_v14 = vld [vmem:[#allocation75_spill] sm:$0xff] }
 0x3f6   : > { %11423 = vst [vmem:[#allocation134_spill] sm:$0xff] %v10129_v58  ;;  %11424 = vst [vmem:[#allocation135_spill] sm:$0xff] %v10135_v38  ;;  %v4393_v19 = vsel %vm2122_vm5, %v4324_v24, %v11394_v17  ;;  %v4394_v27 = vsel %vm2122_vm5, %v9935_v7, %v4324_v24  ;;  %v4487_v53 = vmul.f32 %v8929_v44, %v4155_v13  ;;  %v10167_v38 = vpop.permute.xlu0 %4100 }
 0x3f7   : > { %11429 = vst [vmem:[#allocation61_spill] sm:$0xff] %v10142_v52  ;;  %v4283_v35 = vadd.f32 %v11430_v15, %v4213_v59  ;;  %v4282_v25 = vadd.f32 %v11431_v14, %v4212_v61  ;;  %v4417_v58 = vmul.f32 %v9330_v37, %v4394_v27  ;;  %v4488_v45 = vmul.f32 %v8929_v44, %v4154_v5 }
 0x3f8   : > { %v4418_v56 = vmul.f32 %v9330_v37, %v4393_v19  ;;  %v4556_v52 = vmul.f32 %v9350_v23, %v4394_v27  ;;  %v4765_v17 = vmul.f32 %v9370_v50, %v4394_v27  ;;  %v4626_v7 = vmul.f32 %v8931_v47, %v4155_v13  ;;  %v4091_v15 = vpop.permute.xlu1 %4090  ;;  %v11432_v27 = vld [vmem:[#allocation32_spill] sm:$0xff] }
 0x3f9   : > { %v4452_v9 = vadd.f32 %v10019_v29, %v4283_v35  ;;  %v4627_v59 = vmul.f32 %v8931_v47, %v4154_v5  ;;  %v4450_v24 = vadd.f32 %v4417_v58, %v4281_v20  ;;  %v4151_v33 = vsel %vm1882_vm4, %v4091_v15, %v4093_v3 }
 0x3fa   : > { %v4451_v61 = vadd.f32 %v4418_v56, %v4282_v25  ;;  %v4589_v14 = vadd.f32 %v4556_v52, %v4519_v11  ;;  %v4798_v40 = vadd.f32 %v4765_v17, %v4728_v16  ;;  %v4557_v12 = vmul.f32 %v9350_v23, %v4393_v19  ;;  %v11433_v16 = vld [vmem:[#allocation40_spill] sm:$0xff]  ;;  %v11434_v17 = vld [vmem:[#allocation15_spill] sm:$0xff] }
 0x3fb   : > { %v4520_v4 = vadd.f32 %v4487_v53, %v4450_v24  ;;  %v4152_v29 = vsel %vm1882_vm4, %v11432_v27, %v4091_v15  ;;  %v4183_v13 = vmul.f32 %v8927_v0, %v4151_v33  ;;  %v4456_v20 = vadd.f32 %v10058_v49, %v4287_v18 }
 0x3fc   : > { %v4521_v5 = vadd.f32 %v4488_v45, %v4451_v61  ;;  %v4659_v58 = vadd.f32 %v4626_v7, %v4589_v14  ;;  %v4182_v35 = vmul.f32 %v8927_v0, %v4152_v29  ;;  %6425 = vmatprep.subr.msk.mxu1 %vm4833_vm8, %v4798_v40  ;;  %v4766_v3 = vmul.f32 %v9370_v50, %v4393_v19  ;;  %v4332_v25 = vpop.permute.xlu1 %4331 }
 0x3fd   : > { %v4590_v11 = vadd.f32 %v4557_v12, %v4520_v4  ;;  %v4216_v52 = vadd.f32 %v4183_v13, %v11433_v16  ;;  %v4522_v53 = vadd.f32 %v10037_v41, %v4452_v9  ;;  %6426 = vmatpush1.msk.msra.mxu1 %vm4833_vm8, %v4797_v8  ;;  %v4490_v45 = vmul.f32 %v8929_v44, %v4152_v29  ;;  %v10196_v9 = vpop.permute.xlu0 %4345 }
 0x3fe   : > { %v4591_v56 = vadd.f32 %v10030_v10, %v4521_v5  ;;  %v4729_v49 = vadd.f32 %v11434_v17, %v4659_v58  ;;  %v4215_v18 = vadd.f32 %v4182_v35, %v9699_v2  ;;  %6427 = vmatmul.mubr.msk.f32.vlgmr.msra.gmra.mrb[24].mxu1 %vm4830_vm9, %v11363_v57  ;;  %v4629_v12 = vmul.f32 %v8931_v47, %v4152_v29 }
 0x3ff   : > { %v10189_v40 = vadd.f32 %v4627_v59, %v4590_v11  ;;  %v4592_v4 = vadd.f32 %v4559_v6, %v4522_v53  ;;  %v4146_v41 = vsel %vm1882_vm4, %v10167_v38, %v9893_v1  ;;  %5352 = vmatprep.mubr.f32.mxu1 %v11366_v21  ;;  %v4424_v2 = vmul.f32 %v9330_v37, %v10148_v43  ;;  %v11435_v59 = vld [vmem:[#allocation93_spill] sm:$0xff] }
 0x400   : > { %v10202_v10 = vadd.f32 %v10047_v28, %v4591_v56  ;;  %v10204_v8 = vadd.f32 %v4766_v3, %v4729_v49  ;;  %v4188_v6 = vmul.f32 %v8927_v0, %v4146_v41  ;;  %v4563_v19 = vmul.f32 %v9350_v23, %v10148_v43  ;;  %v4099_v15 = vpop.permute.xlu1 %4098 }
 0x401   : > { %v4662_v7 = vadd.f32 %v4629_v12, %v4592_v4  ;;  %v4285_v1 = vadd.f32 %v11435_v59, %v4215_v18  ;;  %v4286_v24 = vadd.f32 %v9704_v31, %v4216_v52  ;;  %v4526_v61 = vadd.f32 %v10051_v60, %v4456_v20  ;;  %v4109_v11 = vpop.permute.xlu0 %4108 }
 0x402   : > { %v4221_v14 = vadd.f32 %v4188_v6, %v9729_v26  ;;  %v4389_v28 = vsel %vm2122_vm5, %v4332_v25, %v9695_v51  ;;  %v4390_v27 = vsel %vm2122_vm5, %v10027_v54, %v4332_v25  ;;  %v4523_v29 = vadd.f32 %v4490_v45, %v10120_v36 }
 0x403   : > { %v4421_v13 = vmul.f32 %v9330_v37, %v4390_v27  ;;  %v4422_v5 = vmul.f32 %v9330_v37, %v4389_v28  ;;  %v4560_v31 = vmul.f32 %v9350_v23, %v4390_v27  ;;  %v4732_v26 = vadd.f32 %v9709_v46, %v4662_v7  ;;  %v11436_v7 = vld [vmem:[#allocation130_spill] sm:$0xff] }
 0x404   : > { %v4291_v60 = vadd.f32 %v9717_v32, %v4221_v14  ;;  %v4769_v20 = vmul.f32 %v9370_v50, %v4390_v27  ;;  %v4383_v51 = vsel %vm2122_vm5, %v9974_v39, %v10196_v9  ;;  %v4630_v54 = vmul.f32 %v8931_v47, %v4151_v33  ;;  %v4340_v3 = vpop.permute.xlu1 %4339 }
 0x405   : > { %v4454_v36 = vadd.f32 %v4421_v13, %v4285_v1  ;;  %v4455_v58 = vadd.f32 %v4422_v5, %v4286_v24  ;;  %v4593_v35 = vadd.f32 %v4560_v31, %v4523_v29  ;;  %v4457_v16 = vadd.f32 %v4424_v2, %v9807_v42  ;;  %v11437_v1 = vld [vmem:[#allocation37_spill] sm:$0xff] }
 0x406   : > { %v4596_v52 = vadd.f32 %v4563_v19, %v4526_v61  ;;  %v10234_v46 = vmul.f32 %v9370_v50, %v10148_v43  ;;  %v4802_v32 = vadd.f32 %v4769_v20, %v4732_v26  ;;  %v4491_v53 = vmul.f32 %v8929_v44, %v4151_v33  ;;  %v10265_v19 = vpop.permute.xlu0 %4116  ;;  %v11438_v61 = vld [vmem:[#allocation65_spill] sm:$0xff]  ;;  %v11442_v20 = vld [vmem:[#allocation100_spill] sm:$0xff] }
 0x407   : > { %v4496_v25 = vmul.f32 %v8929_v44, %v4146_v41  ;;  %v4663_v39 = vadd.f32 %v4630_v54, %v4593_v35  ;;  %v4428_v56 = vmul.f32 %v9330_v37, %v4383_v51  ;;  %v10240_v17 = vmul.f32 %v8931_v47, %v4146_v41  ;;  %v11443_v54 = vld [vmem:[#allocation30_spill] sm:$0xff] }
 0x408   : > { %v4460_v49 = vadd.f32 %v10098_v62, %v4291_v60  ;;  %v4147_v42 = vsel %vm1882_vm4, %v4099_v15, %v10167_v38  ;;  %v4148_v43 = vsel %vm1882_vm4, %v9725_v48, %v4099_v15  ;;  %6431 = vmatprep.subr.msk.mxu1 %vm4833_vm8, %v4802_v32  ;;  %v4524_v33 = vadd.f32 %v4491_v53, %v4454_v36  ;;  %v4107_v12 = vpop.permute.xlu1 %4106  ;;  %v11441_v60 = vld [vmem:[#allocation94_spill] sm:$0xff] }
 0x409   : > { %v4525_v18 = vadd.f32 %v10132_v55, %v4455_v58  ;;  %v4733_v45 = vadd.f32 %v9713_v63, %v4663_v39  ;;  %v4186_v4 = vmul.f32 %v8927_v0, %v4148_v43  ;;  %v4561_v62 = vmul.f32 %v9350_v23, %v4389_v28 }
 0x40a   : > { %v4770_v41 = vmul.f32 %v9370_v50, %v4389_v28  ;;  %v4567_v38 = vmul.f32 %v9350_v23, %v4383_v51  ;;  %v4187_v2 = vmul.f32 %v8927_v0, %v4147_v42  ;;  %v10258_v48 = vadd.f32 %v4428_v56, %v9966_v30  ;;  %v11439_v28 = vld [vmem:[#allocation128_spill] sm:$0xff]  ;;  %v11444_v56 = vld [vmem:[#allocation21_spill] sm:$0xff] }
 0x40b   : > { %v10261_v6 = vmul.f32 %v9370_v50, %v4383_v51  ;;  %v4219_v55 = vadd.f32 %v4186_v4, %v9764_v34  ;;  %v4494_v63 = vmul.f32 %v8929_v44, %v4148_v43  ;;  %v4530_v59 = vadd.f32 %v11436_v7, %v4460_v49  ;;  %v11440_v34 = vld [vmem:[#allocation27_spill] sm:$0xff] }
 0x40c   : > { %v4220_v24 = vadd.f32 %v4187_v2, %v11437_v1  ;;  %v4633_v15 = vmul.f32 %v8931_v47, %v4148_v43  ;;  %v4142_v30 = vsel %vm1882_vm4, %v4109_v11, %v11438_v61  ;;  %v4594_v14 = vadd.f32 %v4561_v62, %v4524_v33  ;;  %v4115_v5 = vpop.permute.xlu1 %4114  ;;  %v10292_v62 = vpop.permute.xlu0 %4369  ;;  %v11446_v7 = vld [vmem:[#allocation71_spill] sm:$0xff] }
 0x40d   : > { %v4595_v27 = vadd.f32 %v11439_v28, %v4525_v18  ;;  %v4495_v29 = vmul.f32 %v8929_v44, %v4147_v42  ;;  %v4289_v13 = vadd.f32 %v11440_v34, %v4219_v55  ;;  %v4385_v51 = vsel %vm2122_vm5, %v4340_v3, %v11442_v20  ;;  %v11447_v28 = vld [vmem:[#allocation72_spill] sm:$0xff] }
 0x40e   : > { %v4666_v31 = vadd.f32 %v4633_v15, %v4596_v52  ;;  %v4290_v26 = vadd.f32 %v11441_v60, %v4220_v24  ;;  %v4386_v36 = vsel %vm2122_vm5, %v11443_v54, %v4340_v3  ;;  %v4527_v58 = vadd.f32 %v4494_v63, %v4457_v16  ;;  %v11445_v3 = vld [vmem:[#allocation63_spill] sm:$0xff]  ;;  %v11449_v54 = vld [vmem:[#allocation132_spill] sm:$0xff] }
 0x40f   : > { %v4425_v35 = vmul.f32 %v9330_v37, %v4386_v36  ;;  %v4426_v32 = vmul.f32 %v9330_v37, %v4385_v51  ;;  %v4564_v53 = vmul.f32 %v9350_v23, %v4386_v36  ;;  %v4634_v39 = vmul.f32 %v8931_v47, %v4147_v42 }
 0x410   : > { %v4192_v52 = vmul.f32 %v8927_v0, %v4142_v30  ;;  %v4736_v49 = vadd.f32 %v11444_v56, %v4666_v31  ;;  %v4773_v43 = vmul.f32 %v9370_v50, %v4386_v36  ;;  %v4731_v16 = vadd.f32 %v11445_v3, %v10202_v10  ;;  %v4131_v2 = vpop.permute.xlu1 %4130 }
 0x411   : > { %v4458_v33 = vadd.f32 %v4425_v35, %v4289_v13  ;;  %v4459_v18 = vadd.f32 %v4426_v32, %v4290_v26  ;;  %v4597_v4 = vadd.f32 %v4564_v53, %v4527_v58  ;;  %v4565_v55 = vmul.f32 %v9350_v23, %v4385_v51  ;;  %v11448_v26 = vld [vmem:[#allocation135_spill] sm:$0xff] }
 0x412   : > { %v4806_v63 = vadd.f32 %v4773_v43, %v4736_v49  ;;  %v4143_v42 = vsel %vm1882_vm4, %v4107_v12, %v4109_v11  ;;  %v4144_v1 = vsel %vm1882_vm4, %v11446_v7, %v4107_v12  ;;  %v4801_v34 = vadd.f32 %v11447_v28, %v4731_v16  ;;  %v11450_v58 = vld [vmem:[#allocation95_spill] sm:$0xff]  ;;  %v11453_v49 = vld [vmem:[#allocation102_spill] sm:$0xff]  ;;  %v11460_v28 = vld [vmem:[#allocation36_spill] sm:$0xff] }
 0x413   : > { %v4528_v24 = vadd.f32 %v4495_v29, %v4458_v33  ;;  %v4529_v15 = vadd.f32 %v4496_v25, %v4459_v18  ;;  %v4667_v61 = vadd.f32 %v4634_v39, %v4597_v4  ;;  %v4600_v13 = vadd.f32 %v4567_v38, %v4530_v59  ;;  %v11451_v29 = vld [vmem:[#allocation127_spill] sm:$0xff] }
 0x414   : > { %v4190_v10 = vmul.f32 %v8927_v0, %v4144_v1  ;;  %v4191_v31 = vmul.f32 %v8927_v0, %v4143_v42  ;;  %v4498_v60 = vmul.f32 %v8929_v44, %v4144_v1  ;;  %v10305_v20 = vadd.f32 %v11448_v26, %v4594_v14  ;;  %6432 = vmatpush1.msk.msra.mxu1 %vm4833_vm8, %v4801_v34  ;;  %v4348_v25 = vpop.permute.xlu1 %4347  ;;  %v11452_v14 = vld [vmem:[#allocation101_spill] sm:$0xff]  ;;  %v11457_v4 = vld [vmem:[#allocation131_spill] sm:$0xff] }
 0x415   : > { %v4598_v11 = vadd.f32 %v4565_v55, %v4528_v24  ;;  %v4599_v36 = vadd.f32 %v11449_v54, %v4529_v15  ;;  %v4737_v12 = vadd.f32 %v11450_v58, %v4667_v61  ;;  %v4665_v35 = vadd.f32 %v11451_v29, %v4595_v27  ;;  %6437 = vmatprep.subr.msk.mxu1 %vm4833_vm8, %v4806_v63  ;;  %v11459_v15 = vld [vmem:[#allocation67_spill] sm:$0xff]  ;;  %v11464_v29 = vld [vmem:[#allocation12_spill] sm:$0xff] }
 0x416   : > { %v10311_v38 = vadd.f32 %v4770_v41, %v4733_v45  ;;  %v10314_v59 = vmul.f32 %v8929_v44, %v4142_v30  ;;  %v4637_v32 = vmul.f32 %v8931_v47, %v4144_v1  ;;  %v10319_v53 = vadd.f32 %v4192_v52, %v11452_v14  ;;  %6433 = vmatmul.mubr.msk.f32.vlgmr.msra.gmra.mrb[26].mxu1 %vm4830_vm9, %v11363_v57  ;;  %v10328_v45 = vpop.permute.xlu0 %4349  ;;  %v11454_v41 = vld [vmem:[#allocation97_spill] sm:$0xff]  ;;  %v11455_v52 = vld [vmem:[#allocation66_spill] sm:$0xff]  ;;  %v11458_v1 = vld [vmem:[#allocation119_spill] sm:$0xff] }
 0x417   : > { %v10322_v39 = vmul.f32 %v8931_v47, %v4142_v30  ;;  %v4774_v56 = vmul.f32 %v9370_v50, %v4385_v51  ;;  %v4223_v43 = vadd.f32 %v4190_v10, %v11453_v49  ;;  %v4224_v27 = vadd.f32 %v4191_v31, %v11454_v41  ;;  %5494 = vmatprep.mubr.f32.mxu1 %v11366_v21  ;;  %v11462_v10 = vld [vmem:[#allocation98_spill] sm:$0xff]  ;;  %v11466_v14 = vld [vmem:[#allocation103_spill] sm:$0xff] }
 0x418   : > { %v4499_v33 = vmul.f32 %v8929_v44, %v4143_v42  ;;  %v4531_v18 = vadd.f32 %v4498_v60, %v10258_v48  ;;  %v10337_v30 = vsel %vm2122_vm5, %v10292_v62, %v11455_v52  ;;  %v10341_v51 = vadd.f32 %v10240_v17, %v4598_v11  ;;  %v4119_v63 = vpop.permute.xlu1 %4118 }
 0x419   : > { %11456 = vst [vmem:[#allocation13_spill] sm:$0xff] %v10337_v30  ;;  %v10344_v3 = vadd.f32 %v11457_v4, %v4599_v36  ;;  %v10346_v16 = vadd.f32 %v4774_v56, %v4737_v12  ;;  %v4638_v55 = vmul.f32 %v8931_v47, %v4143_v42  ;;  %v4670_v48 = vadd.f32 %v4637_v32, %v4600_v13  ;;  %v11461_v42 = vld [vmem:[#allocation64_spill] sm:$0xff] }
 0x41a   : > { %v4139_v7 = vsel %vm1882_vm4, %v4115_v5, %v10265_v19  ;;  %v4140_v24 = vsel %vm1882_vm4, %v11458_v1, %v4115_v5  ;;  %v4735_v17 = vadd.f32 %v11459_v15, %v4665_v35  ;;  %v4408_v61 = vmul.f32 %v9330_v37, %v10337_v30  ;;  %v10380_v12 = vpop.permute.xlu0 %4120  ;;  %v11465_v35 = vld [vmem:[#allocation44_spill] sm:$0xff] }
 0x41b   : > { %v4132_v34 = vsel %vm1882_vm4, %v11460_v28, %v4131_v2  ;;  %v4164_v13 = vsel %vm1882_vm4, %v4131_v2, %v11461_v42  ;;  %v4293_v31 = vadd.f32 %v11462_v10, %v4223_v43  ;;  %v10367_v60 = vmul.f32 %v9350_v23, %v10337_v30  ;;  %v11473_v30 = vld [vmem:[#allocation26_spill] sm:$0xff] }
 0x41c   : > { %v4805_v5 = vadd.f32 %v10234_v46, %v4735_v17  ;;  %v4169_v26 = vmul.f32 %v8927_v0, %v4132_v34  ;;  %v4170_v11 = vmul.f32 %v8927_v0, %v4164_v13  ;;  %v4194_v54 = vmul.f32 %v8927_v0, %v4140_v24  ;;  %v4352_v43 = vpop.permute.xlu1 %4351  ;;  %v11469_v17 = vld [vmem:[#allocation28_spill] sm:$0xff] }
 0x41d   : > { %11463 = vst [vmem:[#allocation58_spill] sm:$0xff] %v10367_v60  ;;  %v4195_v36 = vmul.f32 %v8927_v0, %v4139_v7  ;;  %v10375_v58 = vmul.f32 %v8929_v44, %v4139_v7  ;;  %v10378_v2 = vmul.f32 %v8931_v47, %v4139_v7  ;;  %v4294_v56 = vadd.f32 %v11466_v14, %v4224_v27  ;;  %v11467_v7 = vld [vmem:[#allocation99_spill] sm:$0xff]  ;;  %v11468_v27 = vld [vmem:[#allocation74_spill] sm:$0xff] }
 0x41e   : > { %6438 = vmatpush1.msk.msra.mxu1 %vm4833_vm8, %v4805_v5  ;;  %v4202_v46 = vadd.f32 %v4169_v26, %v11464_v29  ;;  %v4203_v32 = vadd.f32 %v4170_v11, %v11465_v35  ;;  %v4381_v49 = vsel %vm2122_vm5, %v4348_v25, %v10328_v45  ;;  %v10390_v41 = vmul.f32 %v8929_v44, %v4140_v24  ;;  %v11471_v11 = vld [vmem:[#allocation76_spill] sm:$0xff] }
 0x41f   : > { %v10393_v52 = vmul.f32 %v8931_v47, %v4140_v24  ;;  %v4382_v4 = vsel %vm2122_vm5, %v10196_v9, %v4348_v25  ;;  %v4740_v1 = vadd.f32 %v11467_v7, %v4670_v48  ;;  %6439 = vmatmul.mubr.msk.f32.vlgmr.msra.gmra.mrb[28].mxu1 %vm4830_vm9, %v11363_v57  ;;  %v11470_v24 = vld [vmem:[#allocation41_spill] sm:$0xff]  ;;  %v4478_v9 = vmul.f32 %v8929_v44, %v4164_v13 }
 0x420   : > { %v4272_v15 = vadd.f32 %v11468_v27, %v4202_v46  ;;  %v4273_v42 = vadd.f32 %v11469_v17, %v4203_v32  ;;  %v4429_v10 = vmul.f32 %v9330_v37, %v4382_v4  ;;  %v4568_v5 = vmul.f32 %v9350_v23, %v4382_v4  ;;  %5636 = vmatprep.mubr.f32.mxu1 %v11366_v21  ;;  %v11472_v32 = vld [vmem:[#allocation90_spill] sm:$0xff]  ;;  %v10415_v17 = vpop.permute.xlu0 %4353 }
 0x421   : > { %v10407_v26 = vadd.f32 %v4195_v36, %v11470_v24  ;;  %v4430_v25 = vmul.f32 %v9330_v37, %v4381_v49  ;;  %v4777_v48 = vmul.f32 %v9370_v50, %v4382_v4  ;;  %v4227_v14 = vadd.f32 %v4194_v54, %v11472_v32 }
 0x422   : > { %v4441_v57 = vadd.f32 %v4408_v61, %v4272_v15  ;;  %v4442_v29 = vadd.f32 %v11471_v11, %v4273_v42  ;;  %v4462_v46 = vadd.f32 %v4429_v10, %v4293_v31  ;;  %v4601_v35 = vadd.f32 %v4568_v5, %v4531_v18  ;;  %v4123_v15 = vpop.permute.xlu1 %4122  ;;  %v11476_v42 = vld [vmem:[#allocation77_spill] sm:$0xff] }
 0x423   : > { %v4569_v7 = vmul.f32 %v9350_v23, %v4381_v49  ;;  %v4810_v27 = vadd.f32 %v4777_v48, %v4740_v1  ;;  %v4137_v36 = vsel %vm1882_vm4, %v4119_v63, %v10380_v12  ;;  %v10424_v18 = vmul.f32 %v8929_v44, %v4132_v34 }
 0x424   : > { %v4511_v24 = vadd.f32 %v4478_v9, %v4441_v57  ;;  %v10421_v60 = vadd.f32 %v11473_v30, %v4442_v29  ;;  %v4532_v61 = vadd.f32 %v4499_v33, %v4462_v46  ;;  %v4671_v4 = vadd.f32 %v4638_v55, %v4601_v35  ;;  %v11477_v30 = vld [vmem:[#allocation104_spill] sm:$0xff]  ;;  %v11481_v57 = vld [vmem:[#allocation106_spill] sm:$0xff] }
 0x425   : > { %v10427_v31 = vmul.f32 %v8931_v47, %v4132_v34  ;;  %v10430_v54 = vmul.f32 %v8931_v47, %v4164_v13  ;;  %v4463_v1 = vadd.f32 %v4430_v25, %v4294_v56  ;;  %6443 = vmatprep.subr.msk.mxu1 %vm4833_vm8, %v4810_v27  ;;  %v4138_v33 = vsel %vm1882_vm4, %v10265_v19, %v4119_v63  ;;  %v11478_v34 = vld [vmem:[#allocation43_spill] sm:$0xff]  ;;  %v11479_v13 = vld [vmem:[#allocation105_spill] sm:$0xff]  ;;  %v11482_v29 = vld [vmem:[#allocation46_spill] sm:$0xff] }
 0x426   : > { %v4581_v10 = vadd.f32 %v11476_v42, %v4511_v24  ;;  %v4602_v5 = vadd.f32 %v4569_v7, %v4532_v61  ;;  %v10435_v9 = vadd.f32 %v11477_v30, %v4671_v4  ;;  %v4197_v55 = vmul.f32 %v8927_v0, %v4137_v36  ;;  %v11480_v25 = vld [vmem:[#allocation61_spill] sm:$0xff]  ;;  %v4356_v4 = vpop.permute.xlu1 %4355  ;;  %v11484_v42 = vld [vmem:[#allocation51_spill] sm:$0xff] }
 0x427   : > { %11474 = vst [vmem:[#allocation75_spill] sm:$0xff] %v10427_v31  ;;  %11475 = vst [vmem:[#allocation32_spill] sm:$0xff] %v10430_v54  ;;  %v4739_v48 = vadd.f32 %v11478_v34, %v10344_v3  ;;  %v4295_v56 = vadd.f32 %v11479_v13, %v10319_v53  ;;  %v4296_v11 = vadd.f32 %v11481_v57, %v11480_v25  ;;  %v4125_v53 = vpop.permute.xlu0 %4124  ;;  %v10487_v34 = vld [vmem:[%s10885_s7] sm:$0xf] }
 0x428   : > { %v4651_v46 = vadd.f32 %v11482_v29, %v4581_v10  ;;  %v4672_v35 = vadd.f32 %v10322_v39, %v4602_v5  ;;  %v10450_v32 = vmul.f32 %v9370_v50, %v4381_v49  ;;  %v4379_v19 = vsel %vm2122_vm5, %v4352_v43, %v10415_v17  ;;  %v11487_v13 = vld [vmem:[#allocation111_spill] sm:$0xff] }
 0x429   : > { %v4196_v63 = vmul.f32 %v8927_v0, %v4138_v33  ;;  %v10457_v3 = vmul.f32 %v8929_v44, %v4137_v36  ;;  %v4809_v7 = vadd.f32 %v10261_v6, %v4739_v48  ;;  %v4380_v27 = vsel %vm2122_vm5, %v10328_v45, %v4352_v43  ;;  %v11485_v45 = vld [vmem:[#allocation107_spill] sm:$0xff] }
 0x42a   : > { %11483 = vst [vmem:[#allocation40_spill] sm:$0xff] %v10450_v32  ;;  %v4431_v39 = vmul.f32 %v9330_v37, %v4380_v27  ;;  %v4432_v49 = vmul.f32 %v9330_v37, %v4379_v19  ;;  %v4533_v24 = vadd.f32 %v10314_v59, %v4463_v1  ;;  %v4570_v61 = vmul.f32 %v9350_v23, %v4380_v27 }
 0x42b   : > { %v10468_v10 = vadd.f32 %v4197_v55, %v11484_v42  ;;  %v10471_v5 = vmul.f32 %v8929_v44, %v4138_v33  ;;  %v10474_v6 = vmul.f32 %v8931_v47, %v4138_v33  ;;  %6444 = vmatpush1.msk.msra.mxu1 %vm4833_vm8, %v4809_v7  ;;  %v4742_v43 = vadd.f32 %v11485_v45, %v4672_v35  ;;  %v11486_v33 = vld [vmem:[#allocation10_spill] sm:$0xff]  ;;  %v11490_v42 = vld [vmem:[#allocation68_spill] sm:$0xff] }
 0x42c   : > { %v10479_v30 = vmul.f32 %v8931_v47, %v4137_v36  ;;  %v4464_v59 = vadd.f32 %v4431_v39, %v4295_v56  ;;  %v4603_v1 = vadd.f32 %v4570_v61, %v4533_v24  ;;  %v4136_v55 = vsel %vm1882_vm4, %v10380_v12, %v4123_v15  ;;  %6445 = vmatmul.mubr.msk.f32.vlgmr.msra.gmra.mrb[30].mxu1 %vm4830_vm9, %v10487_v34  ;;  %v11488_v12 = vld [vmem:[#allocation29_spill] sm:$0xff]  ;;  %v11489_v35 = vld [vmem:[#allocation134_spill] sm:$0xff] }
 0x42d   : > { %v4721_v48 = vadd.f32 %v11486_v33, %v4651_v46  ;;  %v4229_v25 = vadd.f32 %v4196_v63, %v11487_v13  ;;  %v4571_v36 = vmul.f32 %v9350_v23, %v4379_v19  ;;  %v4779_v56 = vmul.f32 %v9370_v50, %v4380_v27  ;;  %5778 = vmatprep.mubr.f32.mxu1 %v11366_v21  ;;  %v4358_v46 = vpop.permute.xlu0 %4357  ;;  %v11491_v33 = vld [vmem:[#allocation108_spill] sm:$0xff] }
 0x42e   : > { %v4465_v57 = vadd.f32 %v4432_v49, %v4296_v11  ;;  %v4534_v29 = vadd.f32 %v11488_v12, %v4464_v59  ;;  %v4673_v7 = vadd.f32 %v11489_v35, %v4603_v1  ;;  %v4135_v39 = vsel %vm1882_vm4, %v4123_v15, %v4125_v53  ;;  %v11492_v11 = vld [vmem:[#allocation112_spill] sm:$0xff]  ;;  %v4127_v15 = vpop.permute.xlu1 %4126 }
 0x42f   : > { %v4780_v24 = vmul.f32 %v9370_v50, %v4379_v19  ;;  %v10501_v61 = vadd.f32 %v4779_v56, %v4742_v43  ;;  %v4198_v63 = vmul.f32 %v8927_v0, %v4136_v55  ;;  %v4297_v45 = vadd.f32 %v11490_v42, %v4227_v14  ;;  %v11493_v42 = vld [vmem:[#allocation35_spill] sm:$0xff] }
 0x430   : > { %v4604_v27 = vadd.f32 %v4571_v36, %v4534_v29  ;;  %v4743_v13 = vadd.f32 %v11491_v33, %v4673_v7  ;;  %v4298_v49 = vadd.f32 %v11492_v11, %v10407_v26  ;;  %v10510_v59 = vsel %vm2122_vm5, %v4356_v4, %v4358_v46  ;;  %v11495_v11 = vld [vmem:[#allocation16_spill] sm:$0xff] }
 0x431   : > { %v4199_v19 = vmul.f32 %v8927_v0, %v4135_v39  ;;  %v10514_v43 = vmul.f32 %v8929_v44, %v4136_v55  ;;  %v10517_v1 = vmul.f32 %v8929_v44, %v4135_v39  ;;  %v4378_v14 = vsel %vm2122_vm5, %v10415_v17, %v4356_v4 }
 0x432   : > { %v4674_v36 = vadd.f32 %v10393_v52, %v4604_v27  ;;  %v4433_v26 = vmul.f32 %v9330_v37, %v4378_v14  ;;  %v4535_v56 = vadd.f32 %v10390_v41, %v4465_v57  ;;  %v4572_v12 = vmul.f32 %v9350_v23, %v4378_v14  ;;  %v11494_v52 = vld [vmem:[#allocation39_spill] sm:$0xff]  ;;  %v11496_v57 = vld [vmem:[#allocation53_spill] sm:$0xff] }
 0x433   : > { %v10527_v29 = vmul.f32 %v8931_v47, %v4136_v55  ;;  %v4434_v35 = vmul.f32 %v9330_v37, %v10510_v59  ;;  %v4781_v7 = vmul.f32 %v9370_v50, %v4378_v14  ;;  %v4582_v33 = vadd.f32 %v11493_v42, %v10421_v60  ;;  %v11497_v14 = vld [vmem:[#allocation33_spill] sm:$0xff] }
 0x434   : > { %v4466_v17 = vadd.f32 %v4433_v26, %v4297_v45  ;;  %v4605_v4 = vadd.f32 %v4572_v12, %v4535_v56  ;;  %v4744_v27 = vadd.f32 %v11494_v52, %v4674_v36  ;;  %v4791_v54 = vadd.f32 %v11495_v11, %v4721_v48  ;;  %v4360_v26 = vpop.permute.xlu1 %4359  ;;  %v11498_v12 = vld [vmem:[#allocation50_spill] sm:$0xff]  ;;  %v11500_v11 = vld [vmem:[#allocation60_spill] sm:$0xff] }
 0x435   : > { %v4573_v41 = vmul.f32 %v9350_v23, %v10510_v59  ;;  %v4652_v55 = vadd.f32 %v11496_v57, %v4582_v33  ;;  %v10542_v31 = vsel %vm1882_vm4, %v4127_v15, %v11460_v28  ;;  %v4730_v32 = vadd.f32 %v11497_v14, %v10189_v40  ;;  %v11499_v33 = vld [vmem:[#allocation14_spill] sm:$0xff] }
 0x436   : > { %v4536_v60 = vadd.f32 %v10375_v58, %v4466_v17  ;;  %v4675_v45 = vadd.f32 %v10378_v2, %v4605_v4  ;;  %v4814_v36 = vadd.f32 %v4781_v7, %v4744_v27  ;;  %v4134_v48 = vsel %vm1882_vm4, %v4125_v53, %v4127_v15  ;;  %v11501_v58 = vld [vmem:[#allocation113_spill] sm:$0xff]  ;;  %v4362_v2 = vpop.permute.xlu0 %4361  ;;  %v11502_v53 = vld [vmem:[#allocation123_spill] sm:$0xff]  ;;  %v11505_v4 = vld [vmem:[#allocation110_spill] sm:$0xff] }
 0x437   : > { %v4813_v56 = vadd.f32 %v4780_v24, %v4743_v13  ;;  %v4231_v42 = vadd.f32 %v4198_v63, %v11498_v12  ;;  %v4232_v52 = vadd.f32 %v4199_v19, %v11499_v33  ;;  %v4722_v28 = vadd.f32 %v11500_v11, %v4652_v55  ;;  %v11503_v13 = vld [vmem:[#allocation48_spill] sm:$0xff]  ;;  %v11510_v12 = vld [vmem:[#allocation109_spill] sm:$0xff] }
 0x438   : > { %v10554_v57 = vmul.f32 %v8931_v47, %v4135_v39  ;;  %v4467_v40 = vadd.f32 %v4434_v35, %v4298_v49  ;;  %v4606_v14 = vadd.f32 %v4573_v41, %v4536_v60  ;;  %v10557_v17 = vadd.f32 %v11501_v58, %v4675_v45  ;;  %6449 = vmatprep.subr.msk.mxu1 %vm4833_vm8, %v4814_v36  ;;  %v11504_v35 = vld [vmem:[#allocation62_spill] sm:$0xff]  ;;  %v4364_v60 = vpop.permute.xlu1 %4363  ;;  %v11512_v58 = vld [vmem:[#allocation96_spill] sm:$0xff] }
 0x439   : > { %v4792_v15 = vadd.f32 %v11502_v53, %v4722_v28  ;;  %v4200_v24 = vmul.f32 %v8927_v0, %v4134_v48  ;;  %v4201_v63 = vmul.f32 %v8927_v0, %v10542_v31  ;;  %v4800_v19 = vadd.f32 %v11503_v13, %v4730_v32  ;;  %6450 = vmatpush1.msk.msra.mxu1 %vm4833_vm8, %v4813_v56  ;;  %v11506_v32 = vld [vmem:[#allocation114_spill] sm:$0xff] }
 0x43a   : > { %v4676_v39 = vadd.f32 %v10474_v6, %v4606_v14  ;;  %v10568_v49 = vmul.f32 %v8929_v44, %v4134_v48  ;;  %v4734_v7 = vadd.f32 %v11504_v35, %v10305_v20  ;;  %v4299_v27 = vadd.f32 %v11505_v4, %v4229_v25  ;;  %6451 = vmatmul.mubr.msk.f32.vlgmr.msra.gmra.mrb[32].mxu1 %vm4830_vm9, %v10487_v34  ;;  %v11507_v45 = vld [vmem:[#allocation118_spill] sm:$0xff]  ;;  %v4366_v28 = vpop.permute.xlu0 %4365  ;;  %v11514_v35 = vld [vmem:[#allocation116_spill] sm:$0xff] }
 0x43b   : > { %6416 = vmatprep.subr.msk.mxu0 %vm4833_vm8, %v4792_v15  ;;  %v10578_v0 = vmul.f32 %v8929_v44, %v10542_v31  ;;  %v4300_v6 = vadd.f32 %v11506_v32, %v10468_v10  ;;  %v10584_v41 = vsel %vm2122_vm5, %v4360_v26, %v4362_v2  ;;  %v10588_v20 = vsel %vm2122_vm5, %v4358_v46, %v4360_v26  ;;  %v11508_v46 = vld [vmem:[#allocation121_spill] sm:$0xff]  ;;  %v11509_v26 = vld [vmem:[#allocation59_spill] sm:$0xff] }
 0x43c   : > { %6417 = vmatpush1.msk.msra.mxu0 %vm4833_vm8, %v4791_v54  ;;  %v4435_v25 = vmul.f32 %v9330_v37, %v10588_v20  ;;  %v4436_v44 = vmul.f32 %v9330_v37, %v10584_v41  ;;  %v4537_v55 = vadd.f32 %v10471_v5, %v4467_v40  ;;  %v4574_v10 = vmul.f32 %v9350_v23, %v10588_v20  ;;  %v11511_v40 = vld [vmem:[#allocation120_spill] sm:$0xff]  ;;  %v11513_v15 = vld [vmem:[#allocation89_spill] sm:$0xff] }
 0x43d   : > { %6418 = vmatmul.mubr.msk.f32.vlgmr.msra.gmra.mrb[20].mxu0 %vm4830_vm9, %v10487_v34  ;;  %6422 = vmatprep.subr.msk.mxu0 %vm4833_vm8, %v11507_v45  ;;  %v4233_v54 = vadd.f32 %v4200_v24, %v11508_v46  ;;  %v10604_v36 = vmul.f32 %v8931_v47, %v4134_v48  ;;  %v10607_v56 = vadd.f32 %v11509_v26, %v4676_v39  ;;  %v11519_v26 = vld [vmem:[#allocation124_spill] sm:$0xff] }
 0x43e   : > { %6423 = vmatpush1.msk.msra.mxu0 %vm4833_vm8, %v11510_v12  ;;  %5139 = vmatprep.mubr.f32.mxu0 %v11366_v21  ;;  %v4468_v5 = vadd.f32 %v4435_v25, %v4299_v27  ;;  %v4469_v33 = vadd.f32 %v4436_v44, %v4300_v6  ;;  %v4607_v11 = vadd.f32 %v4574_v10, %v4537_v55  ;;  %v4368_v25 = vpop.permute.xlu1 %4367 }
 0x43f   : > { %v4234_v14 = vadd.f32 %v4201_v63, %v11511_v40  ;;  %6428 = vmatprep.subr.msk.mxu0 %vm4833_vm8, %v4800_v19  ;;  %v4575_v48 = vmul.f32 %v9350_v23, %v10584_v41  ;;  %v4738_v53 = vadd.f32 %v11512_v58, %v10341_v51  ;;  %v4301_v24 = vadd.f32 %v11513_v15, %v4231_v42  ;;  %v11515_v63 = vld [vmem:[#allocation129_spill] sm:$0xff] }
 0x440   : > { %v4538_v13 = vadd.f32 %v10457_v3, %v4468_v5  ;;  %v4677_v39 = vadd.f32 %v10479_v30, %v4607_v11  ;;  %v4302_v4 = vadd.f32 %v11514_v35, %v4232_v52  ;;  %v10624_v27 = vsel %vm2122_vm5, %v4364_v60, %v4366_v28  ;;  %5920 = vmatprep.mubr.f32.mxu1 %v11366_v21  ;;  %v11516_v52 = vld [vmem:[#allocation115_spill] sm:$0xff]  ;;  %v11522_v35 = vld [vmem:[#allocation40_spill] sm:$0xff] }
 0x441   : > { %6424 = vmatmul.mubr.msk.f32.vlgmr.msra.gmra.mrb[22].mxu0 %vm4830_vm9, %v10487_v34  ;;  %v4804_v19 = vadd.f32 %v11515_v63, %v4734_v7  ;;  %v4374_v51 = vsel %vm2122_vm5, %v4362_v2, %v4364_v60  ;;  %v4438_v3 = vmul.f32 %v9330_v37, %v10624_v27  ;;  %v4539_v30 = vadd.f32 %v10514_v43, %v4469_v33  ;;  %v11517_v2 = vld [vmem:[#allocation133_spill] sm:$0xff]  ;;  %v11520_v33 = vld [vmem:[#allocation55_spill] sm:$0xff] }
 0x442   : > { %6429 = vmatpush1.msk.msra.mxu0 %vm4833_vm8, %v10204_v8  ;;  %v4608_v42 = vadd.f32 %v4575_v48, %v4538_v13  ;;  %v4747_v32 = vadd.f32 %v11516_v52, %v4677_v39  ;;  %5281 = vmatprep.mubr.f32.mxu0 %v11366_v21  ;;  %v4437_v6 = vmul.f32 %v9330_v37, %v4374_v51  ;;  %v11523_v63 = vld [vmem:[#allocation125_spill] sm:$0xff]  ;;  %v11528_v52 = vld [vmem:[#allocation75_spill] sm:$0xff] }
 0x443   : > { %v4648_v7 = vmul.f32 %v8931_v47, %v10542_v31  ;;  %6434 = vmatprep.subr.msk.mxu0 %vm4833_vm8, %v4804_v19  ;;  %v4808_v44 = vadd.f32 %v11517_v2, %v4738_v53  ;;  %v4471_v55 = vadd.f32 %v4438_v3, %v4302_v4  ;;  %v4576_v43 = vmul.f32 %v9350_v23, %v4374_v51  ;;  %v11518_v47 = vld [vmem:[#allocation122_spill] sm:$0xff]  ;;  %v11530_v2 = vld [vmem:[#allocation45_spill] sm:$0xff] }
 0x444   : > { %v4678_v8 = vadd.f32 %v10527_v29, %v4608_v42  ;;  %v4470_v10 = vadd.f32 %v4437_v6, %v4301_v24  ;;  %v4577_v60 = vmul.f32 %v9350_v23, %v10624_v27  ;;  %v4785_v45 = vmul.f32 %v9370_v50, %v4374_v51  ;;  %v11529_v6 = vld [vmem:[#allocation32_spill] sm:$0xff] }
 0x445   : > { %6430 = vmatmul.mubr.msk.f32.vlgmr.msra.gmra.mrb[24].mxu0 %vm4830_vm9, %v10487_v34  ;;  %v4609_v46 = vadd.f32 %v4576_v43, %v4539_v30  ;;  %v4303_v31 = vadd.f32 %v11518_v47, %v4233_v54  ;;  %v4304_v12 = vadd.f32 %v11519_v26, %v4234_v14  ;;  %v4371_v5 = vsel %vm2122_vm5, %v4368_v25, %v10292_v62  ;;  %v11527_v30 = vld [vmem:[#allocation91_spill] sm:$0xff] }
 0x446   : > { %6435 = vmatpush1.msk.msra.mxu0 %vm4833_vm8, %v10311_v38  ;;  %v4540_v29 = vadd.f32 %v10517_v1, %v4470_v10  ;;  %v4748_v11 = vadd.f32 %v11520_v33, %v4678_v8  ;;  %5423 = vmatprep.mubr.f32.mxu0 %v11366_v21  ;;  %v4372_v40 = vsel %vm2122_vm5, %v4366_v28, %v4368_v25  ;;  %v11521_v28 = vld [vmem:[#allocation117_spill] sm:$0xff] }
 0x447   : > { %6440 = vmatprep.subr.msk.mxu0 %vm4833_vm8, %v4808_v44  ;;  %v4679_v54 = vadd.f32 %v10554_v57, %v4609_v46  ;;  %v4439_v14 = vmul.f32 %v9330_v37, %v4372_v40  ;;  %v4440_v62 = vmul.f32 %v9330_v37, %v4371_v5  ;;  %v4541_v48 = vadd.f32 %v10568_v49, %v4471_v55  ;;  %v11531_v55 = vld [vmem:[#allocation13_spill] sm:$0xff] }
 0x448   : > { %v4784_v38 = vmul.f32 %v9370_v50, %v10584_v41  ;;  %v4610_v1 = vadd.f32 %v4577_v60, %v4540_v29  ;;  %v4818_v58 = vadd.f32 %v4785_v45, %v4748_v11  ;;  %v4578_v53 = vmul.f32 %v9350_v23, %v4372_v40  ;;  %v11532_v10 = vld [vmem:[#allocation69_spill] sm:$0xff] }
 0x449   : > { %v4783_v22 = vmul.f32 %v9370_v50, %v10588_v20  ;;  %v4749_v15 = vadd.f32 %v11521_v28, %v4679_v54  ;;  %6436 = vmatmul.mubr.msk.f32.vlgmr.msra.gmra.mrb[26].mxu0 %vm4830_vm9, %v10487_v34  ;;  %v4472_v57 = vadd.f32 %v4439_v14, %v4303_v31  ;;  %v4473_v24 = vadd.f32 %v4440_v62, %v4304_v12  ;;  %v11534_v14 = vld [vmem:[#allocation56_spill] sm:$0xff] }
 0x44a   : > { %v4817_v37 = vadd.f32 %v4784_v38, %v4747_v32  ;;  %v4680_v49 = vadd.f32 %v10604_v36, %v4610_v1  ;;  %6441 = vmatpush1.msk.msra.mxu0 %vm4833_vm8, %v10346_v16  ;;  %v4611_v41 = vadd.f32 %v4578_v53, %v4541_v48  ;;  %5565 = vmatprep.mubr.f32.mxu0 %v11366_v21 }
 0x44b   : > { %6446 = vmatprep.subr.msk.mxu0 %vm4833_vm8, %v10501_v61  ;;  %v4542_v20 = vadd.f32 %v10578_v0, %v4472_v57  ;;  %v4543_v13 = vadd.f32 %v10424_v18, %v4473_v24  ;;  %v4579_v39 = vmul.f32 %v9350_v23, %v4371_v5  ;;  %6455 = vmatprep.subr.msk.mxu1 %vm4833_vm8, %v4818_v58  ;;  %v11524_v61 = vld [vmem:[#allocation58_spill] sm:$0xff] }
 0x44c   : > { %v4811_v36 = vadd.f32 %v11522_v35, %v10435_v9  ;;  %v4816_v4 = vadd.f32 %v4783_v22, %v10607_v56  ;;  %v4681_v16 = vadd.f32 %v4648_v7, %v4611_v41  ;;  %v4750_v19 = vadd.f32 %v11523_v63, %v4680_v49  ;;  %6456 = vmatpush1.msk.msra.mxu1 %vm4833_vm8, %v4817_v37  ;;  %v11525_v18 = vld [vmem:[#allocation126_spill] sm:$0xff]  ;;  %v11526_v56 = vld [vmem:[#allocation83_spill] sm:$0xff] }
 0x44d   : > { %v4612_v51 = vadd.f32 %v4579_v39, %v4542_v20  ;;  %v4613_v3 = vadd.f32 %v11524_v61, %v4543_v13  ;;  %v4787_v0 = vmul.f32 %v9370_v50, %v4372_v40  ;;  %6442 = vmatmul.mubr.msk.f32.vlgmr.msra.gmra.mrb[28].mxu0 %vm4830_vm9, %v10487_v34  ;;  %6457 = vmatmul.mubr.msk.f32.vlgmr.msra.gmra.mrb[34].mxu1 %vm4830_vm9, %v10487_v34  ;;  %v11533_v40 = vld [vmem:[#allocation17_spill] sm:$0xff]  ;;  %v11535_v22 = vld [vmem:[#allocation54_spill] sm:$0xff] }
 0x44e   : > { %v4782_v23 = vmul.f32 %v9370_v50, %v10510_v59  ;;  %v4751_v9 = vadd.f32 %v11525_v18, %v4681_v16  ;;  %6447 = vmatpush1.msk.msra.mxu0 %vm4833_vm8, %v4811_v36  ;;  %5707 = vmatprep.mubr.f32.mxu0 %v11366_v21  ;;  %v4719_v42 = vmul.f32 %v11527_v30, %v11526_v56  ;;  %v11537_v35 = vld [vmem:[#allocation70_spill] sm:$0xff]  ;;  %v11539_v18 = vld [vmem:[#allocation79_spill] sm:$0xff]  ;;  %v11540_v56 = vld [vmem:[#allocation73_spill] sm:$0xff] }
 0x44f   : > { %v4682_v32 = vadd.f32 %v11528_v52, %v4612_v51  ;;  %v4683_v25 = vadd.f32 %v11529_v6, %v4613_v3  ;;  %v4820_v7 = vadd.f32 %v4787_v0, %v4750_v19  ;;  %6452 = vmatprep.subr.msk.mxu0 %vm4833_vm8, %v4816_v4  ;;  %6062 = vmatprep.mubr.f32.mxu1 %v11366_v21  ;;  %v11538_v4 = vld [vmem:[#allocation11_spill] sm:$0xff] }
 0x450   : > { %v4815_v59 = vadd.f32 %v4782_v23, %v10557_v17  ;;  %v4790_v44 = vmul.f32 %v9370_v50, %v11530_v2  ;;  %v4789_v43 = vmul.f32 %v9370_v50, %v11531_v55  ;;  %v4786_v45 = vmul.f32 %v9370_v50, %v10624_v27  ;;  %v11541_v2 = vld [vmem:[#allocation19_spill] sm:$0xff] }
 0x451   : > { %6448 = vmatmul.mubr.msk.f32.vlgmr.msra.gmra.mrb[30].mxu0 %vm4830_vm9, %v10487_v34  ;;  %v4752_v8 = vadd.f32 %v4719_v42, %v4682_v32  ;;  %v4753_v60 = vadd.f32 %v11532_v10, %v4683_v25  ;;  %v4788_v17 = vmul.f32 %v9370_v50, %v4371_v5  ;;  %v10738_v50 = vpop.permute.xlu0 %4827  ;;  %v11542_v55 = vld [vmem:[#allocation23_spill] sm:$0xff] }
 0x452   : > { %6453 = vmatpush1.msk.msra.mxu0 %vm4833_vm8, %v4815_v59  ;;  %5849 = vmatprep.mubr.f32.mxu0 %v11366_v21  ;;  %v4819_v31 = vadd.f32 %v4786_v45, %v4749_v15  ;;  %v11536_v15 = vld [vmem:[#allocation49_spill] sm:$0xff] }
 0x453   : > { %6458 = vmatprep.subr.msk.mxu0 %vm4833_vm8, %v4820_v7  ;;  %v4822_v46 = vadd.f32 %v4789_v43, %v4752_v8  ;;  %v4823_v47 = vadd.f32 %v4790_v44, %v4753_v60  ;;  %v4821_v26 = vadd.f32 %v4788_v17, %v4751_v9 }
 0x455   : > { %6454 = vmatmul.mubr.msk.f32.vlgmr.msra.gmra.mrb[32].mxu0 %vm4830_vm9, %v10487_v34  ;;  %6461 = vmatprep.subr.msk.mxu1 %vm4833_vm8, %v4822_v46 }
 0x456   : > { %6459 = vmatpush1.msk.msra.mxu0 %vm4833_vm8, %v4819_v31  ;;  %5991 = vmatprep.mubr.f32.mxu0 %v11366_v21 }
 0x457   : > { %6505 = vmatprep.subr.mxu0 %v11366_v21  ;;  %6462 = vmatpush1.msk.msra.mxu1 %vm4833_vm8, %v4821_v26 }
 0x458   : > { %6463 = vmatmul.mubr.msk.f32.vlgmr.msra.gmra.mrb[36].mxu1 %vm4830_vm9, %v10487_v34 }
 0x459   : > { %6460 = vmatmul.mubr.msk.f32.vlgmr.msra.gmra.mrb[34].mxu0 %vm4830_vm9, %v10487_v34 }
 0x45a   : > { %6506 = vmatpush3.msk.msra.mxu0 %vm4833_vm8, %v4823_v47  ;;  %6507 = vmatprep.mubr.msk.f32.mxu0 %vm6749_vm7, %v11366_v21 }
 0x45d   : > { %6508 = vmatmul.mubr.msk.f32.vlgmr.msra.gmra.mrb[36].mxu0 %vm4830_vm9, %v10487_v34 }
 0x4a7   : > { %v5070_v27 = vpop.f32.mrb[22].mxu1 }
 0x4a8   : > { %v5071_v12 = vadd.f32 %v5070_v27, %v10738_v50  ;;  %v5072_v5 = vpop.f32.mrb[23].mxu1 }
 0x4a9   : > { %v5073_v29 = vadd.f32 %v5072_v5, %v10738_v50  ;;  %v11543_v5 = vld [vmem:[#allocation86_spill] sm:$0xff] }
 0x4aa   : > { %v6141_v33 = vmax.f32 %v5071_v12, 0.0 }
 0x4ab   : > { %v6142_v11 = vmax.f32 %v5073_v29, 0.0 }
 0x4ac   : > { %v6174_v54 = vmul.f32 %v6141_v33, %v11533_v40 }
 0x4ad   : > { %v6175_v62 = vmul.f32 %v6142_v11, %v11534_v14  ;;  %v11544_v11 = vld [vmem:[#allocation34_spill] sm:$0xff] }
 0x4af   : > { %v6238_v48 = vcombine.low %v6174_v54, %v6175_v62  ;;  %v11545_v62 = vld [vmem:[#allocation31_spill] sm:$0xff] }
 0x4b1   : > { %6270 = vst [vmem:[%s10746_s14 + $0x8] sm:$0xff] %v6238_v48 }
 0x4d1   : > { %v5212_v21 = vpop.f32.mrb[24].mxu1 }
 0x4d2   : > { %v5213_v34 = vadd.f32 %v5212_v21, %v10738_v50  ;;  %v5214_v38 = vpop.f32.mrb[25].mxu1 }
 0x4d3   : > { %v5215_v1 = vadd.f32 %v5214_v38, %v10738_v50 }
 0x4d4   : > { %v6145_v58 = vmax.f32 %v5213_v34, 0.0 }
 0x4d5   : > { %v6146_v53 = vmax.f32 %v5215_v1, 0.0  ;;  %v11546_v1 = vld [vmem:[#allocation52_spill] sm:$0xff] }
 0x4d6   : > { %v6178_v28 = vmul.f32 %v6145_v58, %v11535_v22 }
 0x4d7   : > { %v6179_v57 = vmul.f32 %v6146_v53, %v11536_v15 }
 0x4d9   : > { %v6240_v24 = vcombine.low %v6178_v28, %v6179_v57 }
 0x4db   : > { %6272 = vst [vmem:[%s10746_s14 + $0x18] sm:$0xff] %v6240_v24  ;;  %v11547_v24 = vld [vmem:[#allocation78_spill] sm:$0xff] }
 0x4e9   : > { %v5354_v37 = vpop.f32.mrb[26].mxu1 }
 0x4ea   : > { %v5355_v49 = vadd.f32 %v5354_v37, %v10738_v50  ;;  %v5356_v41 = vpop.f32.mrb[27].mxu1 }
 0x4eb   : > { %v5357_v20 = vadd.f32 %v5356_v41, %v10738_v50 }
 0x4ec   : > { %v6149_v13 = vmax.f32 %v5355_v49, 0.0 }
 0x4ed   : > { %v6150_v39 = vmax.f32 %v5357_v20, 0.0  ;;  %v11548_v20 = vld [vmem:[#allocation38_spill] sm:$0xff] }
 0x4ee   : > { %v6182_v36 = vmul.f32 %v6149_v13, %v11537_v35 }
 0x4ef   : > { %v6183_v16 = vmul.f32 %v6150_v39, %v11538_v4 }
 0x4f1   : > { %v6242_v63 = vcombine.low %v6182_v36, %v6183_v16 }
 0x4f2   : > { %v5496_v19 = vpop.f32.mrb[28].mxu1 }
 0x4f3   : > { %v5497_v51 = vadd.f32 %v5496_v19, %v10738_v50  ;;  %v5498_v61 = vpop.f32.mrb[29].mxu1  ;;  %6274 = vst [vmem:[%s10746_s14 + $0x28] sm:$0xff] %v6242_v63  ;;  %v11549_v63 = vld [vmem:[#allocation80_spill] sm:$0xff] }
 0x4f4   : > { %v5499_v3 = vadd.f32 %v5498_v61, %v10738_v50 }
 0x4f5   : > { %v6153_v0 = vmax.f32 %v5497_v51, 0.0 }
 0x4f6   : > { %v6154_v23 = vmax.f32 %v5499_v3, 0.0  ;;  %v11550_v3 = vld [vmem:[#allocation87_spill] sm:$0xff] }
 0x4f7   : > { %v6186_v9 = vmul.f32 %v6153_v0, %v11539_v18 }
 0x4f8   : > { %v6187_v30 = vmul.f32 %v6154_v23, %v11540_v56 }
 0x4fa   : > { %v6244_v42 = vcombine.low %v6186_v9, %v6187_v30 }
 0x4fc   : > { %6276 = vst [vmem:[%s10746_s14 + $0x38] sm:$0xff] %v6244_v42 }
 0x4ff   : > { %v5638_v52 = vpop.f32.mrb[30].mxu1 }
 0x500   : > { %v5639_v32 = vadd.f32 %v5638_v52, %v10738_v50  ;;  %v5640_v6 = vpop.f32.mrb[31].mxu1  ;;  %v11551_v52 = vld [vmem:[#allocation25_spill] sm:$0xff] }
 0x501   : > { %v5641_v25 = vadd.f32 %v5640_v6, %v10738_v50 }
 0x502   : > { %v6157_v7 = vmax.f32 %v5639_v32, 0.0 }
 0x503   : > { %v6158_v59 = vmax.f32 %v5641_v25, 0.0 }
 0x504   : > { %v6190_v44 = vmul.f32 %v6157_v7, %v11541_v2  ;;  %v11552_v2 = vld [vmem:[#allocation85_spill] sm:$0xff] }
 0x505   : > { %v6191_v43 = vmul.f32 %v6158_v59, %v11542_v55 }
 0x507   : > { %v6246_v8 = vcombine.low %v6190_v44, %v6191_v43 }
 0x509   : > { %6278 = vst [vmem:[%s10746_s14 + $0x48] sm:$0xff] %v6246_v8 }
 0x50d   : > { %v5780_v10 = vpop.f32.mrb[32].mxu1 }
 0x50e   : > { %v5781_v60 = vadd.f32 %v5780_v10, %v10738_v50  ;;  %v5782_v45 = vpop.f32.mrb[33].mxu1 }
 0x50f   : > { %v5783_v17 = vadd.f32 %v5782_v45, %v10738_v50 }
 0x510   : > { %v4999_v46 = vpop.f32.mrb[20].mxu0  ;;  %v6161_v47 = vmax.f32 %v5781_v60, 0.0 }
 0x511   : > { %v5000_v31 = vadd.f32 %v4999_v46, %v10738_v50  ;;  %v5001_v26 = vpop.f32.mrb[21].mxu0  ;;  %v6162_v27 = vmax.f32 %v5783_v17, 0.0 }
 0x512   : > { %v5002_v12 = vadd.f32 %v5001_v26, %v10738_v50  ;;  %v6194_v29 = vmul.f32 %v6161_v47, %v11543_v5  ;;  %v11553_v47 = vld [vmem:[#allocation22_spill] sm:$0xff] }
 0x513   : > { %v6139_v33 = vmax.f32 %v5000_v31, 0.0  ;;  %v6195_v40 = vmul.f32 %v6162_v27, %v11544_v11 }
 0x514   : > { %v6140_v54 = vmax.f32 %v5002_v12, 0.0  ;;  %v5141_v14 = vpop.f32.mrb[22].mxu0  ;;  %v11554_v12 = vld [vmem:[#allocation42_spill] sm:$0xff] }
 0x515   : > { %v6172_v48 = vmul.f32 %v6139_v33, %v11545_v62  ;;  %v5142_v21 = vadd.f32 %v5141_v14, %v10738_v50  ;;  %v5143_v34 = vpop.f32.mrb[23].mxu0  ;;  %v6248_v38 = vcombine.low %v6194_v29, %v6195_v40  ;;  %v11555_v29 = vld [vmem:[#allocation20_spill] sm:$0xff] }
 0x516   : > { %v6173_v58 = vmul.f32 %v6140_v54, %v11546_v1  ;;  %v5144_v53 = vadd.f32 %v5143_v34, %v10738_v50  ;;  %v11556_v40 = vld [vmem:[#allocation84_spill] sm:$0xff] }
 0x517   : > { %v6143_v22 = vmax.f32 %v5142_v21, 0.0  ;;  %6280 = vst [vmem:[%s10746_s14 + $0x58] sm:$0xff] %v6248_v38  ;;  %v11557_v38 = vld [vmem:[#allocation24_spill] sm:$0xff] }
 0x518   : > { %v6237_v28 = vcombine.low %v6172_v48, %v6173_v58  ;;  %v6144_v15 = vmax.f32 %v5144_v53, 0.0  ;;  %v5283_v57 = vpop.f32.mrb[24].mxu0 }
 0x519   : > { %v6176_v37 = vmul.f32 %v6143_v22, %v11547_v24  ;;  %v5284_v49 = vadd.f32 %v5283_v57, %v10738_v50  ;;  %v5285_v41 = vpop.f32.mrb[25].mxu0  ;;  %v11558_v22 = vld [vmem:[#allocation82_spill] sm:$0xff] }
 0x51a   : > { %6269 = vst [vmem:[%s10746_s14] sm:$0xff] %v6237_v28  ;;  %v6177_v13 = vmul.f32 %v6144_v15, %v11548_v20  ;;  %v5286_v39 = vadd.f32 %v5285_v41, %v10738_v50 }
 0x51b   : > { %v6147_v35 = vmax.f32 %v5284_v49, 0.0 }
 0x51c   : > { %v6239_v36 = vcombine.low %v6176_v37, %v6177_v13  ;;  %v6148_v4 = vmax.f32 %v5286_v39, 0.0  ;;  %v5425_v16 = vpop.f32.mrb[26].mxu0  ;;  %v11559_v39 = vld [vmem:[#allocation81_spill] sm:$0xff] }
 0x51d   : > { %v6180_v19 = vmul.f32 %v6147_v35, %v11549_v63  ;;  %v5426_v51 = vadd.f32 %v5425_v16, %v10738_v50  ;;  %v5427_v61 = vpop.f32.mrb[27].mxu0  ;;  %v11560_v63 = vld [vmem:[#allocation47_spill] sm:$0xff] }
 0x51e   : > { %6271 = vst [vmem:[%s10746_s14 + $0x10] sm:$0xff] %v6239_v36  ;;  %v6181_v0 = vmul.f32 %v6148_v4, %v11550_v3  ;;  %v5428_v23 = vadd.f32 %v5427_v61, %v10738_v50 }
 0x51f   : > { %v6151_v18 = vmax.f32 %v5426_v51, 0.0 }
 0x520   : > { %v6241_v9 = vcombine.low %v6180_v19, %v6181_v0  ;;  %v6152_v56 = vmax.f32 %v5428_v23, 0.0  ;;  %v5567_v30 = vpop.f32.mrb[28].mxu0  ;;  %v5922_v42 = vpop.f32.mrb[34].mxu1 }
 0x521   : > { %v6184_v32 = vmul.f32 %v6151_v18, %v11551_v52  ;;  %v5568_v6 = vadd.f32 %v5567_v30, %v10738_v50  ;;  %v5569_v25 = vpop.f32.mrb[29].mxu0  ;;  %v5923_v7 = vadd.f32 %v5922_v42, %v10738_v50  ;;  %v5924_v59 = vpop.f32.mrb[35].mxu1  ;;  %v11562_v42 = vld [vmem:[#allocation88_spill] sm:$0xff] }
 0x522   : > { %6273 = vst [vmem:[%s10746_s14 + $0x20] sm:$0xff] %v6241_v9  ;;  %v6185_v44 = vmul.f32 %v6152_v56, %v11552_v2  ;;  %v5570_v55 = vadd.f32 %v5569_v25, %v10738_v50  ;;  %v5925_v43 = vadd.f32 %v5924_v59, %v10738_v50  ;;  %v11561_v9 = vld [vmem:[#allocation92_spill] sm:$0xff]  ;;  %v11564_v59 = vld [vmem:[#allocation57_spill] sm:$0xff] }
 0x523   : > { %v6155_v8 = vmax.f32 %v5568_v6, 0.0  ;;  %v6165_v10 = vmax.f32 %v5923_v7, 0.0 }
 0x524   : > { %v6243_v60 = vcombine.low %v6184_v32, %v6185_v44  ;;  %v6156_v45 = vmax.f32 %v5570_v55, 0.0  ;;  %v5709_v17 = vpop.f32.mrb[30].mxu0  ;;  %v6166_v46 = vmax.f32 %v5925_v43, 0.0  ;;  %v11563_v32 = vld [vmem:[#allocation18_spill] sm:$0xff] }
 0x525   : > { %v6188_v31 = vmul.f32 %v6155_v8, %v11553_v47  ;;  %v5710_v26 = vadd.f32 %v5709_v17, %v10738_v50  ;;  %v5711_v27 = vpop.f32.mrb[31].mxu0  ;;  %v6198_v5 = vmul.f32 %v6165_v10, %v11554_v12  ;;  %v6637_v8 = vld [vmem:[%s10881_s3 + $0x20] ss:$0 sm:$0xff] }
 0x526   : > { %6275 = vst [vmem:[%s10746_s14 + $0x30] sm:$0xff] %v6243_v60  ;;  %v6189_v33 = vmul.f32 %v6156_v45, %v11555_v29  ;;  %v5712_v11 = vadd.f32 %v5711_v27, %v10738_v50  ;;  %v6199_v54 = vmul.f32 %v6166_v46, %v11556_v40 }
 0x527   : > { %v6159_v14 = vmax.f32 %v5710_v26, 0.0 }
 0x528   : > { %v6245_v62 = vcombine.low %v6188_v31, %v6189_v33  ;;  %v6160_v48 = vmax.f32 %v5712_v11, 0.0  ;;  %v5851_v21 = vpop.f32.mrb[32].mxu0  ;;  %v6250_v34 = vcombine.low %v6198_v5, %v6199_v54 }
 0x529   : > { %v6192_v1 = vmul.f32 %v6159_v14, %v11557_v38  ;;  %v5852_v58 = vadd.f32 %v5851_v21, %v10738_v50  ;;  %v5853_v53 = vpop.f32.mrb[33].mxu0 }
 0x52a   : > { %6277 = vst [vmem:[%s10746_s14 + $0x40] sm:$0xff] %v6245_v62  ;;  %v6193_v28 = vmul.f32 %v6160_v48, %v11558_v22  ;;  %v5854_v15 = vadd.f32 %v5853_v53, %v10738_v50  ;;  %6282 = vst [vmem:[%s10746_s14 + $0x68] sm:$0xff] %v6250_v34 }
 0x52b   : > { %v6163_v57 = vmax.f32 %v5852_v58, 0.0  ;;  %v6064_v24 = vpop.f32.mrb[36].mxu1 }
 0x52c   : > { %v6247_v37 = vcombine.low %v6192_v1, %v6193_v28  ;;  %v6164_v49 = vmax.f32 %v5854_v15, 0.0  ;;  %v5993_v41 = vpop.f32.mrb[34].mxu0  ;;  %v6065_v20 = vadd.f32 %v6064_v24, %v10738_v50  ;;  %v6066_v13 = vpop.f32.mrb[37].mxu1 }
 0x52d   : > { %v6196_v35 = vmul.f32 %v6163_v57, %v11559_v39  ;;  %v5994_v36 = vadd.f32 %v5993_v41, %v10738_v50  ;;  %v5995_v4 = vpop.f32.mrb[35].mxu0  ;;  %v6067_v16 = vadd.f32 %v6066_v13, %v10738_v50 }
 0x52e   : > { %6279 = vst [vmem:[%s10746_s14 + $0x50] sm:$0xff] %v6247_v37  ;;  %v6197_v19 = vmul.f32 %v6164_v49, %v11560_v63  ;;  %v5996_v51 = vadd.f32 %v5995_v4, %v10738_v50  ;;  %v6169_v61 = vmax.f32 %v6065_v20, 0.0 }
 0x52f   : > { %v6167_v3 = vmax.f32 %v5994_v36, 0.0  ;;  %v6170_v0 = vmax.f32 %v6067_v16, 0.0 }
 0x530   : > { %v6249_v23 = vcombine.low %v6196_v35, %v6197_v19  ;;  %v6168_v18 = vmax.f32 %v5996_v51, 0.0  ;;  %v6202_v56 = vmul.f32 %v6169_v61, %v11561_v9  ;;  %v6135_v30 = vpop.f32.mrb[36].mxu0 }
 0x531   : > { %v6200_v52 = vmul.f32 %v6167_v3, %v11562_v42  ;;  %v6203_v6 = vmul.f32 %v6170_v0, %v11563_v32  ;;  %v6136_v25 = vadd.f32 %v6135_v30, %v10738_v50  ;;  %v6509_v7 = vpop.f32.mrb[37].mxu0 }
 0x532   : > { %6281 = vst [vmem:[%s10746_s14 + $0x60] sm:$0xff] %v6249_v23  ;;  %v6201_v2 = vmul.f32 %v6168_v18, %v11564_v59 }
 0x533   : > { %v6252_v44 = vcombine.low %v6202_v56, %v6203_v6  ;;  %v6171_v55 = vmax.f32 %v6136_v25, 0.0 }
 0x534   : > { %v6251_v43 = vcombine.low %v6200_v52, %v6201_v2 }
 0x535   : > { %6284 = vst [vmem:[%s10746_s14 + $0x78] sm:$0xff] %v6252_v44  ;;  %v6204_v10 = vmul.f32 %v6637_v8, %v6171_v55 }
 0x536   : > { %6283 = vst [vmem:[%s10746_s14 + $0x70] sm:$0xff] %v6251_v43 }
 0x537   : > { %6285 = vst [vmem:[%s10746_s14 + $0x80] sm:$0xf] %v6204_v10 }
 0x538   : > { %6681 = shalt.err (!%p6678_p7)
}
 0x539   : > { %s6682_s12 = scalar_lea.hbm %s10832_s22, 2112  ;;  %s6686_s13 = scalar_lea.hbm %s10886_s8, 4224 }
 0x53a   : > { %p6683_p8 = scmp.ne.s32.totalorder %s10832_s22, %s6682_s12  ;;  %p6687_p1 = scmp.lt.u32.totalorder %s10832_s22, %s10886_s8 }
 0x53b   : > { %p6688_p3 = scmp.lt.u32.totalorder %s6686_s13, %s6682_s12  ;;  %p6690_p6 = scmp.lt.u32.totalorder %s6682_s12, %s10832_s22 }
 0x53c   : > { %p6684_p9 = pnand %p6683_p8, %p11565_p12 }
 0x53d   : > { %p6689_p11 = por %p6688_p3, %p6687_p1 }
 0x53e   : > { %p6685_p0 = pneg %p6684_p9 }
 0x53f   : > { %p6691_p13 = por %p6690_p6, %p6689_p11 }
 0x541   : > { %p6692_p5 = pnand %p6691_p13, %p6685_p0 }
 0x543   : > { %6695 = shalt.err (!%p6692_p5)
}
 0x544   : > { %6520 = dma.vmem_to_hbm [thread:$0]  (%p11565_p12), %s10834_s19, 2112, %s10832_s22, %s6287_s9  }
 0x545 PF: > { %s6313_s10 = sand.u32 1, %s6722_s27   ;;  %p11566_p10 = scmp.ne.s32.totalorder %s11005_s17, 0 }
 0x546   : > { %p11567_p2 = scmp.ge.s32.totalorder %s6734_s30, 2  ;;  %s6314_s21 = scalar_lea.sflag [#allocation5], %s6313_s10 }
 0x548   : > { %p6527_p4 = pnand %p11567_p2, %p11566_p10 }
 0x54a   : > { %6717 = dma.done.wait (!%p6527_p4), %s6314_s21, 2112  }
 0x54b   : > { %6719 = vsyncadd (!%p6527_p4), %s6314_s21, 4294965184  ;;  %s11568_s18 = sld [smem:[#allocation9_spill]]  ;;  %p21_p7 = scmp.ge.s32.totalorder %s6821_s11, 4  }
 0x54c   : > { %s11569_s27 = smov %s6726_s28  ;;  %s11570_s28 = smov %s6730_s29 }
 0x54d   : > { %s11572_s30 = smov %s6821_s11  ;;  %23 = sbr.rel (!%p21_p7) target bundleno = 5 (0x5), region = 100 }
 0x551   : > { %s11571_s29 = smov %s11568_s18 }
 0x554   :  { %6319 = vsyncpa [#allocation4], 1 }
 0x555   :  { %6321 = vsyncpa [#allocation4 + $0x1], 1 }
 0x556   :  { %6322 = vsyncpa [#allocation5], 1 }
 0x557   :  { %6324 = vsyncpa [#allocation5 + $0x1], 1 }

</bundles_post_ra>
